<compile_context>
chip_gen: v6e
topology: v6e:2x2x1
jax: 0.10.0
libtpu: 0.0.40
codegen_flags: <defaults>
</compile_context>

<pallas_src>
import functools

import jax
import jax.numpy as jnp
from jax.experimental import pallas as pl
from jax.experimental.pallas import tpu as pltpu

LANE = 128
VMEM_LIMIT = 32 * 1024 * 1024  # explicit budget; safe on v5e/v6e/v7x


def _ru(x, m):
    return ((x + m - 1) // m) * m


def _stable_expm1(x):
    # expm1(x) == tanh(x/2) * (exp(x) + 1) exactly; stable near 0 (no exp(x)-1
    # cancellation) and uses only exp/tanh, both guaranteed Mosaic lowerings.
    return jnp.tanh(0.5 * x) * (jnp.exp(x) + 1.0)


def _elu(x):
    # alpha = 1; clamp the expm1 argument so the unselected branch can't overflow.
    return jnp.where(x > 0.0, x, _stable_expm1(jnp.minimum(x, 0.0)))


# ----------------------------------------------------------------------------
# Kernel 1: M-tiled GEMM + bias + ELU (used for all conv-as-GEMM layers).
#   x tile (TM, Kp) bf16, weight (Kp, Np) bf16 resident, bias (1, Np) f32.
#   f32 MXU accumulation, f32 ELU epilogue, lane-dense (Np % 128 == 0) store.
# ----------------------------------------------------------------------------
def _gemm_bias_elu_kernel(x_ref, w_ref, b_ref, o_ref, *, apply_elu):
    acc = jnp.dot(x_ref[...], w_ref[...], preferred_element_type=jnp.float32)
    acc = acc + b_ref[...]
    if apply_elu:
        acc = _elu(acc)
    o_ref[...] = acc.astype(o_ref.dtype)


def gemm_bias_elu(x, w_pad, b_pad, n_out, *, apply_elu=True,
                  out_dtype=jnp.bfloat16, tile_m=256):
    """x: (M, K).  w_pad: (Kp, Np) bf16, b_pad: (1, Np) f32 (pre-padded).
    Returns (M, n_out) in out_dtype."""
    M, K = x.shape
    Kp, Np = w_pad.shape
    tm = min(tile_m, _ru(M, 8))
    Mp = _ru(M, tm)
    xp = jnp.pad(x.astype(jnp.bfloat16), ((0, Mp - M), (0, Kp - K)))
    out = pl.pallas_call(
        functools.partial(_gemm_bias_elu_kernel, apply_elu=apply_elu),
        out_shape=jax.ShapeDtypeStruct((Mp, Np), out_dtype),
        grid=(Mp // tm,),
        in_specs=[
            pl.BlockSpec((tm, Kp), lambda i: (i, 0)),
            pl.BlockSpec((Kp, Np), lambda i: (0, 0)),
            pl.BlockSpec((1, Np), lambda i: (0, 0)),
        ],
        out_specs=pl.BlockSpec((tm, Np), lambda i: (i, 0)),
        compiler_params=pltpu.CompilerParams(
            dimension_semantics=("parallel",),
            vmem_limit_bytes=VMEM_LIMIT,
        ),
    )(xp, w_pad, b_pad)
    return out[:M, :n_out]


# ----------------------------------------------------------------------------
# Kernel 2: fused fc1..fc5 in a single pallas_call (all weights VMEM-resident).
# ----------------------------------------------------------------------------
def _fc_stack_kernel(x_ref, w1, b1, w2, b2, w3, b3, w4, b4, w5, b5, o_ref):
    def layer(h, w_ref, b_ref, elu):
        acc = jnp.dot(h, w_ref[...], preferred_element_type=jnp.float32) + b_ref[...]
        return _elu(acc) if elu else acc

    h = x_ref[...]
    h = layer(h, w1, b1, True).astype(jnp.bfloat16)
    h = layer(h, w2, b2, True).astype(jnp.bfloat16)
    h = layer(h, w3, b3, True).astype(jnp.bfloat16)
    h = layer(h, w4, b4, True).astype(jnp.bfloat16)
    o_ref[...] = layer(h, w5, b5, False).astype(o_ref.dtype)


def fc_stack(x, fc_params, batch):
    """x: (B, 1152) in NHWC-flatten order.  Runs fc1..fc5 fused; returns (B, 1) f32."""
    B, K = x.shape
    Kp = fc_params["w1"].shape[0]
    Np_out = fc_params["w5"].shape[1]
    Mp = max(16, _ru(B, 16))  # bf16 sublane-packing granularity for the M dim
    xp = jnp.pad(x.astype(jnp.bfloat16), ((0, Mp - B), (0, Kp - K)))
    args = [xp]
    for i in range(1, 6):
        args += [fc_params[f"w{i}"], fc_params[f"b{i}"]]
    vm = pl.BlockSpec(memory_space=pltpu.MemorySpace.VMEM)
    out = pl.pallas_call(
        _fc_stack_kernel,
        out_shape=jax.ShapeDtypeStruct((Mp, Np_out), jnp.float32),
        in_specs=[vm] * len(args),
        out_specs=vm,
        compiler_params=pltpu.CompilerParams(vmem_limit_bytes=VMEM_LIMIT),
    )(*args)
    return out[:batch, :1]


# ----------------------------------------------------------------------------
# Conv2d (valid padding) via im2col (bf16) + Pallas GEMM.
# ----------------------------------------------------------------------------
def conv2d_elu(x_nhwc, layer):
    """x_nhwc: (B, H, W, Cin) bf16.  layer: padded weight/bias + meta dict."""
    B, H, W, C = x_nhwc.shape
    KH, KW, stride, Cout = layer["kh"], layer["kw"], layer["stride"], layer["cout"]
    OH = (H - KH) // stride + 1
    OW = (W - KW) // stride + 1
    # TODO(synk): fuse this im2col patch extraction into the Pallas kernel (grid
    # over (B, OH tiles) with strided in-kernel reads) to avoid materializing the
    # KH*KW-expanded patch matrix in HBM.
    cols = []
    for i in range(KH):
        for j in range(KW):
            cols.append(jax.lax.slice(
                x_nhwc,
                (0, i, j, 0),
                (B, i + stride * (OH - 1) + 1, j + stride * (OW - 1) + 1, C),
                (1, stride, stride, 1)))
    patches = jnp.stack(cols, axis=3).reshape(B * OH * OW, KH * KW * C)
    out = gemm_bias_elu(patches, layer["w"], layer["b"], Cout,
                        apply_elu=True, out_dtype=jnp.bfloat16)
    return out.reshape(B, OH, OW, Cout)


# ----------------------------------------------------------------------------
# Parameters: synthetic init in PyTorch-equivalent layouts, then a one-time
# repack (reshape, fc1 row permutation, lane-dense zero padding, bf16 cast).
# ----------------------------------------------------------------------------
CONV_DEFS = [
    # (KH, KW, Cin, Cout, stride)
    (5, 5, 3, 24, 2),
    (5, 5, 24, 36, 2),
    (5, 5, 36, 48, 2),
    (3, 3, 48, 64, 1),
    (3, 3, 64, 64, 1),
]
FC_DEFS = [(64 * 1 * 18, 1164), (1164, 100), (100, 50), (50, 10), (10, 1)]
CONV5_OUT_HWC = (1, 18, 64)  # conv5 output spatial layout for a 66x200 input


def init_params(key):
    params = {}
    keys = jax.random.split(key, 2 * (len(CONV_DEFS) + len(FC_DEFS)))
    ki = 0
    for idx, (kh, kw, cin, cout, _) in enumerate(CONV_DEFS, start=1):
        fan_in = kh * kw * cin
        params[f"c{idx}w"] = jax.random.normal(
            keys[ki], (kh, kw, cin, cout), jnp.float32) / jnp.sqrt(fan_in)
        ki += 1
        params[f"c{idx}b"] = 0.01 * jax.random.normal(keys[ki], (cout,), jnp.float32)
        ki += 1
    for idx, (fin, fout) in enumerate(FC_DEFS, start=1):
        params[f"f{idx}w"] = jax.random.normal(
            keys[ki], (fin, fout), jnp.float32) / jnp.sqrt(fin)
        ki += 1
        params[f"f{idx}b"] = 0.01 * jax.random.normal(keys[ki], (fout,), jnp.float32)
        ki += 1
    return params


def prepare_params(raw):
    """Build-time repack: conv weights -> GEMM layout, fc1 rows permuted from
    torch (C,H,W) flatten order to NHWC (H,W,C) order, everything zero-padded
    to lane-dense shapes, weights cast to bf16, biases kept f32."""
    conv_layers = []
    for idx, (kh, kw, cin, cout, stride) in enumerate(CONV_DEFS, start=1):
        w2 = raw[f"c{idx}w"].reshape(kh * kw * cin, cout)
        kp, np_ = _ru(kh * kw * cin, LANE), _ru(cout, LANE)
        wp = jnp.zeros((kp, np_), jnp.bfloat16).at[:w2.shape[0], :cout].set(
            w2.astype(jnp.bfloat16))
        bp = jnp.zeros((1, np_), jnp.float32).at[0, :cout].set(
            raw[f"c{idx}b"].astype(jnp.float32))
        conv_layers.append(dict(w=wp, b=bp, kh=kh, kw=kw, stride=stride, cout=cout))

    hh, ww, cc = CONV5_OUT_HWC
    n_in = hh * ww * cc
    hwc = jnp.arange(n_in)
    h_i = hwc // (ww * cc)
    w_i = (hwc % (ww * cc)) // cc
    c_i = hwc % cc
    torch_rows = c_i * (hh * ww) + h_i * ww + w_i  # NHWC position -> torch row
    fc_ws = [raw["f1w"][torch_rows, :], raw["f2w"], raw["f3w"], raw["f4w"], raw["f5w"]]
    fc_bs = [raw[f"f{i}b"] for i in range(1, 6)]

    fc_params = {}
    prev_np = _ru(n_in, LANE)
    for i, (wm, bv) in enumerate(zip(fc_ws, fc_bs), start=1):
        k, n = wm.shape
        kp, np_ = prev_np, _ru(n, LANE)
        fc_params[f"w{i}"] = jnp.zeros((kp, np_), jnp.bfloat16).at[:k, :n].set(
            wm.astype(jnp.bfloat16))
        fc_params[f"b{i}"] = jnp.zeros((1, np_), jnp.float32).at[0, :n].set(
            bv.astype(jnp.float32))
        prev_np = np_
    return conv_layers, fc_params


# ----------------------------------------------------------------------------
# Forward pass
# ----------------------------------------------------------------------------
def nvidia_model_forward(x_nchw, conv_layers, fc_params):
    B = x_nchw.shape[0]
    # NCHW (PyTorch) -> NHWC once; bf16 activations throughout the conv stack.
    x = jnp.transpose(x_nchw, (0, 2, 3, 1)).astype(jnp.bfloat16)
    for layer in conv_layers:
        x = conv2d_elu(x, layer)                       # ends at (B, 1, 18, 64)
    # Flatten in NHWC order; fc1 weight rows were pre-permuted to match, so the
    # runtime transpose back to NCHW is eliminated.
    x = x.reshape(B, -1)                               # (B, 1152)
    return fc_stack(x, fc_params, B)                   # (B, 1) f32


if __name__ == "__main__":
    key = jax.random.PRNGKey(0)
    k_param, k_input = jax.random.split(key)

    raw_params = init_params(k_param)
    conv_layers, fc_params = prepare_params(raw_params)

    # fc1 expects 64*1*18 flattened features, pinning the input to the canonical
    # PilotNet 66x200 image; batch=2 keeps it small.
    x = jax.random.normal(k_input, (2, 3, 66, 200), jnp.float32)

    fwd = jax.jit(lambda inp: nvidia_model_forward(inp, conv_layers, fc_params))
    out = jax.block_until_ready(fwd(x))

    assert out.shape == (2, 1), f"unexpected output shape {out.shape}"
    assert jnp.all(jnp.isfinite(out)), "non-finite output"
    print("KERNEL_OK")
</pallas_src>

<mosaic_0001>
module attributes {stable_mosaic.version = 11 : i64} {
  func.func @_gemm_bias_elu_kernel(%arg0: i32, %arg1: memref<256x128xbf16, #tpu.memory_space<vmem>>, %arg2: memref<128x128xbf16, #tpu.memory_space<vmem>>, %arg3: memref<1x128xf32, #tpu.memory_space<vmem>>, %arg4: memref<256x128xbf16, #tpu.memory_space<vmem>>) attributes {dimension_semantics = [#tpu.dimension_semantics<parallel>], iteration_bounds = array<i64: 24>, scalar_prefetch = 0 : i64, scratch_operands = 0 : i64, tpu.core_type = #tpu.core_type<tc>, window_params = [{transform_indices = @transform_0, window_bounds = array<i64: 256, 128>}, {pipeline_mode = #tpu.pipeline_mode<synchronous>, transform_indices = @transform_1, window_bounds = array<i64: 128, 128>}, {pipeline_mode = #tpu.pipeline_mode<synchronous>, transform_indices = @transform_2, window_bounds = array<i64: 1, 128>}, {transform_indices = @transform_3, window_bounds = array<i64: 256, 128>}]} {
    %c0 = arith.constant 0 : index
    %c0_0 = arith.constant 0 : index
    %0 = vector.load %arg1[%c0, %c0_0] : memref<256x128xbf16, #tpu.memory_space<vmem>>, vector<256x128xbf16>
    %c0_1 = arith.constant 0 : index
    %c0_2 = arith.constant 0 : index
    %1 = vector.load %arg2[%c0_1, %c0_2] : memref<128x128xbf16, #tpu.memory_space<vmem>>, vector<128x128xbf16>
    %cst = arith.constant dense<0.000000e+00> : vector<256x128xf32>
    %2 = tpu.matmul %0, %1, %cst {dimension_numbers = #tpu.dot_dimension_numbers<[1], [0], [0], [1], [0, 0, 1, 1], [], []>} : vector<256x128xbf16>, vector<128x128xbf16>, vector<256x128xf32> -> vector<256x128xf32>
    %c0_3 = arith.constant 0 : index
    %c0_4 = arith.constant 0 : index
    %3 = vector.load %arg3[%c0_3, %c0_4] : memref<1x128xf32, #tpu.memory_space<vmem>>, vector<1x128xf32>
    %4 = vector.broadcast %3 : vector<1x128xf32> to vector<256x128xf32>
    %5 = arith.addf %2, %4 : vector<256x128xf32>
    %cst_5 = arith.constant 0.000000e+00 : f32
    %6 = vector.broadcast %cst_5 : f32 to vector<256x128xf32>
    %7 = arith.cmpf ogt, %5, %6 : vector<256x128xf32>
    %cst_6 = arith.constant 0.000000e+00 : f32
    %8 = vector.broadcast %cst_6 : f32 to vector<256x128xf32>
    %9 = arith.minimumf %5, %8 : vector<256x128xf32>
    %cst_7 = arith.constant 5.000000e-01 : f32
    %10 = vector.broadcast %cst_7 : f32 to vector<256x128xf32>
    %11 = arith.mulf %10, %9 : vector<256x128xf32>
    %12 = math.tanh %11 : vector<256x128xf32>
    %13 = math.exp %9 : vector<256x128xf32>
    %cst_8 = arith.constant 1.000000e+00 : f32
    %14 = vector.broadcast %cst_8 : f32 to vector<256x128xf32>
    %15 = arith.addf %13, %14 : vector<256x128xf32>
    %16 = arith.mulf %12, %15 : vector<256x128xf32>
    %17 = arith.select %7, %5, %16 : vector<256x128xi1>, vector<256x128xf32>
    %18 = arith.truncf %17 : vector<256x128xf32> to vector<256x128xbf16>
    %c0_9 = arith.constant 0 : index
    %c0_10 = arith.constant 0 : index
    %19 = vector.load %arg4[%c0_9, %c0_10] : memref<256x128xbf16, #tpu.memory_space<vmem>>, vector<256x128xbf16>
    tpu.vector_store %arg4[%c0_9, %c0_10], %18 {strides = array<i32>} : memref<256x128xbf16, #tpu.memory_space<vmem>>, vector<256x128xbf16>,
    return
  }
  func.func @transform_0(%arg0: i32) -> (i32, i32) {
    %c0_i32 = arith.constant 0 : i32
    %c0_i32_0 = arith.constant 0 : i32
    return %arg0, %c0_i32 : i32, i32
  }
  func.func @transform_1(%arg0: i32) -> (i32, i32) {
    %c0_i32 = arith.constant 0 : i32
    %c0_i32_0 = arith.constant 0 : i32
    %c0_i32_1 = arith.constant 0 : i32
    return %c0_i32, %c0_i32_0 : i32, i32
  }
  func.func @transform_2(%arg0: i32) -> (i32, i32) {
    %c0_i32 = arith.constant 0 : i32
    %c0_i32_0 = arith.constant 0 : i32
    %c0_i32_1 = arith.constant 0 : i32
    return %c0_i32, %c0_i32_0 : i32, i32
  }
  func.func @transform_3(%arg0: i32) -> (i32, i32) {
    %c0_i32 = arith.constant 0 : i32
    %c0_i32_0 = arith.constant 0 : i32
    return %arg0, %c0_i32 : i32, i32
  }
}

module attributes {stable_mosaic.version = 11 : i64} {
  func.func @_gemm_bias_elu_kernel(%arg0: i32, %arg1: memref<256x640xbf16, #tpu.memory_space<vmem>>, %arg2: memref<640x128xbf16, #tpu.memory_space<vmem>>, %arg3: memref<1x128xf32, #tpu.memory_space<vmem>>, %arg4: memref<256x128xbf16, #tpu.memory_space<vmem>>) attributes {dimension_semantics = [#tpu.dimension_semantics<parallel>], iteration_bounds = array<i64: 6>, scalar_prefetch = 0 : i64, scratch_operands = 0 : i64, tpu.core_type = #tpu.core_type<tc>, window_params = [{transform_indices = @transform_0, window_bounds = array<i64: 256, 640>}, {pipeline_mode = #tpu.pipeline_mode<synchronous>, transform_indices = @transform_1, window_bounds = array<i64: 640, 128>}, {pipeline_mode = #tpu.pipeline_mode<synchronous>, transform_indices = @transform_2, window_bounds = array<i64: 1, 128>}, {transform_indices = @transform_3, window_bounds = array<i64: 256, 128>}]} {
    %c0 = arith.constant 0 : index
    %c0_0 = arith.constant 0 : index
    %0 = vector.load %arg1[%c0, %c0_0] : memref<256x640xbf16, #tpu.memory_space<vmem>>, vector<256x640xbf16>
    %c0_1 = arith.constant 0 : index
    %c0_2 = arith.constant 0 : index
    %1 = vector.load %arg2[%c0_1, %c0_2] : memref<640x128xbf16, #tpu.memory_space<vmem>>, vector<640x128xbf16>
    %cst = arith.constant dense<0.000000e+00> : vector<256x128xf32>
    %2 = tpu.matmul %0, %1, %cst {dimension_numbers = #tpu.dot_dimension_numbers<[1], [0], [0], [1], [0, 0, 1, 1], [], []>} : vector<256x640xbf16>, vector<640x128xbf16>, vector<256x128xf32> -> vector<256x128xf32>
    %c0_3 = arith.constant 0 : index
    %c0_4 = arith.constant 0 : index
    %3 = vector.load %arg3[%c0_3, %c0_4] : memref<1x128xf32, #tpu.memory_space<vmem>>, vector<1x128xf32>
    %4 = vector.broadcast %3 : vector<1x128xf32> to vector<256x128xf32>
    %5 = arith.addf %2, %4 : vector<256x128xf32>
    %cst_5 = arith.constant 0.000000e+00 : f32
    %6 = vector.broadcast %cst_5 : f32 to vector<256x128xf32>
    %7 = arith.cmpf ogt, %5, %6 : vector<256x128xf32>
    %cst_6 = arith.constant 0.000000e+00 : f32
    %8 = vector.broadcast %cst_6 : f32 to vector<256x128xf32>
    %9 = arith.minimumf %5, %8 : vector<256x128xf32>
    %cst_7 = arith.constant 5.000000e-01 : f32
    %10 = vector.broadcast %cst_7 : f32 to vector<256x128xf32>
    %11 = arith.mulf %10, %9 : vector<256x128xf32>
    %12 = math.tanh %11 : vector<256x128xf32>
    %13 = math.exp %9 : vector<256x128xf32>
    %cst_8 = arith.constant 1.000000e+00 : f32
    %14 = vector.broadcast %cst_8 : f32 to vector<256x128xf32>
    %15 = arith.addf %13, %14 : vector<256x128xf32>
    %16 = arith.mulf %12, %15 : vector<256x128xf32>
    %17 = arith.select %7, %5, %16 : vector<256x128xi1>, vector<256x128xf32>
    %18 = arith.truncf %17 : vector<256x128xf32> to vector<256x128xbf16>
    %c0_9 = arith.constant 0 : index
    %c0_10 = arith.constant 0 : index
    %19 = vector.load %arg4[%c0_9, %c0_10] : memref<256x128xbf16, #tpu.memory_space<vmem>>, vector<256x128xbf16>
    tpu.vector_store %arg4[%c0_9, %c0_10], %18 {strides = array<i32>} : memref<256x128xbf16, #tpu.memory_space<vmem>>, vector<256x128xbf16>,
    return
  }
  func.func @transform_0(%arg0: i32) -> (i32, i32) {
    %c0_i32 = arith.constant 0 : i32
    %c0_i32_0 = arith.constant 0 : i32
    return %arg0, %c0_i32 : i32, i32
  }
  func.func @transform_1(%arg0: i32) -> (i32, i32) {
    %c0_i32 = arith.constant 0 : i32
    %c0_i32_0 = arith.constant 0 : i32
    %c0_i32_1 = arith.constant 0 : i32
    return %c0_i32, %c0_i32_0 : i32, i32
  }
  func.func @transform_2(%arg0: i32) -> (i32, i32) {
    %c0_i32 = arith.constant 0 : i32
    %c0_i32_0 = arith.constant 0 : i32
    %c0_i32_1 = arith.constant 0 : i32
    return %c0_i32, %c0_i32_0 : i32, i32
  }
  func.func @transform_3(%arg0: i32) -> (i32, i32) {
    %c0_i32 = arith.constant 0 : i32
    %c0_i32_0 = arith.constant 0 : i32
    return %arg0, %c0_i32 : i32, i32
  }
}

module attributes {stable_mosaic.version = 11 : i64} {
  func.func @_gemm_bias_elu_kernel(%arg0: i32, %arg1: memref<224x1024xbf16, #tpu.memory_space<vmem>>, %arg2: memref<1024x128xbf16, #tpu.memory_space<vmem>>, %arg3: memref<1x128xf32, #tpu.memory_space<vmem>>, %arg4: memref<224x128xbf16, #tpu.memory_space<vmem>>) attributes {dimension_semantics = [#tpu.dimension_semantics<parallel>], iteration_bounds = array<i64: 1>, scalar_prefetch = 0 : i64, scratch_operands = 0 : i64, tpu.core_type = #tpu.core_type<tc>, window_params = [{transform_indices = @transform_0, window_bounds = array<i64: 224, 1024>}, {pipeline_mode = #tpu.pipeline_mode<synchronous>, transform_indices = @transform_1, window_bounds = array<i64: 1024, 128>}, {pipeline_mode = #tpu.pipeline_mode<synchronous>, transform_indices = @transform_2, window_bounds = array<i64: 1, 128>}, {transform_indices = @transform_3, window_bounds = array<i64: 224, 128>}]} {
    %c0 = arith.constant 0 : index
    %c0_0 = arith.constant 0 : index
    %0 = vector.load %arg1[%c0, %c0_0] : memref<224x1024xbf16, #tpu.memory_space<vmem>>, vector<224x1024xbf16>
    %c0_1 = arith.constant 0 : index
    %c0_2 = arith.constant 0 : index
    %1 = vector.load %arg2[%c0_1, %c0_2] : memref<1024x128xbf16, #tpu.memory_space<vmem>>, vector<1024x128xbf16>
    %cst = arith.constant dense<0.000000e+00> : vector<224x128xf32>
    %2 = tpu.matmul %0, %1, %cst {dimension_numbers = #tpu.dot_dimension_numbers<[1], [0], [0], [1], [0, 0, 1, 1], [], []>} : vector<224x1024xbf16>, vector<1024x128xbf16>, vector<224x128xf32> -> vector<224x128xf32>
    %c0_3 = arith.constant 0 : index
    %c0_4 = arith.constant 0 : index
    %3 = vector.load %arg3[%c0_3, %c0_4] : memref<1x128xf32, #tpu.memory_space<vmem>>, vector<1x128xf32>
    %4 = vector.broadcast %3 : vector<1x128xf32> to vector<224x128xf32>
    %5 = arith.addf %2, %4 : vector<224x128xf32>
    %cst_5 = arith.constant 0.000000e+00 : f32
    %6 = vector.broadcast %cst_5 : f32 to vector<224x128xf32>
    %7 = arith.cmpf ogt, %5, %6 : vector<224x128xf32>
    %cst_6 = arith.constant 0.000000e+00 : f32
    %8 = vector.broadcast %cst_6 : f32 to vector<224x128xf32>
    %9 = arith.minimumf %5, %8 : vector<224x128xf32>
    %cst_7 = arith.constant 5.000000e-01 : f32
    %10 = vector.broadcast %cst_7 : f32 to vector<224x128xf32>
    %11 = arith.mulf %10, %9 : vector<224x128xf32>
    %12 = math.tanh %11 : vector<224x128xf32>
    %13 = math.exp %9 : vector<224x128xf32>
    %cst_8 = arith.constant 1.000000e+00 : f32
    %14 = vector.broadcast %cst_8 : f32 to vector<224x128xf32>
    %15 = arith.addf %13, %14 : vector<224x128xf32>
    %16 = arith.mulf %12, %15 : vector<224x128xf32>
    %17 = arith.select %7, %5, %16 : vector<224x128xi1>, vector<224x128xf32>
    %18 = arith.truncf %17 : vector<224x128xf32> to vector<224x128xbf16>
    %c0_9 = arith.constant 0 : index
    %c0_10 = arith.constant 0 : index
    %19 = vector.load %arg4[%c0_9, %c0_10] : memref<224x128xbf16, #tpu.memory_space<vmem>>, vector<224x128xbf16>
    tpu.vector_store %arg4[%c0_9, %c0_10], %18 {strides = array<i32>} : memref<224x128xbf16, #tpu.memory_space<vmem>>, vector<224x128xbf16>,
    return
  }
  func.func @transform_0(%arg0: i32) -> (i32, i32) {
    %c0_i32 = arith.constant 0 : i32
    %c0_i32_0 = arith.constant 0 : i32
    return %arg0, %c0_i32 : i32, i32
  }
  func.func @transform_1(%arg0: i32) -> (i32, i32) {
    %c0_i32 = arith.constant 0 : i32
    %c0_i32_0 = arith.constant 0 : i32
    %c0_i32_1 = arith.constant 0 : i32
    return %c0_i32, %c0_i32_0 : i32, i32
  }
  func.func @transform_2(%arg0: i32) -> (i32, i32) {
    %c0_i32 = arith.constant 0 : i32
    %c0_i32_0 = arith.constant 0 : i32
    %c0_i32_1 = arith.constant 0 : i32
    return %c0_i32, %c0_i32_0 : i32, i32
  }
  func.func @transform_3(%arg0: i32) -> (i32, i32) {
    %c0_i32 = arith.constant 0 : i32
    %c0_i32_0 = arith.constant 0 : i32
    return %arg0, %c0_i32 : i32, i32
  }
}

module attributes {stable_mosaic.version = 11 : i64} {
  func.func @_gemm_bias_elu_kernel(%arg0: i32, %arg1: memref<120x512xbf16, #tpu.memory_space<vmem>>, %arg2: memref<512x128xbf16, #tpu.memory_space<vmem>>, %arg3: memref<1x128xf32, #tpu.memory_space<vmem>>, %arg4: memref<120x128xbf16, #tpu.memory_space<vmem>>) attributes {dimension_semantics = [#tpu.dimension_semantics<parallel>], iteration_bounds = array<i64: 1>, scalar_prefetch = 0 : i64, scratch_operands = 0 : i64, tpu.core_type = #tpu.core_type<tc>, window_params = [{transform_indices = @transform_0, window_bounds = array<i64: 120, 512>}, {pipeline_mode = #tpu.pipeline_mode<synchronous>, transform_indices = @transform_1, window_bounds = array<i64: 512, 128>}, {pipeline_mode = #tpu.pipeline_mode<synchronous>, transform_indices = @transform_2, window_bounds = array<i64: 1, 128>}, {transform_indices = @transform_3, window_bounds = array<i64: 120, 128>}]} {
    %c0 = arith.constant 0 : index
    %c0_0 = arith.constant 0 : index
    %0 = vector.load %arg1[%c0, %c0_0] : memref<120x512xbf16, #tpu.memory_space<vmem>>, vector<120x512xbf16>
    %c0_1 = arith.constant 0 : index
    %c0_2 = arith.constant 0 : index
    %1 = vector.load %arg2[%c0_1, %c0_2] : memref<512x128xbf16, #tpu.memory_space<vmem>>, vector<512x128xbf16>
    %cst = arith.constant dense<0.000000e+00> : vector<120x128xf32>
    %2 = tpu.matmul %0, %1, %cst {dimension_numbers = #tpu.dot_dimension_numbers<[1], [0], [0], [1], [0, 0, 1, 1], [], []>} : vector<120x512xbf16>, vector<512x128xbf16>, vector<120x128xf32> -> vector<120x128xf32>
    %c0_3 = arith.constant 0 : index
    %c0_4 = arith.constant 0 : index
    %3 = vector.load %arg3[%c0_3, %c0_4] : memref<1x128xf32, #tpu.memory_space<vmem>>, vector<1x128xf32>
    %4 = vector.broadcast %3 : vector<1x128xf32> to vector<120x128xf32>
    %5 = arith.addf %2, %4 : vector<120x128xf32>
    %cst_5 = arith.constant 0.000000e+00 : f32
    %6 = vector.broadcast %cst_5 : f32 to vector<120x128xf32>
    %7 = arith.cmpf ogt, %5, %6 : vector<120x128xf32>
    %cst_6 = arith.constant 0.000000e+00 : f32
    %8 = vector.broadcast %cst_6 : f32 to vector<120x128xf32>
    %9 = arith.minimumf %5, %8 : vector<120x128xf32>
    %cst_7 = arith.constant 5.000000e-01 : f32
    %10 = vector.broadcast %cst_7 : f32 to vector<120x128xf32>
    %11 = arith.mulf %10, %9 : vector<120x128xf32>
    %12 = math.tanh %11 : vector<120x128xf32>
    %13 = math.exp %9 : vector<120x128xf32>
    %cst_8 = arith.constant 1.000000e+00 : f32
    %14 = vector.broadcast %cst_8 : f32 to vector<120x128xf32>
    %15 = arith.addf %13, %14 : vector<120x128xf32>
    %16 = arith.mulf %12, %15 : vector<120x128xf32>
    %17 = arith.select %7, %5, %16 : vector<120x128xi1>, vector<120x128xf32>
    %18 = arith.truncf %17 : vector<120x128xf32> to vector<120x128xbf16>
    %c0_9 = arith.constant 0 : index
    %c0_10 = arith.constant 0 : index
    %19 = vector.load %arg4[%c0_9, %c0_10] : memref<120x128xbf16, #tpu.memory_space<vmem>>, vector<120x128xbf16>
    tpu.vector_store %arg4[%c0_9, %c0_10], %18 {strides = array<i32>} : memref<120x128xbf16, #tpu.memory_space<vmem>>, vector<120x128xbf16>,
    return
  }
  func.func @transform_0(%arg0: i32) -> (i32, i32) {
    %c0_i32 = arith.constant 0 : i32
    %c0_i32_0 = arith.constant 0 : i32
    return %arg0, %c0_i32 : i32, i32
  }
  func.func @transform_1(%arg0: i32) -> (i32, i32) {
    %c0_i32 = arith.constant 0 : i32
    %c0_i32_0 = arith.constant 0 : i32
    %c0_i32_1 = arith.constant 0 : i32
    return %c0_i32, %c0_i32_0 : i32, i32
  }
  func.func @transform_2(%arg0: i32) -> (i32, i32) {
    %c0_i32 = arith.constant 0 : i32
    %c0_i32_0 = arith.constant 0 : i32
    %c0_i32_1 = arith.constant 0 : i32
    return %c0_i32, %c0_i32_0 : i32, i32
  }
  func.func @transform_3(%arg0: i32) -> (i32, i32) {
    %c0_i32 = arith.constant 0 : i32
    %c0_i32_0 = arith.constant 0 : i32
    return %arg0, %c0_i32 : i32, i32
  }
}

module attributes {stable_mosaic.version = 11 : i64} {
  func.func @_gemm_bias_elu_kernel(%arg0: i32, %arg1: memref<40x640xbf16, #tpu.memory_space<vmem>>, %arg2: memref<640x128xbf16, #tpu.memory_space<vmem>>, %arg3: memref<1x128xf32, #tpu.memory_space<vmem>>, %arg4: memref<40x128xbf16, #tpu.memory_space<vmem>>) attributes {dimension_semantics = [#tpu.dimension_semantics<parallel>], iteration_bounds = array<i64: 1>, scalar_prefetch = 0 : i64, scratch_operands = 0 : i64, tpu.core_type = #tpu.core_type<tc>, window_params = [{transform_indices = @transform_0, window_bounds = array<i64: 40, 640>}, {pipeline_mode = #tpu.pipeline_mode<synchronous>, transform_indices = @transform_1, window_bounds = array<i64: 640, 128>}, {pipeline_mode = #tpu.pipeline_mode<synchronous>, transform_indices = @transform_2, window_bounds = array<i64: 1, 128>}, {transform_indices = @transform_3, window_bounds = array<i64: 40, 128>}]} {
    %c0 = arith.constant 0 : index
    %c0_0 = arith.constant 0 : index
    %0 = vector.load %arg1[%c0, %c0_0] : memref<40x640xbf16, #tpu.memory_space<vmem>>, vector<40x640xbf16>
    %c0_1 = arith.constant 0 : index
    %c0_2 = arith.constant 0 : index
    %1 = vector.load %arg2[%c0_1, %c0_2] : memref<640x128xbf16, #tpu.memory_space<vmem>>, vector<640x128xbf16>
    %cst = arith.constant dense<0.000000e+00> : vector<40x128xf32>
    %2 = tpu.matmul %0, %1, %cst {dimension_numbers = #tpu.dot_dimension_numbers<[1], [0], [0], [1], [0, 0, 1, 1], [], []>} : vector<40x640xbf16>, vector<640x128xbf16>, vector<40x128xf32> -> vector<40x128xf32>
    %c0_3 = arith.constant 0 : index
    %c0_4 = arith.constant 0 : index
    %3 = vector.load %arg3[%c0_3, %c0_4] : memref<1x128xf32, #tpu.memory_space<vmem>>, vector<1x128xf32>
    %4 = vector.broadcast %3 : vector<1x128xf32> to vector<40x128xf32>
    %5 = arith.addf %2, %4 : vector<40x128xf32>
    %cst_5 = arith.constant 0.000000e+00 : f32
    %6 = vector.broadcast %cst_5 : f32 to vector<40x128xf32>
    %7 = arith.cmpf ogt, %5, %6 : vector<40x128xf32>
    %cst_6 = arith.constant 0.000000e+00 : f32
    %8 = vector.broadcast %cst_6 : f32 to vector<40x128xf32>
    %9 = arith.minimumf %5, %8 : vector<40x128xf32>
    %cst_7 = arith.constant 5.000000e-01 : f32
    %10 = vector.broadcast %cst_7 : f32 to vector<40x128xf32>
    %11 = arith.mulf %10, %9 : vector<40x128xf32>
    %12 = math.tanh %11 : vector<40x128xf32>
    %13 = math.exp %9 : vector<40x128xf32>
    %cst_8 = arith.constant 1.000000e+00 : f32
    %14 = vector.broadcast %cst_8 : f32 to vector<40x128xf32>
    %15 = arith.addf %13, %14 : vector<40x128xf32>
    %16 = arith.mulf %12, %15 : vector<40x128xf32>
    %17 = arith.select %7, %5, %16 : vector<40x128xi1>, vector<40x128xf32>
    %18 = arith.truncf %17 : vector<40x128xf32> to vector<40x128xbf16>
    %c0_9 = arith.constant 0 : index
    %c0_10 = arith.constant 0 : index
    %19 = vector.load %arg4[%c0_9, %c0_10] : memref<40x128xbf16, #tpu.memory_space<vmem>>, vector<40x128xbf16>
    tpu.vector_store %arg4[%c0_9, %c0_10], %18 {strides = array<i32>} : memref<40x128xbf16, #tpu.memory_space<vmem>>, vector<40x128xbf16>,
    return
  }
  func.func @transform_0(%arg0: i32) -> (i32, i32) {
    %c0_i32 = arith.constant 0 : i32
    %c0_i32_0 = arith.constant 0 : i32
    return %arg0, %c0_i32 : i32, i32
  }
  func.func @transform_1(%arg0: i32) -> (i32, i32) {
    %c0_i32 = arith.constant 0 : i32
    %c0_i32_0 = arith.constant 0 : i32
    %c0_i32_1 = arith.constant 0 : i32
    return %c0_i32, %c0_i32_0 : i32, i32
  }
  func.func @transform_2(%arg0: i32) -> (i32, i32) {
    %c0_i32 = arith.constant 0 : i32
    %c0_i32_0 = arith.constant 0 : i32
    %c0_i32_1 = arith.constant 0 : i32
    return %c0_i32, %c0_i32_0 : i32, i32
  }
  func.func @transform_3(%arg0: i32) -> (i32, i32) {
    %c0_i32 = arith.constant 0 : i32
    %c0_i32_0 = arith.constant 0 : i32
    return %arg0, %c0_i32 : i32, i32
  }
}

module attributes {stable_mosaic.version = 11 : i64} {
  func.func @_fc_stack_kernel(%arg0: memref<16x1152xbf16, #tpu.memory_space<vmem>>, %arg1: memref<1152x1280xbf16, #tpu.memory_space<vmem>>, %arg2: memref<1x1280xf32, #tpu.memory_space<vmem>>, %arg3: memref<1280x128xbf16, #tpu.memory_space<vmem>>, %arg4: memref<1x128xf32, #tpu.memory_space<vmem>>, %arg5: memref<128x128xbf16, #tpu.memory_space<vmem>>, %arg6: memref<1x128xf32, #tpu.memory_space<vmem>>, %arg7: memref<128x128xbf16, #tpu.memory_space<vmem>>, %arg8: memref<1x128xf32, #tpu.memory_space<vmem>>, %arg9: memref<128x128xbf16, #tpu.memory_space<vmem>>, %arg10: memref<1x128xf32, #tpu.memory_space<vmem>>, %arg11: memref<16x128xf32, #tpu.memory_space<vmem>>) attributes {dimension_semantics = [], scalar_prefetch = 0 : i64, scratch_operands = 0 : i64, tpu.core_type = #tpu.core_type<tc>} {
    %c0 = arith.constant 0 : index
    %c0_0 = arith.constant 0 : index
    %0 = vector.load %arg0[%c0, %c0_0] : memref<16x1152xbf16, #tpu.memory_space<vmem>>, vector<16x1152xbf16>
    %c0_1 = arith.constant 0 : index
    %c0_2 = arith.constant 0 : index
    %1 = vector.load %arg1[%c0_1, %c0_2] : memref<1152x1280xbf16, #tpu.memory_space<vmem>>, vector<1152x1280xbf16>
    %cst = arith.constant dense<0.000000e+00> : vector<16x1280xf32>
    %2 = tpu.matmul %0, %1, %cst {dimension_numbers = #tpu.dot_dimension_numbers<[1], [0], [0], [1], [0, 0, 1, 1], [], []>} : vector<16x1152xbf16>, vector<1152x1280xbf16>, vector<16x1280xf32> -> vector<16x1280xf32>
    %c0_3 = arith.constant 0 : index
    %c0_4 = arith.constant 0 : index
    %3 = vector.load %arg2[%c0_3, %c0_4] : memref<1x1280xf32, #tpu.memory_space<vmem>>, vector<1x1280xf32>
    %4 = vector.broadcast %3 : vector<1x1280xf32> to vector<16x1280xf32>
    %5 = arith.addf %2, %4 : vector<16x1280xf32>
    %cst_5 = arith.constant 0.000000e+00 : f32
    %6 = vector.broadcast %cst_5 : f32 to vector<16x1280xf32>
    %7 = arith.cmpf ogt, %5, %6 : vector<16x1280xf32>
    %cst_6 = arith.constant 0.000000e+00 : f32
    %8 = vector.broadcast %cst_6 : f32 to vector<16x1280xf32>
    %9 = arith.minimumf %5, %8 : vector<16x1280xf32>
    %cst_7 = arith.constant 5.000000e-01 : f32
    %10 = vector.broadcast %cst_7 : f32 to vector<16x1280xf32>
    %11 = arith.mulf %10, %9 : vector<16x1280xf32>
    %12 = math.tanh %11 : vector<16x1280xf32>
    %13 = math.exp %9 : vector<16x1280xf32>
    %cst_8 = arith.constant 1.000000e+00 : f32
    %14 = vector.broadcast %cst_8 : f32 to vector<16x1280xf32>
    %15 = arith.addf %13, %14 : vector<16x1280xf32>
    %16 = arith.mulf %12, %15 : vector<16x1280xf32>
    %17 = arith.select %7, %5, %16 : vector<16x1280xi1>, vector<16x1280xf32>
    %18 = arith.truncf %17 : vector<16x1280xf32> to vector<16x1280xbf16>
    %c0_9 = arith.constant 0 : index
    %c0_10 = arith.constant 0 : index
    %19 = vector.load %arg3[%c0_9, %c0_10] : memref<1280x128xbf16, #tpu.memory_space<vmem>>, vector<1280x128xbf16>
    %cst_11 = arith.constant dense<0.000000e+00> : vector<16x128xf32>
    %20 = tpu.matmul %18, %19, %cst_11 {dimension_numbers = #tpu.dot_dimension_numbers<[1], [0], [0], [1], [0, 0, 1, 1], [], []>} : vector<16x1280xbf16>, vector<1280x128xbf16>, vector<16x128xf32> -> vector<16x128xf32>
    %c0_12 = arith.constant 0 : index
    %c0_13 = arith.constant 0 : index
    %21 = vector.load %arg4[%c0_12, %c0_13] : memref<1x128xf32, #tpu.memory_space<vmem>>, vector<1x128xf32>
    %22 = vector.broadcast %21 : vector<1x128xf32> to vector<16x128xf32>
    %23 = arith.addf %20, %22 : vector<16x128xf32>
    %cst_14 = arith.constant 0.000000e+00 : f32
    %24 = vector.broadcast %cst_14 : f32 to vector<16x128xf32>
    %25 = arith.cmpf ogt, %23, %24 : vector<16x128xf32>
    %cst_15 = arith.constant 0.000000e+00 : f32
    %26 = vector.broadcast %cst_15 : f32 to vector<16x128xf32>
    %27 = arith.minimumf %23, %26 : vector<16x128xf32>
    %cst_16 = arith.constant 5.000000e-01 : f32
    %28 = vector.broadcast %cst_16 : f32 to vector<16x128xf32>
    %29 = arith.mulf %28, %27 : vector<16x128xf32>
    %30 = math.tanh %29 : vector<16x128xf32>
    %31 = math.exp %27 : vector<16x128xf32>
    %cst_17 = arith.constant 1.000000e+00 : f32
    %32 = vector.broadcast %cst_17 : f32 to vector<16x128xf32>
    %33 = arith.addf %31, %32 : vector<16x128xf32>
    %34 = arith.mulf %30, %33 : vector<16x128xf32>
    %35 = arith.select %25, %23, %34 : vector<16x128xi1>, vector<16x128xf32>
    %36 = arith.truncf %35 : vector<16x128xf32> to vector<16x128xbf16>
    %c0_18 = arith.constant 0 : index
    %c0_19 = arith.constant 0 : index
    %37 = vector.load %arg5[%c0_18, %c0_19] : memref<128x128xbf16, #tpu.memory_space<vmem>>, vector<128x128xbf16>
    %cst_20 = arith.constant dense<0.000000e+00> : vector<16x128xf32>
    %38 = tpu.matmul %36, %37, %cst_20 {dimension_numbers = #tpu.dot_dimension_numbers<[1], [0], [0], [1], [0, 0, 1, 1], [], []>} : vector<16x128xbf16>, vector<128x128xbf16>, vector<16x128xf32> -> vector<16x128xf32>
    %c0_21 = arith.constant 0 : index
    %c0_22 = arith.constant 0 : index
    %39 = vector.load %arg6[%c0_21, %c0_22] : memref<1x128xf32, #tpu.memory_space<vmem>>, vector<1x128xf32>
    %40 = vector.broadcast %39 : vector<1x128xf32> to vector<16x128xf32>
    %41 = arith.addf %38, %40 : vector<16x128xf32>
    %cst_23 = arith.constant 0.000000e+00 : f32
    %42 = vector.broadcast %cst_23 : f32 to vector<16x128xf32>
    %43 = arith.cmpf ogt, %41, %42 : vector<16x128xf32>
    %cst_24 = arith.constant 0.000000e+00 : f32
    %44 = vector.broadcast %cst_24 : f32 to vector<16x128xf32>
    %45 = arith.minimumf %41, %44 : vector<16x128xf32>
    %cst_25 = arith.constant 5.000000e-01 : f32
    %46 = vector.broadcast %cst_25 : f32 to vector<16x128xf32>
    %47 = arith.mulf %46, %45 : vector<16x128xf32>
    %48 = math.tanh %47 : vector<16x128xf32>
    %49 = math.exp %45 : vector<16x128xf32>
    %cst_26 = arith.constant 1.000000e+00 : f32
    %50 = vector.broadcast %cst_26 : f32 to vector<16x128xf32>
    %51 = arith.addf %49, %50 : vector<16x128xf32>
    %52 = arith.mulf %48, %51 : vector<16x128xf32>
    %53 = arith.select %43, %41, %52 : vector<16x128xi1>, vector<16x128xf32>
    %54 = arith.truncf %53 : vector<16x128xf32> to vector<16x128xbf16>
    %c0_27 = arith.constant 0 : index
    %c0_28 = arith.constant 0 : index
    %55 = vector.load %arg7[%c0_27, %c0_28] : memref<128x128xbf16, #tpu.memory_space<vmem>>, vector<128x128xbf16>
    %cst_29 = arith.constant dense<0.000000e+00> : vector<16x128xf32>
    %56 = tpu.matmul %54, %55, %cst_29 {dimension_numbers = #tpu.dot_dimension_numbers<[1], [0], [0], [1], [0, 0, 1, 1], [], []>} : vector<16x128xbf16>, vector<128x128xbf16>, vector<16x128xf32> -> vector<16x128xf32>
    %c0_30 = arith.constant 0 : index
    %c0_31 = arith.constant 0 : index
    %57 = vector.load %arg8[%c0_30, %c0_31] : memref<1x128xf32, #tpu.memory_space<vmem>>, vector<1x128xf32>
    %58 = vector.broadcast %57 : vector<1x128xf32> to vector<16x128xf32>
    %59 = arith.addf %56, %58 : vector<16x128xf32>
    %cst_32 = arith.constant 0.000000e+00 : f32
    %60 = vector.broadcast %cst_32 : f32 to vector<16x128xf32>
    %61 = arith.cmpf ogt, %59, %60 : vector<16x128xf32>
    %cst_33 = arith.constant 0.000000e+00 : f32
    %62 = vector.broadcast %cst_33 : f32 to vector<16x128xf32>
    %63 = arith.minimumf %59, %62 : vector<16x128xf32>
    %cst_34 = arith.constant 5.000000e-01 : f32
    %64 = vector.broadcast %cst_34 : f32 to vector<16x128xf32>
    %65 = arith.mulf %64, %63 : vector<16x128xf32>
    %66 = math.tanh %65 : vector<16x128xf32>
    %67 = math.exp %63 : vector<16x128xf32>
    %cst_35 = arith.constant 1.000000e+00 : f32
    %68 = vector.broadcast %cst_35 : f32 to vector<16x128xf32>
    %69 = arith.addf %67, %68 : vector<16x128xf32>
    %70 = arith.mulf %66, %69 : vector<16x128xf32>
    %71 = arith.select %61, %59, %70 : vector<16x128xi1>, vector<16x128xf32>
    %72 = arith.truncf %71 : vector<16x128xf32> to vector<16x128xbf16>
    %c0_36 = arith.constant 0 : index
    %c0_37 = arith.constant 0 : index
    %73 = vector.load %arg9[%c0_36, %c0_37] : memref<128x128xbf16, #tpu.memory_space<vmem>>, vector<128x128xbf16>
    %cst_38 = arith.constant dense<0.000000e+00> : vector<16x128xf32>
    %74 = tpu.matmul %72, %73, %cst_38 {dimension_numbers = #tpu.dot_dimension_numbers<[1], [0], [0], [1], [0, 0, 1, 1], [], []>} : vector<16x128xbf16>, vector<128x128xbf16>, vector<16x128xf32> -> vector<16x128xf32>
    %c0_39 = arith.constant 0 : index
    %c0_40 = arith.constant 0 : index
    %75 = vector.load %arg10[%c0_39, %c0_40] : memref<1x128xf32, #tpu.memory_space<vmem>>, vector<1x128xf32>
    %76 = vector.broadcast %75 : vector<1x128xf32> to vector<16x128xf32>
    %77 = arith.addf %74, %76 : vector<16x128xf32>
    %c0_41 = arith.constant 0 : index
    %c0_42 = arith.constant 0 : index
    %78 = vector.load %arg11[%c0_41, %c0_42] : memref<16x128xf32, #tpu.memory_space<vmem>>, vector<16x128xf32>
    tpu.vector_store %arg11[%c0_41, %c0_42], %77 {strides = array<i32>} : memref<16x128xf32, #tpu.memory_space<vmem>>, vector<16x128xf32>,
    return
  }
}

</mosaic_0001>

<bundles_post_ra>
// kernel: _lambda_.6
= control target key start
LH: loop header
LB: loop body
LE: loop exit
PB: predicated region body
PF: predicated region fallthrough
CT: control target
= control target key end

     0   :  { %s1510_s12 = smov 0   ;;  %s1829_s0 = inlined_call_operand.vmem [shape: bf16[6144,128], index: 0, kind: input, shape index: {}]   ;;  %s1830_s1 = inlined_call_operand.vmem [shape: bf16[128,128], index: 1, kind: input, shape index: {}]   ;;  %s1831_s2 = inlined_call_operand.vmem [shape: f32[1,128], index: 2, kind: input, shape index: {}]   ;;  %s1832_s3 = inlined_call_operand.vmem [shape: bf16[6144,128], index: 3, kind: output, shape index: {}]  }
   0x1 LB: > { %s1039_s13 = sadd.s32 4294967295, %s1488_s12   ;;  %p1043_p0 = scmp.ge.s32.totalorder %s1488_s12, 1  ;;  %s1488_s12 = sphi %s1510_s12, %s13_s12  }
   0x2   : > { %p138_p1 = scmp.lt.s32.totalorder %s1488_s12, 25 }
   0x4   : > { %p139_p2 = pnand %p1043_p0, %p138_p1 }
   0x5   : > { %s1044_s16 = sshll.u32 (!%p139_p2), %s1039_s13, 5 }
   0x6   : > { %142 = sbr.rel (%p139_p2) target bundleno = 336 (0x150), region = 32  ;;  %p163_p3 = scmp.lt.s32.totalorder (!%p139_p2), %s1044_s16, 767 }
   0xb   : > { %v1330_v0 = vld [vmem:[%s1830_s1 + $0x38] sm:$0xff]   ;;  %v1331_v1 = vld [vmem:[%s1830_s1 + $0x30] sm:$0xff]   ;;  %s1834_s16 = smov (!%p163_p3, %s1044_s16), 767  ;;  %v1332_v2 = vld [vmem:[%s1830_s1 + $0x28] sm:$0xff]  }
   0xc   : > { %1258 = vmatprep.subr.bf16.mxu0 %v1330_v0  ;;  %1306 = vmatprep.subr.bf16.mxu1 %v1330_v0  ;;  %s1045_s21 = sshll.u32 %s1834_s16, 2  ;;  %v1333_v3 = vld [vmem:[%s1830_s1 + $0x20] sm:$0xff]   ;;  %v1334_v6 = vld [vmem:[%s1830_s1 + $0x18] sm:$0xff]   ;;  %v1335_v7 = vld [vmem:[%s1830_s1 + $0x10] sm:$0xff]  }
   0xd   : > { %1259 = vmatpush3.bf16.msra.mxu0 %v1330_v0  ;;  %1314 = vmatpush3.bf16.msra.mxu1 %v1330_v0  ;;  %s1535_s24 = scalar_lea.vmem %s1829_s0, %s1045_s21  ;;  %v1336_v8 = vld [vmem:[%s1830_s1 + $0x8] sm:$0xff]   ;;  %v1337_v9 = vld [vmem:[%s1830_s1] sm:$0xff]   ;;  %s1659_s13 = scalar_lea.vmem %s1832_s3, %s1045_s21 }
   0xe   : > { %1260 = vmatprep.subr.bf16.mxu0 %v1331_v1  ;;  %1307 = vmatprep.subr.bf16.mxu1 %v1331_v1  ;;  %v1338_v4 = vld [vmem:[%s1535_s24] sm:$0xff]   ;;  %v1340_v10 = vld [vmem:[%s1535_s24 + $0x8] sm:$0xff]   ;;  %v1342_v12 = vld [vmem:[%s1535_s24 + $0x10] sm:$0xff]  }
   0xf   : > { %v1339_v5 = vld [vmem:[%s1535_s24 + $0x40] sm:$0xff]   ;;  %1274 = vmatprep.mubr.bf16.mxu0 %v1338_v4  ;;  %v1341_v11 = vld [vmem:[%s1535_s24 + $0x48] sm:$0xff]   ;;  %v1343_v13 = vld [vmem:[%s1535_s24 + $0x50] sm:$0xff]  }
  0x10   : > { %1290 = vmatprep.mubr.bf16.mxu1 %v1339_v5  ;;  %v1344_v14 = vld [vmem:[%s1535_s24 + $0x18] sm:$0xff]   ;;  %v1346_v16 = vld [vmem:[%s1535_s24 + $0x20] sm:$0xff]   ;;  %v1348_v18 = vld [vmem:[%s1535_s24 + $0x28] sm:$0xff]  }
  0x11   : > { %1261 = vmatpush3.bf16.msra.mxu0 %v1331_v1  ;;  %1315 = vmatpush3.bf16.msra.mxu1 %v1331_v1  ;;  %v1345_v15 = vld [vmem:[%s1535_s24 + $0x58] sm:$0xff]   ;;  %v1347_v17 = vld [vmem:[%s1535_s24 + $0x60] sm:$0xff]   ;;  %v1349_v19 = vld [vmem:[%s1535_s24 + $0x68] sm:$0xff]  }
  0x12   : > { %1262 = vmatprep.subr.bf16.mxu0 %v1332_v2  ;;  %1308 = vmatprep.subr.bf16.mxu1 %v1332_v2  ;;  %v1350_v20 = vld [vmem:[%s1535_s24 + $0x30] sm:$0xff]   ;;  %v1352_v22 = vld [vmem:[%s1535_s24 + $0x38] sm:$0xff]   ;;  %v1571_v24 = vld [vmem:[%s1831_s2] ss:$0 sm:$0xff] }
  0x13   : > { %v1351_v21 = vld [vmem:[%s1535_s24 + $0x70] sm:$0xff]   ;;  %v1353_v23 = vld [vmem:[%s1535_s24 + $0x78] sm:$0xff]  }
  0x15   : > { %1263 = vmatpush3.bf16.msra.mxu0 %v1332_v2  ;;  %1316 = vmatpush3.bf16.msra.mxu1 %v1332_v2 }
  0x16   : > { %1264 = vmatprep.subr.bf16.mxu0 %v1333_v3  ;;  %1309 = vmatprep.subr.bf16.mxu1 %v1333_v3 }
  0x19   : > { %1265 = vmatpush3.bf16.msra.mxu0 %v1333_v3  ;;  %1317 = vmatpush3.bf16.msra.mxu1 %v1333_v3 }
  0x1a   : > { %1266 = vmatprep.subr.bf16.mxu0 %v1334_v6  ;;  %1310 = vmatprep.subr.bf16.mxu1 %v1334_v6 }
  0x1d   : > { %1267 = vmatpush3.bf16.msra.mxu0 %v1334_v6  ;;  %1318 = vmatpush3.bf16.msra.mxu1 %v1334_v6 }
  0x1e   : > { %1268 = vmatprep.subr.bf16.mxu0 %v1335_v7  ;;  %1311 = vmatprep.subr.bf16.mxu1 %v1335_v7 }
  0x21   : > { %1269 = vmatpush3.bf16.msra.mxu0 %v1335_v7  ;;  %1319 = vmatpush3.bf16.msra.mxu1 %v1335_v7 }
  0x22   : > { %1270 = vmatprep.subr.bf16.mxu0 %v1336_v8  ;;  %1312 = vmatprep.subr.bf16.mxu1 %v1336_v8 }
  0x25   : > { %1271 = vmatpush3.bf16.msra.mxu0 %v1336_v8  ;;  %1320 = vmatpush3.bf16.msra.mxu1 %v1336_v8 }
  0x26   : > { %1272 = vmatprep.subr.bf16.mxu0 %v1337_v9  ;;  %1313 = vmatprep.subr.bf16.mxu1 %v1337_v9 }
  0x29   : > { %1273 = vmatpush3.bf16.msra.mxu0 %v1337_v9  ;;  %1321 = vmatpush3.bf16.msra.mxu1 %v1337_v9 }
  0x2c   : > { %1275 = vmatmul.mubr.bf16.vlgmr.msra.gmra.mxu0 %v1340_v10  ;;  %1291 = vmatmul.mubr.bf16.vlgmr.msra.gmra.mxu1 %v1341_v11 }
  0x2d   : > { %1278 = vmatprep.mubr.bf16.mxu0 %v1342_v12  ;;  %1294 = vmatprep.mubr.bf16.mxu1 %v1343_v13 }
  0x34   : > { %1279 = vmatmul.mubr.bf16.gmra.mxu0 %v1344_v14  ;;  %1295 = vmatmul.mubr.bf16.gmra.mxu1 %v1345_v15 }
  0x35   : > { %1282 = vmatprep.mubr.bf16.mxu0 %v1346_v16  ;;  %1298 = vmatprep.mubr.bf16.mxu1 %v1347_v17 }
  0x3c   : > { %1283 = vmatmul.mubr.bf16.gmra.mxu0 %v1348_v18  ;;  %1299 = vmatmul.mubr.bf16.gmra.mxu1 %v1349_v19 }
  0x3d   : > { %1286 = vmatprep.mubr.bf16.mxu0 %v1350_v20  ;;  %1302 = vmatprep.mubr.bf16.mxu1 %v1351_v21 }
  0x44   : > { %1287 = vmatmul.mubr.bf16.gmra.mxu0 %v1352_v22  ;;  %1303 = vmatmul.mubr.bf16.gmra.mxu1 %v1353_v23 }
  0xec   : > { %v1276_v25 = vpop.f32.mrf.mxu0  ;;  %v1292_v26 = vpop.f32.mrf.mxu1 }
  0xed   : > { %v1574_v27 = vadd.f32 %v1276_v25, %v1571_v24  ;;  %v1577_v28 = vadd.f32 %v1292_v26, %v1571_v24 }
  0xee   : > { %v408_v29 = vpop.f32.mrf.mxu0  ;;  %v472_v30 = vpop.f32.mrf.mxu1 }
  0xef   : > { %v569_v31 = vmin.f32 %v1574_v27, 0.0  ;;  %v585_v32 = vmin.f32 %v1577_v28, 0.0  ;;  %v1582_v33 = vadd.f32 %v1571_v24, %v408_v29  ;;  %v1585_v34 = vadd.f32 %v1571_v24, %v472_v30 }
  0xf0   : > { %v1277_v35 = vpop.f32.mrf.mxu0  ;;  %v1293_v36 = vpop.f32.mrf.mxu1  ;;  %vm537_vm0 = vcmp.gt.f32.partialorder %v1574_v27, 0.0  ;;  %vm553_vm1 = vcmp.gt.f32.partialorder %v1577_v28, 0.0 }
  0xf1   : > { %v601_v37 = vmul.f32 0.5, %v569_v31  ;;  %v667_v38 = vmul.f32 1.442695, %v569_v31  ;;  %v617_v39 = vmul.f32 0.5, %v585_v32  ;;  %v699_v40 = vmul.f32 1.442695, %v585_v32 }
  0xf2   : > { %v567_v41 = vmin.f32 %v1582_v33, 0.0  ;;  %v583_v42 = vmin.f32 %v1585_v34, 0.0  ;;  %v411_v43 = vpop.f32.mrf.mxu0  ;;  %v1590_v44 = vadd.f32 %v1277_v35, %v1571_v24  ;;  %v1593_v45 = vadd.f32 %v1293_v36, %v1571_v24  ;;  %v475_v47 = vpop.f32.mrf.mxu1 }
  0xf3   : > { %1354 = vtanh.f32 %v601_v37  ;;  %v1596_v46 = vadd.f32 %v1571_v24, %v411_v43  ;;  %v1602_v59 = vadd.f32 %v1571_v24, %v475_v47  ;;  %vm535_vm4 = vcmp.gt.f32.partialorder %v1582_v33, 0.0 }
  0xf4   : > { %1356 = vpow2.f32 %v667_v38  ;;  %v599_v48 = vmul.f32 0.5, %v567_v41  ;;  %v663_v49 = vmul.f32 1.442695, %v567_v41  ;;  %v1280_v50 = vpop.f32.mrf.mxu0  ;;  %v615_v51 = vmul.f32 0.5, %v583_v42  ;;  %v1296_v57 = vpop.f32.mrf.mxu1 }
  0xf5   : > { %1358 = vtanh.f32 %v617_v39  ;;  %v570_v52 = vmin.f32 %v1590_v44, 0.0  ;;  %v695_v53 = vmul.f32 1.442695, %v583_v42  ;;  %v586_v54 = vmin.f32 %v1593_v45, 0.0 }
  0xf6   : > { %1360 = vpow2.f32 %v699_v40  ;;  %v568_v56 = vmin.f32 %v1596_v46, 0.0  ;;  %v424_v60 = vpop.f32.mrf.mxu0  ;;  %v1605_v62 = vadd.f32 %v1280_v50, %v1571_v24  ;;  %v584_v0 = vmin.f32 %v1602_v59, 0.0  ;;  %v488_v5 = vpop.f32.mrf.mxu1 }
  0xf7   : > { %1362 = vtanh.f32 %v599_v48  ;;  %v602_v55 = vmul.f32 0.5, %v570_v52  ;;  %v669_v58 = vmul.f32 1.442695, %v570_v52  ;;  %v618_v61 = vmul.f32 0.5, %v586_v54 }
  0xf8   : > { %1364 = vpow2.f32 %v663_v49  ;;  %v701_v63 = vmul.f32 1.442695, %v586_v54  ;;  %v1609_v1 = vadd.f32 %v1296_v57, %v1571_v24  ;;  %v600_v2 = vmul.f32 0.5, %v568_v56  ;;  %v1281_v7 = vpop.f32.mrf.mxu0  ;;  %v1297_v15 = vpop.f32.mrf.mxu1 }
  0xf9   : > { %1366 = vtanh.f32 %v615_v51  ;;  %v573_v3 = vmin.f32 %v1605_v62, 0.0  ;;  %v1613_v4 = vadd.f32 %v1571_v24, %v424_v60  ;;  %v665_v6 = vmul.f32 1.442695, %v568_v56 }
  0xfa   : > { %1368 = vpow2.f32 %v695_v53  ;;  %v616_v8 = vmul.f32 0.5, %v584_v0  ;;  %v589_v9 = vmin.f32 %v1609_v1, 0.0  ;;  %v697_v10 = vmul.f32 1.442695, %v584_v0  ;;  %v427_v21 = vpop.f32.mrf.mxu0  ;;  %v491_v48 = vpop.f32.mrf.mxu1 }
  0xfb   : > { %1370 = vtanh.f32 %v602_v55  ;;  %v1617_v11 = vadd.f32 %v1571_v24, %v488_v5  ;;  %v605_v12 = vmul.f32 0.5, %v573_v3  ;;  %v571_v13 = vmin.f32 %v1613_v4, 0.0 }
  0xfc   : > { %1372 = vpow2.f32 %v669_v58  ;;  %v1621_v14 = vadd.f32 %v1281_v7, %v1571_v24  ;;  %v675_v17 = vmul.f32 1.442695, %v573_v3  ;;  %v621_v19 = vmul.f32 0.5, %v589_v9  ;;  %v1284_v56 = vpop.f32.mrf.mxu0 }
  0xfd   : > { %1374 = vtanh.f32 %v618_v61  ;;  %v587_v20 = vmin.f32 %v1617_v11, 0.0  ;;  %v707_v25 = vmul.f32 1.442695, %v589_v9  ;;  %v1626_v26 = vadd.f32 %v1297_v15, %v1571_v24 }
  0xfe   : > { %1376 = vpow2.f32 %v701_v63  ;;  %v603_v30 = vmul.f32 0.5, %v571_v13  ;;  %v671_v31 = vmul.f32 1.442695, %v571_v13  ;;  %v574_v32 = vmin.f32 %v1621_v14, 0.0 }
  0xff   : > { %1378 = vtanh.f32 %v600_v2  ;;  %v1630_v38 = vadd.f32 %v1571_v24, %v427_v21  ;;  %v619_v40 = vmul.f32 0.5, %v587_v20  ;;  %v590_v41 = vmin.f32 %v1626_v26, 0.0 }
 0x100   : > { %v1355_v16 = vpop.eup %1354  ;;  %1380 = vpow2.f32 %v665_v6  ;;  %vm538_vm2 = vcmp.gt.f32.partialorder %v1590_v44, 0.0  ;;  %v703_v47 = vmul.f32 1.442695, %v587_v20  ;;  %vm554_vm3 = vcmp.gt.f32.partialorder %v1593_v45, 0.0 }
 0x101   : > { %v1357_v18 = vpop.eup %1356  ;;  %1382 = vtanh.f32 %v616_v8  ;;  %v606_v51 = vmul.f32 0.5, %v574_v32  ;;  %v677_v54 = vmul.f32 1.442695, %v574_v32  ;;  %v572_v55 = vmin.f32 %v1630_v38, 0.0 }
 0x102   : > { %v1359_v22 = vpop.eup %1358  ;;  %v729_v23 = vadd.f32 1.0, %v1357_v18  ;;  %1384 = vpow2.f32 %v697_v10  ;;  %vm536_vm5 = vcmp.gt.f32.partialorder %v1596_v46, 0.0  ;;  %v622_v60 = vmul.f32 0.5, %v590_v41 }
 0x103   : > { %v1361_v29 = vpop.eup %1360  ;;  %1386 = vtanh.f32 %v605_v12  ;;  %v1643_v61 = vadd.f32 %v1571_v24, %v491_v48  ;;  %v709_v2 = vmul.f32 1.442695, %v590_v41  ;;  %vm551_vm6 = vcmp.gt.f32.partialorder %v1585_v34, 0.0  ;;  %v1300_v12 = vpop.f32.mrf.mxu1 }
 0x104   : > { %v1363_v35 = vpop.eup %1362  ;;  %v761_v36 = vmul.f32 %v1355_v16, %v729_v23  ;;  %v745_v37 = vadd.f32 1.0, %v1361_v29  ;;  %1388 = vpow2.f32 %v675_v17  ;;  %vm552_vm7 = vcmp.gt.f32.partialorder %v1602_v59, 0.0 }
 0x105   : > { %v1365_v39 = vpop.eup %1364  ;;  %1390 = vtanh.f32 %v621_v19  ;;  %v588_v6 = vmin.f32 %v1643_v61, 0.0  ;;  %v1652_v7 = vadd.f32 %v1284_v56, %v1571_v24  ;;  %v604_v16 = vmul.f32 0.5, %v572_v55 }
 0x106   : > { %v1367_v42 = vpop.eup %1366  ;;  %v777_v43 = vmul.f32 %v1359_v22, %v745_v37  ;;  %1392 = vpow2.f32 %v707_v25  ;;  %v727_v50 = vadd.f32 1.0, %v1365_v39  ;;  %v793_v53 = vsel %vm537_vm0, %v1574_v27, %v761_v36  ;;  %v440_v36 = vpop.f32.mrf.mxu0 }
 0x107   : > { %v1369_v49 = vpop.eup %1368  ;;  %1394 = vtanh.f32 %v603_v30  ;;  %v705_v17 = vmul.f32 1.442695, %v588_v6  ;;  %v620_v25 = vmul.f32 0.5, %v588_v6  ;;  %v577_v29 = vmin.f32 %v1652_v7, 0.0 }
 0x108   : > { %v1371_v52 = vpop.eup %1370  ;;  %1396 = vpow2.f32 %v671_v31  ;;  %v743_v58 = vadd.f32 1.0, %v1369_v49  ;;  %v809_v27 = vsel %vm553_vm1, %v1577_v28, %v777_v43  ;;  %v759_v5 = vmul.f32 %v1363_v35, %v727_v50  ;;  %v504_v50 = vpop.f32.mrf.mxu1 }
 0x109   : > { %v1373_v57 = vpop.eup %1372  ;;  %1398 = vtanh.f32 %v619_v40  ;;  %v673_v28 = vmul.f32 1.442695, %v572_v55  ;;  %v1666_v30 = vadd.f32 %v1300_v12, %v1571_v24  ;;  %v683_v41 = vmul.f32 1.442695, %v577_v29 }
 0x10a   : > { %v1375_v63 = vpop.eup %1374  ;;  %v730_v0 = vadd.f32 1.0, %v1373_v57  ;;  %1400 = vpow2.f32 %v703_v47  ;;  %v775_v15 = vmul.f32 %v1367_v42, %v743_v58  ;;  %v791_v39 = vsel %vm535_vm4, %v1582_v33, %v759_v5 }
 0x10b   : > { %v1377_v3 = vpop.eup %1376  ;;  %1402 = vtanh.f32 %v606_v51  ;;  %vm541_vm8 = vcmp.gt.f32.partialorder %v1605_v62, 0.0  ;;  %vm557_vm9 = vcmp.gt.f32.partialorder %v1609_v1, 0.0  ;;  %v593_v33 = vmin.f32 %v1666_v30, 0.0 }
 0x10c   : > { %v1379_v8 = vpop.eup %1378  ;;  %v762_v9 = vmul.f32 %v1371_v52, %v730_v0  ;;  %v746_v10 = vadd.f32 1.0, %v1377_v3  ;;  %1404 = vpow2.f32 %v677_v54  ;;  %v807_v52 = vsel %vm551_vm6, %v1585_v34, %v775_v15  ;;  %v1285_v54 = vpop.f32.mrf.mxu0 }
 0x10d   : > { %v1381_v13 = vpop.eup %1380  ;;  %1406 = vtanh.f32 %v622_v60  ;;  %v609_v57 = vmul.f32 0.5, %v577_v29  ;;  %v715_v58 = vmul.f32 1.442695, %v593_v33  ;;  %v1690_v60 = vadd.f32 %v1571_v24, %v440_v36 }
 0x10e   : > { %v1383_v18 = vpop.eup %1382  ;;  %v794_v19 = vsel %vm538_vm2, %v1590_v44, %v762_v9  ;;  %v778_v20 = vmul.f32 %v1375_v63, %v746_v10  ;;  %v728_v21 = vadd.f32 1.0, %v1381_v13  ;;  %1408 = vpow2.f32 %v709_v2  ;;  %v443_v36 = vpop.f32.mrf.mxu0 }
 0x10f   : > { %v1385_v22 = vpop.eup %1384  ;;  %v1147_v23 = vpack.c.bf16 %v794_v19, %v793_v53  ;;  %1410 = vpow2.f32 %v673_v28  ;;  %v1693_v34 = vadd.f32 %v1571_v24, %v504_v50  ;;  %vm539_vm10 = vcmp.gt.f32.partialorder %v1613_v4, 0.0 }
 0x110   : > { %v1387_v31 = vpop.eup %1386  ;;  %v810_v32 = vsel %vm554_vm3, %v1593_v45, %v778_v20  ;;  %v760_v35 = vmul.f32 %v1379_v8, %v728_v21  ;;  %v744_v44 = vadd.f32 1.0, %v1385_v22  ;;  %1412 = vtanh.f32 %v604_v16 }
 0x111   : > { %v1389_v37 = vpop.eup %1388  ;;  %1219 = vst [vmem:[%s1659_s13 + $0x8] sm:$0xff] %v1147_v23   ;;  %v1187_v40 = vpack.c.bf16 %v810_v32, %v809_v27  ;;  %1414 = vpow2.f32 %v705_v17  ;;  %v625_v2 = vmul.f32 0.5, %v593_v33  ;;  %v575_v3 = vmin.f32 %v1690_v60, 0.0 }
 0x112   : > { %v1391_v42 = vpop.eup %1390  ;;  %v792_v43 = vsel %vm536_vm5, %v1596_v46, %v760_v35  ;;  %v776_v45 = vmul.f32 %v1383_v18, %v744_v44  ;;  %v733_v47 = vadd.f32 1.0, %v1389_v37  ;;  %1416 = vtanh.f32 %v620_v25  ;;  %v1301_v18 = vpop.f32.mrf.mxu1 }
 0x113   : > { %v1393_v48 = vpop.eup %1392  ;;  %1227 = vst [vmem:[%s1659_s13 + $0x48] sm:$0xff] %v1187_v40   ;;  %v1142_v49 = vpack.c.bf16 %v792_v43, %v791_v39  ;;  %1418 = vpow2.f32 %v683_v41  ;;  %v1699_v5 = vadd.f32 %v1285_v54, %v1571_v24  ;;  %vm542_vm11 = vcmp.gt.f32.partialorder %v1621_v14, 0.0 }
 0x114   : > { %v1395_v51 = vpop.eup %1394  ;;  %v808_v46 = vsel %vm552_vm7, %v1602_v59, %v776_v45  ;;  %v749_v53 = vadd.f32 1.0, %v1393_v48  ;;  %v765_v27 = vmul.f32 %v1387_v31, %v733_v47  ;;  %vm558_vm12 = vcmp.gt.f32.partialorder %v1626_v26, 0.0  ;;  %v507_v45 = vpop.f32.mrf.mxu1 }
 0x115   : > { %v1397_v55 = vpop.eup %1396  ;;  %1143 = vst [vmem:[%s1659_s13] sm:$0xff] %v1142_v49   ;;  %v1182_v56 = vpack.c.bf16 %v808_v46, %v807_v52  ;;  %1420 = vpow2.f32 %v715_v58  ;;  %vm540_vm13 = vcmp.gt.f32.partialorder %v1630_v38, 0.0  ;;  %v679_v28 = vmul.f32 1.442695, %v575_v3  ;;  %v1288_v52 = vpop.f32.mrf.mxu0 }
 0x116   : > { %v1399_v63 = vpop.eup %1398  ;;  %v731_v0 = vadd.f32 1.0, %v1397_v55  ;;  %v781_v8 = vmul.f32 %v1391_v42, %v749_v53  ;;  %v591_v12 = vmin.f32 %v1693_v34, 0.0  ;;  %v797_v15 = vsel %vm541_vm8, %v1605_v62, %v765_v27 }
 0x117   : > { %v1401_v59 = vpop.eup %1400  ;;  %1226 = vst [vmem:[%s1659_s13 + $0x40] sm:$0xff] %v1182_v56   ;;  %1422 = vtanh.f32 %v609_v57  ;;  %v607_v17 = vmul.f32 0.5, %v575_v3  ;;  %vm555_vm14 = vcmp.gt.f32.partialorder %v1617_v11, 0.0  ;;  %v578_v22 = vmin.f32 %v1699_v5, 0.0 }
 0x118   : > { %v1403_v6 = vpop.eup %1402  ;;  %v763_v10 = vmul.f32 %v1395_v51, %v731_v0  ;;  %v747_v20 = vadd.f32 1.0, %v1401_v59  ;;  %1424 = vtanh.f32 %v625_v2  ;;  %v711_v21 = vmul.f32 1.442695, %v591_v12 }
 0x119   : > { %v1405_v9 = vpop.eup %1404  ;;  %v813_v23 = vsel %vm557_vm9, %v1609_v1, %v781_v8  ;;  %1426 = vpow2.f32 %v679_v28  ;;  %v610_v32 = vmul.f32 0.5, %v578_v22  ;;  %v685_v35 = vmul.f32 1.442695, %v578_v22  ;;  %v456_v8 = vpop.f32.mrf.mxu0 }
 0x11a   : > { %v1407_v13 = vpop.eup %1406  ;;  %v734_v16 = vadd.f32 1.0, %v1405_v9  ;;  %v795_v31 = vsel %vm539_vm10, %v1613_v4, %v763_v10  ;;  %v1717_v44 = vadd.f32 %v1301_v18, %v1571_v24  ;;  %1428 = vtanh.f32 %v607_v17 }
 0x11b   : > { %v1409_v19 = vpop.eup %1408  ;;  %v779_v42 = vmul.f32 %v1399_v63, %v747_v20  ;;  %1430 = vpow2.f32 %v711_v21  ;;  %v1728_v51 = vadd.f32 %v1571_v24, %v443_v36  ;;  %v1734_v54 = vadd.f32 %v1571_v24, %v507_v45  ;;  %v1304_v63 = vpop.f32.mrf.mxu1 }
 0x11c   : > { %v766_v25 = vmul.f32 %v1403_v6, %v734_v16  ;;  %v750_v29 = vadd.f32 1.0, %v1409_v19  ;;  %v1411_v62 = vpop.eup %1410  ;;  %v594_v4 = vmin.f32 %v1717_v44, 0.0  ;;  %1432 = vpow2.f32 %v685_v35  ;;  %v1289_v22 = vpop.f32.mrf.mxu0 }
 0x11d   : > { %v1413_v37 = vpop.eup %1412  ;;  %v732_v40 = vadd.f32 1.0, %v1411_v62  ;;  %1434 = vtanh.f32 %v610_v32  ;;  %vm556_vm15 = vcmp.gt.f32.partialorder %v1643_v61, 0.0  ;;  %v623_v57 = vmul.f32 0.5, %v591_v12  ;;  %v520_v19 = vpop.f32.mrf.mxu1 }
 0x11e   : > { %v798_v1 = vsel %vm542_vm11, %v1621_v14, %v766_v25  ;;  %v782_v39 = vmul.f32 %v1407_v13, %v750_v29  ;;  %v1415_v41 = vpop.eup %1414  ;;  %v717_v50 = vmul.f32 1.442695, %v594_v4  ;;  %v576_v58 = vmin.f32 %v1728_v51, 0.0 }
 0x11f   : > { %v1157_v43 = vpack.c.bf16 %v798_v1, %v797_v15  ;;  %v764_v48 = vmul.f32 %v1413_v37, %v732_v40  ;;  %v748_v49 = vadd.f32 1.0, %v1415_v41  ;;  %v1417_v33 = vpop.eup %1416  ;;  %v811_v27 = vsel %vm555_vm14, %v1617_v11, %v779_v42 }
 0x120   : > { %v814_v47 = vsel %vm558_vm12, %v1626_v26, %v782_v39  ;;  %v626_v26 = vmul.f32 0.5, %v594_v4  ;;  %v1419_v55 = vpop.eup %1418  ;;  %1436 = vpow2.f32 %v717_v50  ;;  %v608_v2 = vmul.f32 0.5, %v576_v58  ;;  %v1305_v39 = vpop.f32.mrf.mxu1 }
 0x121   : > { %1221 = vst [vmem:[%s1659_s13 + $0x18] sm:$0xff] %v1157_v43   ;;  %v1197_v14 = vpack.c.bf16 %v814_v47, %v813_v23  ;;  %v796_v46 = vsel %vm540_vm13, %v1630_v38, %v764_v48  ;;  %v780_v53 = vmul.f32 %v1417_v33, %v748_v49  ;;  %v681_v3 = vmul.f32 1.442695, %v576_v58 }
 0x122   : > { %v1152_v56 = vpack.c.bf16 %v796_v46, %v795_v31  ;;  %v1421_v0 = vpop.eup %1420  ;;  %v592_v6 = vmin.f32 %v1734_v54, 0.0  ;;  %v737_v9 = vadd.f32 1.0, %v1419_v55  ;;  %1438 = vtanh.f32 %v626_v26 }
 0x123   : > { %1229 = vst [vmem:[%s1659_s13 + $0x58] sm:$0xff] %v1197_v14   ;;  %v812_v38 = vsel %vm556_vm15, %v1643_v61, %v780_v53  ;;  %v1746_v10 = vadd.f32 %v1288_v52, %v1571_v24  ;;  %v1749_v28 = vadd.f32 %v1304_v63, %v1571_v24  ;;  %v753_v61 = vadd.f32 1.0, %v1421_v0  ;;  %v523_v53 = vpop.f32.mrf.mxu1 }
 0x124   : > { %1220 = vst [vmem:[%s1659_s13 + $0x10] sm:$0xff] %v1152_v56   ;;  %v1192_v59 = vpack.c.bf16 %v812_v38, %v811_v27  ;;  %v1423_v11 = vpop.eup %1422  ;;  %1440 = vtanh.f32 %v623_v57  ;;  %v713_v12 = vmul.f32 1.442695, %v592_v6  ;;  %v624_v15 = vmul.f32 0.5, %v592_v6 }
 0x125   : > { %v1425_v13 = vpop.eup %1424  ;;  %1442 = vpow2.f32 %v681_v3  ;;  %v581_v16 = vmin.f32 %v1746_v10, 0.0  ;;  %v1754_v17 = vadd.f32 %v1571_v24, %v456_v8  ;;  %v769_v20 = vmul.f32 %v1423_v11, %v737_v9 }
 0x126   : > { %1228 = vst [vmem:[%s1659_s13 + $0x50] sm:$0xff] %v1192_v59   ;;  %v1427_v18 = vpop.eup %1426  ;;  %1444 = vtanh.f32 %v608_v2  ;;  %v597_v21 = vmin.f32 %v1749_v28, 0.0  ;;  %vm545_vm0 = vcmp.gt.f32.partialorder %v1652_v7, 0.0  ;;  %v785_v25 = vmul.f32 %v1425_v13, %v753_v61 }
 0x127   : > { %1446 = vpow2.f32 %v713_v12  ;;  %v1429_v23 = vpop.eup %1428  ;;  %v735_v29 = vadd.f32 1.0, %v1427_v18  ;;  %v691_v31 = vmul.f32 1.442695, %v581_v16  ;;  %v579_v32 = vmin.f32 %v1754_v17, 0.0 }
 0x128   : > { %v1431_v62 = vpop.eup %1430  ;;  %1448 = vtanh.f32 %v624_v15  ;;  %v1760_v35 = vadd.f32 %v1571_v24, %v520_v19  ;;  %vm561_vm1 = vcmp.gt.f32.partialorder %v1666_v30, 0.0  ;;  %vm546_vm2 = vcmp.gt.f32.partialorder %v1699_v5, 0.0 }
 0x129   : > { %v1433_v36 = vpop.eup %1432  ;;  %v613_v37 = vmul.f32 0.5, %v581_v16  ;;  %v1765_v1 = vadd.f32 %v1289_v22, %v1571_v24  ;;  %v801_v41 = vsel %vm545_vm0, %v1652_v7, %v769_v20  ;;  %vm562_vm3 = vcmp.gt.f32.partialorder %v1717_v44, 0.0 }
 0x12a   : > { %v1435_v40 = vpop.eup %1434  ;;  %v738_v42 = vadd.f32 1.0, %v1433_v36  ;;  %v723_v43 = vmul.f32 1.442695, %v597_v21  ;;  %v817_v4 = vsel %vm561_vm1, %v1666_v30, %v785_v25  ;;  %v767_v45 = vmul.f32 %v1429_v23, %v735_v29  ;;  %v459_v30 = vpop.f32.mrf.mxu0 }
 0x12b   : > { %v629_v47 = vmul.f32 0.5, %v597_v21  ;;  %v595_v48 = vmin.f32 %v1760_v35, 0.0  ;;  %vm543_vm4 = vcmp.gt.f32.partialorder %v1690_v60, 0.0  ;;  %1450 = vpow2.f32 %v691_v31 }
 0x12c   : > { %v770_v49 = vmul.f32 %v1435_v40, %v738_v42  ;;  %v687_v33 = vmul.f32 1.442695, %v579_v32  ;;  %v582_v14 = vmin.f32 %v1765_v1, 0.0  ;;  %v751_v52 = vadd.f32 1.0, %v1431_v62 }
 0x12d   : > { %v1437_v50 = vpop.eup %1436  ;;  %vm544_vm5 = vcmp.gt.f32.partialorder %v1728_v51, 0.0  ;;  %1452 = vtanh.f32 %v613_v37  ;;  %v719_v7 = vmul.f32 1.442695, %v595_v48  ;;  %v1775_v46 = vadd.f32 %v1305_v39, %v1571_v24 }
 0x12e   : > { %v802_v26 = vsel %vm546_vm2, %v1699_v5, %v770_v49  ;;  %v754_v55 = vadd.f32 1.0, %v1437_v50  ;;  %1454 = vpow2.f32 %v723_v43  ;;  %v693_v56 = vmul.f32 1.442695, %v582_v14 }
 0x12f   : > { %v1439_v57 = vpop.eup %1438  ;;  %v1167_v58 = vpack.c.bf16 %v802_v26, %v801_v41  ;;  %1456 = vtanh.f32 %v629_v47  ;;  %v614_v63 = vmul.f32 0.5, %v582_v14  ;;  %v598_v27 = vmin.f32 %v1775_v46, 0.0 }
 0x130   : > { %v786_v0 = vmul.f32 %v1439_v57, %v754_v55  ;;  %1458 = vpow2.f32 %v687_v33  ;;  %v1782_v59 = vadd.f32 %v1571_v24, %v459_v30  ;;  %v1785_v2 = vadd.f32 %v1571_v24, %v523_v53 }
 0x131   : > { %v1441_v38 = vpop.eup %1440  ;;  %1223 = vst [vmem:[%s1659_s13 + $0x28] sm:$0xff] %v1167_v58   ;;  %v611_v6 = vmul.f32 0.5, %v579_v32  ;;  %1460 = vpow2.f32 %v719_v7  ;;  %v725_v8 = vmul.f32 1.442695, %v598_v27  ;;  %v630_v12 = vmul.f32 0.5, %v598_v27 }
 0x132   : > { %v1443_v5 = vpop.eup %1442  ;;  %v783_v3 = vmul.f32 %v1441_v38, %v751_v52  ;;  %v818_v11 = vsel %vm562_vm3, %v1717_v44, %v786_v0  ;;  %1462 = vpow2.f32 %v693_v56  ;;  %v627_v16 = vmul.f32 0.5, %v595_v48 }
 0x133   : > { %v1445_v9 = vpop.eup %1444  ;;  %v736_v61 = vadd.f32 1.0, %v1443_v5  ;;  %v1207_v15 = vpack.c.bf16 %v818_v11, %v817_v4  ;;  %1464 = vtanh.f32 %v614_v63  ;;  %v580_v24 = vmin.f32 %v1782_v59, 0.0 }
 0x134   : > { %v1447_v13 = vpop.eup %1446  ;;  %1466 = vpow2.f32 %v725_v8  ;;  %v596_v20 = vmin.f32 %v1785_v2, 0.0  ;;  %v799_v22 = vsel %vm543_vm4, %v1690_v60, %v767_v45  ;;  %vm559_vm6 = vcmp.gt.f32.partialorder %v1693_v34, 0.0 }
 0x135   : > { %v768_v18 = vmul.f32 %v1445_v9, %v736_v61  ;;  %v752_v19 = vadd.f32 1.0, %v1447_v13  ;;  %v1449_v21 = vpop.eup %1448  ;;  %1231 = vst [vmem:[%s1659_s13 + $0x68] sm:$0xff] %v1207_v15   ;;  %1468 = vtanh.f32 %v611_v6  ;;  %v612_v44 = vmul.f32 0.5, %v580_v24 }
 0x136   : > { %v689_v23 = vmul.f32 1.442695, %v580_v24  ;;  %1470 = vtanh.f32 %v630_v12  ;;  %v721_v62 = vmul.f32 1.442695, %v596_v20  ;;  %vm560_vm7 = vcmp.gt.f32.partialorder %v1734_v54, 0.0 }
 0x137   : > { %v800_v25 = vsel %vm544_vm5, %v1728_v51, %v768_v18  ;;  %v784_v29 = vmul.f32 %v1449_v21, %v752_v19  ;;  %1472 = vtanh.f32 %v627_v16  ;;  %v815_v60 = vsel %vm559_vm6, %v1693_v34, %v783_v3 }
 0x138   : > { %v1162_v31 = vpack.c.bf16 %v800_v25, %v799_v22  ;;  %1474 = vpow2.f32 %v689_v23  ;;  %v628_v36 = vmul.f32 0.5, %v596_v20  ;;  %v1451_v37 = vpop.eup %1450  ;;  %vm549_vm8 = vcmp.gt.f32.partialorder %v1746_v10, 0.0 }
 0x139   : > { %v816_v32 = vsel %vm560_vm7, %v1734_v54, %v784_v29  ;;  %1476 = vtanh.f32 %v612_v44  ;;  %v741_v42 = vadd.f32 1.0, %v1451_v37  ;;  %vm550_vm9 = vcmp.gt.f32.partialorder %v1765_v1, 0.0 }
 0x13a   : > { %1222 = vst [vmem:[%s1659_s13 + $0x20] sm:$0xff] %v1162_v31   ;;  %v1202_v39 = vpack.c.bf16 %v816_v32, %v815_v60  ;;  %v1453_v51 = vpop.eup %1452  ;;  %1478 = vpow2.f32 %v721_v62  ;;  %vm565_vm10 = vcmp.gt.f32.partialorder %v1749_v28, 0.0  ;;  %vm566_vm11 = vcmp.gt.f32.partialorder %v1775_v46, 0.0 }
 0x13b   : > { %v1455_v40 = vpop.eup %1454  ;;  %1480 = vtanh.f32 %v628_v36  ;;  %v773_v48 = vmul.f32 %v1453_v51, %v741_v42  ;;  %vm547_vm12 = vcmp.gt.f32.partialorder %v1754_v17, 0.0  ;;  %vm548_vm13 = vcmp.gt.f32.partialorder %v1782_v59, 0.0 }
 0x13c   : > { %1230 = vst [vmem:[%s1659_s13 + $0x60] sm:$0xff] %v1202_v39   ;;  %v1457_v41 = vpop.eup %1456  ;;  %v757_v45 = vadd.f32 1.0, %v1455_v40  ;;  %vm563_vm14 = vcmp.gt.f32.partialorder %v1760_v35, 0.0  ;;  %vm564_vm15 = vcmp.gt.f32.partialorder %v1785_v2, 0.0 }
 0x13d   : > { %v1459_v43 = vpop.eup %1458  ;;  %v805_v26 = vsel %vm549_vm8, %v1746_v10, %v773_v48 }
 0x13e   : > { %v1461_v4 = vpop.eup %1460  ;;  %v789_v14 = vmul.f32 %v1457_v41, %v757_v45  ;;  %v739_v50 = vadd.f32 1.0, %v1459_v43 }
 0x13f   : > { %v1463_v47 = vpop.eup %1462  ;;  %v755_v55 = vadd.f32 1.0, %v1461_v4 }
 0x140   : > { %v1465_v34 = vpop.eup %1464  ;;  %v742_v54 = vadd.f32 1.0, %v1463_v47  ;;  %v821_v38 = vsel %vm565_vm10, %v1749_v28, %v789_v14 }
 0x141   : > { %v1467_v49 = vpop.eup %1466 }
 0x142   : > { %v1469_v33 = vpop.eup %1468  ;;  %v774_v52 = vmul.f32 %v1465_v34, %v742_v54  ;;  %v758_v7 = vadd.f32 1.0, %v1467_v49 }
 0x143   : > { %v1471_v30 = vpop.eup %1470  ;;  %v771_v0 = vmul.f32 %v1469_v33, %v739_v50 }
 0x144   : > { %v1473_v53 = vpop.eup %1472  ;;  %v806_v56 = vsel %vm550_vm9, %v1765_v1, %v774_v52  ;;  %v790_v57 = vmul.f32 %v1471_v30, %v758_v7 }
 0x145   : > { %v1475_v58 = vpop.eup %1474  ;;  %v1177_v63 = vpack.c.bf16 %v806_v56, %v805_v26  ;;  %v787_v1 = vmul.f32 %v1473_v53, %v755_v55  ;;  %v803_v28 = vsel %vm547_vm12, %v1754_v17, %v771_v0 }
 0x146   : > { %v1477_v27 = vpop.eup %1476  ;;  %v822_v5 = vsel %vm566_vm11, %v1775_v46, %v790_v57  ;;  %v740_v3 = vadd.f32 1.0, %v1475_v58 }
 0x147   : > { %v1479_v6 = vpop.eup %1478  ;;  %1225 = vst [vmem:[%s1659_s13 + $0x38] sm:$0xff] %v1177_v63   ;;  %v1217_v10 = vpack.c.bf16 %v822_v5, %v821_v38  ;;  %v819_v13 = vsel %vm563_vm14, %v1760_v35, %v787_v1 }
 0x148   : > { %v772_v8 = vmul.f32 %v1477_v27, %v740_v3  ;;  %v756_v9 = vadd.f32 1.0, %v1479_v6  ;;  %v1481_v11 = vpop.eup %1480 }
 0x149   : > { %1233 = vst [vmem:[%s1659_s13 + $0x78] sm:$0xff] %v1217_v10  }
 0x14a   : > { %v804_v61 = vsel %vm548_vm13, %v1782_v59, %v772_v8  ;;  %v788_v46 = vmul.f32 %v1481_v11, %v756_v9 }
 0x14b   : > { %v1172_v12 = vpack.c.bf16 %v804_v61, %v803_v28 }
 0x14c   : > { %v820_v15 = vsel %vm564_vm15, %v1785_v2, %v788_v46 }
 0x14d   : > { %1224 = vst [vmem:[%s1659_s13 + $0x30] sm:$0xff] %v1172_v12   ;;  %v1212_v16 = vpack.c.bf16 %v820_v15, %v819_v13 }
 0x14f   : > { %1232 = vst [vmem:[%s1659_s13 + $0x70] sm:$0xff] %v1212_v16  }
 0x150 PF: > { %s13_s12 = sadd.s32 1, %s1488_s12  }
 0x151   : > { %p10_p4 = scmp.ge.s32.totalorder %s13_s12, 26  }
 0x153   :  { %12 = sbr.rel (!%p10_p4) target bundleno = 1 (0x1), region = 62 }

// kernel: _lambda_.7
= control target key start
LH: loop header
LB: loop body
LE: loop exit
PB: predicated region body
PF: predicated region fallthrough
CT: control target
= control target key end

     0   :  { %s2924_s12 = smov 0   ;;  %s3818_s0 = inlined_call_operand.vmem [shape: bf16[1536,640], index: 0, kind: input, shape index: {}]   ;;  %s3819_s1 = inlined_call_operand.vmem [shape: bf16[640,128], index: 1, kind: input, shape index: {}]   ;;  %s3820_s2 = inlined_call_operand.vmem [shape: f32[1,128], index: 2, kind: input, shape index: {}]   ;;  %s3821_s3 = inlined_call_operand.vmem [shape: bf16[1536,128], index: 3, kind: output, shape index: {}]  }
   0x1 LB: > { %s2004_s13 = sadd.s32 4294967295, %s2902_s12   ;;  %p2008_p0 = scmp.ge.s32.totalorder %s2902_s12, 1  ;;  %s2902_s12 = sphi %s2924_s12, %s13_s12  }
   0x2   : > { %p139_p1 = scmp.lt.s32.totalorder %s2902_s12, 7 }
   0x4   : > { %p140_p2 = pnand %p2008_p0, %p139_p1 }
   0x6   : > { %143 = sbr.rel (%p140_p2) target bundleno = 445 (0x1bd), region = 32 }
   0xb   : > { %v2616_v0 = vld [vmem:[%s3819_s1 + $0x78] sm:$0xff]   ;;  %s2009_s16 = sshll.u32 %s2004_s13, 5  ;;  %v2618_v2 = vld [vmem:[%s3819_s1 + $0x70] sm:$0xff]   ;;  %v2620_v4 = vld [vmem:[%s3819_s1 + $0x68] sm:$0xff]  }
   0xc   : > { %v2617_v1 = vld [vmem:[%s3819_s1 + $0x38] sm:$0xff]   ;;  %2295 = vmatprep.subr.bf16.mxu0 %v2616_v0  ;;  %2591 = vmatprep.subr.bf16.mxu1 %v2616_v0  ;;  %p165_p3 = scmp.lt.s32.totalorder %s2009_s16, 191  ;;  %v2619_v3 = vld [vmem:[%s3819_s1 + $0x30] sm:$0xff]   ;;  %v2621_v5 = vld [vmem:[%s3819_s1 + $0x28] sm:$0xff]  }
   0xd   : > { %2296 = vmatpush3.bf16.msra.mxu0 %v2617_v1  ;;  %2599 = vmatpush3.bf16.msra.mxu1 %v2617_v1  ;;  %v2622_v6 = vld [vmem:[%s3819_s1 + $0x60] sm:$0xff]   ;;  %v2624_v8 = vld [vmem:[%s3819_s1 + $0x58] sm:$0xff]   ;;  %v2626_v10 = vld [vmem:[%s3819_s1 + $0x50] sm:$0xff]  }
   0xe   : > { %2297 = vmatprep.subr.bf16.mxu0 %v2618_v2  ;;  %2592 = vmatprep.subr.bf16.mxu1 %v2618_v2  ;;  %s3843_s16 = smov (!%p165_p3, %s2009_s16), 191  ;;  %v2623_v7 = vld [vmem:[%s3819_s1 + $0x20] sm:$0xff]   ;;  %v2625_v9 = vld [vmem:[%s3819_s1 + $0x18] sm:$0xff]   ;;  %v2627_v13 = vld [vmem:[%s3819_s1 + $0x10] sm:$0xff]  }
   0xf   : > { %s2607_s29 = smul.u32 20, %s3843_s16  ;;  %v2628_v14 = vld [vmem:[%s3819_s1 + $0x48] sm:$0xff]   ;;  %v2630_v16 = vld [vmem:[%s3819_s1 + $0x40] sm:$0xff]   ;;  %v2638_v18 = vld [vmem:[%s3819_s1 + $0xf8] sm:$0xff]   ;;  %s2012_s27 = sshll.u32 %s3843_s16, 2 }
  0x10   : > { %v2629_v15 = vld [vmem:[%s3819_s1 + $0x8] sm:$0xff]   ;;  %v2631_v17 = vld [vmem:[%s3819_s1] sm:$0xff]   ;;  %v2641_v19 = vld [vmem:[%s3819_s1 + $0x138] sm:$0xff]  }
  0x11   : > { %2298 = vmatpush3.bf16.msra.mxu0 %v2619_v3  ;;  %2600 = vmatpush3.bf16.msra.mxu1 %v2619_v3  ;;  %s2965_s9 = scalar_lea.vmem %s3818_s0, %s2607_s29  ;;  %v2639_v22 = vld [vmem:[%s3819_s1 + $0xb8] sm:$0xff]   ;;  %v2640_v23 = vld [vmem:[%s3819_s1 + $0xf0] sm:$0xff]   ;;  %v2649_v29 = vld [vmem:[%s3819_s1 + $0xe8] sm:$0xff]   ;;  %s3548_s29 = scalar_lea.vmem %s3821_s3, %s2012_s27 }
  0x12   : > { %2299 = vmatprep.subr.bf16.mxu0 %v2620_v4  ;;  %2593 = vmatprep.subr.bf16.mxu1 %v2620_v4  ;;  %v2634_v11 = vld [vmem:[%s2965_s9 + $0x4] ss:$20 sps:$4 sm:$0xff]   ;;  %v2632_v20 = vld [vmem:[%s2965_s9] ss:$20 sps:$4 sm:$0xff]   ;;  %v2647_v28 = vld [vmem:[%s2965_s9 + $0x28] ss:$20 sps:$4 sm:$0xff]  }
  0x13   : > { %v2637_v12 = vld [vmem:[%s2965_s9 + $0x1e4] ss:$20 sps:$4 sm:$0xff]   ;;  %1049 = vmatprep.mubr.bf16.mxu0 %v2634_v11  ;;  %v2635_v21 = vld [vmem:[%s2965_s9 + $0x1e0] ss:$20 sps:$4 sm:$0xff]   ;;  %v2648_v30 = vld [vmem:[%s2965_s9 + $0x208] ss:$20 sps:$4 sm:$0xff]  }
  0x14   : > { %1145 = vmatprep.mubr.bf16.mxu1 %v2637_v12  ;;  %v2643_v24 = vld [vmem:[%s2965_s9 + $0x2c] ss:$20 sps:$4 sm:$0xff]   ;;  %v2660_v26 = vld [vmem:[%s3819_s1 + $0x130] sm:$0xff]   ;;  %v2659_v36 = vld [vmem:[%s3819_s1 + $0xd8] sm:$0xff]  }
  0x15   : > { %2300 = vmatpush3.bf16.msra.mxu0 %v2621_v5  ;;  %2601 = vmatpush3.bf16.msra.mxu1 %v2621_v5  ;;  %v2645_v25 = vld [vmem:[%s2965_s9 + $0x20c] ss:$20 sps:$4 sm:$0xff]   ;;  %v2642_v27 = vld [vmem:[%s3819_s1 + $0xb0] sm:$0xff]   ;;  %v2661_v40 = vld [vmem:[%s3819_s1 + $0x98] sm:$0xff]  }
  0x16   : > { %2301 = vmatprep.subr.bf16.mxu0 %v2622_v6  ;;  %2594 = vmatprep.subr.bf16.mxu1 %v2622_v6  ;;  %v2650_v31 = vld [vmem:[%s3819_s1 + $0xa8] sm:$0xff]   ;;  %v2651_v33 = vld [vmem:[%s3819_s1 + $0xe0] sm:$0xff]   ;;  %v2662_v41 = vld [vmem:[%s3819_s1 + $0xd0] sm:$0xff]  }
  0x17   : > { %v2653_v32 = vld [vmem:[%s2965_s9 + $0x54] ss:$20 sps:$4 sm:$0xff]   ;;  %v2652_v35 = vld [vmem:[%s3819_s1 + $0xa0] sm:$0xff]   ;;  %v2664_v42 = vld [vmem:[%s2965_s9 + $0x7c] ss:$20 sps:$4 sm:$0xff]  }
  0x18   : > { %v2655_v34 = vld [vmem:[%s2965_s9 + $0x234] ss:$20 sps:$4 sm:$0xff]   ;;  %v2657_v37 = vld [vmem:[%s2965_s9 + $0x50] ss:$20 sps:$4 sm:$0xff]   ;;  %v2668_v46 = vld [vmem:[%s2965_s9 + $0x78] ss:$20 sps:$4 sm:$0xff]  }
  0x19   : > { %2302 = vmatpush3.bf16.msra.mxu0 %v2623_v7  ;;  %2602 = vmatpush3.bf16.msra.mxu1 %v2623_v7  ;;  %v2673_v38 = vld [vmem:[%s3819_s1 + $0x128] sm:$0xff]   ;;  %v2658_v39 = vld [vmem:[%s2965_s9 + $0x230] ss:$20 sps:$4 sm:$0xff]   ;;  %v2694_v52 = vld [vmem:[%s3819_s1 + $0x118] sm:$0xff]  }
  0x1a   : > { %2303 = vmatprep.subr.bf16.mxu0 %v2624_v8  ;;  %2595 = vmatprep.subr.bf16.mxu1 %v2624_v8  ;;  %v2666_v43 = vld [vmem:[%s2965_s9 + $0x25c] ss:$20 sps:$4 sm:$0xff]   ;;  %v2687_v45 = vld [vmem:[%s3819_s1 + $0x120] sm:$0xff]   ;;  %v2669_v47 = vld [vmem:[%s2965_s9 + $0x258] ss:$20 sps:$4 sm:$0xff]  }
  0x1b   : > { %v2663_v44 = vld [vmem:[%s3819_s1 + $0x90] sm:$0xff]   ;;  %v2670_v48 = vld [vmem:[%s3819_s1 + $0xc8] sm:$0xff]   ;;  %v2672_v50 = vld [vmem:[%s3819_s1 + $0xc0] sm:$0xff]  }
  0x1c   : > { %v2671_v49 = vld [vmem:[%s3819_s1 + $0x88] sm:$0xff]   ;;  %v2675_v51 = vld [vmem:[%s2965_s9 + $0xa4] ss:$20 sps:$4 sm:$0xff]   ;;  %v2680_v56 = vld [vmem:[%s2965_s9 + $0xa0] ss:$20 sps:$4 sm:$0xff]  }
  0x1d   : > { %2304 = vmatpush3.bf16.msra.mxu0 %v2625_v9  ;;  %2603 = vmatpush3.bf16.msra.mxu1 %v2625_v9  ;;  %v2679_v53 = vld [vmem:[%s2965_s9 + $0xc] ss:$20 sps:$4 sm:$0xff]   ;;  %v2677_v55 = vld [vmem:[%s2965_s9 + $0x8] ss:$20 sps:$4 sm:$0xff]   ;;  %v2707_v57 = vld [vmem:[%s3819_s1 + $0x110] sm:$0xff]  }
  0x1e   : > { %2305 = vmatprep.subr.bf16.mxu0 %v2626_v10  ;;  %2596 = vmatprep.subr.bf16.mxu1 %v2626_v10  ;;  %v2674_v54 = vld [vmem:[%s3819_s1 + $0x80] sm:$0xff]   ;;  %v2683_v59 = vld [vmem:[%s2965_s9 + $0x34] ss:$20 sps:$4 sm:$0xff]   ;;  %v2690_v0 = vld [vmem:[%s2965_s9 + $0x5c] ss:$20 sps:$4 sm:$0xff]  }
  0x1f   : > { %v2681_v58 = vld [vmem:[%s2965_s9 + $0xcc] ss:$20 sps:$4 sm:$0xff]   ;;  %v2685_v61 = vld [vmem:[%s2965_s9 + $0xc8] ss:$20 sps:$4 sm:$0xff]   ;;  %v2686_v62 = vld [vmem:[%s2965_s9 + $0x30] ss:$20 sps:$4 sm:$0xff]  }
  0x20   : > { %v2714_v60 = vld [vmem:[%s3819_s1 + $0x108] sm:$0xff]   ;;  %v2727_v1 = vld [vmem:[%s3819_s1 + $0x100] sm:$0xff]   ;;  %v2695_v4 = vld [vmem:[%s2965_s9 + $0x11c] ss:$20 sps:$4 sm:$0xff]  }
  0x21   : > { %2306 = vmatpush3.bf16.msra.mxu0 %v2627_v13  ;;  %2604 = vmatpush3.bf16.msra.mxu1 %v2627_v13  ;;  %v2688_v63 = vld [vmem:[%s2965_s9 + $0xf4] ss:$20 sps:$4 sm:$0xff]   ;;  %v2692_v2 = vld [vmem:[%s2965_s9 + $0xf0] ss:$20 sps:$4 sm:$0xff]   ;;  %v2693_v3 = vld [vmem:[%s2965_s9 + $0x58] ss:$20 sps:$4 sm:$0xff]  }
  0x22   : > { %2307 = vmatprep.subr.bf16.mxu0 %v2628_v14  ;;  %2597 = vmatprep.subr.bf16.mxu1 %v2628_v14  ;;  %v2697_v5 = vld [vmem:[%s2965_s9 + $0x84] ss:$20 sps:$4 sm:$0xff]   ;;  %v2700_v7 = vld [vmem:[%s2965_s9 + $0x80] ss:$20 sps:$4 sm:$0xff]   ;;  %v2706_v11 = vld [vmem:[%s2965_s9 + $0xa8] ss:$20 sps:$4 sm:$0xff]  }
  0x23   : > { %v2699_v6 = vld [vmem:[%s2965_s9 + $0x118] ss:$20 sps:$4 sm:$0xff]   ;;  %v2705_v10 = vld [vmem:[%s2965_s9 + $0x140] ss:$20 sps:$4 sm:$0xff]   ;;  %v2712_v14 = vld [vmem:[%s2965_s9 + $0x168] ss:$20 sps:$4 sm:$0xff]  }
  0x24   : > { %v2701_v8 = vld [vmem:[%s2965_s9 + $0x144] ss:$20 sps:$4 sm:$0xff]   ;;  %v2703_v9 = vld [vmem:[%s2965_s9 + $0xac] ss:$20 sps:$4 sm:$0xff]   ;;  %v2710_v13 = vld [vmem:[%s2965_s9 + $0xd4] ss:$20 sps:$4 sm:$0xff]  }
  0x25   : > { %2308 = vmatpush3.bf16.msra.mxu0 %v2629_v15  ;;  %2605 = vmatpush3.bf16.msra.mxu1 %v2629_v15  ;;  %v2708_v12 = vld [vmem:[%s2965_s9 + $0x16c] ss:$20 sps:$4 sm:$0xff]   ;;  %v2713_v15 = vld [vmem:[%s2965_s9 + $0xd0] ss:$20 sps:$4 sm:$0xff]  }
  0x26   : > { %2309 = vmatprep.subr.bf16.mxu0 %v2630_v16  ;;  %2598 = vmatprep.subr.bf16.mxu1 %v2630_v16  ;;  %v2715_v16 = vld [vmem:[%s2965_s9 + $0x194] ss:$20 sps:$4 sm:$0xff]  }
  0x29   : > { %2310 = vmatpush3.bf16.msra.mxu0 %v2631_v17  ;;  %2606 = vmatpush3.bf16.msra.mxu1 %v2631_v17  ;;  %v2717_v17 = vld [vmem:[%s2965_s9 + $0xfc] ss:$20 sps:$4 sm:$0xff]  }
  0x2a   : > { %2407 = vmatprep.subr.bf16.mxu1 %v2638_v18  ;;  %2543 = vmatprep.subr.bf16.mxu0 %v2641_v19  ;;  %v2719_v18 = vld [vmem:[%s2965_s9 + $0x190] ss:$20 sps:$4 sm:$0xff]  }
  0x2c   : > { %1050 = vmatmul.mubr.bf16.vlgmr.msra.gmra.mxu0 %v2632_v20  ;;  %1146 = vmatmul.mubr.bf16.vlgmr.msra.gmra.mxu1 %v2635_v21  ;;  %v2721_v20 = vld [vmem:[%s2965_s9 + $0x1bc] ss:$20 sps:$4 sm:$0xff]   ;;  %v2723_v21 = vld [vmem:[%s2965_s9 + $0x124] ss:$20 sps:$4 sm:$0xff]  }
  0x2d   : > { %2408 = vmatpush3.bf16.msra.mxu1 %v2639_v22  ;;  %2544 = vmatpush3.bf16.msra.mxu0 %v2641_v19  ;;  %v2720_v19 = vld [vmem:[%s2965_s9 + $0xf8] ss:$20 sps:$4 sm:$0xff]  }
  0x2e   : > { %2409 = vmatprep.subr.bf16.mxu1 %v2640_v23  ;;  %1057 = vmatprep.mubr.bf16.mxu0 %v2643_v24  ;;  %v2725_v22 = vld [vmem:[%s2965_s9 + $0x1b8] ss:$20 sps:$4 sm:$0xff]   ;;  %v2726_v23 = vld [vmem:[%s2965_s9 + $0x120] ss:$20 sps:$4 sm:$0xff]  }
  0x2f   : > { %1153 = vmatprep.mubr.bf16.mxu1 %v2645_v25  ;;  %2545 = vmatprep.subr.bf16.mxu0 %v2660_v26  ;;  %v2728_v24 = vld [vmem:[%s2965_s9 + $0x14c] ss:$20 sps:$4 sm:$0xff]   ;;  %v2730_v25 = vld [vmem:[%s2965_s9 + $0x10] ss:$20 sps:$4 sm:$0xff]  }
  0x31   : > { %2410 = vmatpush3.bf16.msra.mxu1 %v2642_v27  ;;  %2546 = vmatpush3.bf16.msra.mxu0 %v2660_v26  ;;  %v2731_v26 = vld [vmem:[%s2965_s9 + $0x148] ss:$20 sps:$4 sm:$0xff]   ;;  %v2732_v27 = vld [vmem:[%s2965_s9 + $0x38] ss:$20 sps:$4 sm:$0xff]  }
  0x32   : > { %2411 = vmatprep.subr.bf16.mxu1 %v2649_v29  ;;  %2547 = vmatprep.subr.bf16.mxu0 %v2673_v38  ;;  %v2735_v29 = vld [vmem:[%s2965_s9 + $0x60] ss:$20 sps:$4 sm:$0xff]  }
  0x34   : > { %1058 = vmatmul.mubr.bf16.gmra.mxu0 %v2647_v28  ;;  %1154 = vmatmul.mubr.bf16.gmra.mxu1 %v2648_v30  ;;  %v2733_v28 = vld [vmem:[%s2965_s9 + $0x174] ss:$20 sps:$4 sm:$0xff]   ;;  %v2736_v30 = vld [vmem:[%s2965_s9 + $0x170] ss:$20 sps:$4 sm:$0xff]  }
  0x35   : > { %2412 = vmatpush3.bf16.msra.mxu1 %v2650_v31  ;;  %1065 = vmatprep.mubr.bf16.mxu0 %v2653_v32  ;;  %v2737_v31 = vld [vmem:[%s2965_s9 + $0x88] ss:$20 sps:$4 sm:$0xff]  }
  0x36   : > { %2413 = vmatprep.subr.bf16.mxu1 %v2651_v33  ;;  %1161 = vmatprep.mubr.bf16.mxu1 %v2655_v34  ;;  %v2738_v32 = vld [vmem:[%s2965_s9 + $0x19c] ss:$20 sps:$4 sm:$0xff]   ;;  %v2741_v34 = vld [vmem:[%s2965_s9 + $0x198] ss:$20 sps:$4 sm:$0xff]  }
  0x37   : > { %2548 = vmatpush3.bf16.msra.mxu0 %v2673_v38  ;;  %v2740_v33 = vld [vmem:[%s2965_s9 + $0xb0] ss:$20 sps:$4 sm:$0xff]   ;;  %v2746_v38 = vld [vmem:[%s2965_s9 + $0x1c0] ss:$20 sps:$4 sm:$0xff]  }
  0x38   : > { %2549 = vmatprep.subr.bf16.mxu0 %v2687_v45 }
  0x39   : > { %2414 = vmatpush3.bf16.msra.mxu1 %v2652_v35  ;;  %v2742_v35 = vld [vmem:[%s2965_s9 + $0xd8] ss:$20 sps:$4 sm:$0xff]  }
  0x3a   : > { %2415 = vmatprep.subr.bf16.mxu1 %v2659_v36  ;;  %v2743_v36 = vld [vmem:[%s2965_s9 + $0x1c4] ss:$20 sps:$4 sm:$0xff]  }
  0x3b   : > { %2550 = vmatpush3.bf16.msra.mxu0 %v2687_v45  ;;  %v2755_v45 = vld [vmem:[%s2965_s9 + $0x1a0] ss:$20 sps:$4 sm:$0xff]  }
  0x3c   : > { %1066 = vmatmul.mubr.bf16.gmra.mxu0 %v2657_v37  ;;  %1162 = vmatmul.mubr.bf16.gmra.mxu1 %v2658_v39  ;;  %v2745_v37 = vld [vmem:[%s2965_s9 + $0x100] ss:$20 sps:$4 sm:$0xff]   ;;  %v2747_v39 = vld [vmem:[%s2965_s9 + $0x128] ss:$20 sps:$4 sm:$0xff]  }
  0x3d   : > { %2416 = vmatpush3.bf16.msra.mxu1 %v2661_v40  ;;  %1073 = vmatprep.mubr.bf16.mxu0 %v2664_v42  ;;  %v2748_v40 = vld [vmem:[%s2965_s9 + $0x1ec] ss:$20 sps:$4 sm:$0xff]   ;;  %v2751_v42 = vld [vmem:[%s2965_s9 + $0x1e8] ss:$20 sps:$4 sm:$0xff]  }
  0x3e   : > { %2417 = vmatprep.subr.bf16.mxu1 %v2662_v41  ;;  %1169 = vmatprep.mubr.bf16.mxu1 %v2666_v43  ;;  %v2750_v41 = vld [vmem:[%s2965_s9 + $0x150] ss:$20 sps:$4 sm:$0xff]   ;;  %v2752_v43 = vld [vmem:[%s2965_s9 + $0x178] ss:$20 sps:$4 sm:$0xff]  }
  0x3f   : > { %2551 = vmatprep.subr.bf16.mxu0 %v2694_v52 }
  0x40   : > { %2552 = vmatpush3.bf16.msra.mxu0 %v2694_v52  ;;  %v2763_v52 = vld [vmem:[%s2965_s9 + $0x264] ss:$20 sps:$4 sm:$0xff]  }
  0x41   : > { %2418 = vmatpush3.bf16.msra.mxu1 %v2663_v44  ;;  %2553 = vmatprep.subr.bf16.mxu0 %v2707_v57  ;;  %v2753_v44 = vld [vmem:[%s2965_s9 + $0x214] ss:$20 sps:$4 sm:$0xff]  }
  0x42   : > { %2419 = vmatprep.subr.bf16.mxu1 %v2670_v48  ;;  %v2758_v48 = vld [vmem:[%s2965_s9 + $0x23c] ss:$20 sps:$4 sm:$0xff]  }
  0x44   : > { %1074 = vmatmul.mubr.bf16.gmra.mxu0 %v2668_v46  ;;  %1170 = vmatmul.mubr.bf16.gmra.mxu1 %v2669_v47  ;;  %v2756_v46 = vld [vmem:[%s2965_s9 + $0x210] ss:$20 sps:$4 sm:$0xff]   ;;  %v2757_v47 = vld [vmem:[%s2965_s9 + $0x1c8] ss:$20 sps:$4 sm:$0xff]  }
  0x45   : > { %2420 = vmatpush3.bf16.msra.mxu1 %v2671_v49  ;;  %1081 = vmatprep.mubr.bf16.mxu0 %v2675_v51  ;;  %v2760_v49 = vld [vmem:[%s2965_s9 + $0x1f0] ss:$20 sps:$4 sm:$0xff]   ;;  %v2762_v51 = vld [vmem:[%s2965_s9 + $0x218] ss:$20 sps:$4 sm:$0xff]  }
  0x46   : > { %2421 = vmatprep.subr.bf16.mxu1 %v2672_v50  ;;  %1210 = vmatprep.mubr.bf16.mxu1 %v2679_v53  ;;  %v2761_v50 = vld [vmem:[%s2965_s9 + $0x238] ss:$20 sps:$4 sm:$0xff]   ;;  %v2765_v53 = vld [vmem:[%s2965_s9 + $0x240] ss:$20 sps:$4 sm:$0xff]  }
  0x47   : > { %2554 = vmatpush3.bf16.msra.mxu0 %v2707_v57 }
  0x48   : > { %2555 = vmatprep.subr.bf16.mxu0 %v2714_v60 }
  0x49   : > { %2422 = vmatpush3.bf16.msra.mxu1 %v2674_v54  ;;  %v2766_v54 = vld [vmem:[%s2965_s9 + $0x260] ss:$20 sps:$4 sm:$0xff]  }
  0x4b   : > { %2556 = vmatpush3.bf16.msra.mxu0 %v2714_v60 }
  0x4c   : > { %1082 = vmatmul.mubr.bf16.gmra.mxu0 %v2680_v56  ;;  %1211 = vmatmul.mubr.bf16.vlgmr.msra.gmra.mxu1 %v2677_v55  ;;  %v2767_v55 = vld [vmem:[%s2965_s9 + $0x268] ss:$20 sps:$4 sm:$0xff]  }
  0x4d   : > { %1089 = vmatprep.mubr.bf16.mxu0 %v2681_v58  ;;  %1218 = vmatprep.mubr.bf16.mxu1 %v2683_v59 }
  0x4e   : > { %2557 = vmatprep.subr.bf16.mxu0 %v2727_v1 }
  0x4f   : > { %2558 = vmatpush3.bf16.msra.mxu0 %v2727_v1 }
  0x54   : > { %1090 = vmatmul.mubr.bf16.gmra.mxu0 %v2685_v61  ;;  %1219 = vmatmul.mubr.bf16.gmra.mxu1 %v2686_v62 }
  0x55   : > { %1097 = vmatprep.mubr.bf16.mxu0 %v2688_v63  ;;  %1226 = vmatprep.mubr.bf16.mxu1 %v2690_v0 }
  0x5c   : > { %1098 = vmatmul.mubr.bf16.gmra.mxu0 %v2692_v2  ;;  %1227 = vmatmul.mubr.bf16.gmra.mxu1 %v2693_v3 }
  0x5d   : > { %1105 = vmatprep.mubr.bf16.mxu0 %v2695_v4  ;;  %1234 = vmatprep.mubr.bf16.mxu1 %v2697_v5 }
  0x64   : > { %1106 = vmatmul.mubr.bf16.gmra.mxu0 %v2699_v6  ;;  %1235 = vmatmul.mubr.bf16.gmra.mxu1 %v2700_v7 }
  0x65   : > { %1113 = vmatprep.mubr.bf16.mxu0 %v2701_v8  ;;  %1242 = vmatprep.mubr.bf16.mxu1 %v2703_v9 }
  0x6c   : > { %1114 = vmatmul.mubr.bf16.gmra.mxu0 %v2705_v10  ;;  %1243 = vmatmul.mubr.bf16.gmra.mxu1 %v2706_v11 }
  0x6d   : > { %1121 = vmatprep.mubr.bf16.mxu0 %v2708_v12  ;;  %1250 = vmatprep.mubr.bf16.mxu1 %v2710_v13 }
  0x74   : > { %1122 = vmatmul.mubr.bf16.gmra.mxu0 %v2712_v14  ;;  %1251 = vmatmul.mubr.bf16.gmra.mxu1 %v2713_v15 }
  0x75   : > { %1129 = vmatprep.mubr.bf16.mxu0 %v2715_v16  ;;  %1258 = vmatprep.mubr.bf16.mxu1 %v2717_v17 }
  0x7c   : > { %1130 = vmatmul.mubr.bf16.gmra.mxu0 %v2719_v18  ;;  %1259 = vmatmul.mubr.bf16.gmra.mxu1 %v2720_v19 }
  0x7d   : > { %1137 = vmatprep.mubr.bf16.mxu0 %v2721_v20  ;;  %1266 = vmatprep.mubr.bf16.mxu1 %v2723_v21 }
  0x84   : > { %1138 = vmatmul.mubr.bf16.gmra.mxu0 %v2725_v22  ;;  %1267 = vmatmul.mubr.bf16.gmra.mxu1 %v2726_v23 }
  0x85   : > { %1274 = vmatprep.mubr.bf16.mxu1 %v2728_v24  ;;  %2559 = vmatprep.mubr.bf16.mxu0 %v2730_v25 }
  0x8c   : > { %1275 = vmatmul.mubr.bf16.gmra.mxu1 %v2731_v26  ;;  %2560 = vmatmul.mubr.bf16.vlgmr.msra.gmra.mxu0 %v2732_v27 }
  0x8d   : > { %1282 = vmatprep.mubr.bf16.mxu1 %v2733_v28  ;;  %2563 = vmatprep.mubr.bf16.mxu0 %v2735_v29 }
  0x94   : > { %1283 = vmatmul.mubr.bf16.gmra.mxu1 %v2736_v30  ;;  %2564 = vmatmul.mubr.bf16.gmra.mxu0 %v2737_v31 }
  0x95   : > { %1290 = vmatprep.mubr.bf16.mxu1 %v2738_v32  ;;  %2567 = vmatprep.mubr.bf16.mxu0 %v2740_v33 }
  0x9c   : > { %1291 = vmatmul.mubr.bf16.gmra.mxu1 %v2741_v34  ;;  %2568 = vmatmul.mubr.bf16.gmra.mxu0 %v2742_v35 }
  0x9d   : > { %1298 = vmatprep.mubr.bf16.mxu1 %v2743_v36  ;;  %2571 = vmatprep.mubr.bf16.mxu0 %v2745_v37 }
  0xa4   : > { %1299 = vmatmul.mubr.bf16.gmra.mxu1 %v2746_v38  ;;  %2572 = vmatmul.mubr.bf16.gmra.mxu0 %v2747_v39 }
  0xa5   : > { %1306 = vmatprep.mubr.bf16.mxu1 %v2748_v40  ;;  %2575 = vmatprep.mubr.bf16.mxu0 %v2750_v41 }
  0xac   : > { %1307 = vmatmul.mubr.bf16.gmra.mxu1 %v2751_v42  ;;  %2576 = vmatmul.mubr.bf16.gmra.mxu0 %v2752_v43 }
  0xad   : > { %1314 = vmatprep.mubr.bf16.mxu1 %v2753_v44  ;;  %2579 = vmatprep.mubr.bf16.mxu0 %v2755_v45 }
  0xb4   : > { %1315 = vmatmul.mubr.bf16.gmra.mxu1 %v2756_v46  ;;  %2580 = vmatmul.mubr.bf16.gmra.mxu0 %v2757_v47 }
  0xb5   : > { %1322 = vmatprep.mubr.bf16.mxu1 %v2758_v48  ;;  %2583 = vmatprep.mubr.bf16.mxu0 %v2760_v49 }
  0xbc   : > { %1323 = vmatmul.mubr.bf16.gmra.mxu1 %v2761_v50  ;;  %2584 = vmatmul.mubr.bf16.gmra.mxu0 %v2762_v51 }
  0xbd   : > { %1330 = vmatprep.mubr.bf16.mxu1 %v2763_v52  ;;  %2587 = vmatprep.mubr.bf16.mxu0 %v2765_v53 }
  0xc4   : > { %1331 = vmatmul.mubr.bf16.gmra.mxu1 %v2766_v54  ;;  %2588 = vmatmul.mubr.bf16.gmra.mxu0 %v2767_v55 }
  0xec   : > { %v2311_v56 = vpop.f32.mrf.mxu0  ;;  %v2383_v57 = vpop.f32.mrf.mxu1 }
  0xee   : > { %v2312_v58 = vpop.f32.mrf.mxu0  ;;  %v2384_v59 = vpop.f32.mrf.mxu1 }
  0xef   : > { %v3140_v60 = vadd.f32 %v2312_v58, %v2311_v56  ;;  %v3142_v61 = vadd.f32 %v2384_v59, %v2383_v57 }
  0xf0   : > { %v2314_v62 = vpop.f32.mrf.mxu0  ;;  %v2386_v63 = vpop.f32.mrf.mxu1 }
  0xf2   : > { %v2315_v0 = vpop.f32.mrf.mxu0  ;;  %v2387_v1 = vpop.f32.mrf.mxu1 }
  0xf3   : > { %v3144_v2 = vadd.f32 %v2315_v0, %v2314_v62  ;;  %v3146_v3 = vadd.f32 %v2387_v1, %v2386_v63 }
  0xf4   : > { %v2317_v4 = vpop.f32.mrf.mxu0  ;;  %v2389_v5 = vpop.f32.mrf.mxu1 }
  0xf6   : > { %v2318_v6 = vpop.f32.mrf.mxu0  ;;  %v2390_v7 = vpop.f32.mrf.mxu1 }
  0xf7   : > { %v3148_v8 = vadd.f32 %v2318_v6, %v2317_v4  ;;  %v3150_v9 = vadd.f32 %v2390_v7, %v2389_v5 }
  0xf8   : > { %v2320_v10 = vpop.f32.mrf.mxu0  ;;  %v2392_v11 = vpop.f32.mrf.mxu1 }
  0xfa   : > { %v2321_v12 = vpop.f32.mrf.mxu0  ;;  %v2393_v13 = vpop.f32.mrf.mxu1 }
  0xfb   : > { %v3152_v14 = vadd.f32 %v2321_v12, %v2320_v10  ;;  %v3154_v15 = vadd.f32 %v2393_v13, %v2392_v11 }
  0xfc   : > { %v2323_v16 = vpop.f32.mrf.mxu0  ;;  %v2395_v17 = vpop.f32.mrf.mxu1 }
  0xfe   : > { %v2324_v18 = vpop.f32.mrf.mxu0  ;;  %v2396_v19 = vpop.f32.mrf.mxu1 }
  0xff   : > { %v3156_v20 = vadd.f32 %v2324_v18, %v2323_v16  ;;  %v3158_v21 = vadd.f32 %v2396_v19, %v2395_v17 }
 0x100   : > { %v2326_v22 = vpop.f32.mrf.mxu0  ;;  %v2398_v23 = vpop.f32.mrf.mxu1 }
 0x102   : > { %v2327_v24 = vpop.f32.mrf.mxu0  ;;  %v2399_v25 = vpop.f32.mrf.mxu1 }
 0x103   : > { %v3160_v26 = vadd.f32 %v2327_v24, %v2326_v22  ;;  %v3162_v27 = vadd.f32 %v2399_v25, %v2398_v23 }
 0x104   : > { %v2329_v28 = vpop.f32.mrf.mxu0  ;;  %v2401_v29 = vpop.f32.mrf.mxu1 }
 0x106   : > { %v2330_v30 = vpop.f32.mrf.mxu0  ;;  %v2402_v31 = vpop.f32.mrf.mxu1 }
 0x107   : > { %v3164_v32 = vadd.f32 %v2330_v30, %v2329_v28  ;;  %v3166_v33 = vadd.f32 %v2402_v31, %v2401_v29 }
 0x108   : > { %v2332_v34 = vpop.f32.mrf.mxu0  ;;  %v2404_v35 = vpop.f32.mrf.mxu1 }
 0x10a   : > { %v2333_v36 = vpop.f32.mrf.mxu0  ;;  %v2405_v37 = vpop.f32.mrf.mxu1 }
 0x10b   : > { %v3168_v38 = vadd.f32 %v2333_v36, %v2332_v34  ;;  %v3170_v39 = vadd.f32 %v2405_v37, %v2404_v35 }
 0x10c   : > { %v2335_v40 = vpop.f32.mrf.mxu0  ;;  %v3172_v41 = vpop.f32.mrf.mxu1 }
 0x10e   : > { %v2336_v42 = vpop.f32.mrf.mxu0  ;;  %v3174_v43 = vpop.f32.mrf.mxu1 }
 0x10f   : > { %v3176_v44 = vadd.f32 %v2336_v42, %v2335_v40 }
 0x110   : > { %v2338_v45 = vpop.f32.mrf.mxu0  ;;  %v3178_v46 = vpop.f32.mrf.mxu1 }
 0x112   : > { %v2339_v47 = vpop.f32.mrf.mxu0  ;;  %v3180_v48 = vpop.f32.mrf.mxu1 }
 0x113   : > { %v3182_v49 = vadd.f32 %v2339_v47, %v2338_v45 }
 0x114   : > { %v2341_v50 = vpop.f32.mrf.mxu0  ;;  %v3184_v51 = vpop.f32.mrf.mxu1 }
 0x116   : > { %v2342_v52 = vpop.f32.mrf.mxu0  ;;  %v3186_v53 = vpop.f32.mrf.mxu1 }
 0x117   : > { %v3188_v54 = vadd.f32 %v2342_v52, %v2341_v50 }
 0x118   : > { %v2344_v55 = vpop.f32.mrf.mxu0  ;;  %v3190_v56 = vpop.f32.mrf.mxu1 }
 0x11a   : > { %v2345_v57 = vpop.f32.mrf.mxu0  ;;  %v3192_v58 = vpop.f32.mrf.mxu1 }
 0x11b   : > { %v3194_v59 = vadd.f32 %v2345_v57, %v2344_v55 }
 0x11c   : > { %v2347_v62 = vpop.f32.mrf.mxu0  ;;  %v3196_v63 = vpop.f32.mrf.mxu1 }
 0x11e   : > { %v2348_v0 = vpop.f32.mrf.mxu0  ;;  %v3198_v1 = vpop.f32.mrf.mxu1 }
 0x11f   : > { %v3200_v4 = vadd.f32 %v2348_v0, %v2347_v62 }
 0x120   : > { %v2350_v5 = vpop.f32.mrf.mxu0  ;;  %v3202_v6 = vpop.f32.mrf.mxu1 }
 0x122   : > { %v2351_v7 = vpop.f32.mrf.mxu0  ;;  %v3204_v10 = vpop.f32.mrf.mxu1 }
 0x123   : > { %v3206_v11 = vadd.f32 %v2351_v7, %v2350_v5 }
 0x124   : > { %v2353_v12 = vpop.f32.mrf.mxu0  ;;  %v3208_v13 = vpop.f32.mrf.mxu1 }
 0x126   : > { %v2354_v16 = vpop.f32.mrf.mxu0  ;;  %v3210_v17 = vpop.f32.mrf.mxu1 }
 0x127   : > { %v3212_v18 = vadd.f32 %v2354_v16, %v2353_v12 }
 0x128   : > { %v3214_v19 = vpop.f32.mrf.mxu0  ;;  %v3216_v22 = vpop.f32.mrf.mxu1 }
 0x12a   : > { %v3218_v23 = vpop.f32.mrf.mxu0  ;;  %v3220_v24 = vpop.f32.mrf.mxu1 }
 0x12c   : > { %v2359_v25 = vpop.f32.mrf.mxu0  ;;  %v3222_v28 = vpop.f32.mrf.mxu1 }
 0x12e   : > { %v2360_v29 = vpop.f32.mrf.mxu0  ;;  %v3224_v30 = vpop.f32.mrf.mxu1 }
 0x12f   : > { %v3226_v31 = vadd.f32 %v2360_v29, %v2359_v25 }
 0x130   : > { %v2362_v34 = vpop.f32.mrf.mxu0  ;;  %v3228_v35 = vpop.f32.mrf.mxu1 }
 0x131   : > { %3822 = vst [vmem:[#allocation2_spill] sm:$0xff] %v3226_v31 }
 0x132   : > { %v2363_v36 = vpop.f32.mrf.mxu0  ;;  %v3230_v37 = vpop.f32.mrf.mxu1 }
 0x133   : > { %v3232_v40 = vadd.f32 %v2363_v36, %v2362_v34  ;;  %v3261_v34 = vld [vmem:[%s3820_s2] ss:$0 sm:$0xff] }
 0x134   : > { %v3234_v42 = vpop.f32.mrf.mxu0  ;;  %v3236_v45 = vpop.f32.mrf.mxu1 }
 0x135   : > { %3823 = vst [vmem:[#allocation3_spill] sm:$0xff] %v3232_v40 }
 0x136   : > { %v3238_v47 = vpop.f32.mrf.mxu0  ;;  %v3240_v50 = vpop.f32.mrf.mxu1 }
 0x138   : > { %v3242_v52 = vpop.f32.mrf.mxu0  ;;  %v3244_v55 = vpop.f32.mrf.mxu1 }
 0x13a   : > { %v3246_v57 = vpop.f32.mrf.mxu0  ;;  %v3248_v62 = vpop.f32.mrf.mxu1 }
 0x13c   : > { %v2371_v0 = vpop.f32.mrf.mxu0  ;;  %v3250_v5 = vpop.f32.mrf.mxu1 }
 0x13d   : > { %3824 = vst [vmem:[#allocation4_spill] sm:$0xff] %v3250_v5  ;;  %v1052_v5 = vadd.f32 %v3140_v60, %v3261_v34  ;;  %v3287_v60 = vadd.f32 %v3150_v9, %v3261_v34 }
 0x13e   : > { %v2372_v7 = vpop.f32.mrf.mxu0  ;;  %v3252_v12 = vpop.f32.mrf.mxu1 }
 0x13f   : > { %3825 = vst [vmem:[#allocation5_spill] sm:$0xff] %v3252_v12  ;;  %v3254_v16 = vadd.f32 %v2372_v7, %v2371_v0  ;;  %v3271_v0 = vadd.f32 %v3142_v61, %v3261_v34  ;;  %v1055_v7 = vadd.f32 %v3144_v2, %v3261_v34  ;;  %v3281_v12 = vadd.f32 %v3146_v3, %v3261_v34 }
 0x140   : > { %v2374_v25 = vpop.f32.mrf.mxu0  ;;  %v3256_v29 = vpop.f32.mrf.mxu1  ;;  %v1063_v61 = vadd.f32 %v3152_v14, %v3261_v34  ;;  %v3293_v2 = vadd.f32 %v3154_v15, %v3261_v34  ;;  %v2425_v3 = vadd.f32 %v3174_v43, %v3172_v41  ;;  %v3307_v14 = vadd.f32 %v3158_v21, %v3261_v34 }
 0x141   : > { %3826 = vst [vmem:[#allocation6_spill] sm:$0xff] %v3254_v16  ;;  %3827 = vst [vmem:[#allocation7_spill] sm:$0xff] %v3256_v29  ;;  %v1071_v15 = vadd.f32 %v3160_v26, %v3261_v34  ;;  %v2434_v41 = vadd.f32 %v3192_v58, %v3190_v56  ;;  %v3317_v43 = vadd.f32 %v3162_v27, %v3261_v34 }
 0x142   : > { %v2375_v36 = vpop.f32.mrf.mxu0  ;;  %v3263_v40 = vpop.f32.mrf.mxu1  ;;  %3828 = vst [vmem:[#allocation8_spill] sm:$0xff] %v3281_v12  ;;  %3829 = vst [vmem:[#allocation9_spill] sm:$0xff] %v3307_v14  ;;  %v3323_v21 = vadd.f32 %v3166_v33, %v3261_v34  ;;  %v2437_v26 = vadd.f32 %v3198_v1, %v3196_v63  ;;  %v3335_v27 = vadd.f32 %v3170_v39, %v3261_v34 }
 0x143   : > { %v3265_v31 = vadd.f32 %v2375_v36, %v2374_v25  ;;  %v1060_v25 = vadd.f32 %v3148_v8, %v3261_v34  ;;  %v1068_v36 = vadd.f32 %v3156_v20, %v3261_v34  ;;  %v2428_v8 = vadd.f32 %v3180_v48, %v3178_v46  ;;  %3830 = vst [vmem:[#allocation10_spill] sm:$0xff] %v3317_v43 }
 0x144   : > { %v3275_v29 = vpop.f32.mrf.mxu0  ;;  %v3277_v16 = vpop.f32.mrf.mxu1  ;;  %v2431_v20 = vadd.f32 %v3186_v53, %v3184_v51  ;;  %v1076_v46 = vadd.f32 %v3164_v32, %v3261_v34  ;;  %v1079_v53 = vadd.f32 %v3168_v38, %v3261_v34  ;;  %3831 = vst [vmem:[#allocation11_spill] sm:$0xff] %v3335_v27  ;;  %v1084_v32 = vadd.f32 %v3176_v44, %v3261_v34 }
 0x145   : > { %v2440_v33 = vadd.f32 %v3204_v10, %v3202_v6  ;;  %v1087_v56 = vadd.f32 %v3182_v49, %v3261_v34  ;;  %v1092_v58 = vadd.f32 %v3188_v54, %v3261_v34  ;;  %v1213_v38 = vadd.f32 %v2425_v3, %v1052_v5 }
 0x146   : > { %v3301_v12 = vpop.f32.mrf.mxu0  ;;  %v3303_v9 = vpop.f32.mrf.mxu1  ;;  %v1216_v43 = vadd.f32 %v2428_v8, %v1055_v7  ;;  %v1095_v39 = vadd.f32 %v3194_v59, %v3261_v34  ;;  %v1100_v44 = vadd.f32 %v3200_v4, %v3261_v34  ;;  %v1221_v27 = vadd.f32 %v2431_v20, %v1060_v25 }
 0x147   : > { %v1224_v6 = vadd.f32 %v2434_v41, %v1063_v61  ;;  %v2443_v49 = vadd.f32 %v3210_v17, %v3208_v13  ;;  %v2358_v54 = vadd.f32 %v3218_v23, %v3214_v19  ;;  %v2446_v10 = vadd.f32 %v3220_v24, %v3216_v22 }
 0x148   : > { %v3327_v48 = vpop.f32.mrf.mxu0  ;;  %v3329_v51 = vpop.f32.mrf.mxu1  ;;  %v1229_v7 = vadd.f32 %v2437_v26, %v1068_v36  ;;  %v3363_v59 = vadd.f32 %v3206_v11, %v3261_v34  ;;  %v2449_v4 = vadd.f32 %v3224_v30, %v3222_v28  ;;  %v3369_v13 = vadd.f32 %v2440_v33, %v1071_v15  ;;  %v3835_v15 = vld [vmem:[#allocation3_spill] sm:$0xff] }
 0x149   : > { %v3373_v17 = vadd.f32 %v3212_v18, %v3261_v34  ;;  %v2452_v19 = vadd.f32 %v3230_v37, %v3228_v35  ;;  %v2367_v22 = vadd.f32 %v3238_v47, %v3234_v42  ;;  %v2455_v11 = vadd.f32 %v3240_v50, %v3236_v45  ;;  %v3832_v37 = vld [vmem:[#allocation2_spill] sm:$0xff] }
 0x14a   : > { %v3345_v63 = vpop.f32.mrf.mxu0  ;;  %v3347_v1 = vpop.f32.mrf.mxu1  ;;  %v2370_v28 = vadd.f32 %v3246_v57, %v3242_v52  ;;  %v2458_v30 = vadd.f32 %v3248_v62, %v3244_v55  ;;  %v3391_v35 = vadd.f32 %v2358_v54, %v3261_v34  ;;  %v3395_v42 = vadd.f32 %v3832_v37, %v3261_v34  ;;  %v3833_v52 = vld [vmem:[#allocation4_spill] sm:$0xff]  ;;  %v3834_v57 = vld [vmem:[#allocation5_spill] sm:$0xff] }
 0x14b   : > { %v1237_v50 = vadd.f32 %v2443_v49, %v1076_v46  ;;  %v1240_v36 = vadd.f32 %v2446_v10, %v1079_v53  ;;  %v2461_v3 = vadd.f32 %v3834_v57, %v3833_v52  ;;  %v3402_v8 = vadd.f32 %v2449_v4, %v1084_v32 }
 0x14c   : > { %v3359_v14 = vpop.f32.mrf.mxu1  ;;  %v2561_v5 = vpop.f32.mrf.mxu0  ;;  %v3406_v20 = vadd.f32 %v3835_v15, %v3261_v34  ;;  %v3409_v41 = vadd.f32 %v2367_v22, %v3261_v34  ;;  %v3415_v53 = vadd.f32 %v2452_v19, %v1087_v56  ;;  %v3418_v33 = vadd.f32 %v2370_v28, %v3261_v34  ;;  %v3836_v22 = vld [vmem:[#allocation6_spill] sm:$0xff]  ;;  %v3837_v19 = vld [vmem:[#allocation7_spill] sm:$0xff] }
 0x14d   : > { %v3367_v25 = vadd.f32 %v2561_v5, %v1221_v27  ;;  %v1253_v32 = vadd.f32 %v2455_v11, %v1092_v58  ;;  %v3420_v49 = vadd.f32 %v2458_v30, %v1095_v39  ;;  %v3429_v56 = vadd.f32 %v3836_v22, %v3261_v34 }
 0x14e   : > { %v3381_v23 = vpop.f32.mrf.mxu1  ;;  %v1373_v24 = vpop.f32.mrf.mxu0  ;;  %v3435_v58 = vadd.f32 %v2461_v3, %v1100_v44  ;;  %v3439_v39 = vadd.f32 %v3265_v31, %v3261_v34  ;;  %v2379_v37 = vadd.f32 %v3301_v12, %v3275_v29  ;;  %v2467_v44 = vadd.f32 %v3303_v9, %v3277_v16 }
 0x14f   : > { %v1534_v18 = vmin.f32 %v3367_v25, 0.0  ;;  %v3388_v61 = vadd.f32 %v1373_v24, %v1213_v38  ;;  %v2464_v24 = vadd.f32 %v3263_v40, %v3837_v19  ;;  %v2382_v31 = vadd.f32 %v3345_v63, %v3327_v48 }
 0x150   : > { %v3397_v45 = vpop.f32.mrf.mxu1  ;;  %v2562_v47 = vpop.f32.mrf.mxu0  ;;  %v2470_v12 = vadd.f32 %v3347_v1, %v3329_v51  ;;  %v3469_v51 = vadd.f32 %v2379_v37, %v3261_v34  ;;  %vm1502_vm0 = vcmp.gt.f32.partialorder %v3367_v25, 0.0 }
 0x151   : > { %v1632_v55 = vmul.f32 1.442695, %v1534_v18  ;;  %v1532_v62 = vmin.f32 %v3388_v61, 0.0  ;;  %v3411_v26 = vadd.f32 %v2562_v47, %v1224_v6  ;;  %v1566_v54 = vmul.f32 0.5, %v1534_v18 }
 0x152   : > { %v3413_v27 = vpop.f32.mrf.mxu1  ;;  %v1376_v46 = vpop.f32.mrf.mxu0  ;;  %vm1500_vm1 = vcmp.gt.f32.partialorder %v3388_v61, 0.0 }
 0x153   : > { %v1628_v38 = vmul.f32 1.442695, %v1532_v62  ;;  %2768 = vpow2.f32 %v1632_v55  ;;  %v1535_v10 = vmin.f32 %v3411_v26, 0.0  ;;  %v3423_v5 = vadd.f32 %v1376_v46, %v1216_v43 }
 0x154   : > { %v3425_v6 = vpop.f32.mrf.mxu1  ;;  %v2565_v4 = vpop.f32.mrf.mxu0  ;;  %v1564_v43 = vmul.f32 0.5, %v1532_v62  ;;  %v3466_v46 = vadd.f32 %v2464_v24, %v3363_v59  ;;  %v3479_v59 = vadd.f32 %v2382_v31, %v3261_v34  ;;  %v2476_v37 = vadd.f32 %v3413_v27, %v3397_v45 }
 0x155   : > { %v3433_v28 = vadd.f32 %v2565_v4, %v1237_v50  ;;  %2770 = vpow2.f32 %v1628_v38  ;;  %v1634_v11 = vmul.f32 1.442695, %v1535_v10  ;;  %v1567_v47 = vmul.f32 0.5, %v1535_v10 }
 0x156   : > { %v3441_v30 = vpop.f32.mrf.mxu1  ;;  %v1389_v18 = vpop.f32.mrf.mxu0  ;;  %v1533_v40 = vmin.f32 %v3423_v5, 0.0  ;;  %2772 = vtanh.f32 %v1566_v54  ;;  %v3474_v54 = vadd.f32 %v2467_v44, %v3373_v17  ;;  %v2473_v17 = vadd.f32 %v3381_v23, %v3359_v14 }
 0x157   : > { %v1538_v50 = vmin.f32 %v3433_v28, 0.0  ;;  %v3451_v52 = vadd.f32 %v1389_v18, %v1229_v7  ;;  %2774 = vpow2.f32 %v1634_v11  ;;  %vm1503_vm2 = vcmp.gt.f32.partialorder %v3411_v26, 0.0 }
 0x158   : > { %v3453_v57 = vpop.f32.mrf.mxu1  ;;  %v2566_v3 = vpop.f32.mrf.mxu0  ;;  %v1565_v29 = vmul.f32 0.5, %v1533_v40  ;;  %v1630_v55 = vmul.f32 1.442695, %v1533_v40  ;;  %2776 = vtanh.f32 %v1564_v43  ;;  %v3486_v43 = vadd.f32 %v2470_v12, %v3391_v35 }
 0x159   : > { %v1640_v62 = vmul.f32 1.442695, %v1538_v50  ;;  %v1536_v15 = vmin.f32 %v3451_v52, 0.0  ;;  %v3458_v16 = vadd.f32 %v2566_v3, %v1240_v36  ;;  %2778 = vtanh.f32 %v1567_v47 }
 0x15a   : > { %v3460_v9 = vpop.f32.mrf.mxu1  ;;  %v1392_v48 = vpop.f32.mrf.mxu0  ;;  %v1570_v63 = vmul.f32 0.5, %v1538_v50  ;;  %2780 = vpow2.f32 %v1630_v55  ;;  %v3506_v55 = vadd.f32 %v2473_v17, %v3395_v42  ;;  %v3516_v42 = vadd.f32 %v2476_v37, %v3406_v20 }
 0x15b   : > { %v3463_v7 = vadd.f32 %v1392_v48, %v3369_v13  ;;  %v1636_v1 = vmul.f32 1.442695, %v1536_v15  ;;  %2782 = vtanh.f32 %v1565_v29  ;;  %v1568_v10 = vmul.f32 0.5, %v1536_v15 }
 0x15c   : > { %v3471_v38 = vpop.f32.mrf.mxu1  ;;  %v2569_v36 = vpop.f32.mrf.mxu0  ;;  %v1539_v4 = vmin.f32 %v3458_v16, 0.0  ;;  %2784 = vpow2.f32 %v1640_v62  ;;  %vm1501_vm3 = vcmp.gt.f32.partialorder %v3423_v5, 0.0  ;;  %vm1506_vm4 = vcmp.gt.f32.partialorder %v3433_v28, 0.0 }
 0x15d   : > { %v1537_v13 = vmin.f32 %v3463_v7, 0.0  ;;  %v3481_v22 = vadd.f32 %v2569_v36, %v1253_v32  ;;  %2786 = vtanh.f32 %v1570_v63  ;;  %vm1507_vm5 = vcmp.gt.f32.partialorder %v3458_v16, 0.0 }
 0x15e   : > { %v3483_v19 = vpop.f32.mrf.mxu1  ;;  %v1405_v24 = vpop.f32.mrf.mxu0  ;;  %v1571_v11 = vmul.f32 0.5, %v1539_v4  ;;  %v1642_v18 = vmul.f32 1.442695, %v1539_v4  ;;  %2788 = vpow2.f32 %v1636_v1  ;;  %vm1504_vm6 = vcmp.gt.f32.partialorder %v3451_v52, 0.0 }
 0x15f   : > { %v1638_v34 = vmul.f32 1.442695, %v1537_v13  ;;  %v1542_v32 = vmin.f32 %v3481_v22, 0.0  ;;  %2790 = vtanh.f32 %v1568_v10  ;;  %v1569_v35 = vmul.f32 0.5, %v1537_v13 }
 0x160   : > { %v3493_v47 = vpop.f32.mrf.mxu1  ;;  %v2570_v40 = vpop.f32.mrf.mxu0  ;;  %v3496_v44 = vadd.f32 %v1405_v24, %v3402_v8  ;;  %2792 = vpow2.f32 %v1642_v18  ;;  %v2479_v8 = vadd.f32 %v3441_v30, %v3425_v6  ;;  %v3521_v6 = vadd.f32 %v3460_v9, %v3453_v57 }
 0x161   : > { %v2769_v50 = vpop.eup %2768  ;;  %v3499_v14 = vadd.f32 %v2570_v40, %v3420_v49  ;;  %v1648_v45 = vmul.f32 1.442695, %v1542_v32  ;;  %2794 = vtanh.f32 %v1571_v11  ;;  %v1574_v12 = vmul.f32 0.5, %v1542_v32 }
 0x162   : > { %v1694_v23 = vadd.f32 1.0, %v2769_v50  ;;  %v3502_v27 = vpop.f32.mrf.mxu1  ;;  %v1408_v31 = vpop.f32.mrf.mxu0  ;;  %v1540_v29 = vmin.f32 %v3496_v44, 0.0  ;;  %2796 = vpow2.f32 %v1638_v34  ;;  %v3535_v34 = vadd.f32 %v2479_v8, %v3409_v41 }
 0x163   : > { %v2771_v3 = vpop.eup %2770  ;;  %v1543_v49 = vmin.f32 %v3499_v14, 0.0  ;;  %2798 = vtanh.f32 %v1569_v35  ;;  %v3526_v11 = vadd.f32 %v1408_v31, %v3415_v53  ;;  %vm1505_vm7 = vcmp.gt.f32.partialorder %v3463_v7, 0.0 }
 0x164   : > { %v3513_v62 = vpop.f32.mrf.mxu1  ;;  %v2573_v15 = vpop.f32.mrf.mxu0  ;;  %v1692_v63 = vadd.f32 1.0, %v2771_v3  ;;  %v1644_v1 = vmul.f32 1.442695, %v1540_v29  ;;  %2800 = vpow2.f32 %v1648_v45  ;;  %v1572_v35 = vmul.f32 0.5, %v1540_v29 }
 0x165   : > { %v2773_v48 = vpop.eup %2772  ;;  %2802 = vtanh.f32 %v1574_v12  ;;  %v1650_v17 = vmul.f32 1.442695, %v1543_v49  ;;  %v1575_v18 = vmul.f32 0.5, %v1543_v49  ;;  %v3530_v37 = vadd.f32 %v2573_v15, %v3474_v54 }
 0x166   : > { %v2775_v36 = vpop.eup %2774  ;;  %v1726_v10 = vmul.f32 %v2773_v48, %v1694_v23  ;;  %v3523_v30 = vpop.f32.mrf.mxu1  ;;  %2804 = vpow2.f32 %v1644_v1  ;;  %v1541_v53 = vmin.f32 %v3526_v11, 0.0  ;;  %vm1510_vm8 = vcmp.gt.f32.partialorder %v3481_v22, 0.0 }
 0x167   : > { %v1421_v4 = vpop.f32.mrf.mxu0  ;;  %v2777_v13 = vpop.eup %2776  ;;  %v1695_v24 = vadd.f32 1.0, %v2775_v36  ;;  %2806 = vpow2.f32 %v1650_v17  ;;  %v1546_v54 = vmin.f32 %v3530_v37, 0.0  ;;  %vm1508_vm9 = vcmp.gt.f32.partialorder %v3496_v44, 0.0 }
 0x168   : > { %v2779_v20 = vpop.eup %2778  ;;  %v3532_v57 = vpop.f32.mrf.mxu1  ;;  %v1724_v40 = vmul.f32 %v2777_v13, %v1692_v63  ;;  %v1758_v45 = vsel %vm1502_vm0, %v3367_v25, %v1726_v10  ;;  %v1573_v25 = vmul.f32 0.5, %v1541_v53  ;;  %v1646_v8 = vmul.f32 1.442695, %v1541_v53 }
 0x169   : > { %v2574_v9 = vpop.f32.mrf.mxu0  ;;  %v2781_v32 = vpop.eup %2780  ;;  %v1727_v50 = vmul.f32 %v2779_v20, %v1695_v24  ;;  %v3555_v49 = vadd.f32 %v1421_v4, %v3435_v58  ;;  %2808 = vtanh.f32 %v1575_v18  ;;  %v1656_v24 = vmul.f32 1.442695, %v1546_v54 }
 0x16a   : > { %v2783_v23 = vpop.eup %2782  ;;  %v1693_v31 = vadd.f32 1.0, %v2781_v32  ;;  %v3543_v3 = vpop.f32.mrf.mxu1  ;;  %2810 = vtanh.f32 %v1572_v35  ;;  %v1578_v18 = vmul.f32 0.5, %v1546_v54  ;;  %vm1511_vm10 = vcmp.gt.f32.partialorder %v3499_v14, 0.0 }
 0x16b   : > { %v1424_v41 = vpop.f32.mrf.mxu0  ;;  %v2785_v12 = vpop.eup %2784  ;;  %v1759_v29 = vsel %vm1503_vm2, %v3411_v26, %v1727_v50  ;;  %v1756_v26 = vsel %vm1500_vm1, %v3388_v61, %v1724_v40  ;;  %v1544_v58 = vmin.f32 %v3555_v49, 0.0  ;;  %2812 = vpow2.f32 %v1646_v8 }
 0x16c   : > { %v2787_v15 = vpop.eup %2786  ;;  %v2208_v48 = vpack.c.bf16 %v1759_v29, %v1758_v45  ;;  %v1725_v63 = vmul.f32 %v2783_v23, %v1693_v31  ;;  %v1698_v1 = vadd.f32 1.0, %v2785_v12  ;;  %v3557_v36 = vpop.f32.mrf.mxu1  ;;  %2814 = vtanh.f32 %v1573_v25 }
 0x16d   : > { %v2577_v10 = vpop.f32.mrf.mxu0  ;;  %v2789_v13 = vpop.eup %2788  ;;  %v1652_v53 = vmul.f32 1.442695, %v1544_v58  ;;  %2816 = vpow2.f32 %v1656_v24  ;;  %v1576_v29 = vmul.f32 0.5, %v1544_v58  ;;  %v3584_v25 = vadd.f32 %v2574_v9, %v3486_v43 }
 0x16e   : > { %v2791_v4 = vpop.eup %2790  ;;  %2280 = vst [vmem:[%s3548_s29 + $0x8] sm:$0xff] %v2208_v48   ;;  %v1757_v17 = vsel %vm1501_vm3, %v3423_v5, %v1725_v63  ;;  %v1696_v20 = vadd.f32 1.0, %v2789_v13  ;;  %v3568_v32 = vpop.f32.mrf.mxu1  ;;  %v1730_v35 = vmul.f32 %v2787_v15, %v1698_v1  ;;  %v3577_v5 = vadd.f32 %v3521_v6, %v3418_v33 }
 0x16f   : > { %v3570_v50 = vpop.f32.mrf.mxu0  ;;  %v2793_v61 = vpop.eup %2792  ;;  %v2203_v40 = vpack.c.bf16 %v1757_v17, %v1756_v26  ;;  %v3587_v8 = vadd.f32 %v1424_v41, %v3466_v46  ;;  %2818 = vpow2.f32 %v1652_v53  ;;  %v1547_v43 = vmin.f32 %v3584_v25, 0.0 }
 0x170   : > { %v2795_v23 = vpop.eup %2794  ;;  %v1699_v45 = vadd.f32 1.0, %v2793_v61  ;;  %v3573_v31 = vpop.f32.mrf.mxu1  ;;  %v1728_v48 = vmul.f32 %v2791_v4, %v1696_v20  ;;  %v1762_v26 = vsel %vm1506_vm4, %v3433_v28, %v1730_v35  ;;  %2820 = vtanh.f32 %v1578_v18 }
 0x171   : > { %v3579_v54 = vpop.f32.mrf.mxu0  ;;  %v2797_v12 = vpop.eup %2796  ;;  %2204 = vst [vmem:[%s3548_s29] sm:$0xff] %v2203_v40   ;;  %v1545_v9 = vmin.f32 %v3587_v8, 0.0  ;;  %v3600_v4 = vadd.f32 %v2577_v10, %v3535_v34  ;;  %2822 = vtanh.f32 %v1576_v29  ;;  %v1579_v61 = vmul.f32 0.5, %v1547_v43 }
 0x172   : > { %v2799_v15 = vpop.eup %2798  ;;  %v1731_v63 = vmul.f32 %v2795_v23, %v1699_v45  ;;  %v1697_v1 = vadd.f32 1.0, %v2797_v12  ;;  %v3589_v33 = vpop.f32.mrf.mxu1  ;;  %v1658_v40 = vmul.f32 1.442695, %v1547_v43  ;;  %v1760_v35 = vsel %vm1504_vm6, %v3451_v52, %v1728_v48 }
 0x173   : > { %v1440_v6 = vpop.f32.mrf.mxu0  ;;  %v2801_v13 = vpop.eup %2800  ;;  %v1654_v34 = vmul.f32 1.442695, %v1545_v9  ;;  %v3620_v52 = vadd.f32 %v3483_v19, %v3471_v38  ;;  %vm1509_vm11 = vcmp.gt.f32.partialorder %v3526_v11, 0.0  ;;  %vm1514_vm12 = vcmp.gt.f32.partialorder %v3530_v37, 0.0 }
 0x174   : > { %v2803_v46 = vpop.eup %2802  ;;  %v1763_v41 = vsel %vm1507_vm5, %v3458_v16, %v1731_v63  ;;  %v1729_v24 = vmul.f32 %v2799_v15, %v1697_v1  ;;  %v1702_v58 = vadd.f32 1.0, %v2801_v13  ;;  %v3602_v17 = vpop.f32.mrf.mxu1  ;;  %v1577_v15 = vmul.f32 0.5, %v1545_v9 }
 0x175   : > { %v3604_v20 = vpop.f32.mrf.mxu0  ;;  %v2805_v28 = vpop.eup %2804  ;;  %v2218_v18 = vpack.c.bf16 %v1763_v41, %v1762_v26  ;;  %v1550_v63 = vmin.f32 %v3600_v4, 0.0  ;;  %2824 = vpow2.f32 %v1658_v40  ;;  %v3629_v13 = vadd.f32 %v3502_v27, %v3493_v47 }
 0x176   : > { %v1761_v16 = vsel %vm1505_vm7, %v3463_v7, %v1729_v24  ;;  %v1734_v53 = vmul.f32 %v2803_v46, %v1702_v58  ;;  %v3612_v10 = vpop.f32.mrf.mxu1  ;;  %v2807_v45 = vpop.eup %2806  ;;  %v1700_v29 = vadd.f32 1.0, %v2805_v28  ;;  %2826 = vtanh.f32 %v1579_v61 }
 0x177   : > { %v3614_v23 = vpop.f32.mrf.mxu0  ;;  %2282 = vst [vmem:[%s3548_s29 + $0x18] sm:$0xff] %v2218_v18   ;;  %v2213_v12 = vpack.c.bf16 %v1761_v16, %v1760_v35  ;;  %v1703_v7 = vadd.f32 1.0, %v2807_v45  ;;  %v2809_v1 = vpop.eup %2808  ;;  %v1664_v26 = vmul.f32 1.442695, %v1550_v63  ;;  %2828 = vpow2.f32 %v1654_v34 }
 0x178   : > { %v3623_v48 = vpop.f32.mrf.mxu1  ;;  %v2811_v43 = vpop.eup %2810  ;;  %v1766_v38 = vsel %vm1510_vm8, %v3481_v22, %v1734_v53  ;;  %v3636_v9 = vadd.f32 %v3570_v50, %v3506_v55  ;;  %2830 = vtanh.f32 %v1577_v15  ;;  %v3644_v27 = vadd.f32 %v3579_v54, %v3577_v5 }
 0x179   : > { %2281 = vst [vmem:[%s3548_s29 + $0x10] sm:$0xff] %v2213_v12   ;;  %v1735_v19 = vmul.f32 %v2809_v1, %v1703_v7  ;;  %v3638_v46 = vpop.f32.mrf.mxu0  ;;  %v2813_v24 = vpop.eup %2812  ;;  %v1732_v47 = vmul.f32 %v2811_v43, %v1700_v29  ;;  %v3647_v58 = vadd.f32 %v1440_v6, %v3516_v42  ;;  %v1582_v28 = vmul.f32 0.5, %v1550_v63 }
 0x17a   : > { %v3640_v41 = vpop.f32.mrf.mxu1  ;;  %v2815_v22 = vpop.eup %2814  ;;  %v1701_v50 = vadd.f32 1.0, %v2813_v24  ;;  %2832 = vpow2.f32 %v1664_v26  ;;  %v2491_v5 = vadd.f32 %v3523_v30, %v3513_v62  ;;  %v1548_v54 = vmin.f32 %v3636_v9, 0.0 }
 0x17b   : > { %v1767_v55 = vsel %vm1511_vm10, %v3499_v14, %v1735_v19  ;;  %v2817_v61 = vpop.eup %2816  ;;  %v1551_v42 = vmin.f32 %v3644_v27, 0.0  ;;  %v1549_v14 = vmin.f32 %v3647_v58, 0.0  ;;  %v1456_v16 = vpop.f32.mrf.mxu0  ;;  %v2494_v34 = vadd.f32 %v3543_v3, %v3532_v57 }
 0x17c   : > { %v3652_v18 = vpop.f32.mrf.mxu1  ;;  %v2228_v40 = vpack.c.bf16 %v1767_v55, %v1766_v38  ;;  %v1733_v6 = vmul.f32 %v2815_v22, %v1701_v50  ;;  %v1706_v35 = vadd.f32 1.0, %v2817_v61  ;;  %v2819_v53 = vpop.eup %2818  ;;  %v1580_v45 = vmul.f32 0.5, %v1548_v54 }
 0x17d   : > { %v1660_v62 = vmul.f32 1.442695, %v1548_v54  ;;  %v2821_v30 = vpop.eup %2820  ;;  %v1764_v12 = vsel %vm1508_vm9, %v3496_v44, %v1732_v47  ;;  %vm1512_vm13 = vcmp.gt.f32.partialorder %v3555_v49, 0.0  ;;  %2834 = vtanh.f32 %v1582_v28  ;;  %v3673_v38 = vpop.f32.mrf.mxu0 }
 0x17e   : > { %2284 = vst [vmem:[%s3548_s29 + $0x28] sm:$0xff] %v2228_v40   ;;  %v1765_v29 = vsel %vm1509_vm11, %v3526_v11, %v1733_v6  ;;  %v1666_v15 = vmul.f32 1.442695, %v1551_v42  ;;  %v3669_v63 = vpop.f32.mrf.mxu1  ;;  %v1704_v1 = vadd.f32 1.0, %v2819_v53  ;;  %v1583_v26 = vmul.f32 0.5, %v1551_v42  ;;  %v2823_v3 = vpop.eup %2822 }
 0x17f   : > { %v2223_v7 = vpack.c.bf16 %v1765_v29, %v1764_v12  ;;  %v1301_v57 = vadd.f32 %v2491_v5, %v3469_v51  ;;  %v1738_v43 = vmul.f32 %v2821_v30, %v1706_v35  ;;  %vm1515_vm14 = vcmp.gt.f32.partialorder %v3584_v25, 0.0 }
 0x180   : > { %2836 = vpow2.f32 %v1660_v62  ;;  %v1662_v44 = vmul.f32 1.442695, %v1549_v14  ;;  %v1581_v11 = vmul.f32 0.5, %v1549_v14  ;;  %v1293_v24 = vadd.f32 %v3620_v52, %v3429_v56  ;;  %v3687_v22 = vpop.f32.mrf.mxu1 }
 0x181   : > { %2283 = vst [vmem:[%s3548_s29 + $0x20] sm:$0xff] %v2223_v7   ;;  %2838 = vtanh.f32 %v1580_v45  ;;  %v3677_v19 = vadd.f32 %v3604_v20, %v1301_v57  ;;  %vm1513_vm15 = vcmp.gt.f32.partialorder %v3587_v8, 0.0  ;;  %v3684_v51 = vadd.f32 %v3568_v32, %v3557_v36 }
 0x182   : > { %2840 = vpow2.f32 %v1666_v15  ;;  %v1304_v47 = vadd.f32 %v2494_v34, %v3479_v59  ;;  %v2825_v55 = vpop.eup %2824  ;;  %v1736_v50 = vmul.f32 %v2823_v3, %v1704_v1  ;;  %v3691_v28 = vadd.f32 %v3614_v23, %v1293_v24  ;;  %v1469_v59 = vpop.f32.mrf.mxu0 }
 0x183   : > { %2842 = vtanh.f32 %v1583_v26  ;;  %v1554_v20 = vmin.f32 %v3677_v19, 0.0  ;;  %v2827_v56 = vpop.eup %2826  ;;  %v1707_v52 = vadd.f32 1.0, %v2825_v55  ;;  %v1296_v36 = vadd.f32 %v3629_v13, %v3439_v39  ;;  %v3705_v14 = vpop.f32.mrf.mxu1 }
 0x184   : > { %2844 = vpow2.f32 %v1662_v44  ;;  %v3694_v61 = vadd.f32 %v3638_v46, %v1304_v47  ;;  %v2829_v32 = vpop.eup %2828  ;;  %v1770_v40 = vsel %vm1514_vm12, %v3530_v37, %v1738_v43  ;;  %v1552_v23 = vmin.f32 %v3691_v28, 0.0  ;;  %v2586_v30 = vpop.f32.mrf.mxu0 }
 0x185   : > { %2846 = vtanh.f32 %v1581_v11  ;;  %v1672_v5 = vmul.f32 1.442695, %v1554_v20  ;;  %v2831_v54 = vpop.eup %2830  ;;  %v1739_v42 = vmul.f32 %v2827_v56, %v1707_v52  ;;  %v1705_v6 = vadd.f32 1.0, %v2829_v32  ;;  %v2513_v7 = vpop.f32.mrf.mxu1 }
 0x186   : > { %v1555_v35 = vmin.f32 %v3694_v61, 0.0  ;;  %v3703_v46 = vadd.f32 %v1456_v16, %v1296_v36  ;;  %v1768_v13 = vsel %vm1512_vm13, %v3555_v49, %v1736_v50  ;;  %v1586_v53 = vmul.f32 0.5, %v1554_v20  ;;  %v1472_v57 = vpop.f32.mrf.mxu0 }
 0x187   : > { %v2833_v39 = vpop.eup %2832  ;;  %v2503_v37 = vadd.f32 %v3612_v10, %v3602_v17  ;;  %v1668_v34 = vmul.f32 1.442695, %v1552_v23  ;;  %v1771_v45 = vsel %vm1515_vm14, %v3584_v25, %v1739_v42  ;;  %v1737_v62 = vmul.f32 %v2831_v54, %v1705_v6  ;;  %v2514_v47 = vpop.f32.mrf.mxu1 }
 0x188   : > { %2848 = vpow2.f32 %v1672_v5  ;;  %v2506_v16 = vadd.f32 %v3640_v41, %v3623_v48  ;;  %v2238_v12 = vpack.c.bf16 %v1771_v45, %v1770_v40  ;;  %vm1518_vm0 = vcmp.gt.f32.partialorder %v3600_v4, 0.0  ;;  %v2589_v40 = vpop.f32.mrf.mxu0 }
 0x189   : > { %v1710_v49 = vadd.f32 1.0, %v2833_v39  ;;  %v1584_v29 = vmul.f32 0.5, %v1552_v23  ;;  %v1674_v15 = vmul.f32 1.442695, %v1555_v35  ;;  %v1769_v17 = vsel %vm1513_vm15, %v3587_v8, %v1737_v62 }
 0x18a   : > { %2850 = vpow2.f32 %v1668_v34  ;;  %v1587_v25 = vmul.f32 0.5, %v1555_v35  ;;  %v1553_v10 = vmin.f32 %v3703_v46, 0.0  ;;  %v2835_v1 = vpop.eup %2834  ;;  %2286 = vst [vmem:[%s3548_s29 + $0x38] sm:$0xff] %v2238_v12   ;;  %v2233_v48 = vpack.c.bf16 %v1769_v17, %v1768_v13  ;;  %v2516_v35 = vpop.f32.mrf.mxu1 }
 0x18b   : > { %v2500_v41 = vadd.f32 %v3589_v33, %v3573_v31  ;;  %2852 = vtanh.f32 %v1586_v53  ;;  %v1317_v26 = vadd.f32 %v2503_v37, %v3287_v60  ;;  %vm1516_vm1 = vcmp.gt.f32.partialorder %v3636_v9, 0.0  ;;  %v1485_v62 = vpop.f32.mrf.mxu0 }
 0x18c   : > { %vm1519_vm2 = vcmp.gt.f32.partialorder %v3644_v27, 0.0  ;;  %2854 = vpow2.f32 %v1674_v15  ;;  %v1670_v8 = vmul.f32 1.442695, %v1553_v10  ;;  %2285 = vst [vmem:[%s3548_s29 + $0x30] sm:$0xff] %v2233_v48   ;;  %vm1517_vm3 = vcmp.gt.f32.partialorder %v3647_v58, 0.0  ;;  %v2517_v17 = vpop.f32.mrf.mxu1 }
 0x18d   : > { %v2837_v3 = vpop.eup %2836  ;;  %2856 = vtanh.f32 %v1584_v29  ;;  %v1585_v43 = vmul.f32 0.5, %v1553_v10  ;;  %v3731_v44 = vadd.f32 %v3673_v38, %v1317_v26  ;;  %v1309_v31 = vadd.f32 %v3684_v51, %v3271_v0  ;;  %v3838_v51 = vld [vmem:[#allocation8_spill] sm:$0xff] }
 0x18e   : > { %v2839_v60 = vpop.eup %2838  ;;  %v1742_v33 = vmul.f32 %v2835_v1, %v1710_v49  ;;  %v1708_v11 = vadd.f32 1.0, %v2837_v3  ;;  %2858 = vtanh.f32 %v1587_v25  ;;  %v1320_v24 = vadd.f32 %v2506_v16, %v3293_v2 }
 0x18f   : > { %v2841_v55 = vpop.eup %2840  ;;  %2860 = vpow2.f32 %v1670_v8  ;;  %v1558_v50 = vmin.f32 %v3731_v44, 0.0  ;;  %v2509_v20 = vadd.f32 %v3669_v63, %v3652_v18  ;;  %v3739_v56 = vadd.f32 %v1469_v59, %v1309_v31  ;;  %v2590_v8 = vpop.f32.mrf.mxu0 }
 0x190   : > { %v2843_v38 = vpop.eup %2842  ;;  %v1740_v52 = vmul.f32 %v2839_v60, %v1708_v11  ;;  %v1711_v36 = vadd.f32 1.0, %v2841_v55  ;;  %v3741_v0 = vadd.f32 %v2586_v30, %v1320_v24  ;;  %v1312_v32 = vadd.f32 %v2500_v41, %v3838_v51 }
 0x191   : > { %v2845_v5 = vpop.eup %2844  ;;  %2862 = vtanh.f32 %v1585_v43  ;;  %v1590_v2 = vmul.f32 0.5, %v1558_v50  ;;  %v1680_v23 = vmul.f32 1.442695, %v1558_v50  ;;  %v1556_v54 = vmin.f32 %v3739_v56, 0.0 }
 0x192   : > { %v2847_v42 = vpop.eup %2846  ;;  %v1774_v18 = vsel %vm1518_vm0, %v3600_v4, %v1742_v33  ;;  %v1743_v63 = vmul.f32 %v2843_v38, %v1711_v36  ;;  %v1709_v59 = vadd.f32 1.0, %v2845_v5  ;;  %v3748_v6 = vadd.f32 %v1472_v57, %v1312_v32  ;;  %v3841_v32 = vld [vmem:[#allocation10_spill] sm:$0xff] }
 0x193   : > { %v1588_v39 = vmul.f32 0.5, %v1556_v54  ;;  %v1676_v13 = vmul.f32 1.442695, %v1556_v54  ;;  %v1559_v53 = vmin.f32 %v3741_v0, 0.0  ;;  %v2515_v37 = vadd.f32 %v2514_v47, %v2513_v7  ;;  %v3839_v7 = vld [vmem:[#allocation9_spill] sm:$0xff] }
 0x194   : > { %v1772_v34 = vsel %vm1516_vm1, %v3636_v9, %v1740_v52  ;;  %v1775_v45 = vsel %vm1519_vm2, %v3644_v27, %v1743_v63  ;;  %v1741_v4 = vmul.f32 %v2847_v42, %v1709_v59  ;;  %2864 = vpow2.f32 %v1680_v23  ;;  %v1488_v52 = vpop.f32.mrf.mxu0 }
 0x195   : > { %v2849_v16 = vpop.eup %2848  ;;  %v2248_v30 = vpack.c.bf16 %v1775_v45, %v1774_v18  ;;  %2866 = vtanh.f32 %v1590_v2  ;;  %v1591_v12 = vmul.f32 0.5, %v1559_v53  ;;  %v1682_v49 = vmul.f32 1.442695, %v1559_v53 }
 0x196   : > { %v1773_v29 = vsel %vm1517_vm3, %v3647_v58, %v1741_v4  ;;  %v1714_v15 = vadd.f32 1.0, %v2849_v16  ;;  %2868 = vpow2.f32 %v1676_v13  ;;  %v1557_v9 = vmin.f32 %v3748_v6, 0.0 }
 0x197   : > { %v2851_v25 = vpop.eup %2850  ;;  %2288 = vst [vmem:[%s3548_s29 + $0x48] sm:$0xff] %v2248_v30   ;;  %v2243_v27 = vpack.c.bf16 %v1773_v29, %v1772_v34  ;;  %2870 = vtanh.f32 %v1588_v39  ;;  %v1333_v10 = vadd.f32 %v2515_v37, %v3323_v21  ;;  %v1325_v1 = vadd.f32 %v2509_v20, %v3839_v7  ;;  %v3840_v20 = vld [vmem:[#allocation11_spill] sm:$0xff] }
 0x198   : > { %v2853_v48 = vpop.eup %2852  ;;  %v1712_v41 = vadd.f32 1.0, %v2851_v25  ;;  %2872 = vpow2.f32 %v1682_v49  ;;  %v2512_v58 = vadd.f32 %v3705_v14, %v3687_v22  ;;  %v1589_v26 = vmul.f32 0.5, %v1557_v9 }
 0x199   : > { %v2855_v57 = vpop.eup %2854  ;;  %2287 = vst [vmem:[%s3548_s29 + $0x40] sm:$0xff] %v2243_v27   ;;  %v1678_v3 = vmul.f32 1.442695, %v1557_v9  ;;  %v3767_v43 = vadd.f32 %v2589_v40, %v1333_v10  ;;  %v3769_v31 = vadd.f32 %v1485_v62, %v1325_v1  ;;  %v2518_v60 = vadd.f32 %v2517_v17, %v2516_v35 }
 0x19a   : > { %v2857_v33 = vpop.eup %2856  ;;  %vm1522_vm4 = vcmp.gt.f32.partialorder %v3677_v19, 0.0  ;;  %v1746_v21 = vmul.f32 %v2853_v48, %v1714_v15  ;;  %v1715_v11 = vadd.f32 1.0, %v2855_v57  ;;  %2874 = vtanh.f32 %v1591_v12 }
 0x19b   : > { %v2859_v24 = vpop.eup %2858  ;;  %vm1520_vm5 = vcmp.gt.f32.partialorder %v3691_v28, 0.0  ;;  %vm1523_vm6 = vcmp.gt.f32.partialorder %v3694_v61, 0.0  ;;  %2876 = vpow2.f32 %v1678_v3  ;;  %v1562_v22 = vmin.f32 %v3767_v43, 0.0 }
 0x19c   : > { %v2861_v14 = vpop.eup %2860  ;;  %v1744_v47 = vmul.f32 %v2857_v33, %v1712_v41  ;;  %v1747_v55 = vmul.f32 %v2859_v24, %v1715_v11  ;;  %v1560_v50 = vmin.f32 %v3769_v31, 0.0  ;;  %v1336_v38 = vadd.f32 %v2518_v60, %v3840_v20 }
 0x19d   : > { %v1713_v36 = vadd.f32 1.0, %v2861_v14  ;;  %2878 = vtanh.f32 %v1589_v26  ;;  %v1688_v51 = vmul.f32 1.442695, %v1562_v22  ;;  %v1328_v40 = vadd.f32 %v2512_v58, %v3841_v32 }
 0x19e   : > { %v2863_v5 = vpop.eup %2862  ;;  %v1778_v2 = vsel %vm1522_vm4, %v3677_v19, %v1746_v21  ;;  %v1779_v23 = vsel %vm1523_vm6, %v3694_v61, %v1747_v55  ;;  %v1684_v54 = vmul.f32 1.442695, %v1560_v50  ;;  %v3782_v42 = vadd.f32 %v2590_v8, %v1336_v38 }
 0x19f   : > { %v2258_v18 = vpack.c.bf16 %v1779_v23, %v1778_v2  ;;  %v1745_v63 = vmul.f32 %v2863_v5, %v1713_v36  ;;  %v1594_v59 = vmul.f32 0.5, %v1562_v22  ;;  %v3784_v35 = vadd.f32 %v1488_v52, %v1328_v40 }
 0x1a0   : > { %vm1521_vm7 = vcmp.gt.f32.partialorder %v3703_v46, 0.0  ;;  %2880 = vpow2.f32 %v1688_v51  ;;  %v1592_v39 = vmul.f32 0.5, %v1560_v50  ;;  %v1563_v13 = vmin.f32 %v3782_v42, 0.0 }
 0x1a1   : > { %v2865_v53 = vpop.eup %2864  ;;  %v1776_v19 = vsel %vm1520_vm5, %v3691_v28, %v1744_v47  ;;  %2290 = vst [vmem:[%s3548_s29 + $0x58] sm:$0xff] %v2258_v18   ;;  %v1777_v61 = vsel %vm1521_vm7, %v3703_v46, %v1745_v63  ;;  %v1561_v37 = vmin.f32 %v3784_v35, 0.0  ;;  %2882 = vpow2.f32 %v1684_v54 }
 0x1a2   : > { %v2867_v34 = vpop.eup %2866  ;;  %v2253_v45 = vpack.c.bf16 %v1777_v61, %v1776_v19  ;;  %v1718_v4 = vadd.f32 1.0, %v2865_v53  ;;  %v1595_v62 = vmul.f32 0.5, %v1563_v13  ;;  %2884 = vtanh.f32 %v1594_v59 }
 0x1a3   : > { %v2869_v16 = vpop.eup %2868  ;;  %v1690_v30 = vmul.f32 1.442695, %v1563_v13  ;;  %v1686_v12 = vmul.f32 1.442695, %v1561_v37  ;;  %2886 = vtanh.f32 %v1592_v39  ;;  %v1593_v28 = vmul.f32 0.5, %v1561_v37 }
 0x1a4   : > { %v2871_v49 = vpop.eup %2870  ;;  %2289 = vst [vmem:[%s3548_s29 + $0x50] sm:$0xff] %v2253_v45   ;;  %v1716_v15 = vadd.f32 1.0, %v2869_v16  ;;  %v1750_v9 = vmul.f32 %v2867_v34, %v1718_v4  ;;  %vm1526_vm8 = vcmp.gt.f32.partialorder %v3731_v44, 0.0  ;;  %vm1527_vm9 = vcmp.gt.f32.partialorder %v3741_v0, 0.0 }
 0x1a5   : > { %v2873_v29 = vpop.eup %2872  ;;  %2888 = vpow2.f32 %v1690_v30  ;;  %vm1524_vm10 = vcmp.gt.f32.partialorder %v3739_v56, 0.0  ;;  %vm1525_vm11 = vcmp.gt.f32.partialorder %v3748_v6, 0.0  ;;  %vm1530_vm12 = vcmp.gt.f32.partialorder %v3767_v43, 0.0 }
 0x1a6   : > { %v1719_v46 = vadd.f32 1.0, %v2873_v29  ;;  %2890 = vtanh.f32 %v1595_v62  ;;  %v1748_v10 = vmul.f32 %v2871_v49, %v1716_v15  ;;  %v1782_v48 = vsel %vm1526_vm8, %v3731_v44, %v1750_v9 }
 0x1a7   : > { %v2875_v17 = vpop.eup %2874  ;;  %2892 = vpow2.f32 %v1686_v12  ;;  %vm1531_vm13 = vcmp.gt.f32.partialorder %v3782_v42, 0.0  ;;  %vm1528_vm14 = vcmp.gt.f32.partialorder %v3769_v31, 0.0  ;;  %vm1529_vm15 = vcmp.gt.f32.partialorder %v3784_v35, 0.0 }
 0x1a8   : > { %v2877_v25 = vpop.eup %2876  ;;  %v1751_v27 = vmul.f32 %v2875_v17, %v1719_v46  ;;  %2894 = vtanh.f32 %v1593_v28  ;;  %v1780_v57 = vsel %vm1524_vm10, %v3739_v56, %v1748_v10 }
 0x1a9   : > { %v1717_v7 = vadd.f32 1.0, %v2877_v25 }
 0x1aa   : > { %v2879_v1 = vpop.eup %2878  ;;  %v1783_v41 = vsel %vm1527_vm9, %v3741_v0, %v1751_v27 }
 0x1ab   : > { %v2268_v58 = vpack.c.bf16 %v1783_v41, %v1782_v48  ;;  %v1749_v26 = vmul.f32 %v2879_v1, %v1717_v7 }
 0x1ad   : > { %v2881_v8 = vpop.eup %2880  ;;  %2292 = vst [vmem:[%s3548_s29 + $0x68] sm:$0xff] %v2268_v58   ;;  %v1781_v3 = vsel %vm1525_vm11, %v3748_v6, %v1749_v26 }
 0x1ae   : > { %v2263_v60 = vpack.c.bf16 %v1781_v3, %v1780_v57  ;;  %v2883_v33 = vpop.eup %2882  ;;  %v1722_v21 = vadd.f32 1.0, %v2881_v8 }
 0x1af   : > { %v2885_v11 = vpop.eup %2884  ;;  %v1720_v24 = vadd.f32 1.0, %v2883_v33 }
 0x1b0   : > { %2291 = vst [vmem:[%s3548_s29 + $0x60] sm:$0xff] %v2263_v60   ;;  %v2887_v44 = vpop.eup %2886  ;;  %v1754_v14 = vmul.f32 %v2885_v11, %v1722_v21 }
 0x1b1   : > { %v1752_v50 = vmul.f32 %v2887_v44, %v1720_v24 }
 0x1b2   : > { %v2889_v0 = vpop.eup %2888  ;;  %v1786_v6 = vsel %vm1530_vm12, %v3767_v43, %v1754_v14 }
 0x1b3   : > { %v2891_v22 = vpop.eup %2890  ;;  %v1723_v47 = vadd.f32 1.0, %v2889_v0  ;;  %v1784_v32 = vsel %vm1528_vm14, %v3769_v31, %v1752_v50 }
 0x1b4   : > { %v2893_v55 = vpop.eup %2892 }
 0x1b5   : > { %v1755_v20 = vmul.f32 %v2891_v22, %v1723_v47  ;;  %v1721_v56 = vadd.f32 1.0, %v2893_v55  ;;  %v2895_v38 = vpop.eup %2894 }
 0x1b7   : > { %v1787_v52 = vsel %vm1531_vm13, %v3782_v42, %v1755_v20  ;;  %v1753_v36 = vmul.f32 %v2895_v38, %v1721_v56 }
 0x1b8   : > { %v2278_v51 = vpack.c.bf16 %v1787_v52, %v1786_v6 }
 0x1b9   : > { %v1785_v40 = vsel %vm1529_vm15, %v3784_v35, %v1753_v36 }
 0x1ba   : > { %2294 = vst [vmem:[%s3548_s29 + $0x78] sm:$0xff] %v2278_v51   ;;  %v2273_v5 = vpack.c.bf16 %v1785_v40, %v1784_v32 }
 0x1bc   : > { %2293 = vst [vmem:[%s3548_s29 + $0x70] sm:$0xff] %v2273_v5  }
 0x1bd PF: > { %s13_s12 = sadd.s32 1, %s2902_s12  }
 0x1be   : > { %p10_p4 = scmp.ge.s32.totalorder %s13_s12, 8  }
 0x1c0   :  { %12 = sbr.rel (!%p10_p4) target bundleno = 1 (0x1), region = 62 }

// kernel: _lambda_.8
= control target key start
LH: loop header
LB: loop body
LE: loop exit
PB: predicated region body
PF: predicated region fallthrough
CT: control target
= control target key end

     0   :  { %s3918_s1 = inlined_call_operand.vmem [shape: bf16[1024,128], index: 1, kind: input, shape index: {}]   ;;  %s3919_s0 = inlined_call_operand.vmem [shape: bf16[224,1024], index: 0, kind: input, shape index: {}]   ;;  %s3920_s2 = inlined_call_operand.vmem [shape: f32[1,128], index: 2, kind: input, shape index: {}]   ;;  %s3921_s3 = inlined_call_operand.vmem [shape: bf16[224,128], index: 3, kind: output, shape index: {}]  }
   0x1   :  { %v2898_v0 = vld [vmem:[%s3918_s1 + $0x78] sm:$0xff]   ;;  %v2902_v4 = vld [vmem:[%s3918_s1 + $0x70] sm:$0xff]   ;;  %v2906_v8 = vld [vmem:[%s3918_s1 + $0x68] sm:$0xff]  }
   0x2   :  { %v2899_v1 = vld [vmem:[%s3918_s1 + $0xf8] sm:$0xff]   ;;  %2498 = vmatprep.subr.bf16.mxu0 %v2898_v0  ;;  %v2903_v5 = vld [vmem:[%s3918_s1 + $0xf0] sm:$0xff]   ;;  %v2907_v9 = vld [vmem:[%s3918_s1 + $0xe8] sm:$0xff]  }
   0x3   :  { %v2900_v2 = vld [vmem:[%s3918_s1 + $0x38] sm:$0xff]   ;;  %2598 = vmatprep.subr.bf16.mxu1 %v2899_v1  ;;  %v2904_v6 = vld [vmem:[%s3918_s1 + $0x30] sm:$0xff]   ;;  %v2908_v10 = vld [vmem:[%s3918_s1 + $0x28] sm:$0xff]  }
   0x4   :  { %v2901_v3 = vld [vmem:[%s3918_s1 + $0xb8] sm:$0xff]   ;;  %2499 = vmatpush3.bf16.msra.mxu0 %v2900_v2  ;;  %v2905_v7 = vld [vmem:[%s3918_s1 + $0xb0] sm:$0xff]   ;;  %v2909_v11 = vld [vmem:[%s3918_s1 + $0xa8] sm:$0xff]  }
   0x5   :  { %2599 = vmatpush3.bf16.msra.mxu1 %v2901_v3  ;;  %2500 = vmatprep.subr.bf16.mxu0 %v2902_v4  ;;  %v2910_v12 = vld [vmem:[%s3918_s1 + $0x60] sm:$0xff]   ;;  %v2914_v16 = vld [vmem:[%s3918_s1 + $0x58] sm:$0xff]   ;;  %v2918_v20 = vld [vmem:[%s3918_s1 + $0x50] sm:$0xff]  }
   0x6   :  { %2600 = vmatprep.subr.bf16.mxu1 %v2903_v5  ;;  %v2911_v13 = vld [vmem:[%s3918_s1 + $0xe0] sm:$0xff]   ;;  %v2915_v17 = vld [vmem:[%s3918_s1 + $0xd8] sm:$0xff]   ;;  %v2919_v21 = vld [vmem:[%s3918_s1 + $0xd0] sm:$0xff]  }
   0x7   :  { %v2912_v14 = vld [vmem:[%s3918_s1 + $0x20] sm:$0xff]   ;;  %v2916_v18 = vld [vmem:[%s3918_s1 + $0x18] sm:$0xff]   ;;  %v2920_v22 = vld [vmem:[%s3918_s1 + $0x10] sm:$0xff]  }
   0x8   :  { %2501 = vmatpush3.bf16.msra.mxu0 %v2904_v6  ;;  %v2913_v15 = vld [vmem:[%s3918_s1 + $0xa0] sm:$0xff]   ;;  %v2917_v19 = vld [vmem:[%s3918_s1 + $0x98] sm:$0xff]   ;;  %v2921_v23 = vld [vmem:[%s3918_s1 + $0x90] sm:$0xff]  }
   0x9   :  { %2601 = vmatpush3.bf16.msra.mxu1 %v2905_v7  ;;  %2502 = vmatprep.subr.bf16.mxu0 %v2906_v8  ;;  %v2922_v24 = vld [vmem:[%s3918_s1 + $0x48] sm:$0xff]   ;;  %v2926_v28 = vld [vmem:[%s3918_s1 + $0x40] sm:$0xff]   ;;  %v2930_v40 = vld [vmem:[%s3918_s1 + $0x178] sm:$0xff]  }
   0xa   :  { %2602 = vmatprep.subr.bf16.mxu1 %v2907_v9  ;;  %v2923_v25 = vld [vmem:[%s3918_s1 + $0xc8] sm:$0xff]   ;;  %v2927_v29 = vld [vmem:[%s3918_s1 + $0xc0] sm:$0xff]   ;;  %v2931_v41 = vld [vmem:[%s3918_s1 + $0x138] sm:$0xff]  }
   0xb   :  { %v2924_v26 = vld [vmem:[%s3918_s1 + $0x8] sm:$0xff]   ;;  %v2928_v30 = vld [vmem:[%s3918_s1] sm:$0xff]   ;;  %v2932_v42 = vld [vmem:[%s3918_s1 + $0x1f8] sm:$0xff]  }
   0xc   :  { %2503 = vmatpush3.bf16.msra.mxu0 %v2908_v10  ;;  %v2925_v27 = vld [vmem:[%s3918_s1 + $0x88] sm:$0xff]   ;;  %v2929_v31 = vld [vmem:[%s3918_s1 + $0x80] sm:$0xff]   ;;  %v2933_v43 = vld [vmem:[%s3918_s1 + $0x1b8] sm:$0xff]  }
   0xd   :  { %2603 = vmatpush3.bf16.msra.mxu1 %v2909_v11  ;;  %2504 = vmatprep.subr.bf16.mxu0 %v2910_v12  ;;  %v15_v32 = vld [vmem:[%s3919_s0] sm:$0xff]  ;;  %v16_v34 = vld [vmem:[%s3919_s0 + $0x8] sm:$0xff]  ;;  %v2934_v50 = vld [vmem:[%s3918_s1 + $0x170] sm:$0xff]  }
   0xe   :  { %2604 = vmatprep.subr.bf16.mxu1 %v2911_v13  ;;  %v19_v33 = vld [vmem:[%s3919_s0 + $0x20] sm:$0xff]  ;;  %v20_v37 = vld [vmem:[%s3919_s0 + $0x28] sm:$0xff]  ;;  %v2935_v58 = vld [vmem:[%s3918_s1 + $0x130] sm:$0xff]  }
   0xf   :  { %v2183_v35 = vcombine.low %v15_v32, %v19_v33  ;;  %v2184_v36 = vcombine.high %v15_v32, %v19_v33  ;;  %v2185_v38 = vcombine.low %v16_v34, %v20_v37  ;;  %v2186_v39 = vcombine.high %v16_v34, %v20_v37  ;;  %v23_v44 = vld [vmem:[%s3919_s0 + $0x40] sm:$0xff]  ;;  %v24_v47 = vld [vmem:[%s3919_s0 + $0x48] sm:$0xff]  ;;  %v2936_v60 = vld [vmem:[%s3918_s1 + $0x1f0] sm:$0xff]  }
  0x10   :  { %2505 = vmatpush3.bf16.msra.mxu0 %v2912_v14  ;;  %v27_v45 = vld [vmem:[%s3919_s0 + $0x60] sm:$0xff]  ;;  %v28_v48 = vld [vmem:[%s3919_s0 + $0x68] sm:$0xff]  ;;  %v2937_v61 = vld [vmem:[%s3918_s1 + $0x1b0] sm:$0xff]  }
  0x11   :  { %2605 = vmatpush3.bf16.msra.mxu1 %v2913_v15  ;;  %2506 = vmatprep.subr.bf16.mxu0 %v2914_v16  ;;  %v2192_v46 = vcombine.high %v23_v44, %v27_v45  ;;  %v2194_v49 = vcombine.high %v24_v47, %v28_v48  ;;  %v31_v51 = vld [vmem:[%s3919_s0 + $0x80] sm:$0xff]  ;;  %v2191_v52 = vcombine.low %v23_v44, %v27_v45  ;;  %v32_v54 = vld [vmem:[%s3919_s0 + $0x88] sm:$0xff] }
  0x12   :  { %2606 = vmatprep.subr.bf16.mxu1 %v2915_v17  ;;  %1238 = vmatprep.mubr.bf16.mxu0 %v2184_v36  ;;  %v35_v53 = vld [vmem:[%s3919_s0 + $0xa0] sm:$0xff]  ;;  %v36_v55 = vld [vmem:[%s3919_s0 + $0xa8] sm:$0xff]  ;;  %v2193_v56 = vcombine.low %v24_v47, %v28_v48  ;;  %v2952_v36 = vld [vmem:[%s3918_s1 + $0x1d0] sm:$0xff]  }
  0x13   :  { %1383 = vmatprep.mubr.bf16.mxu1 %v2186_v39  ;;  %v2200_v57 = vcombine.high %v31_v51, %v35_v53  ;;  %v2202_v59 = vcombine.high %v32_v54, %v36_v55  ;;  %v39_v62 = vld [vmem:[%s3919_s0 + $0xc0] sm:$0xff]  ;;  %v40_v0 = vld [vmem:[%s3919_s0 + $0xc8] sm:$0xff]  ;;  %v2199_v4 = vcombine.low %v31_v51, %v35_v53  ;;  %v2201_v6 = vcombine.low %v32_v54, %v36_v55  ;;  %v2953_v39 = vld [vmem:[%s3918_s1 + $0x190] sm:$0xff]  }
  0x14   :  { %2507 = vmatpush3.bf16.msra.mxu0 %v2916_v18  ;;  %v43_v63 = vld [vmem:[%s3919_s0 + $0xe0] sm:$0xff]  ;;  %v44_v1 = vld [vmem:[%s3919_s0 + $0xe8] sm:$0xff] }
  0x15   :  { %2607 = vmatpush3.bf16.msra.mxu1 %v2917_v19  ;;  %2508 = vmatprep.subr.bf16.mxu0 %v2918_v20  ;;  %v2938_v2 = vld [vmem:[%s3918_s1 + $0x168] sm:$0xff]   ;;  %v2208_v7 = vcombine.high %v39_v62, %v43_v63  ;;  %v2210_v8 = vcombine.high %v40_v0, %v44_v1  ;;  %v47_v10 = vld [vmem:[%s3919_s0 + $0x100] sm:$0xff]  ;;  %v2207_v18 = vcombine.low %v39_v62, %v43_v63 }
  0x16   :  { %2608 = vmatprep.subr.bf16.mxu1 %v2919_v21  ;;  %v2939_v3 = vld [vmem:[%s3918_s1 + $0x128] sm:$0xff]   ;;  %v51_v11 = vld [vmem:[%s3919_s0 + $0x120] sm:$0xff]  ;;  %v2209_v19 = vcombine.low %v40_v0, %v44_v1 }
  0x17   :  { %v2940_v5 = vld [vmem:[%s3918_s1 + $0x1e8] sm:$0xff]   ;;  %v2942_v12 = vld [vmem:[%s3918_s1 + $0x160] sm:$0xff]   ;;  %v2216_v20 = vcombine.high %v47_v10, %v51_v11 }
  0x18   :  { %2509 = vmatpush3.bf16.msra.mxu0 %v2920_v22  ;;  %v2941_v9 = vld [vmem:[%s3918_s1 + $0x1a8] sm:$0xff]   ;;  %v2943_v15 = vld [vmem:[%s3918_s1 + $0x120] sm:$0xff]   ;;  %v2946_v22 = vld [vmem:[%s3918_s1 + $0x158] sm:$0xff]  }
  0x19   :  { %2609 = vmatpush3.bf16.msra.mxu1 %v2921_v23  ;;  %2510 = vmatprep.subr.bf16.mxu0 %v2922_v24  ;;  %v48_v13 = vld [vmem:[%s3919_s0 + $0x108] sm:$0xff]  ;;  %v2944_v16 = vld [vmem:[%s3918_s1 + $0x1e0] sm:$0xff]   ;;  %v2947_v24 = vld [vmem:[%s3918_s1 + $0x118] sm:$0xff]  }
  0x1a   :  { %2610 = vmatprep.subr.bf16.mxu1 %v2923_v25  ;;  %v52_v14 = vld [vmem:[%s3919_s0 + $0x128] sm:$0xff]  ;;  %v2945_v17 = vld [vmem:[%s3918_s1 + $0x1a0] sm:$0xff]   ;;  %v2948_v25 = vld [vmem:[%s3918_s1 + $0x1d8] sm:$0xff]  }
  0x1b   :  { %v2218_v21 = vcombine.high %v48_v13, %v52_v14  ;;  %v55_v23 = vld [vmem:[%s3919_s0 + $0x140] sm:$0xff]  ;;  %v2217_v32 = vcombine.low %v48_v13, %v52_v14  ;;  %v2955_v44 = vld [vmem:[%s3918_s1 + $0x108] sm:$0xff]  }
  0x1c   :  { %2511 = vmatpush3.bf16.msra.mxu0 %v2924_v26  ;;  %v59_v26 = vld [vmem:[%s3919_s0 + $0x160] sm:$0xff]  ;;  %v2956_v47 = vld [vmem:[%s3918_s1 + $0x1c8] sm:$0xff]  }
  0x1d   :  { %2611 = vmatpush3.bf16.msra.mxu1 %v2925_v27  ;;  %2512 = vmatprep.subr.bf16.mxu0 %v2926_v28  ;;  %v2949_v27 = vld [vmem:[%s3918_s1 + $0x198] sm:$0xff]   ;;  %v56_v28 = vld [vmem:[%s3919_s0 + $0x148] sm:$0xff]  ;;  %v2224_v33 = vcombine.high %v55_v23, %v59_v26  ;;  %v63_v37 = vld [vmem:[%s3919_s0 + $0x180] sm:$0xff] }
  0x1e   :  { %2612 = vmatprep.subr.bf16.mxu1 %v2927_v29  ;;  %v60_v29 = vld [vmem:[%s3919_s0 + $0x168] sm:$0xff]  ;;  %v75_v51 = vld [vmem:[%s3919_s0 + $0x1e0] sm:$0xff] }
  0x1f   :  { %v2226_v34 = vcombine.high %v56_v28, %v60_v29  ;;  %v2225_v45 = vcombine.low %v56_v28, %v60_v29  ;;  %v76_v53 = vld [vmem:[%s3919_s0 + $0x1e8] sm:$0xff]  ;;  %v2958_v54 = vld [vmem:[%s3918_s1 + $0x140] sm:$0xff]  }
  0x20   :  { %2513 = vmatpush3.bf16.msra.mxu0 %v2928_v30  ;;  %v2215_v30 = vcombine.low %v47_v10, %v51_v11  ;;  %v2959_v55 = vld [vmem:[%s3918_s1 + $0x100] sm:$0xff]   ;;  %v80_v0 = vld [vmem:[%s3919_s0 + $0x208] sm:$0xff] }
  0x21   :  { %2613 = vmatpush3.bf16.msra.mxu1 %v2929_v31  ;;  %2698 = vmatprep.subr.bf16.mxu0 %v2930_v40  ;;  %v2950_v31 = vld [vmem:[%s3918_s1 + $0x150] sm:$0xff]   ;;  %v64_v40 = vld [vmem:[%s3919_s0 + $0x188] sm:$0xff]  ;;  %v79_v62 = vld [vmem:[%s3919_s0 + $0x200] sm:$0xff] }
  0x22   :  { %2798 = vmatprep.subr.bf16.mxu1 %v2932_v42  ;;  %v2954_v42 = vld [vmem:[%s3918_s1 + $0x148] sm:$0xff]   ;;  %v83_v63 = vld [vmem:[%s3919_s0 + $0x220] sm:$0xff] }
  0x23   :  { %1239 = vmatmul.mubr.bf16.vlgmr.msra.gmra.mxu0 %v2183_v35  ;;  %v2951_v35 = vld [vmem:[%s3918_s1 + $0x110] sm:$0xff]   ;;  %v84_v1 = vld [vmem:[%s3919_s0 + $0x228] sm:$0xff]  ;;  %v2247_v10 = vcombine.low %v79_v62, %v83_v63  ;;  %v95_v14 = vld [vmem:[%s3919_s0 + $0x280] sm:$0xff] }
  0x24   :  { %1384 = vmatmul.mubr.bf16.vlgmr.msra.gmra.mxu1 %v2185_v38  ;;  %2699 = vmatpush3.bf16.msra.mxu0 %v2931_v41  ;;  %v67_v38 = vld [vmem:[%s3919_s0 + $0x1a0] sm:$0xff]  ;;  %v68_v41 = vld [vmem:[%s3919_s0 + $0x1a8] sm:$0xff]  ;;  %v2249_v11 = vcombine.low %v80_v0, %v84_v1 }
  0x25   :  { %2799 = vmatpush3.bf16.msra.mxu1 %v2933_v43  ;;  %1246 = vmatprep.mubr.bf16.mxu0 %v2192_v46  ;;  %v2223_v43 = vcombine.low %v55_v23, %v59_v26  ;;  %v2232_v46 = vcombine.high %v63_v37, %v67_v38  ;;  %v2234_v48 = vcombine.high %v64_v40, %v68_v41  ;;  %v107_v23 = vld [vmem:[%s3919_s0 + $0x2e0] sm:$0xff] }
  0x26   :  { %1391 = vmatprep.mubr.bf16.mxu1 %v2194_v49  ;;  %2700 = vmatprep.subr.bf16.mxu0 %v2934_v50  ;;  %v2957_v49 = vld [vmem:[%s3918_s1 + $0x188] sm:$0xff]   ;;  %v71_v50 = vld [vmem:[%s3919_s0 + $0x1c0] sm:$0xff] }
  0x27   :  { %2800 = vmatprep.subr.bf16.mxu1 %v2936_v60  ;;  %v2961_v60 = vld [vmem:[%s3918_s1 + $0x180] sm:$0xff]  }
  0x28   :  { %2701 = vmatpush3.bf16.msra.mxu0 %v2935_v58  ;;  %v2233_v58 = vcombine.low %v64_v40, %v68_v41  ;;  %v120_v40 = vld [vmem:[%s3919_s0 + $0x348] sm:$0xff] }
  0x29   :  { %2801 = vmatpush3.bf16.msra.mxu1 %v2937_v61  ;;  %2702 = vmatprep.subr.bf16.mxu0 %v2938_v2  ;;  %v2239_v2 = vcombine.low %v71_v50, %v75_v51  ;;  %v124_v41 = vld [vmem:[%s3919_s0 + $0x368] sm:$0xff] }
  0x2a   :  { %2802 = vmatprep.subr.bf16.mxu1 %v2940_v5  ;;  %v2250_v5 = vcombine.high %v80_v0, %v84_v1  ;;  %v34_v0 = vld [vmem:[%s3919_s0 + $0x98] sm:$0xff] }
  0x2b   :  { %1247 = vmatmul.mubr.bf16.gmra.mxu0 %v2191_v52  ;;  %v72_v52 = vld [vmem:[%s3919_s0 + $0x1c8] sm:$0xff]  ;;  %v38_v1 = vld [vmem:[%s3919_s0 + $0xb8] sm:$0xff] }
  0x2c   :  { %1392 = vmatmul.mubr.bf16.gmra.mxu1 %v2193_v56  ;;  %1254 = vmatprep.mubr.bf16.mxu0 %v2200_v57  ;;  %v2231_v56 = vcombine.low %v63_v37, %v67_v38  ;;  %v2960_v57 = vld [vmem:[%s3918_s1 + $0x1c0] sm:$0xff]   ;;  %v2242_v61 = vcombine.high %v72_v52, %v76_v53 }
  0x2d   :  { %1399 = vmatprep.mubr.bf16.mxu1 %v2202_v59  ;;  %2703 = vmatpush3.bf16.msra.mxu0 %v2939_v3  ;;  %v2240_v59 = vcombine.high %v71_v50, %v75_v51  ;;  %v2241_v3 = vcombine.low %v72_v52, %v76_v53  ;;  %v119_v38 = vld [vmem:[%s3919_s0 + $0x340] sm:$0xff]  ;;  %v2289_v51 = vcombine.low %v120_v40, %v124_v41 }
  0x2e   :  { %2803 = vmatpush3.bf16.msra.mxu1 %v2941_v9  ;;  %2704 = vmatprep.subr.bf16.mxu0 %v2942_v12  ;;  %v92_v9 = vld [vmem:[%s3919_s0 + $0x268] sm:$0xff] }
  0x2f   :  { %2804 = vmatprep.subr.bf16.mxu1 %v2944_v16  ;;  %v96_v16 = vld [vmem:[%s3919_s0 + $0x288] sm:$0xff] }
  0x31   :  { %2705 = vmatpush3.bf16.msra.mxu0 %v2943_v15  ;;  %v99_v15 = vld [vmem:[%s3919_s0 + $0x2a0] sm:$0xff] }
  0x32   :  { %2805 = vmatpush3.bf16.msra.mxu1 %v2945_v17  ;;  %2706 = vmatprep.subr.bf16.mxu0 %v2946_v22  ;;  %v100_v17 = vld [vmem:[%s3919_s0 + $0x2a8] sm:$0xff]  ;;  %v103_v22 = vld [vmem:[%s3919_s0 + $0x2c0] sm:$0xff]  ;;  %v2263_v26 = vcombine.low %v95_v14, %v99_v15 }
  0x33   :  { %1255 = vmatmul.mubr.bf16.gmra.mxu0 %v2199_v4  ;;  %2806 = vmatprep.subr.bf16.mxu1 %v2948_v25  ;;  %v2248_v4 = vcombine.high %v79_v62, %v83_v63  ;;  %v108_v25 = vld [vmem:[%s3919_s0 + $0x2e8] sm:$0xff]  ;;  %v2272_v28 = vcombine.high %v103_v22, %v107_v23  ;;  %v33_v62 = vld [vmem:[%s3919_s0 + $0x90] sm:$0xff] }
  0x34   :  { %1400 = vmatmul.mubr.bf16.gmra.mxu1 %v2201_v6  ;;  %1262 = vmatprep.mubr.bf16.mxu0 %v2208_v7  ;;  %v87_v6 = vld [vmem:[%s3919_s0 + $0x240] sm:$0xff]  ;;  %v37_v63 = vld [vmem:[%s3919_s0 + $0xb0] sm:$0xff] }
  0x35   :  { %1407 = vmatprep.mubr.bf16.mxu1 %v2210_v8  ;;  %2707 = vmatpush3.bf16.msra.mxu0 %v2947_v24  ;;  %v91_v7 = vld [vmem:[%s3919_s0 + $0x260] sm:$0xff]  ;;  %v88_v8 = vld [vmem:[%s3919_s0 + $0x248] sm:$0xff] }
  0x36   :  { %2807 = vmatpush3.bf16.msra.mxu1 %v2949_v27  ;;  %2708 = vmatprep.subr.bf16.mxu0 %v2950_v31  ;;  %v2256_v12 = vcombine.high %v87_v6, %v91_v7  ;;  %v2258_v13 = vcombine.high %v88_v8, %v92_v9  ;;  %v104_v24 = vld [vmem:[%s3919_s0 + $0x2c8] sm:$0xff]  ;;  %v2265_v27 = vcombine.low %v96_v16, %v100_v17  ;;  %v115_v31 = vld [vmem:[%s3919_s0 + $0x320] sm:$0xff] }
  0x37   :  { %2808 = vmatprep.subr.bf16.mxu1 %v2952_v36  ;;  %v2274_v29 = vcombine.high %v104_v24, %v108_v25 }
  0x39   :  { %2709 = vmatpush3.bf16.msra.mxu0 %v2951_v35  ;;  %v2273_v35 = vcombine.low %v104_v24, %v108_v25  ;;  %v58_v24 = vld [vmem:[%s3919_s0 + $0x158] sm:$0xff] }
  0x3a   :  { %2809 = vmatpush3.bf16.msra.mxu1 %v2953_v39  ;;  %2710 = vmatprep.subr.bf16.mxu0 %v2954_v42  ;;  %v123_v39 = vld [vmem:[%s3919_s0 + $0x360] sm:$0xff]  ;;  %v62_v25 = vld [vmem:[%s3919_s0 + $0x178] sm:$0xff] }
  0x3b   :  { %1263 = vmatmul.mubr.bf16.gmra.mxu0 %v2207_v18  ;;  %2810 = vmatprep.subr.bf16.mxu1 %v2956_v47  ;;  %v2255_v18 = vcombine.low %v87_v6, %v91_v7  ;;  %v21_v47 = vld [vmem:[%s3919_s0 + $0x30] sm:$0xff]  ;;  %v2287_v50 = vcombine.low %v119_v38, %v123_v39 }
  0x3c   :  { %1408 = vmatmul.mubr.bf16.gmra.mxu1 %v2209_v19  ;;  %1270 = vmatprep.mubr.bf16.mxu0 %v2216_v20  ;;  %v2257_v19 = vcombine.low %v88_v8, %v92_v9  ;;  %v2264_v20 = vcombine.high %v95_v14, %v99_v15  ;;  %v41_v6 = vld [vmem:[%s3919_s0 + $0xd0] sm:$0xff]  ;;  %v42_v8 = vld [vmem:[%s3919_s0 + $0xd8] sm:$0xff] }
  0x3d   :  { %1415 = vmatprep.mubr.bf16.mxu1 %v2218_v21  ;;  %2711 = vmatpush3.bf16.msra.mxu0 %v2955_v44  ;;  %v2266_v21 = vcombine.high %v96_v16, %v100_v17  ;;  %v2288_v44 = vcombine.high %v119_v38, %v123_v39  ;;  %v45_v7 = vld [vmem:[%s3919_s0 + $0xf0] sm:$0xff]  ;;  %v46_v9 = vld [vmem:[%s3919_s0 + $0xf8] sm:$0xff] }
  0x3e   :  { %2811 = vmatpush3.bf16.msra.mxu1 %v2957_v49  ;;  %2712 = vmatprep.subr.bf16.mxu0 %v2958_v54  ;;  %v22_v49 = vld [vmem:[%s3919_s0 + $0x38] sm:$0xff]  ;;  %v25_v54 = vld [vmem:[%s3919_s0 + $0x50] sm:$0xff] }
  0x3f   :  { %2812 = vmatprep.subr.bf16.mxu1 %v2960_v57  ;;  %v30_v57 = vld [vmem:[%s3919_s0 + $0x78] sm:$0xff]  ;;  %v49_v14 = vld [vmem:[%s3919_s0 + $0x110] sm:$0xff] }
  0x40   :  { %v53_v15 = vld [vmem:[%s3919_s0 + $0x130] sm:$0xff]  ;;  %v50_v16 = vld [vmem:[%s3919_s0 + $0x118] sm:$0xff] }
  0x41   :  { %2713 = vmatpush3.bf16.msra.mxu0 %v2959_v55  ;;  %v29_v55 = vld [vmem:[%s3919_s0 + $0x70] sm:$0xff]  ;;  %v54_v17 = vld [vmem:[%s3919_s0 + $0x138] sm:$0xff] }
  0x42   :  { %2813 = vmatpush3.bf16.msra.mxu1 %v2961_v60  ;;  %v2196_v60 = vcombine.high %v25_v54, %v29_v55  ;;  %v73_v38 = vld [vmem:[%s3919_s0 + $0x1d0] sm:$0xff] }
  0x43   :  { %1271 = vmatmul.mubr.bf16.gmra.mxu0 %v2215_v30  ;;  %v111_v30 = vld [vmem:[%s3919_s0 + $0x300] sm:$0xff]  ;;  %v77_v39 = vld [vmem:[%s3919_s0 + $0x1f0] sm:$0xff] }
  0x44   :  { %1416 = vmatmul.mubr.bf16.gmra.mxu1 %v2217_v32  ;;  %1278 = vmatprep.mubr.bf16.mxu0 %v2224_v33  ;;  %v112_v32 = vld [vmem:[%s3919_s0 + $0x308] sm:$0xff]  ;;  %v2280_v36 = vcombine.high %v111_v30, %v115_v31  ;;  %v2279_v42 = vcombine.low %v111_v30, %v115_v31  ;;  %v65_v30 = vld [vmem:[%s3919_s0 + $0x190] sm:$0xff] }
  0x45   :  { %1423 = vmatprep.mubr.bf16.mxu1 %v2226_v34  ;;  %v116_v33 = vld [vmem:[%s3919_s0 + $0x328] sm:$0xff]  ;;  %v2271_v34 = vcombine.low %v103_v22, %v107_v23  ;;  %v57_v22 = vld [vmem:[%s3919_s0 + $0x150] sm:$0xff] }
  0x46   :  { %v2282_v37 = vcombine.high %v112_v32, %v116_v33  ;;  %v61_v23 = vld [vmem:[%s3919_s0 + $0x170] sm:$0xff] }
  0x47   :  { %v69_v31 = vld [vmem:[%s3919_s0 + $0x1b0] sm:$0xff] }
  0x4b   :  { %1279 = vmatmul.mubr.bf16.gmra.mxu0 %v2223_v43  ;;  %v2281_v43 = vcombine.low %v112_v32, %v116_v33  ;;  %v66_v32 = vld [vmem:[%s3919_s0 + $0x198] sm:$0xff] }
  0x4c   :  { %1424 = vmatmul.mubr.bf16.gmra.mxu1 %v2225_v45  ;;  %1286 = vmatprep.mubr.bf16.mxu0 %v2232_v46  ;;  %v2290_v45 = vcombine.high %v120_v40, %v124_v41  ;;  %v17_v46 = vld [vmem:[%s3919_s0 + $0x10] sm:$0xff]  ;;  %v70_v33 = vld [vmem:[%s3919_s0 + $0x1b8] sm:$0xff] }
  0x4d   :  { %1431 = vmatprep.mubr.bf16.mxu1 %v2234_v48  ;;  %v18_v48 = vld [vmem:[%s3919_s0 + $0x18] sm:$0xff]  ;;  %v2188_v52 = vcombine.high %v17_v46, %v21_v47 }
  0x4e   :  { %v2190_v53 = vcombine.high %v18_v48, %v22_v49  ;;  %v74_v40 = vld [vmem:[%s3919_s0 + $0x1d8] sm:$0xff] }
  0x4f   :  { %v78_v41 = vld [vmem:[%s3919_s0 + $0x1f8] sm:$0xff] }
  0x53   :  { %1287 = vmatmul.mubr.bf16.gmra.mxu0 %v2231_v56  ;;  %v26_v56 = vld [vmem:[%s3919_s0 + $0x58] sm:$0xff] }
  0x54   :  { %1432 = vmatmul.mubr.bf16.gmra.mxu1 %v2233_v58  ;;  %1294 = vmatprep.mubr.bf16.mxu0 %v2240_v59  ;;  %v2187_v58 = vcombine.low %v17_v46, %v21_v47  ;;  %v2189_v59 = vcombine.low %v18_v48, %v22_v49  ;;  %v81_v46 = vld [vmem:[%s3919_s0 + $0x210] sm:$0xff]  ;;  %v82_v48 = vld [vmem:[%s3919_s0 + $0x218] sm:$0xff] }
  0x55   :  { %1439 = vmatprep.mubr.bf16.mxu1 %v2242_v61  ;;  %v2198_v61 = vcombine.high %v26_v56, %v30_v57  ;;  %v85_v47 = vld [vmem:[%s3919_s0 + $0x230] sm:$0xff]  ;;  %v86_v49 = vld [vmem:[%s3919_s0 + $0x238] sm:$0xff] }
  0x5b   :  { %1295 = vmatmul.mubr.bf16.gmra.mxu0 %v2239_v2  ;;  %v2195_v2 = vcombine.low %v25_v54, %v29_v55  ;;  %v89_v54 = vld [vmem:[%s3919_s0 + $0x250] sm:$0xff] }
  0x5c   :  { %1440 = vmatmul.mubr.bf16.gmra.mxu1 %v2241_v3  ;;  %1302 = vmatprep.mubr.bf16.mxu0 %v2248_v4  ;;  %v2197_v3 = vcombine.low %v26_v56, %v30_v57  ;;  %v2204_v4 = vcombine.high %v33_v62, %v37_v63  ;;  %v93_v55 = vld [vmem:[%s3919_s0 + $0x270] sm:$0xff]  ;;  %v90_v56 = vld [vmem:[%s3919_s0 + $0x258] sm:$0xff] }
  0x5d   :  { %1447 = vmatprep.mubr.bf16.mxu1 %v2250_v5  ;;  %v2206_v5 = vcombine.high %v34_v0, %v38_v1  ;;  %v94_v57 = vld [vmem:[%s3919_s0 + $0x278] sm:$0xff] }
  0x63   :  { %1303 = vmatmul.mubr.bf16.gmra.mxu0 %v2247_v10  ;;  %v2203_v10 = vcombine.low %v33_v62, %v37_v63  ;;  %v97_v62 = vld [vmem:[%s3919_s0 + $0x290] sm:$0xff] }
  0x64   :  { %1448 = vmatmul.mubr.bf16.gmra.mxu1 %v2249_v11  ;;  %1310 = vmatprep.mubr.bf16.mxu0 %v2256_v12  ;;  %v2205_v11 = vcombine.low %v34_v0, %v38_v1  ;;  %v2212_v12 = vcombine.high %v41_v6, %v45_v7  ;;  %v101_v63 = vld [vmem:[%s3919_s0 + $0x2b0] sm:$0xff]  ;;  %v98_v0 = vld [vmem:[%s3919_s0 + $0x298] sm:$0xff] }
  0x65   :  { %1455 = vmatprep.mubr.bf16.mxu1 %v2258_v13  ;;  %v2214_v13 = vcombine.high %v42_v8, %v46_v9  ;;  %v102_v1 = vld [vmem:[%s3919_s0 + $0x2b8] sm:$0xff] }
  0x6b   :  { %1311 = vmatmul.mubr.bf16.gmra.mxu0 %v2255_v18  ;;  %v2211_v18 = vcombine.low %v41_v6, %v45_v7  ;;  %v105_v6 = vld [vmem:[%s3919_s0 + $0x2d0] sm:$0xff] }
  0x6c   :  { %1456 = vmatmul.mubr.bf16.gmra.mxu1 %v2257_v19  ;;  %1318 = vmatprep.mubr.bf16.mxu0 %v2264_v20  ;;  %v2213_v19 = vcombine.low %v42_v8, %v46_v9  ;;  %v2220_v20 = vcombine.high %v49_v14, %v53_v15  ;;  %v109_v7 = vld [vmem:[%s3919_s0 + $0x2f0] sm:$0xff]  ;;  %v106_v8 = vld [vmem:[%s3919_s0 + $0x2d8] sm:$0xff] }
  0x6d   :  { %1463 = vmatprep.mubr.bf16.mxu1 %v2266_v21  ;;  %v2222_v21 = vcombine.high %v50_v16, %v54_v17  ;;  %v110_v9 = vld [vmem:[%s3919_s0 + $0x2f8] sm:$0xff] }
  0x73   :  { %1319 = vmatmul.mubr.bf16.gmra.mxu0 %v2263_v26  ;;  %v2219_v26 = vcombine.low %v49_v14, %v53_v15 }
  0x74   :  { %1464 = vmatmul.mubr.bf16.gmra.mxu1 %v2265_v27  ;;  %1326 = vmatprep.mubr.bf16.mxu0 %v2272_v28  ;;  %v2221_v27 = vcombine.low %v50_v16, %v54_v17  ;;  %v2228_v28 = vcombine.high %v57_v22, %v61_v23  ;;  %v3601_v16 = vld [vmem:[%s3920_s2] ss:$0 sm:$0xff] }
  0x75   :  { %1471 = vmatprep.mubr.bf16.mxu1 %v2274_v29  ;;  %v2230_v29 = vcombine.high %v58_v24, %v62_v25 }
  0x7b   :  { %1327 = vmatmul.mubr.bf16.gmra.mxu0 %v2271_v34  ;;  %v2227_v34 = vcombine.low %v57_v22, %v61_v23  ;;  %v114_v22 = vld [vmem:[%s3919_s0 + $0x318] sm:$0xff] }
  0x7c   :  { %1472 = vmatmul.mubr.bf16.gmra.mxu1 %v2273_v35  ;;  %1334 = vmatprep.mubr.bf16.mxu0 %v2280_v36  ;;  %v2229_v35 = vcombine.low %v58_v24, %v62_v25  ;;  %v2236_v36 = vcombine.high %v65_v30, %v69_v31  ;;  %v118_v23 = vld [vmem:[%s3919_s0 + $0x338] sm:$0xff] }
  0x7d   :  { %1479 = vmatprep.mubr.bf16.mxu1 %v2282_v37  ;;  %v2238_v37 = vcombine.high %v66_v32, %v70_v33 }
  0x83   :  { %1335 = vmatmul.mubr.bf16.gmra.mxu0 %v2279_v42  ;;  %v2235_v42 = vcombine.low %v65_v30, %v69_v31 }
  0x84   :  { %1480 = vmatmul.mubr.bf16.gmra.mxu1 %v2281_v43  ;;  %1342 = vmatprep.mubr.bf16.mxu0 %v2288_v44  ;;  %v2237_v43 = vcombine.low %v66_v32, %v70_v33  ;;  %v2244_v44 = vcombine.high %v73_v38, %v77_v39  ;;  %v2286_v32 = vcombine.high %v114_v22, %v118_v23 }
  0x85   :  { %1487 = vmatprep.mubr.bf16.mxu1 %v2290_v45  ;;  %v2246_v45 = vcombine.high %v74_v40, %v78_v41 }
  0x8b   :  { %1343 = vmatmul.mubr.bf16.gmra.mxu0 %v2287_v50  ;;  %v2243_v50 = vcombine.low %v73_v38, %v77_v39 }
  0x8c   :  { %1488 = vmatmul.mubr.bf16.gmra.mxu1 %v2289_v51  ;;  %1528 = vmatprep.mubr.bf16.mxu0 %v2188_v52  ;;  %v2245_v51 = vcombine.low %v74_v40, %v78_v41  ;;  %v2252_v52 = vcombine.high %v81_v46, %v85_v47  ;;  %v121_v41 = vld [vmem:[%s3919_s0 + $0x350] sm:$0xff] }
  0x8d   :  { %1673 = vmatprep.mubr.bf16.mxu1 %v2190_v53  ;;  %v2254_v53 = vcombine.high %v82_v48, %v86_v49 }
  0x93   :  { %1529 = vmatmul.mubr.bf16.vlgmr.msra.gmra.mxu0 %v2187_v58  ;;  %v2251_v58 = vcombine.low %v81_v46, %v85_v47  ;;  %v122_v46 = vld [vmem:[%s3919_s0 + $0x358] sm:$0xff] }
  0x94   :  { %1674 = vmatmul.mubr.bf16.vlgmr.msra.gmra.mxu1 %v2189_v59  ;;  %1536 = vmatprep.mubr.bf16.mxu0 %v2196_v60  ;;  %v2253_v59 = vcombine.low %v82_v48, %v86_v49  ;;  %v2260_v60 = vcombine.high %v89_v54, %v93_v55  ;;  %v126_v47 = vld [vmem:[%s3919_s0 + $0x378] sm:$0xff] }
  0x95   :  { %1681 = vmatprep.mubr.bf16.mxu1 %v2198_v61  ;;  %v2262_v61 = vcombine.high %v90_v56, %v94_v57 }
  0x9b   :  { %1537 = vmatmul.mubr.bf16.gmra.mxu0 %v2195_v2  ;;  %v2259_v2 = vcombine.low %v89_v54, %v93_v55 }
  0x9c   :  { %1682 = vmatmul.mubr.bf16.gmra.mxu1 %v2197_v3  ;;  %1544 = vmatprep.mubr.bf16.mxu0 %v2204_v4  ;;  %v2261_v3 = vcombine.low %v90_v56, %v94_v57  ;;  %v2268_v4 = vcombine.high %v97_v62, %v101_v63  ;;  %v2294_v56 = vcombine.high %v122_v46, %v126_v47 }
  0x9d   :  { %1689 = vmatprep.mubr.bf16.mxu1 %v2206_v5  ;;  %v2270_v5 = vcombine.high %v98_v0, %v102_v1 }
  0xa3   :  { %1545 = vmatmul.mubr.bf16.gmra.mxu0 %v2203_v10  ;;  %v2267_v10 = vcombine.low %v97_v62, %v101_v63 }
  0xa4   :  { %1690 = vmatmul.mubr.bf16.gmra.mxu1 %v2205_v11  ;;  %1552 = vmatprep.mubr.bf16.mxu0 %v2212_v12  ;;  %v2269_v11 = vcombine.low %v98_v0, %v102_v1  ;;  %v2276_v12 = vcombine.high %v105_v6, %v109_v7 }
  0xa5   :  { %1697 = vmatprep.mubr.bf16.mxu1 %v2214_v13  ;;  %v2278_v13 = vcombine.high %v106_v8, %v110_v9 }
  0xab   :  { %1553 = vmatmul.mubr.bf16.gmra.mxu0 %v2211_v18  ;;  %v113_v18 = vld [vmem:[%s3919_s0 + $0x310] sm:$0xff] }
  0xac   :  { %1698 = vmatmul.mubr.bf16.gmra.mxu1 %v2213_v19  ;;  %1560 = vmatprep.mubr.bf16.mxu0 %v2220_v20  ;;  %v117_v19 = vld [vmem:[%s3919_s0 + $0x330] sm:$0xff] }
  0xad   :  { %1705 = vmatprep.mubr.bf16.mxu1 %v2222_v21  ;;  %v2284_v30 = vcombine.high %v113_v18, %v117_v19 }
  0xb3   :  { %1561 = vmatmul.mubr.bf16.gmra.mxu0 %v2219_v26  ;;  %v2275_v26 = vcombine.low %v105_v6, %v109_v7 }
  0xb4   :  { %1706 = vmatmul.mubr.bf16.gmra.mxu1 %v2221_v27  ;;  %1568 = vmatprep.mubr.bf16.mxu0 %v2228_v28 }
  0xb5   :  { %1713 = vmatprep.mubr.bf16.mxu1 %v2230_v29  ;;  %v2277_v29 = vcombine.low %v106_v8, %v110_v9  ;;  %v2293_v9 = vcombine.low %v122_v46, %v126_v47 }
  0xbb   :  { %1569 = vmatmul.mubr.bf16.gmra.mxu0 %v2227_v34 }
  0xbc   :  { %1714 = vmatmul.mubr.bf16.gmra.mxu1 %v2229_v35  ;;  %1576 = vmatprep.mubr.bf16.mxu0 %v2236_v36 }
  0xbd   :  { %1721 = vmatprep.mubr.bf16.mxu1 %v2238_v37 }
  0xc3   :  { %1577 = vmatmul.mubr.bf16.gmra.mxu0 %v2235_v42  ;;  %v125_v42 = vld [vmem:[%s3919_s0 + $0x370] sm:$0xff] }
  0xc4   :  { %1722 = vmatmul.mubr.bf16.gmra.mxu1 %v2237_v43  ;;  %1584 = vmatprep.mubr.bf16.mxu0 %v2244_v44  ;;  %v2292_v54 = vcombine.high %v121_v41, %v125_v42  ;;  %v2291_v6 = vcombine.low %v121_v41, %v125_v42 }
  0xc5   :  { %1729 = vmatprep.mubr.bf16.mxu1 %v2246_v45 }
  0xcb   :  { %1585 = vmatmul.mubr.bf16.gmra.mxu0 %v2243_v50  ;;  %v2283_v50 = vcombine.low %v113_v18, %v117_v19 }
  0xcc   :  { %1730 = vmatmul.mubr.bf16.gmra.mxu1 %v2245_v51  ;;  %1592 = vmatprep.mubr.bf16.mxu0 %v2252_v52 }
  0xcd   :  { %1737 = vmatprep.mubr.bf16.mxu1 %v2254_v53  ;;  %v2285_v53 = vcombine.low %v114_v22, %v118_v23 }
  0xd3   :  { %1593 = vmatmul.mubr.bf16.gmra.mxu0 %v2251_v58 }
  0xd4   :  { %1738 = vmatmul.mubr.bf16.gmra.mxu1 %v2253_v59  ;;  %1600 = vmatprep.mubr.bf16.mxu0 %v2260_v60 }
  0xd5   :  { %1745 = vmatprep.mubr.bf16.mxu1 %v2262_v61 }
  0xdb   :  { %1601 = vmatmul.mubr.bf16.gmra.mxu0 %v2259_v2 }
  0xdc   :  { %1746 = vmatmul.mubr.bf16.gmra.mxu1 %v2261_v3  ;;  %1608 = vmatprep.mubr.bf16.mxu0 %v2268_v4 }
  0xdd   :  { %1753 = vmatprep.mubr.bf16.mxu1 %v2270_v5 }
  0xe3   :  { %v2514_v14 = vpop.f32.mrf.mxu0  ;;  %1609 = vmatmul.mubr.bf16.gmra.mxu0 %v2267_v10 }
  0xe4   :  { %v2614_v15 = vpop.f32.mrf.mxu1  ;;  %1754 = vmatmul.mubr.bf16.gmra.mxu1 %v2269_v11  ;;  %1616 = vmatprep.mubr.bf16.mxu0 %v2276_v12 }
  0xe5   :  { %v2515_v17 = vpop.f32.mrf.mxu0  ;;  %1761 = vmatprep.mubr.bf16.mxu1 %v2278_v13 }
  0xe6   :  { %v2516_v20 = vadd.f32 %v2515_v17, %v2514_v14  ;;  %v2615_v21 = vpop.f32.mrf.mxu1 }
  0xe7   :  { %v2616_v24 = vadd.f32 %v2615_v21, %v2614_v15  ;;  %v2517_v25 = vpop.f32.mrf.mxu0 }
  0xe8   :  { %v1241_v27 = vadd.f32 %v2516_v20, %v3601_v16  ;;  %v2617_v28 = vpop.f32.mrf.mxu1 }
  0xe9   :  { %v2518_v31 = vpop.f32.mrf.mxu0 }
  0xea   :  { %v3616_v33 = vadd.f32 %v2616_v24, %v1241_v27  ;;  %v2519_v34 = vadd.f32 %v2518_v31, %v2517_v25  ;;  %v2618_v35 = vpop.f32.mrf.mxu1 }
  0xeb   :  { %v2619_v36 = vadd.f32 %v2618_v35, %v2617_v28  ;;  %v2520_v37 = vpop.f32.mrf.mxu0  ;;  %1617 = vmatmul.mubr.bf16.gmra.mxu0 %v2275_v26 }
  0xec   :  { %v1244_v38 = vadd.f32 %v2519_v34, %v3601_v16  ;;  %v2620_v39 = vpop.f32.mrf.mxu1  ;;  %1762 = vmatmul.mubr.bf16.gmra.mxu1 %v2277_v29  ;;  %1624 = vmatprep.mubr.bf16.mxu0 %v2284_v30 }
  0xed   :  { %v2521_v40 = vpop.f32.mrf.mxu0  ;;  %1769 = vmatprep.mubr.bf16.mxu1 %v2286_v32 }
  0xee   :  { %v3625_v43 = vadd.f32 %v2619_v36, %v1244_v38  ;;  %v2522_v44 = vadd.f32 %v2521_v40, %v2520_v37  ;;  %v2621_v45 = vpop.f32.mrf.mxu1 }
  0xef   :  { %v2622_v48 = vadd.f32 %v2621_v45, %v2620_v39  ;;  %v2523_v49 = vpop.f32.mrf.mxu0 }
  0xf0   :  { %v1249_v51 = vadd.f32 %v2522_v44, %v3601_v16  ;;  %v2623_v52 = vpop.f32.mrf.mxu1 }
  0xf1   :  { %v2524_v55 = vpop.f32.mrf.mxu0 }
  0xf2   :  { %v3634_v57 = vadd.f32 %v2622_v48, %v1249_v51  ;;  %v2525_v58 = vadd.f32 %v2524_v55, %v2523_v49  ;;  %v2624_v59 = vpop.f32.mrf.mxu1 }
  0xf3   :  { %v2625_v60 = vadd.f32 %v2624_v59, %v2623_v52  ;;  %v2526_v61 = vpop.f32.mrf.mxu0  ;;  %1625 = vmatmul.mubr.bf16.gmra.mxu0 %v2283_v50 }
  0xf4   :  { %v1252_v62 = vadd.f32 %v2525_v58, %v3601_v16  ;;  %v2626_v63 = vpop.f32.mrf.mxu1  ;;  %1770 = vmatmul.mubr.bf16.gmra.mxu1 %v2285_v53  ;;  %1632 = vmatprep.mubr.bf16.mxu0 %v2292_v54 }
  0xf5   :  { %v2527_v0 = vpop.f32.mrf.mxu0  ;;  %1777 = vmatprep.mubr.bf16.mxu1 %v2294_v56 }
  0xf6   :  { %v3637_v1 = vadd.f32 %v2625_v60, %v1252_v62  ;;  %v2528_v2 = vadd.f32 %v2527_v0, %v2526_v61  ;;  %v2627_v3 = vpop.f32.mrf.mxu1 }
  0xf7   :  { %v2628_v4 = vadd.f32 %v2627_v3, %v2626_v63  ;;  %v2529_v5 = vpop.f32.mrf.mxu0 }
  0xf8   :  { %v1257_v7 = vadd.f32 %v2528_v2, %v3601_v16  ;;  %v2629_v8 = vpop.f32.mrf.mxu1 }
  0xf9   :  { %v2530_v10 = vpop.f32.mrf.mxu0 }
  0xfa   :  { %v3640_v11 = vadd.f32 %v2628_v4, %v1257_v7  ;;  %v2531_v12 = vadd.f32 %v2530_v10, %v2529_v5  ;;  %v2630_v13 = vpop.f32.mrf.mxu1 }
  0xfb   :  { %v2631_v14 = vadd.f32 %v2630_v13, %v2629_v8  ;;  %v2532_v15 = vpop.f32.mrf.mxu0  ;;  %1633 = vmatmul.mubr.bf16.gmra.mxu0 %v2291_v6 }
  0xfc   :  { %v1260_v17 = vadd.f32 %v2531_v12, %v3601_v16  ;;  %v2632_v18 = vpop.f32.mrf.mxu1  ;;  %1778 = vmatmul.mubr.bf16.gmra.mxu1 %v2293_v9 }
  0xfd   :  { %v2533_v19 = vpop.f32.mrf.mxu0 }
  0xfe   :  { %v3643_v20 = vadd.f32 %v2631_v14, %v1260_v17  ;;  %v2534_v21 = vadd.f32 %v2533_v19, %v2532_v15  ;;  %v2633_v22 = vpop.f32.mrf.mxu1 }
  0xff   :  { %v2634_v23 = vadd.f32 %v2633_v22, %v2632_v18  ;;  %v2535_v24 = vpop.f32.mrf.mxu0 }
 0x100   :  { %v1265_v25 = vadd.f32 %v2534_v21, %v3601_v16  ;;  %v2635_v26 = vpop.f32.mrf.mxu1 }
 0x101   :  { %v2536_v27 = vpop.f32.mrf.mxu0 }
 0x102   :  { %v3646_v28 = vadd.f32 %v2634_v23, %v1265_v25  ;;  %v2537_v29 = vadd.f32 %v2536_v27, %v2535_v24  ;;  %v2636_v30 = vpop.f32.mrf.mxu1 }
 0x103   :  { %v2637_v31 = vadd.f32 %v2636_v30, %v2635_v26  ;;  %v2538_v32 = vpop.f32.mrf.mxu0 }
 0x104   :  { %v1268_v34 = vadd.f32 %v2537_v29, %v3601_v16  ;;  %v2638_v35 = vpop.f32.mrf.mxu1 }
 0x105   :  { %v2539_v36 = vpop.f32.mrf.mxu0 }
 0x106   :  { %v3649_v37 = vadd.f32 %v2637_v31, %v1268_v34  ;;  %v2540_v38 = vadd.f32 %v2539_v36, %v2538_v32  ;;  %v2639_v39 = vpop.f32.mrf.mxu1 }
 0x107   :  { %v2640_v40 = vadd.f32 %v2639_v39, %v2638_v35  ;;  %v2541_v41 = vpop.f32.mrf.mxu0 }
 0x108   :  { %v1273_v42 = vadd.f32 %v2540_v38, %v3601_v16  ;;  %v2641_v44 = vpop.f32.mrf.mxu1 }
 0x109   :  { %v2542_v45 = vpop.f32.mrf.mxu0 }
 0x10a   :  { %v3652_v46 = vadd.f32 %v2640_v40, %v1273_v42  ;;  %v2543_v47 = vadd.f32 %v2542_v45, %v2541_v41  ;;  %v2642_v48 = vpop.f32.mrf.mxu1 }
 0x10b   :  { %v2643_v49 = vadd.f32 %v2642_v48, %v2641_v44  ;;  %v2544_v50 = vpop.f32.mrf.mxu0 }
 0x10c   :  { %v1276_v51 = vadd.f32 %v2543_v47, %v3601_v16  ;;  %v2644_v52 = vpop.f32.mrf.mxu1 }
 0x10d   :  { %v2545_v53 = vpop.f32.mrf.mxu0 }
 0x10e   :  { %v3655_v54 = vadd.f32 %v2643_v49, %v1276_v51  ;;  %v2546_v55 = vadd.f32 %v2545_v53, %v2544_v50  ;;  %v2645_v56 = vpop.f32.mrf.mxu1 }
 0x10f   :  { %v2646_v58 = vadd.f32 %v2645_v56, %v2644_v52  ;;  %v2547_v59 = vpop.f32.mrf.mxu0 }
 0x110   :  { %v1281_v60 = vadd.f32 %v2546_v55, %v3601_v16  ;;  %v2647_v61 = vpop.f32.mrf.mxu1 }
 0x111   :  { %v2548_v62 = vpop.f32.mrf.mxu0 }
 0x112   :  { %v3658_v63 = vadd.f32 %v2646_v58, %v1281_v60  ;;  %v2549_v0 = vadd.f32 %v2548_v62, %v2547_v59  ;;  %v2648_v2 = vpop.f32.mrf.mxu1 }
 0x113   :  { %v2649_v3 = vadd.f32 %v2648_v2, %v2647_v61  ;;  %v2550_v4 = vpop.f32.mrf.mxu0 }
 0x114   :  { %v1284_v5 = vadd.f32 %v2549_v0, %v3601_v16  ;;  %v2650_v6 = vpop.f32.mrf.mxu1 }
 0x115   :  { %v2551_v7 = vpop.f32.mrf.mxu0 }
 0x116   :  { %v3661_v8 = vadd.f32 %v2649_v3, %v1284_v5  ;;  %v2552_v9 = vadd.f32 %v2551_v7, %v2550_v4  ;;  %v2651_v10 = vpop.f32.mrf.mxu1 }
 0x117   :  { %v2652_v12 = vadd.f32 %v2651_v10, %v2650_v6  ;;  %v2553_v13 = vpop.f32.mrf.mxu0 }
 0x118   :  { %v1289_v14 = vadd.f32 %v2552_v9, %v3601_v16  ;;  %v2653_v15 = vpop.f32.mrf.mxu1 }
 0x119   :  { %v2554_v17 = vpop.f32.mrf.mxu0 }
 0x11a   :  { %v3664_v18 = vadd.f32 %v2652_v12, %v1289_v14  ;;  %v2555_v19 = vadd.f32 %v2554_v17, %v2553_v13  ;;  %v2654_v21 = vpop.f32.mrf.mxu1 }
 0x11b   :  { %v2655_v22 = vadd.f32 %v2654_v21, %v2653_v15  ;;  %v2556_v23 = vpop.f32.mrf.mxu0 }
 0x11c   :  { %v1292_v24 = vadd.f32 %v2555_v19, %v3601_v16  ;;  %v2656_v25 = vpop.f32.mrf.mxu1 }
 0x11d   :  { %v2557_v26 = vpop.f32.mrf.mxu0 }
 0x11e   :  { %v3667_v27 = vadd.f32 %v2655_v22, %v1292_v24  ;;  %v2558_v29 = vadd.f32 %v2557_v26, %v2556_v23  ;;  %v2657_v30 = vpop.f32.mrf.mxu1 }
 0x11f   :  { %v2658_v31 = vadd.f32 %v2657_v30, %v2656_v25  ;;  %v2559_v32 = vpop.f32.mrf.mxu0 }
 0x120   :  { %v1297_v34 = vadd.f32 %v2558_v29, %v3601_v16  ;;  %v2659_v35 = vpop.f32.mrf.mxu1 }
 0x121   :  { %v2560_v36 = vpop.f32.mrf.mxu0 }
 0x122   :  { %v3670_v38 = vadd.f32 %v2658_v31, %v1297_v34  ;;  %v2561_v39 = vadd.f32 %v2560_v36, %v2559_v32  ;;  %v2660_v40 = vpop.f32.mrf.mxu1 }
 0x123   :  { %v2661_v41 = vadd.f32 %v2660_v40, %v2659_v35  ;;  %v2562_v42 = vpop.f32.mrf.mxu0 }
 0x124   :  { %v1300_v44 = vadd.f32 %v2561_v39, %v3601_v16  ;;  %v2662_v45 = vpop.f32.mrf.mxu1 }
 0x125   :  { %v2563_v47 = vpop.f32.mrf.mxu0 }
 0x126   :  { %v3673_v48 = vadd.f32 %v2661_v41, %v1300_v44  ;;  %v2564_v49 = vadd.f32 %v2563_v47, %v2562_v42  ;;  %v2663_v50 = vpop.f32.mrf.mxu1 }
 0x127   :  { %v2664_v51 = vadd.f32 %v2663_v50, %v2662_v45  ;;  %v2565_v52 = vpop.f32.mrf.mxu0 }
 0x128   :  { %v1305_v53 = vadd.f32 %v2564_v49, %v3601_v16  ;;  %v2665_v55 = vpop.f32.mrf.mxu1 }
 0x129   :  { %v2566_v56 = vpop.f32.mrf.mxu0 }
 0x12a   :  { %v3676_v58 = vadd.f32 %v2664_v51, %v1305_v53  ;;  %v2567_v59 = vadd.f32 %v2566_v56, %v2565_v52  ;;  %v2666_v60 = vpop.f32.mrf.mxu1 }
 0x12b   :  { %v2667_v61 = vadd.f32 %v2666_v60, %v2665_v55  ;;  %v2568_v62 = vpop.f32.mrf.mxu0 }
 0x12c   :  { %v1308_v0 = vadd.f32 %v2567_v59, %v3601_v16  ;;  %v2668_v2 = vpop.f32.mrf.mxu1 }
 0x12d   :  { %v2569_v3 = vpop.f32.mrf.mxu0 }
 0x12e   :  { %v3679_v4 = vadd.f32 %v2667_v61, %v1308_v0  ;;  %v2570_v5 = vadd.f32 %v2569_v3, %v2568_v62  ;;  %v2669_v6 = vpop.f32.mrf.mxu1 }
 0x12f   :  { %v2670_v7 = vadd.f32 %v2669_v6, %v2668_v2  ;;  %v2571_v9 = vpop.f32.mrf.mxu0 }
 0x130   :  { %v1313_v10 = vadd.f32 %v2570_v5, %v3601_v16  ;;  %v2671_v12 = vpop.f32.mrf.mxu1 }
 0x131   :  { %v2572_v13 = vpop.f32.mrf.mxu0 }
 0x132   :  { %v3682_v14 = vadd.f32 %v2670_v7, %v1313_v10  ;;  %v2573_v15 = vadd.f32 %v2572_v13, %v2571_v9  ;;  %v2672_v17 = vpop.f32.mrf.mxu1 }
 0x133   :  { %v2673_v19 = vadd.f32 %v2672_v17, %v2671_v12  ;;  %v2574_v21 = vpop.f32.mrf.mxu0 }
 0x134   :  { %v1316_v22 = vadd.f32 %v2573_v15, %v3601_v16  ;;  %v2674_v23 = vpop.f32.mrf.mxu1 }
 0x135   :  { %v2575_v24 = vpop.f32.mrf.mxu0 }
 0x136   :  { %v3685_v25 = vadd.f32 %v2673_v19, %v1316_v22  ;;  %v2576_v26 = vadd.f32 %v2575_v24, %v2574_v21  ;;  %v2675_v29 = vpop.f32.mrf.mxu1 }
 0x137   :  { %v2676_v30 = vadd.f32 %v2675_v29, %v2674_v23  ;;  %v2577_v31 = vpop.f32.mrf.mxu0 }
 0x138   :  { %v1321_v32 = vadd.f32 %v2576_v26, %v3601_v16  ;;  %v2677_v34 = vpop.f32.mrf.mxu1 }
 0x139   :  { %v2578_v35 = vpop.f32.mrf.mxu0 }
 0x13a   :  { %v3688_v36 = vadd.f32 %v2676_v30, %v1321_v32  ;;  %v2579_v39 = vadd.f32 %v2578_v35, %v2577_v31  ;;  %v2678_v40 = vpop.f32.mrf.mxu1 }
 0x13b   :  { %v2679_v41 = vadd.f32 %v2678_v40, %v2677_v34  ;;  %v2580_v42 = vpop.f32.mrf.mxu0 }
 0x13c   :  { %v1324_v44 = vadd.f32 %v2579_v39, %v3601_v16  ;;  %v2680_v45 = vpop.f32.mrf.mxu1 }
 0x13d   :  { %v2581_v47 = vpop.f32.mrf.mxu0 }
 0x13e   :  { %v3691_v49 = vadd.f32 %v2679_v41, %v1324_v44  ;;  %v2582_v50 = vadd.f32 %v2581_v47, %v2580_v42  ;;  %v2681_v51 = vpop.f32.mrf.mxu1 }
 0x13f   :  { %v2682_v52 = vadd.f32 %v2681_v51, %v2680_v45  ;;  %v2583_v53 = vpop.f32.mrf.mxu0 }
 0x140   :  { %v1329_v55 = vadd.f32 %v2582_v50, %v3601_v16  ;;  %v2683_v56 = vpop.f32.mrf.mxu1 }
 0x141   :  { %v2584_v59 = vpop.f32.mrf.mxu0 }
 0x142   :  { %v3694_v60 = vadd.f32 %v2682_v52, %v1329_v55  ;;  %v2585_v61 = vadd.f32 %v2584_v59, %v2583_v53  ;;  %v2684_v62 = vpop.f32.mrf.mxu1 }
 0x143   :  { %v2685_v0 = vadd.f32 %v2684_v62, %v2683_v56  ;;  %v2586_v2 = vpop.f32.mrf.mxu0 }
 0x144   :  { %v1332_v3 = vadd.f32 %v2585_v61, %v3601_v16  ;;  %v2686_v5 = vpop.f32.mrf.mxu1 }
 0x145   :  { %v2587_v6 = vpop.f32.mrf.mxu0 }
 0x146   :  { %v3697_v7 = vadd.f32 %v2685_v0, %v1332_v3  ;;  %v2588_v9 = vadd.f32 %v2587_v6, %v2586_v2  ;;  %v2687_v10 = vpop.f32.mrf.mxu1 }
 0x147   :  { %v2688_v12 = vadd.f32 %v2687_v10, %v2686_v5  ;;  %v2589_v13 = vpop.f32.mrf.mxu0 }
 0x148   :  { %v1337_v15 = vadd.f32 %v2588_v9, %v3601_v16  ;;  %v2689_v17 = vpop.f32.mrf.mxu1 }
 0x149   :  { %v2590_v19 = vpop.f32.mrf.mxu0 }
 0x14a   :  { %v3700_v21 = vadd.f32 %v2688_v12, %v1337_v15  ;;  %v2591_v22 = vadd.f32 %v2590_v19, %v2589_v13  ;;  %v2690_v23 = vpop.f32.mrf.mxu1 }
 0x14b   :  { %v2691_v24 = vadd.f32 %v2690_v23, %v2689_v17  ;;  %v2592_v26 = vpop.f32.mrf.mxu0 }
 0x14c   :  { %v1340_v29 = vadd.f32 %v2591_v22, %v3601_v16  ;;  %v2692_v30 = vpop.f32.mrf.mxu1 }
 0x14d   :  { %v2593_v31 = vpop.f32.mrf.mxu0 }
 0x14e   :  { %v3703_v32 = vadd.f32 %v2691_v24, %v1340_v29  ;;  %v2594_v34 = vadd.f32 %v2593_v31, %v2592_v26  ;;  %v2693_v35 = vpop.f32.mrf.mxu1 }
 0x14f   :  { %v2694_v39 = vadd.f32 %v2693_v35, %v2692_v30  ;;  %v2595_v40 = vpop.f32.mrf.mxu0 }
 0x150   :  { %v1345_v41 = vadd.f32 %v2594_v34, %v3601_v16  ;;  %v2695_v42 = vpop.f32.mrf.mxu1 }
 0x151   :  { %v2596_v44 = vpop.f32.mrf.mxu0 }
 0x152   :  { %v3706_v45 = vadd.f32 %v2694_v39, %v1345_v41  ;;  %v2597_v47 = vadd.f32 %v2596_v44, %v2595_v40  ;;  %v2696_v50 = vpop.f32.mrf.mxu1 }
 0x153   :  { %v2697_v51 = vadd.f32 %v2696_v50, %v2695_v42  ;;  %v2714_v52 = vpop.f32.mrf.mxu0 }
 0x154   :  { %v1348_v53 = vadd.f32 %v2597_v47, %v3601_v16  ;;  %v2814_v55 = vpop.f32.mrf.mxu1 }
 0x155   :  { %v2715_v56 = vpop.f32.mrf.mxu0 }
 0x156   :  { %v3709_v59 = vadd.f32 %v2697_v51, %v1348_v53  ;;  %v2716_v61 = vadd.f32 %v2715_v56, %v2714_v52  ;;  %v2815_v62 = vpop.f32.mrf.mxu1 }
 0x157   :  { %v2717_v0 = vpop.f32.mrf.mxu0  ;;  %v2816_v3 = vadd.f32 %v2815_v62, %v2814_v55 }
 0x158   :  { %v1531_v2 = vadd.f32 %v2716_v61, %v3616_v33  ;;  %v2817_v5 = vpop.f32.mrf.mxu1 }
 0x159   :  { %v2718_v6 = vpop.f32.mrf.mxu0 }
 0x15a   :  { %v3712_v9 = vadd.f32 %v2816_v3, %v1531_v2  ;;  %v2719_v10 = vadd.f32 %v2718_v6, %v2717_v0  ;;  %v2818_v12 = vpop.f32.mrf.mxu1 }
 0x15b   :  { %v2720_v13 = vpop.f32.mrf.mxu0  ;;  %v2819_v17 = vadd.f32 %v2818_v12, %v2817_v5 }
 0x15c   :  { %v1814_v15 = vmin.f32 %v3712_v9, 0.0  ;;  %v1534_v16 = vadd.f32 %v2719_v10, %v3625_v43  ;;  %v2820_v19 = vpop.f32.mrf.mxu1  ;;  %vm1786_vm0 = vcmp.gt.f32.partialorder %v3712_v9, 0.0 }
 0x15d   :  { %v2721_v22 = vpop.f32.mrf.mxu0 }
 0x15e   :  { %v1898_v23 = vmul.f32 1.442695, %v1814_v15  ;;  %v3716_v24 = vadd.f32 %v2819_v17, %v1534_v16  ;;  %v2722_v26 = vadd.f32 %v2721_v22, %v2720_v13  ;;  %v2821_v33 = vpop.f32.mrf.mxu1  ;;  %v1842_v30 = vmul.f32 0.5, %v1814_v15 }
 0x15f   :  { %v2723_v29 = vpop.f32.mrf.mxu0  ;;  %v2822_v35 = vadd.f32 %v2821_v33, %v2820_v19 }
 0x160   :  { %v1815_v31 = vmin.f32 %v3716_v24, 0.0  ;;  %v1539_v34 = vadd.f32 %v2722_v26, %v3634_v57  ;;  %v2823_v39 = vpop.f32.mrf.mxu1  ;;  %2962 = vpow2.f32 %v1898_v23  ;;  %vm1787_vm1 = vcmp.gt.f32.partialorder %v3716_v24, 0.0 }
 0x161   :  { %v2724_v40 = vpop.f32.mrf.mxu0  ;;  %2964 = vtanh.f32 %v1842_v30 }
 0x162   :  { %v1900_v41 = vmul.f32 1.442695, %v1815_v31  ;;  %v3720_v43 = vadd.f32 %v2822_v35, %v1539_v34  ;;  %v2725_v42 = vadd.f32 %v2724_v40, %v2723_v29  ;;  %v2824_v44 = vpop.f32.mrf.mxu1  ;;  %v1843_v47 = vmul.f32 0.5, %v1815_v31 }
 0x163   :  { %v2726_v50 = vpop.f32.mrf.mxu0  ;;  %v2825_v53 = vadd.f32 %v2824_v44, %v2823_v39 }
 0x164   :  { %v1816_v51 = vmin.f32 %v3720_v43, 0.0  ;;  %v1542_v52 = vadd.f32 %v2725_v42, %v3637_v1  ;;  %v2826_v55 = vpop.f32.mrf.mxu1  ;;  %2966 = vpow2.f32 %v1900_v41  ;;  %vm1788_vm2 = vcmp.gt.f32.partialorder %v3720_v43, 0.0 }
 0x165   :  { %v2727_v57 = vpop.f32.mrf.mxu0  ;;  %2968 = vtanh.f32 %v1843_v47 }
 0x166   :  { %v1902_v56 = vmul.f32 1.442695, %v1816_v51  ;;  %v3724_v61 = vadd.f32 %v2825_v53, %v1542_v52  ;;  %v2728_v62 = vadd.f32 %v2727_v57, %v2726_v50  ;;  %v2827_v0 = vpop.f32.mrf.mxu1  ;;  %v1844_v3 = vmul.f32 0.5, %v1816_v51 }
 0x167   :  { %v2729_v2 = vpop.f32.mrf.mxu0  ;;  %v2828_v10 = vadd.f32 %v2827_v0, %v2826_v55 }
 0x168   :  { %v1817_v5 = vmin.f32 %v3724_v61, 0.0  ;;  %v1547_v6 = vadd.f32 %v2728_v62, %v3640_v11  ;;  %v2829_v12 = vpop.f32.mrf.mxu1  ;;  %2970 = vpow2.f32 %v1902_v56  ;;  %vm1789_vm3 = vcmp.gt.f32.partialorder %v3724_v61, 0.0 }
 0x169   :  { %v2730_v1 = vpop.f32.mrf.mxu0  ;;  %2972 = vtanh.f32 %v1844_v3 }
 0x16a   :  { %v1904_v13 = vmul.f32 1.442695, %v1817_v5  ;;  %v3728_v15 = vadd.f32 %v2828_v10, %v1547_v6  ;;  %v2731_v16 = vadd.f32 %v2730_v1, %v2729_v2  ;;  %v2830_v17 = vpop.f32.mrf.mxu1  ;;  %v1845_v19 = vmul.f32 0.5, %v1817_v5 }
 0x16b   :  { %v2732_v22 = vpop.f32.mrf.mxu0  ;;  %v2831_v33 = vadd.f32 %v2830_v17, %v2829_v12 }
 0x16c   :  { %v1818_v23 = vmin.f32 %v3728_v15, 0.0  ;;  %v1550_v26 = vadd.f32 %v2731_v16, %v3643_v20  ;;  %v2832_v29 = vpop.f32.mrf.mxu1  ;;  %2974 = vpow2.f32 %v1904_v13  ;;  %vm1790_vm4 = vcmp.gt.f32.partialorder %v3728_v15, 0.0 }
 0x16d   :  { %v2733_v11 = vpop.f32.mrf.mxu0  ;;  %v2963_v30 = vpop.eup %2962  ;;  %2976 = vtanh.f32 %v1845_v19 }
 0x16e   :  { %v1906_v31 = vmul.f32 1.442695, %v1818_v23  ;;  %v3732_v34 = vadd.f32 %v2831_v33, %v1550_v26  ;;  %v2734_v35 = vadd.f32 %v2733_v11, %v2732_v22  ;;  %v2833_v39 = vpop.f32.mrf.mxu1  ;;  %v1954_v40 = vadd.f32 1.0, %v2963_v30  ;;  %v2965_v51 = vpop.eup %2964 }
 0x16f   :  { %v2735_v41 = vpop.f32.mrf.mxu0  ;;  %v1846_v42 = vmul.f32 0.5, %v1818_v23  ;;  %v2834_v50 = vadd.f32 %v2833_v39, %v2832_v29 }
 0x170   :  { %v1819_v44 = vmin.f32 %v3732_v34, 0.0  ;;  %v1555_v47 = vadd.f32 %v2734_v35, %v3646_v28  ;;  %v2835_v20 = vpop.f32.mrf.mxu1  ;;  %2978 = vpow2.f32 %v1906_v31  ;;  %v1982_v0 = vmul.f32 %v2965_v51, %v1954_v40 }
 0x171   :  { %v2736_v52 = vpop.f32.mrf.mxu0  ;;  %v2967_v53 = vpop.eup %2966  ;;  %2980 = vtanh.f32 %v1846_v42  ;;  %vm1791_vm5 = vcmp.gt.f32.partialorder %v3732_v34, 0.0 }
 0x172   :  { %v1908_v55 = vmul.f32 1.442695, %v1819_v44  ;;  %v3736_v57 = vadd.f32 %v2834_v50, %v1555_v47  ;;  %v2737_v56 = vadd.f32 %v2736_v52, %v2735_v41  ;;  %v2836_v62 = vpop.f32.mrf.mxu1  ;;  %v1955_v2 = vadd.f32 1.0, %v2967_v53  ;;  %v2969_v6 = vpop.eup %2968 }
 0x173   :  { %v1847_v3 = vmul.f32 0.5, %v1819_v44  ;;  %v2738_v5 = vpop.f32.mrf.mxu0  ;;  %v2837_v12 = vadd.f32 %v2836_v62, %v2835_v20  ;;  %v2010_v33 = vsel %vm1786_vm0, %v3712_v9, %v1982_v0 }
 0x174   :  { %v1820_v10 = vmin.f32 %v3736_v57, 0.0  ;;  %v1558_v28 = vadd.f32 %v2737_v56, %v3649_v37  ;;  %v2838_v1 = vpop.f32.mrf.mxu1  ;;  %v1983_v13 = vmul.f32 %v2969_v6, %v1955_v2  ;;  %2982 = vpow2.f32 %v1908_v55 }
 0x175   :  { %v2739_v16 = vpop.f32.mrf.mxu0  ;;  %v2971_v17 = vpop.eup %2970  ;;  %2984 = vtanh.f32 %v1847_v3  ;;  %vm1792_vm6 = vcmp.gt.f32.partialorder %v3736_v57, 0.0 }
 0x176   :  { %v1910_v19 = vmul.f32 1.442695, %v1820_v10  ;;  %v3742_v22 = vadd.f32 %v2837_v12, %v1558_v28  ;;  %v2740_v23 = vadd.f32 %v2739_v16, %v2738_v5  ;;  %v2839_v26 = vpop.f32.mrf.mxu1  ;;  %v2011_v29 = vsel %vm1787_vm1, %v3716_v24, %v1983_v13  ;;  %v2973_v40 = vpop.eup %2972 }
 0x177   :  { %v1956_v37 = vadd.f32 1.0, %v2971_v17  ;;  %v2741_v11 = vpop.f32.mrf.mxu0  ;;  %v2418_v30 = vpack.c.bf16 %v2011_v29, %v2010_v33  ;;  %v1848_v31 = vmul.f32 0.5, %v1820_v10  ;;  %v2840_v42 = vadd.f32 %v2839_v26, %v2838_v1 }
 0x178   :  { %v1821_v35 = vmin.f32 %v3742_v22, 0.0  ;;  %v2841_v39 = vpop.f32.mrf.mxu1  ;;  %2986 = vpow2.f32 %v1910_v19  ;;  %v1563_v41 = vadd.f32 %v2740_v23, %v3652_v46  ;;  %vm1793_vm7 = vcmp.gt.f32.partialorder %v3742_v22, 0.0 }
 0x179   :  { %v2742_v44 = vpop.f32.mrf.mxu0  ;;  %v2975_v47 = vpop.eup %2974  ;;  %2419 = vst [vmem:[%s3921_s3] sm:$0xff] %v2418_v30   ;;  %v1984_v9 = vmul.f32 %v2973_v40, %v1956_v37  ;;  %2988 = vtanh.f32 %v1848_v31 }
 0x17a   :  { %v1912_v24 = vmul.f32 1.442695, %v1821_v35  ;;  %v2743_v50 = vadd.f32 %v2742_v44, %v2741_v11  ;;  %v2842_v20 = vpop.f32.mrf.mxu1  ;;  %v1957_v51 = vadd.f32 1.0, %v2975_v47  ;;  %v1849_v52 = vmul.f32 0.5, %v1821_v35  ;;  %v2977_v56 = vpop.eup %2976 }
 0x17b   :  { %v3751_v53 = vadd.f32 %v2840_v42, %v1563_v41  ;;  %v2744_v55 = vpop.f32.mrf.mxu0  ;;  %v2843_v62 = vadd.f32 %v2842_v20, %v2841_v39  ;;  %v2012_v10 = vsel %vm1788_vm2, %v3720_v43, %v1984_v9 }
 0x17c   :  { %v1566_v46 = vadd.f32 %v2743_v50, %v3655_v54  ;;  %v2844_v0 = vpop.f32.mrf.mxu1  ;;  %v1985_v2 = vmul.f32 %v2977_v56, %v1957_v51  ;;  %2990 = vpow2.f32 %v1912_v24 }
 0x17d   :  { %v1822_v3 = vmin.f32 %v3751_v53, 0.0  ;;  %v2745_v5 = vpop.f32.mrf.mxu0  ;;  %v2979_v6 = vpop.eup %2978  ;;  %2992 = vtanh.f32 %v1849_v52  ;;  %vm1794_vm8 = vcmp.gt.f32.partialorder %v3751_v53, 0.0 }
 0x17e   :  { %v3758_v28 = vadd.f32 %v2843_v62, %v1566_v46  ;;  %v2746_v12 = vadd.f32 %v2745_v5, %v2744_v55  ;;  %v2845_v1 = vpop.f32.mrf.mxu1  ;;  %v2013_v54 = vsel %vm1789_vm3, %v3724_v61, %v1985_v2  ;;  %v1958_v13 = vadd.f32 1.0, %v2979_v6  ;;  %v2981_v43 = vpop.eup %2980 }
 0x17f   :  { %v1914_v16 = vmul.f32 1.442695, %v1822_v3  ;;  %v2747_v17 = vpop.f32.mrf.mxu0  ;;  %v2423_v19 = vpack.c.bf16 %v2013_v54, %v2012_v10  ;;  %v1850_v23 = vmul.f32 0.5, %v1822_v3  ;;  %v2846_v37 = vadd.f32 %v2845_v1, %v2844_v0 }
 0x180   :  { %v1823_v26 = vmin.f32 %v3758_v28, 0.0  ;;  %v1571_v33 = vadd.f32 %v2746_v12, %v3658_v63  ;;  %v2847_v29 = vpop.f32.mrf.mxu1  ;;  %v1986_v61 = vmul.f32 %v2981_v43, %v1958_v13  ;;  %vm1795_vm9 = vcmp.gt.f32.partialorder %v3758_v28, 0.0 }
 0x181   :  { %v2748_v11 = vpop.f32.mrf.mxu0  ;;  %v2983_v30 = vpop.eup %2982  ;;  %2485 = vst [vmem:[%s3921_s3 + $0x8] sm:$0xff] %v2423_v19   ;;  %2994 = vpow2.f32 %v1914_v16 }
 0x182   :  { %v1916_v31 = vmul.f32 1.442695, %v1823_v26  ;;  %v2749_v35 = vadd.f32 %v2748_v11, %v2747_v17  ;;  %v2848_v39 = vpop.f32.mrf.mxu1  ;;  %v1959_v40 = vadd.f32 1.0, %v2983_v30  ;;  %v1851_v41 = vmul.f32 0.5, %v1823_v26  ;;  %v2985_v63 = vpop.eup %2984 }
 0x183   :  { %v3766_v42 = vadd.f32 %v2846_v37, %v1571_v33  ;;  %v2750_v44 = vpop.f32.mrf.mxu0  ;;  %2996 = vtanh.f32 %v1850_v23  ;;  %v2849_v9 = vadd.f32 %v2848_v39, %v2847_v29  ;;  %v2014_v55 = vsel %vm1790_vm4, %v3728_v15, %v1986_v61 }
 0x184   :  { %v1574_v47 = vadd.f32 %v2749_v35, %v3661_v8  ;;  %v2850_v24 = vpop.f32.mrf.mxu1  ;;  %v1987_v50 = vmul.f32 %v2985_v63, %v1959_v40  ;;  %2998 = vpow2.f32 %v1916_v31 }
 0x185   :  { %v1824_v20 = vmin.f32 %v3766_v42, 0.0  ;;  %v2751_v51 = vpop.f32.mrf.mxu0  ;;  %v2987_v52 = vpop.eup %2986  ;;  %3000 = vtanh.f32 %v1851_v41  ;;  %vm1796_vm10 = vcmp.gt.f32.partialorder %v3766_v42, 0.0 }
 0x186   :  { %v3773_v56 = vadd.f32 %v2849_v9, %v1574_v47  ;;  %v2752_v46 = vadd.f32 %v2751_v51, %v2750_v44  ;;  %v2851_v62 = vpop.f32.mrf.mxu1  ;;  %v2015_v8 = vsel %vm1791_vm5, %v3732_v34, %v1987_v50  ;;  %v1960_v0 = vadd.f32 1.0, %v2987_v52  ;;  %v2989_v15 = vpop.eup %2988 }
 0x187   :  { %v1918_v2 = vmul.f32 1.442695, %v1824_v20  ;;  %v2753_v3 = vpop.f32.mrf.mxu0  ;;  %v2428_v5 = vpack.c.bf16 %v2015_v8, %v2014_v55  ;;  %v1852_v6 = vmul.f32 0.5, %v1824_v20  ;;  %v2852_v54 = vadd.f32 %v2851_v62, %v2850_v24 }
 0x188   :  { %v1825_v10 = vmin.f32 %v3773_v56, 0.0  ;;  %v1579_v12 = vadd.f32 %v2752_v46, %v3664_v18  ;;  %v2853_v1 = vpop.f32.mrf.mxu1  ;;  %v1988_v23 = vmul.f32 %v2989_v15, %v1960_v0  ;;  %vm1797_vm11 = vcmp.gt.f32.partialorder %v3773_v56, 0.0 }
 0x189   :  { %v2754_v13 = vpop.f32.mrf.mxu0  ;;  %v2991_v16 = vpop.eup %2990  ;;  %2486 = vst [vmem:[%s3921_s3 + $0x10] sm:$0xff] %v2428_v5   ;;  %3002 = vpow2.f32 %v1918_v2 }
 0x18a   :  { %v1920_v34 = vmul.f32 1.442695, %v1825_v10  ;;  %v2755_v17 = vadd.f32 %v2754_v13, %v2753_v3  ;;  %v2854_v19 = vpop.f32.mrf.mxu1  ;;  %v1961_v26 = vadd.f32 1.0, %v2991_v16  ;;  %v1853_v33 = vmul.f32 0.5, %v1825_v10  ;;  %v2993_v18 = vpop.eup %2992 }
 0x18b   :  { %v3781_v29 = vadd.f32 %v2852_v54, %v1579_v12  ;;  %v2756_v43 = vpop.f32.mrf.mxu0  ;;  %3004 = vtanh.f32 %v1852_v6  ;;  %v2855_v11 = vadd.f32 %v2854_v19, %v2853_v1  ;;  %v2016_v63 = vsel %vm1792_vm6, %v3736_v57, %v1988_v23 }
 0x18c   :  { %v1582_v37 = vadd.f32 %v2755_v17, %v3667_v27  ;;  %v2856_v30 = vpop.f32.mrf.mxu1  ;;  %v1989_v61 = vmul.f32 %v2993_v18, %v1961_v26  ;;  %3006 = vpow2.f32 %v1920_v34 }
 0x18d   :  { %v1826_v31 = vmin.f32 %v3781_v29, 0.0  ;;  %v2757_v35 = vpop.f32.mrf.mxu0  ;;  %3008 = vtanh.f32 %v1853_v33  ;;  %vm1798_vm12 = vcmp.gt.f32.partialorder %v3781_v29, 0.0 }
 0x18e   :  { %v3787_v39 = vadd.f32 %v2855_v11, %v1582_v37  ;;  %v2758_v40 = vadd.f32 %v2757_v35, %v2756_v43  ;;  %v2857_v41 = vpop.f32.mrf.mxu1  ;;  %v2995_v44 = vpop.eup %2994  ;;  %v2017_v27 = vsel %vm1793_vm7, %v3742_v22, %v1989_v61 }
 0x18f   :  { %v1922_v47 = vmul.f32 1.442695, %v1826_v31  ;;  %v2759_v9 = vpop.f32.mrf.mxu0  ;;  %v2433_v24 = vpack.c.bf16 %v2017_v27, %v2016_v63  ;;  %v1962_v50 = vadd.f32 1.0, %v2995_v44  ;;  %v1854_v20 = vmul.f32 0.5, %v1826_v31 }
 0x190   :  { %v1827_v51 = vmin.f32 %v3787_v39, 0.0  ;;  %v2859_v52 = vpop.f32.mrf.mxu1  ;;  %v2997_v55 = vpop.eup %2996  ;;  %v1587_v46 = vadd.f32 %v2758_v40, %v3670_v38  ;;  %v2858_v62 = vadd.f32 %v2857_v41, %v2856_v30  ;;  %vm1799_vm13 = vcmp.gt.f32.partialorder %v3787_v39, 0.0 }
 0x191   :  { %v2760_v8 = vpop.f32.mrf.mxu0  ;;  %v2999_v0 = vpop.eup %2998  ;;  %2487 = vst [vmem:[%s3921_s3 + $0x18] sm:$0xff] %v2433_v24   ;;  %v1990_v57 = vmul.f32 %v2997_v55, %v1962_v50  ;;  %3010 = vpow2.f32 %v1922_v47 }
 0x192   :  { %v1924_v22 = vmul.f32 1.442695, %v1827_v51  ;;  %v2860_v2 = vpop.f32.mrf.mxu1  ;;  %v1963_v3 = vadd.f32 1.0, %v2999_v0  ;;  %v1855_v5 = vmul.f32 0.5, %v1827_v51  ;;  %v3796_v6 = vadd.f32 %v2858_v62, %v1587_v46  ;;  %v3001_v1 = vpop.eup %3000 }
 0x193   :  { %v2761_v10 = vadd.f32 %v2760_v8, %v2759_v9  ;;  %v2762_v12 = vpop.f32.mrf.mxu0  ;;  %3012 = vtanh.f32 %v1854_v20  ;;  %v2861_v34 = vadd.f32 %v2860_v2, %v2859_v52  ;;  %v2018_v26 = vsel %vm1794_vm8, %v3751_v53, %v1990_v57 }
 0x194   :  { %v2862_v38 = vpop.f32.mrf.mxu1  ;;  %v1991_v15 = vmul.f32 %v3001_v1, %v1963_v3  ;;  %3014 = vpow2.f32 %v1924_v22  ;;  %v1828_v54 = vmin.f32 %v3796_v6, 0.0  ;;  %vm1800_vm14 = vcmp.gt.f32.partialorder %v3796_v6, 0.0 }
 0x195   :  { %v2763_v13 = vpop.f32.mrf.mxu0  ;;  %v1590_v16 = vadd.f32 %v2761_v10, %v3673_v48  ;;  %3016 = vtanh.f32 %v1855_v5 }
 0x196   :  { %v2764_v17 = vadd.f32 %v2763_v13, %v2762_v12  ;;  %v2863_v19 = vpop.f32.mrf.mxu1  ;;  %v3003_v23 = vpop.eup %3002  ;;  %v2019_v33 = vsel %vm1795_vm9, %v3758_v28, %v1991_v15  ;;  %v1926_v43 = vmul.f32 1.442695, %v1828_v54  ;;  %v1856_v53 = vmul.f32 0.5, %v1828_v54 }
 0x197   :  { %v2765_v18 = vpop.f32.mrf.mxu0  ;;  %v2438_v37 = vpack.c.bf16 %v2019_v33, %v2018_v26  ;;  %v1964_v11 = vadd.f32 1.0, %v3003_v23  ;;  %v3804_v30 = vadd.f32 %v2861_v34, %v1590_v16  ;;  %v2864_v48 = vadd.f32 %v2863_v19, %v2862_v38 }
 0x198   :  { %v1595_v61 = vadd.f32 %v2764_v17, %v3676_v58  ;;  %v2865_v31 = vpop.f32.mrf.mxu1  ;;  %v3005_v35 = vpop.eup %3004  ;;  %3018 = vpow2.f32 %v1926_v43 }
 0x199   :  { %v2766_v40 = vpop.f32.mrf.mxu0  ;;  %v3007_v41 = vpop.eup %3006  ;;  %2488 = vst [vmem:[%s3921_s3 + $0x20] sm:$0xff] %v2438_v37   ;;  %v1829_v28 = vmin.f32 %v3804_v30, 0.0  ;;  %v1992_v63 = vmul.f32 %v3005_v35, %v1964_v11  ;;  %3020 = vtanh.f32 %v1856_v53  ;;  %vm1801_vm15 = vcmp.gt.f32.partialorder %v3804_v30, 0.0 }
 0x19a   :  { %v2866_v44 = vpop.f32.mrf.mxu1  ;;  %v1965_v27 = vadd.f32 1.0, %v3007_v41  ;;  %v3811_v47 = vadd.f32 %v2864_v48, %v1595_v61  ;;  %v2767_v9 = vadd.f32 %v2766_v40, %v2765_v18  ;;  %v3009_v24 = vpop.eup %3008 }
 0x19b   :  { %v2768_v58 = vpop.f32.mrf.mxu0  ;;  %v1928_v50 = vmul.f32 1.442695, %v1829_v28  ;;  %v1857_v52 = vmul.f32 0.5, %v1829_v28  ;;  %v2867_v8 = vadd.f32 %v2866_v44, %v2865_v31  ;;  %v2020_v2 = vsel %vm1796_vm10, %v3766_v42, %v1992_v63 }
 0x19c   :  { %v2868_v20 = vpop.f32.mrf.mxu1  ;;  %v1993_v51 = vmul.f32 %v3009_v24, %v1965_v27  ;;  %v1830_v55 = vmin.f32 %v3811_v47, 0.0  ;;  %v1598_v46 = vadd.f32 %v2767_v9, %v3679_v4  ;;  %vm1802_vm0 = vcmp.gt.f32.partialorder %v3811_v47, 0.0 }
 0x19d   :  { %v2769_v62 = vpop.f32.mrf.mxu0  ;;  %3022 = vpow2.f32 %v1928_v50 }
 0x19e   :  { %v2770_v0 = vadd.f32 %v2769_v62, %v2768_v58  ;;  %v2869_v57 = vpop.f32.mrf.mxu1  ;;  %v3011_v22 = vpop.eup %3010  ;;  %v2021_v3 = vsel %vm1797_vm11, %v3773_v56, %v1993_v51  ;;  %v1930_v5 = vmul.f32 1.442695, %v1830_v55  ;;  %v3819_v38 = vadd.f32 %v2867_v8, %v1598_v46 }
 0x19f   :  { %v2771_v10 = vpop.f32.mrf.mxu0  ;;  %v2443_v12 = vpack.c.bf16 %v2021_v3, %v2020_v2  ;;  %v1966_v1 = vadd.f32 1.0, %v3011_v22  ;;  %3024 = vtanh.f32 %v1857_v52  ;;  %v2870_v13 = vadd.f32 %v2869_v57, %v2868_v20 }
 0x1a0   :  { %v1603_v4 = vadd.f32 %v2770_v0, %v3682_v14  ;;  %v2871_v15 = vpop.f32.mrf.mxu1  ;;  %v3013_v54 = vpop.eup %3012  ;;  %v1858_v56 = vmul.f32 0.5, %v1830_v55  ;;  %3026 = vpow2.f32 %v1930_v5  ;;  %v1831_v17 = vmin.f32 %v3819_v38, 0.0 }
 0x1a1   :  { %v2772_v16 = vpop.f32.mrf.mxu0  ;;  %v3015_v34 = vpop.eup %3014  ;;  %2489 = vst [vmem:[%s3921_s3 + $0x28] sm:$0xff] %v2443_v12   ;;  %v1994_v42 = vmul.f32 %v3013_v54, %v1966_v1  ;;  %vm1803_vm1 = vcmp.gt.f32.partialorder %v3819_v38, 0.0 }
 0x1a2   :  { %v2872_v19 = vpop.f32.mrf.mxu1  ;;  %v1967_v23 = vadd.f32 1.0, %v3015_v34  ;;  %v3826_v26 = vadd.f32 %v2870_v13, %v1603_v4  ;;  %v2773_v14 = vadd.f32 %v2772_v16, %v2771_v10  ;;  %v3017_v43 = vpop.eup %3016  ;;  %v1932_v18 = vmul.f32 1.442695, %v1831_v17 }
 0x1a3   :  { %v2774_v33 = vpop.f32.mrf.mxu0  ;;  %v1859_v61 = vmul.f32 0.5, %v1831_v17  ;;  %v2022_v40 = vsel %vm1798_vm12, %v3781_v29, %v1994_v42  ;;  %3028 = vtanh.f32 %v1858_v56  ;;  %v2873_v41 = vadd.f32 %v2872_v19, %v2871_v15 }
 0x1a4   :  { %v2874_v37 = vpop.f32.mrf.mxu1  ;;  %v1995_v11 = vmul.f32 %v3017_v43, %v1967_v23  ;;  %v1832_v31 = vmin.f32 %v3826_v26, 0.0  ;;  %v1606_v35 = vadd.f32 %v2773_v14, %v3685_v25  ;;  %3030 = vpow2.f32 %v1932_v18 }
 0x1a5   :  { %v2775_v48 = vpop.f32.mrf.mxu0  ;;  %v3019_v44 = vpop.eup %3018  ;;  %3032 = vtanh.f32 %v1859_v61  ;;  %vm1804_vm2 = vcmp.gt.f32.partialorder %v3826_v26, 0.0 }
 0x1a6   :  { %v2776_v53 = vadd.f32 %v2775_v48, %v2774_v33  ;;  %v2875_v28 = vpop.f32.mrf.mxu1  ;;  %v2023_v63 = vsel %vm1799_vm13, %v3787_v39, %v1995_v11  ;;  %v1860_v27 = vmul.f32 0.5, %v1832_v31  ;;  %v1934_v9 = vmul.f32 1.442695, %v1832_v31  ;;  %v3021_v46 = vpop.eup %3020 }
 0x1a7   :  { %v2777_v58 = vpop.f32.mrf.mxu0  ;;  %v2448_v24 = vpack.c.bf16 %v2023_v63, %v2022_v40  ;;  %v1968_v50 = vadd.f32 1.0, %v3019_v44  ;;  %v3834_v20 = vadd.f32 %v2873_v41, %v1606_v35  ;;  %v2876_v29 = vadd.f32 %v2875_v28, %v2874_v37 }
 0x1a8   :  { %v1611_v25 = vadd.f32 %v2776_v53, %v3688_v36  ;;  %v2877_v51 = vpop.f32.mrf.mxu1  ;;  %3034 = vpow2.f32 %v1934_v9 }
 0x1a9   :  { %v2778_v52 = vpop.f32.mrf.mxu0  ;;  %2490 = vst [vmem:[%s3921_s3 + $0x30] sm:$0xff] %v2448_v24   ;;  %v1833_v39 = vmin.f32 %v3834_v20, 0.0  ;;  %v1996_v22 = vmul.f32 %v3021_v46, %v1968_v50  ;;  %3036 = vtanh.f32 %v1860_v27  ;;  %vm1805_vm3 = vcmp.gt.f32.partialorder %v3834_v20, 0.0 }
 0x1aa   :  { %v2878_v55 = vpop.f32.mrf.mxu1  ;;  %v3841_v62 = vadd.f32 %v2876_v29, %v1611_v25  ;;  %v2779_v8 = vadd.f32 %v2778_v52, %v2777_v58  ;;  %v3023_v57 = vpop.eup %3022 }
 0x1ab   :  { %v2780_v0 = vpop.f32.mrf.mxu0  ;;  %v1936_v36 = vmul.f32 1.442695, %v1833_v39  ;;  %v1969_v3 = vadd.f32 1.0, %v3023_v57  ;;  %v1861_v5 = vmul.f32 0.5, %v1833_v39  ;;  %v2879_v15 = vadd.f32 %v2878_v55, %v2877_v51 }
 0x1ac   :  { %v2880_v2 = vpop.f32.mrf.mxu1  ;;  %v1834_v10 = vmin.f32 %v3841_v62, 0.0  ;;  %v1614_v12 = vadd.f32 %v2779_v8, %v3691_v49  ;;  %v3025_v4 = vpop.eup %3024  ;;  %v2024_v14 = vsel %vm1800_vm14, %v3796_v6, %v1996_v22  ;;  %vm1806_vm4 = vcmp.gt.f32.partialorder %v3841_v62, 0.0 }
 0x1ad   :  { %v2781_v1 = vpop.f32.mrf.mxu0  ;;  %v3027_v16 = vpop.eup %3026  ;;  %v1997_v34 = vmul.f32 %v3025_v4, %v1969_v3  ;;  %3038 = vpow2.f32 %v1936_v36 }
 0x1ae   :  { %v2782_v54 = vadd.f32 %v2781_v1, %v2780_v0  ;;  %v2881_v13 = vpop.f32.mrf.mxu1  ;;  %v1938_v42 = vmul.f32 1.442695, %v1834_v10  ;;  %v1970_v17 = vadd.f32 1.0, %v3027_v16  ;;  %v3847_v19 = vadd.f32 %v2879_v15, %v1614_v12 }
 0x1af   :  { %v2783_v56 = vpop.f32.mrf.mxu0  ;;  %v2025_v33 = vsel %vm1801_vm15, %v3804_v30, %v1997_v34  ;;  %3040 = vtanh.f32 %v1861_v5  ;;  %v2882_v43 = vadd.f32 %v2881_v13, %v2880_v2  ;;  %v1862_v31 = vmul.f32 0.5, %v1834_v10 }
 0x1b0   :  { %v1619_v23 = vadd.f32 %v2782_v54, %v3694_v60  ;;  %v2883_v49 = vpop.f32.mrf.mxu1  ;;  %v2453_v37 = vpack.c.bf16 %v2025_v33, %v2024_v14  ;;  %3042 = vpow2.f32 %v1938_v42  ;;  %v3029_v61 = vpop.eup %3028  ;;  %v1835_v35 = vmin.f32 %v3847_v19, 0.0 }
 0x1b1   :  { %v2784_v18 = vpop.f32.mrf.mxu0  ;;  %v3031_v60 = vpop.eup %3030  ;;  %v1998_v6 = vmul.f32 %v3029_v61, %v1970_v17  ;;  %3044 = vtanh.f32 %v1862_v31  ;;  %vm1807_vm5 = vcmp.gt.f32.partialorder %v3847_v19, 0.0 }
 0x1b2   :  { %v2884_v11 = vpop.f32.mrf.mxu1  ;;  %v3853_v48 = vadd.f32 %v2882_v43, %v1619_v23  ;;  %v2785_v40 = vadd.f32 %v2784_v18, %v2783_v56  ;;  %2491 = vst [vmem:[%s3921_s3 + $0x38] sm:$0xff] %v2453_v37   ;;  %v1971_v53 = vadd.f32 1.0, %v3031_v60  ;;  %v1940_v28 = vmul.f32 1.442695, %v1835_v35  ;;  %v3033_v63 = vpop.eup %3032 }
 0x1b3   :  { %v2786_v41 = vpop.f32.mrf.mxu0  ;;  %v1863_v27 = vmul.f32 0.5, %v1835_v35  ;;  %v2885_v29 = vadd.f32 %v2884_v11, %v2883_v49  ;;  %v2026_v39 = vsel %vm1802_vm0, %v3811_v47, %v1998_v6 }
 0x1b4   :  { %v2886_v30 = vpop.f32.mrf.mxu1  ;;  %v1836_v9 = vmin.f32 %v3853_v48, 0.0  ;;  %v1622_v58 = vadd.f32 %v2785_v40, %v3697_v7  ;;  %v1999_v51 = vmul.f32 %v3033_v63, %v1971_v53  ;;  %3046 = vpow2.f32 %v1940_v28 }
 0x1b5   :  { %v2787_v44 = vpop.f32.mrf.mxu0  ;;  %v3035_v25 = vpop.eup %3034  ;;  %3048 = vtanh.f32 %v1863_v27  ;;  %vm1808_vm6 = vcmp.gt.f32.partialorder %v3853_v48, 0.0 }
 0x1b6   :  { %v2788_v24 = vadd.f32 %v2787_v44, %v2786_v41  ;;  %v2887_v50 = vpop.f32.mrf.mxu1  ;;  %v1972_v55 = vadd.f32 1.0, %v3035_v25  ;;  %v1942_v46 = vmul.f32 1.442695, %v1836_v9  ;;  %v3037_v0 = vpop.eup %3036  ;;  %v2027_v7 = vsel %vm1803_vm1, %v3819_v38, %v1999_v51 }
 0x1b7   :  { %v2789_v52 = vpop.f32.mrf.mxu0  ;;  %v3866_v57 = vadd.f32 %v2885_v29, %v1622_v58  ;;  %v2888_v36 = vadd.f32 %v2887_v50, %v2886_v30  ;;  %v2458_v3 = vpack.c.bf16 %v2027_v7, %v2026_v39  ;;  %v1864_v5 = vmul.f32 0.5, %v1836_v9 }
 0x1b8   :  { %v2889_v8 = vpop.f32.mrf.mxu1  ;;  %v1627_v22 = vadd.f32 %v2788_v24, %v3700_v21  ;;  %v2000_v1 = vmul.f32 %v3037_v0, %v1972_v55  ;;  %3050 = vpow2.f32 %v1942_v46 }
 0x1b9   :  { %v2790_v2 = vpop.f32.mrf.mxu0  ;;  %v1837_v47 = vmin.f32 %v3866_v57, 0.0  ;;  %2492 = vst [vmem:[%s3921_s3 + $0x40] sm:$0xff] %v2458_v3   ;;  %3052 = vtanh.f32 %v1864_v5  ;;  %vm1809_vm7 = vcmp.gt.f32.partialorder %v3866_v57, 0.0 }
 0x1ba   :  { %v2791_v10 = vadd.f32 %v2790_v2, %v2789_v52  ;;  %v2890_v12 = vpop.f32.mrf.mxu1  ;;  %v3870_v4 = vadd.f32 %v2888_v36, %v1627_v22  ;;  %v3039_v54 = vpop.eup %3038  ;;  %v2028_v18 = vsel %vm1804_vm2, %v3826_v26, %v2000_v1 }
 0x1bb   :  { %v2792_v15 = vpop.f32.mrf.mxu0  ;;  %v2891_v38 = vadd.f32 %v2890_v12, %v2889_v8  ;;  %v1973_v16 = vadd.f32 1.0, %v3039_v54  ;;  %v1944_v34 = vmul.f32 1.442695, %v1837_v47  ;;  %v1865_v17 = vmul.f32 0.5, %v1837_v47 }
 0x1bc   :  { %v1630_v21 = vadd.f32 %v2791_v10, %v3703_v32  ;;  %v2892_v13 = vpop.f32.mrf.mxu1  ;;  %v3041_v56 = vpop.eup %3040  ;;  %v1838_v23 = vmin.f32 %v3870_v4, 0.0  ;;  %vm1810_vm8 = vcmp.gt.f32.partialorder %v3870_v4, 0.0 }
 0x1bd   :  { %v2793_v42 = vpop.f32.mrf.mxu0  ;;  %v3043_v43 = vpop.eup %3042  ;;  %v2001_v32 = vmul.f32 %v3041_v56, %v1973_v16  ;;  %3054 = vpow2.f32 %v1944_v34 }
 0x1be   :  { %v3878_v49 = vadd.f32 %v2891_v38, %v1630_v21  ;;  %v2794_v14 = vadd.f32 %v2793_v42, %v2792_v15  ;;  %v2893_v33 = vpop.f32.mrf.mxu1  ;;  %v1974_v11 = vadd.f32 1.0, %v3043_v43  ;;  %v1946_v61 = vmul.f32 1.442695, %v1838_v23  ;;  %v3045_v27 = vpop.eup %3044 }
 0x1bf   :  { %v2795_v37 = vpop.f32.mrf.mxu0  ;;  %v2894_v31 = vadd.f32 %v2893_v33, %v2892_v13  ;;  %v2029_v40 = vsel %vm1805_vm3, %v3834_v20, %v2001_v32  ;;  %v1866_v41 = vmul.f32 0.5, %v1838_v23  ;;  %3056 = vtanh.f32 %v1865_v17 }
 0x1c0   :  { %v2895_v35 = vpop.f32.mrf.mxu1  ;;  %v1839_v60 = vmin.f32 %v3878_v49, 0.0  ;;  %v1635_v6 = vadd.f32 %v2794_v14, %v3706_v45  ;;  %v2463_v53 = vpack.c.bf16 %v2029_v40, %v2028_v18  ;;  %3058 = vpow2.f32 %v1946_v61 }
 0x1c1   :  { %v2796_v30 = vpop.f32.mrf.mxu0  ;;  %v3047_v24 = vpop.eup %3046  ;;  %v2002_v45 = vmul.f32 %v3045_v27, %v1974_v11  ;;  %3060 = vtanh.f32 %v1866_v41  ;;  %vm1811_vm9 = vcmp.gt.f32.partialorder %v3878_v49, 0.0 }
 0x1c2   :  { %v2797_v26 = vadd.f32 %v2796_v30, %v2795_v37  ;;  %v2896_v28 = vpop.f32.mrf.mxu1  ;;  %v1948_v44 = vmul.f32 1.442695, %v1839_v60  ;;  %v3885_v63 = vadd.f32 %v2894_v31, %v1635_v6  ;;  %2493 = vst [vmem:[%s3921_s3 + $0x48] sm:$0xff] %v2463_v53   ;;  %v1867_v20 = vmul.f32 0.5, %v1839_v60  ;;  %v3049_v29 = vpop.eup %3048 }
 0x1c3   :  { %v2897_v58 = vadd.f32 %v2896_v28, %v2895_v35  ;;  %v1975_v25 = vadd.f32 1.0, %v3047_v24 }
 0x1c4   :  { %v1638_v9 = vadd.f32 %v2797_v26, %v3709_v59  ;;  %v1840_v50 = vmin.f32 %v3885_v63, 0.0  ;;  %3062 = vpow2.f32 %v1948_v44  ;;  %v2030_v59 = vsel %vm1806_vm4, %v3841_v62, %v2002_v45 }
 0x1c5   :  { %v3051_v39 = vpop.eup %3050  ;;  %v2003_v55 = vmul.f32 %v3049_v29, %v1975_v25  ;;  %3064 = vtanh.f32 %v1867_v20  ;;  %vm1812_vm10 = vcmp.gt.f32.partialorder %v3885_v63, 0.0 }
 0x1c6   :  { %v1783_v51 = vadd.f32 %v2897_v58, %v1638_v9  ;;  %v1950_v52 = vmul.f32 1.442695, %v1840_v50  ;;  %v1868_v46 = vmul.f32 0.5, %v1840_v50  ;;  %v1976_v7 = vadd.f32 1.0, %v3051_v39  ;;  %v3053_v3 = vpop.eup %3052 }
 0x1c7   :  { %v2031_v0 = vsel %vm1807_vm5, %v3847_v19, %v2003_v55 }
 0x1c8   :  { %v1841_v8 = vmin.f32 %v1783_v51, 0.0  ;;  %3066 = vpow2.f32 %v1950_v52  ;;  %v2468_v36 = vpack.c.bf16 %v2031_v0, %v2030_v59  ;;  %v2004_v10 = vmul.f32 %v3053_v3, %v1976_v7 }
 0x1c9   :  { %3068 = vtanh.f32 %v1868_v46  ;;  %vm1813_vm11 = vcmp.gt.f32.partialorder %v1783_v51, 0.0 }
 0x1ca   :  { %v1952_v22 = vmul.f32 1.442695, %v1841_v8  ;;  %v1869_v2 = vmul.f32 0.5, %v1841_v8  ;;  %v3055_v5 = vpop.eup %3054  ;;  %2494 = vst [vmem:[%s3921_s3 + $0x50] sm:$0xff] %v2468_v36   ;;  %v2032_v54 = vsel %vm1808_vm6, %v3853_v48, %v2004_v10 }
 0x1cb   :  { %v1977_v12 = vadd.f32 1.0, %v3055_v5 }
 0x1cc   :  { %3070 = vpow2.f32 %v1952_v22  ;;  %v3057_v62 = vpop.eup %3056 }
 0x1cd   :  { %3072 = vtanh.f32 %v1869_v2  ;;  %v3059_v1 = vpop.eup %3058  ;;  %v2005_v47 = vmul.f32 %v3057_v62, %v1977_v12 }
 0x1ce   :  { %v1978_v19 = vadd.f32 1.0, %v3059_v1  ;;  %v3061_v15 = vpop.eup %3060 }
 0x1cf   :  { %v2033_v21 = vsel %vm1809_vm7, %v3866_v57, %v2005_v47 }
 0x1d0   :  { %v2473_v13 = vpack.c.bf16 %v2033_v21, %v2032_v54  ;;  %v2006_v16 = vmul.f32 %v3061_v15, %v1978_v19 }
 0x1d1   :  { %v3063_v38 = vpop.eup %3062 }
 0x1d2   :  { %v1979_v34 = vadd.f32 1.0, %v3063_v38  ;;  %v3065_v42 = vpop.eup %3064  ;;  %2495 = vst [vmem:[%s3921_s3 + $0x58] sm:$0xff] %v2473_v13   ;;  %v2034_v23 = vsel %vm1810_vm8, %v3870_v4, %v2006_v16 }
 0x1d4   :  { %v2007_v56 = vmul.f32 %v3065_v42, %v1979_v34 }
 0x1d5   :  { %v3067_v17 = vpop.eup %3066 }
 0x1d6   :  { %v2035_v48 = vsel %vm1811_vm9, %v3878_v49, %v2007_v56  ;;  %v1980_v57 = vadd.f32 1.0, %v3067_v17  ;;  %v3069_v14 = vpop.eup %3068 }
 0x1d7   :  { %v2478_v33 = vpack.c.bf16 %v2035_v48, %v2034_v23 }
 0x1d8   :  { %v2008_v18 = vmul.f32 %v3069_v14, %v1980_v57 }
 0x1d9   :  { %v3071_v43 = vpop.eup %3070  ;;  %2496 = vst [vmem:[%s3921_s3 + $0x60] sm:$0xff] %v2478_v33  }
 0x1da   :  { %v1981_v32 = vadd.f32 1.0, %v3071_v43  ;;  %v3073_v37 = vpop.eup %3072  ;;  %v2036_v61 = vsel %vm1812_vm10, %v3885_v63, %v2008_v18 }
 0x1dc   :  { %v2009_v11 = vmul.f32 %v3073_v37, %v1981_v32 }
 0x1de   :  { %v2037_v4 = vsel %vm1813_vm11, %v1783_v51, %v2009_v11 }
 0x1df   :  { %v2483_v31 = vpack.c.bf16 %v2037_v4, %v2036_v61 }
 0x1e1   :  { %2497 = vst [vmem:[%s3921_s3 + $0x68] sm:$0xff] %v2483_v31  }

// kernel: _lambda_.9
= control target key start
LH: loop header
LB: loop body
LE: loop exit
PB: predicated region body
PF: predicated region fallthrough
CT: control target
= control target key end

     0   :  { %s1591_s1 = inlined_call_operand.vmem [shape: bf16[512,128], index: 1, kind: input, shape index: {}]   ;;  %s1592_s0 = inlined_call_operand.vmem [shape: bf16[120,512], index: 0, kind: input, shape index: {}]   ;;  %s1593_s2 = inlined_call_operand.vmem [shape: f32[1,128], index: 2, kind: input, shape index: {}]   ;;  %s1594_s3 = inlined_call_operand.vmem [shape: bf16[120,128], index: 3, kind: output, shape index: {}]  }
   0x1   :  { %v1133_v0 = vld [vmem:[%s1591_s1 + $0x78] sm:$0xff]   ;;  %v1137_v4 = vld [vmem:[%s1591_s1 + $0x70] sm:$0xff]   ;;  %v1141_v8 = vld [vmem:[%s1591_s1 + $0x68] sm:$0xff]  }
   0x2   :  { %v1134_v1 = vld [vmem:[%s1591_s1 + $0xf8] sm:$0xff]   ;;  %1005 = vmatprep.subr.bf16.mxu0 %v1133_v0  ;;  %v1138_v5 = vld [vmem:[%s1591_s1 + $0xf0] sm:$0xff]   ;;  %v1142_v9 = vld [vmem:[%s1591_s1 + $0xe8] sm:$0xff]  }
   0x3   :  { %v1135_v2 = vld [vmem:[%s1591_s1 + $0x38] sm:$0xff]   ;;  %1069 = vmatprep.subr.bf16.mxu1 %v1134_v1  ;;  %v1139_v6 = vld [vmem:[%s1591_s1 + $0x30] sm:$0xff]   ;;  %v1143_v10 = vld [vmem:[%s1591_s1 + $0x28] sm:$0xff]  }
   0x4   :  { %v1136_v3 = vld [vmem:[%s1591_s1 + $0xb8] sm:$0xff]   ;;  %1006 = vmatpush3.bf16.msra.mxu0 %v1135_v2  ;;  %v1140_v7 = vld [vmem:[%s1591_s1 + $0xb0] sm:$0xff]   ;;  %v1144_v11 = vld [vmem:[%s1591_s1 + $0xa8] sm:$0xff]  }
   0x5   :  { %1070 = vmatpush3.bf16.msra.mxu1 %v1136_v3  ;;  %1007 = vmatprep.subr.bf16.mxu0 %v1137_v4  ;;  %v1145_v12 = vld [vmem:[%s1591_s1 + $0x60] sm:$0xff]   ;;  %v1149_v16 = vld [vmem:[%s1591_s1 + $0x58] sm:$0xff]   ;;  %v1153_v20 = vld [vmem:[%s1591_s1 + $0x50] sm:$0xff]  }
   0x6   :  { %1071 = vmatprep.subr.bf16.mxu1 %v1138_v5  ;;  %v1146_v13 = vld [vmem:[%s1591_s1 + $0xe0] sm:$0xff]   ;;  %v1150_v17 = vld [vmem:[%s1591_s1 + $0xd8] sm:$0xff]   ;;  %v1154_v21 = vld [vmem:[%s1591_s1 + $0xd0] sm:$0xff]  }
   0x7   :  { %v1147_v14 = vld [vmem:[%s1591_s1 + $0x20] sm:$0xff]   ;;  %v1151_v18 = vld [vmem:[%s1591_s1 + $0x18] sm:$0xff]   ;;  %v1155_v22 = vld [vmem:[%s1591_s1 + $0x10] sm:$0xff]  }
   0x8   :  { %1008 = vmatpush3.bf16.msra.mxu0 %v1139_v6  ;;  %v1148_v15 = vld [vmem:[%s1591_s1 + $0xa0] sm:$0xff]   ;;  %v1152_v19 = vld [vmem:[%s1591_s1 + $0x98] sm:$0xff]   ;;  %v1156_v23 = vld [vmem:[%s1591_s1 + $0x90] sm:$0xff]  }
   0x9   :  { %1072 = vmatpush3.bf16.msra.mxu1 %v1140_v7  ;;  %1009 = vmatprep.subr.bf16.mxu0 %v1141_v8  ;;  %v1157_v24 = vld [vmem:[%s1591_s1 + $0x48] sm:$0xff]   ;;  %v1161_v28 = vld [vmem:[%s1591_s1 + $0x40] sm:$0xff]  }
   0xa   :  { %1073 = vmatprep.subr.bf16.mxu1 %v1142_v9  ;;  %v1158_v25 = vld [vmem:[%s1591_s1 + $0xc8] sm:$0xff]   ;;  %v1162_v29 = vld [vmem:[%s1591_s1 + $0xc0] sm:$0xff]  }
   0xb   :  { %v1159_v26 = vld [vmem:[%s1591_s1 + $0x8] sm:$0xff]   ;;  %v1163_v30 = vld [vmem:[%s1591_s1] sm:$0xff]  }
   0xc   :  { %1010 = vmatpush3.bf16.msra.mxu0 %v1143_v10  ;;  %v1160_v27 = vld [vmem:[%s1591_s1 + $0x88] sm:$0xff]   ;;  %v1164_v31 = vld [vmem:[%s1591_s1 + $0x80] sm:$0xff]  }
   0xd   :  { %1074 = vmatpush3.bf16.msra.mxu1 %v1144_v11  ;;  %1011 = vmatprep.subr.bf16.mxu0 %v1145_v12  ;;  %v1165_v32 = vld [vmem:[%s1592_s0] ss:$16 sps:$4 sm:$0xff]   ;;  %v1167_v33 = vld [vmem:[%s1592_s0 + $0x4] ss:$16 sps:$4 sm:$0xff]   ;;  %v1168_v34 = vld [vmem:[%s1592_s0 + $0x8] ss:$16 sps:$4 sm:$0xff]  }
   0xe   :  { %1075 = vmatprep.subr.bf16.mxu1 %v1146_v13  ;;  %v1170_v35 = vld [vmem:[%s1592_s0 + $0xc] ss:$16 sps:$4 sm:$0xff]   ;;  %494 = vmatprep.mubr.bf16.mxu0 %v1167_v33  ;;  %v1171_v36 = vld [vmem:[%s1592_s0 + $0x24] ss:$16 sps:$4 sm:$0xff]   ;;  %v1175_v38 = vld [vmem:[%s1592_s0 + $0x20] ss:$16 sps:$4 sm:$0xff]  }
   0xf   :  { %590 = vmatprep.mubr.bf16.mxu1 %v1170_v35  ;;  %v1173_v37 = vld [vmem:[%s1592_s0 + $0x2c] ss:$16 sps:$4 sm:$0xff]   ;;  %v1176_v39 = vld [vmem:[%s1592_s0 + $0x28] ss:$16 sps:$4 sm:$0xff]   ;;  %v1177_v40 = vld [vmem:[%s1592_s0 + $0x44] ss:$16 sps:$4 sm:$0xff]  }
  0x10   :  { %1012 = vmatpush3.bf16.msra.mxu0 %v1147_v14  ;;  %v1179_v41 = vld [vmem:[%s1592_s0 + $0x4c] ss:$16 sps:$4 sm:$0xff]   ;;  %v1181_v42 = vld [vmem:[%s1592_s0 + $0x40] ss:$16 sps:$4 sm:$0xff]   ;;  %v1182_v43 = vld [vmem:[%s1592_s0 + $0x48] ss:$16 sps:$4 sm:$0xff]  }
  0x11   :  { %1076 = vmatpush3.bf16.msra.mxu1 %v1148_v15  ;;  %1013 = vmatprep.subr.bf16.mxu0 %v1149_v16  ;;  %v1183_v44 = vld [vmem:[%s1592_s0 + $0x64] ss:$16 sps:$4 sm:$0xff]   ;;  %v1185_v45 = vld [vmem:[%s1592_s0 + $0x6c] ss:$16 sps:$4 sm:$0xff]   ;;  %v1187_v46 = vld [vmem:[%s1592_s0 + $0x60] ss:$16 sps:$4 sm:$0xff]  }
  0x12   :  { %1077 = vmatprep.subr.bf16.mxu1 %v1150_v17  ;;  %v1188_v47 = vld [vmem:[%s1592_s0 + $0x68] ss:$16 sps:$4 sm:$0xff]   ;;  %v1189_v48 = vld [vmem:[%s1592_s0 + $0x84] ss:$16 sps:$4 sm:$0xff]   ;;  %v1191_v49 = vld [vmem:[%s1592_s0 + $0x8c] ss:$16 sps:$4 sm:$0xff]  }
  0x13   :  { %v1193_v50 = vld [vmem:[%s1592_s0 + $0x80] ss:$16 sps:$4 sm:$0xff]   ;;  %v1194_v51 = vld [vmem:[%s1592_s0 + $0x88] ss:$16 sps:$4 sm:$0xff]   ;;  %v1195_v52 = vld [vmem:[%s1592_s0 + $0xa4] ss:$16 sps:$4 sm:$0xff]  }
  0x14   :  { %1014 = vmatpush3.bf16.msra.mxu0 %v1151_v18  ;;  %v1197_v53 = vld [vmem:[%s1592_s0 + $0xac] ss:$16 sps:$4 sm:$0xff]   ;;  %v1199_v54 = vld [vmem:[%s1592_s0 + $0xa0] ss:$16 sps:$4 sm:$0xff]   ;;  %v1200_v55 = vld [vmem:[%s1592_s0 + $0xa8] ss:$16 sps:$4 sm:$0xff]  }
  0x15   :  { %1078 = vmatpush3.bf16.msra.mxu1 %v1152_v19  ;;  %1015 = vmatprep.subr.bf16.mxu0 %v1153_v20  ;;  %v1201_v56 = vld [vmem:[%s1592_s0 + $0xc4] ss:$16 sps:$4 sm:$0xff]   ;;  %v1203_v57 = vld [vmem:[%s1592_s0 + $0xcc] ss:$16 sps:$4 sm:$0xff]   ;;  %v1205_v60 = vld [vmem:[%s1592_s0 + $0xc0] ss:$16 sps:$4 sm:$0xff]  }
  0x16   :  { %1079 = vmatprep.subr.bf16.mxu1 %v1154_v21  ;;  %v43_v58 = vld [vmem:[%s1592_s0 + $0xe0] sm:$0xff]  ;;  %v44_v59 = vld [vmem:[%s1592_s0 + $0xe8] sm:$0xff] }
  0x17   :  { %v1206_v61 = vld [vmem:[%s1592_s0 + $0xc8] ss:$16 sps:$4 sm:$0xff]   ;;  %v899_v62 = vcombine.high %v43_v58, %v43_v58  ;;  %v901_v63 = vcombine.high %v44_v59, %v44_v59  ;;  %v898_v0 = vcombine.low %v43_v58, %v43_v58  ;;  %v900_v1 = vcombine.low %v44_v59, %v44_v59  ;;  %v1480_v4 = vld [vmem:[%s1593_s2] ss:$0 sm:$0xff] }
  0x18   :  { %1016 = vmatpush3.bf16.msra.mxu0 %v1155_v22 }
  0x19   :  { %1080 = vmatpush3.bf16.msra.mxu1 %v1156_v23  ;;  %1017 = vmatprep.subr.bf16.mxu0 %v1157_v24 }
  0x1a   :  { %1081 = vmatprep.subr.bf16.mxu1 %v1158_v25 }
  0x1c   :  { %1018 = vmatpush3.bf16.msra.mxu0 %v1159_v26 }
  0x1d   :  { %1082 = vmatpush3.bf16.msra.mxu1 %v1160_v27  ;;  %1019 = vmatprep.subr.bf16.mxu0 %v1161_v28 }
  0x1e   :  { %1083 = vmatprep.subr.bf16.mxu1 %v1162_v29 }
  0x20   :  { %1020 = vmatpush3.bf16.msra.mxu0 %v1163_v30 }
  0x21   :  { %1084 = vmatpush3.bf16.msra.mxu1 %v1164_v31 }
  0x23   :  { %495 = vmatmul.mubr.bf16.vlgmr.msra.gmra.mxu0 %v1165_v32 }
  0x24   :  { %591 = vmatmul.mubr.bf16.vlgmr.msra.gmra.mxu1 %v1168_v34  ;;  %502 = vmatprep.mubr.bf16.mxu0 %v1171_v36 }
  0x25   :  { %598 = vmatprep.mubr.bf16.mxu1 %v1173_v37 }
  0x2b   :  { %503 = vmatmul.mubr.bf16.gmra.mxu0 %v1175_v38 }
  0x2c   :  { %599 = vmatmul.mubr.bf16.gmra.mxu1 %v1176_v39  ;;  %510 = vmatprep.mubr.bf16.mxu0 %v1177_v40 }
  0x2d   :  { %606 = vmatprep.mubr.bf16.mxu1 %v1179_v41 }
  0x33   :  { %511 = vmatmul.mubr.bf16.gmra.mxu0 %v1181_v42 }
  0x34   :  { %607 = vmatmul.mubr.bf16.gmra.mxu1 %v1182_v43  ;;  %518 = vmatprep.mubr.bf16.mxu0 %v1183_v44 }
  0x35   :  { %614 = vmatprep.mubr.bf16.mxu1 %v1185_v45 }
  0x3b   :  { %519 = vmatmul.mubr.bf16.gmra.mxu0 %v1187_v46 }
  0x3c   :  { %615 = vmatmul.mubr.bf16.gmra.mxu1 %v1188_v47  ;;  %526 = vmatprep.mubr.bf16.mxu0 %v1189_v48 }
  0x3d   :  { %622 = vmatprep.mubr.bf16.mxu1 %v1191_v49 }
  0x43   :  { %527 = vmatmul.mubr.bf16.gmra.mxu0 %v1193_v50 }
  0x44   :  { %623 = vmatmul.mubr.bf16.gmra.mxu1 %v1194_v51  ;;  %534 = vmatprep.mubr.bf16.mxu0 %v1195_v52 }
  0x45   :  { %630 = vmatprep.mubr.bf16.mxu1 %v1197_v53 }
  0x4b   :  { %535 = vmatmul.mubr.bf16.gmra.mxu0 %v1199_v54 }
  0x4c   :  { %631 = vmatmul.mubr.bf16.gmra.mxu1 %v1200_v55  ;;  %542 = vmatprep.mubr.bf16.mxu0 %v1201_v56 }
  0x4d   :  { %638 = vmatprep.mubr.bf16.mxu1 %v1203_v57 }
  0x53   :  { %543 = vmatmul.mubr.bf16.gmra.mxu0 %v1205_v60 }
  0x54   :  { %639 = vmatmul.mubr.bf16.gmra.mxu1 %v1206_v61  ;;  %550 = vmatprep.mubr.bf16.mxu0 %v899_v62 }
  0x55   :  { %646 = vmatprep.mubr.bf16.mxu1 %v901_v63 }
  0x5b   :  { %551 = vmatmul.mubr.bf16.gmra.mxu0 %v898_v0 }
  0x5c   :  { %647 = vmatmul.mubr.bf16.gmra.mxu1 %v900_v1 }
  0xe3   :  { %v1021_v2 = vpop.f32.mrf.mxu0 }
  0xe4   :  { %v1085_v3 = vpop.f32.mrf.mxu1 }
  0xe5   :  { %v1022_v5 = vpop.f32.mrf.mxu0 }
  0xe6   :  { %v1023_v6 = vadd.f32 %v1022_v5, %v1021_v2  ;;  %v1086_v7 = vpop.f32.mrf.mxu1 }
  0xe7   :  { %v1024_v8 = vpop.f32.mrf.mxu0  ;;  %v1087_v10 = vadd.f32 %v1086_v7, %v1085_v3 }
  0xe8   :  { %v497_v9 = vadd.f32 %v1023_v6, %v1480_v4  ;;  %v1088_v11 = vpop.f32.mrf.mxu1 }
  0xe9   :  { %v1025_v12 = vpop.f32.mrf.mxu0 }
  0xea   :  { %v1483_v13 = vadd.f32 %v1087_v10, %v497_v9  ;;  %v1026_v14 = vadd.f32 %v1025_v12, %v1024_v8  ;;  %v1089_v15 = vpop.f32.mrf.mxu1 }
  0xeb   :  { %v1027_v16 = vpop.f32.mrf.mxu0  ;;  %v1090_v19 = vadd.f32 %v1089_v15, %v1088_v11 }
  0xec   :  { %v669_v17 = vmin.f32 %v1483_v13, 0.0  ;;  %v500_v18 = vadd.f32 %v1026_v14, %v1480_v4  ;;  %v1091_v20 = vpop.f32.mrf.mxu1  ;;  %vm654_vm0 = vcmp.gt.f32.partialorder %v1483_v13, 0.0 }
  0xed   :  { %v1028_v21 = vpop.f32.mrf.mxu0 }
  0xee   :  { %v714_v22 = vmul.f32 1.442695, %v669_v17  ;;  %v1487_v23 = vadd.f32 %v1090_v19, %v500_v18  ;;  %v1029_v24 = vadd.f32 %v1028_v21, %v1027_v16  ;;  %v1092_v25 = vpop.f32.mrf.mxu1  ;;  %v684_v27 = vmul.f32 0.5, %v669_v17 }
  0xef   :  { %v1030_v26 = vpop.f32.mrf.mxu0  ;;  %v1093_v30 = vadd.f32 %v1092_v25, %v1091_v20 }
  0xf0   :  { %v670_v28 = vmin.f32 %v1487_v23, 0.0  ;;  %v505_v29 = vadd.f32 %v1029_v24, %v1480_v4  ;;  %v1094_v31 = vpop.f32.mrf.mxu1  ;;  %1211 = vpow2.f32 %v714_v22  ;;  %vm655_vm1 = vcmp.gt.f32.partialorder %v1487_v23, 0.0 }
  0xf1   :  { %v1031_v32 = vpop.f32.mrf.mxu0  ;;  %1213 = vtanh.f32 %v684_v27 }
  0xf2   :  { %v716_v33 = vmul.f32 1.442695, %v670_v28  ;;  %v1491_v34 = vadd.f32 %v1093_v30, %v505_v29  ;;  %v1032_v35 = vadd.f32 %v1031_v32, %v1030_v26  ;;  %v1095_v36 = vpop.f32.mrf.mxu1  ;;  %v685_v37 = vmul.f32 0.5, %v670_v28 }
  0xf3   :  { %v1033_v38 = vpop.f32.mrf.mxu0  ;;  %v1096_v41 = vadd.f32 %v1095_v36, %v1094_v31 }
  0xf4   :  { %v671_v39 = vmin.f32 %v1491_v34, 0.0  ;;  %v508_v40 = vadd.f32 %v1032_v35, %v1480_v4  ;;  %v1097_v42 = vpop.f32.mrf.mxu1  ;;  %1215 = vpow2.f32 %v716_v33  ;;  %vm656_vm2 = vcmp.gt.f32.partialorder %v1491_v34, 0.0 }
  0xf5   :  { %v1034_v43 = vpop.f32.mrf.mxu0  ;;  %1217 = vtanh.f32 %v685_v37 }
  0xf6   :  { %v718_v44 = vmul.f32 1.442695, %v671_v39  ;;  %v1495_v45 = vadd.f32 %v1096_v41, %v508_v40  ;;  %v1035_v46 = vadd.f32 %v1034_v43, %v1033_v38  ;;  %v1098_v47 = vpop.f32.mrf.mxu1  ;;  %v686_v49 = vmul.f32 0.5, %v671_v39 }
  0xf7   :  { %v1036_v48 = vpop.f32.mrf.mxu0  ;;  %v1099_v52 = vadd.f32 %v1098_v47, %v1097_v42 }
  0xf8   :  { %v672_v50 = vmin.f32 %v1495_v45, 0.0  ;;  %v513_v51 = vadd.f32 %v1035_v46, %v1480_v4  ;;  %v1100_v53 = vpop.f32.mrf.mxu1  ;;  %1219 = vpow2.f32 %v718_v44  ;;  %vm657_vm3 = vcmp.gt.f32.partialorder %v1495_v45, 0.0 }
  0xf9   :  { %v1037_v54 = vpop.f32.mrf.mxu0  ;;  %1221 = vtanh.f32 %v686_v49 }
  0xfa   :  { %v720_v55 = vmul.f32 1.442695, %v672_v50  ;;  %v1499_v56 = vadd.f32 %v1099_v52, %v513_v51  ;;  %v1038_v57 = vadd.f32 %v1037_v54, %v1036_v48  ;;  %v1101_v58 = vpop.f32.mrf.mxu1  ;;  %v687_v59 = vmul.f32 0.5, %v672_v50 }
  0xfb   :  { %v1039_v60 = vpop.f32.mrf.mxu0  ;;  %v1102_v63 = vadd.f32 %v1101_v58, %v1100_v53 }
  0xfc   :  { %v673_v61 = vmin.f32 %v1499_v56, 0.0  ;;  %v516_v62 = vadd.f32 %v1038_v57, %v1480_v4  ;;  %v1103_v0 = vpop.f32.mrf.mxu1  ;;  %1223 = vpow2.f32 %v720_v55  ;;  %vm658_vm4 = vcmp.gt.f32.partialorder %v1499_v56, 0.0 }
  0xfd   :  { %v1040_v1 = vpop.f32.mrf.mxu0  ;;  %v1212_v2 = vpop.eup %1211  ;;  %1225 = vtanh.f32 %v687_v59 }
  0xfe   :  { %v722_v3 = vmul.f32 1.442695, %v673_v61  ;;  %v1503_v5 = vadd.f32 %v1102_v63, %v516_v62  ;;  %v1041_v6 = vadd.f32 %v1040_v1, %v1039_v60  ;;  %v1104_v7 = vpop.f32.mrf.mxu1  ;;  %v744_v8 = vadd.f32 1.0, %v1212_v2  ;;  %v1214_v16 = vpop.eup %1213 }
  0xff   :  { %v1042_v9 = vpop.f32.mrf.mxu0  ;;  %v688_v10 = vmul.f32 0.5, %v673_v61  ;;  %v1105_v14 = vadd.f32 %v1104_v7, %v1103_v0 }
 0x100   :  { %v674_v11 = vmin.f32 %v1503_v5, 0.0  ;;  %v521_v12 = vadd.f32 %v1041_v6, %v1480_v4  ;;  %v1106_v15 = vpop.f32.mrf.mxu1  ;;  %1227 = vpow2.f32 %v722_v3  ;;  %v759_v24 = vmul.f32 %v1214_v16, %v744_v8 }
 0x101   :  { %v1043_v17 = vpop.f32.mrf.mxu0  ;;  %v1216_v18 = vpop.eup %1215  ;;  %1229 = vtanh.f32 %v688_v10  ;;  %vm659_vm5 = vcmp.gt.f32.partialorder %v1503_v5, 0.0 }
 0x102   :  { %v724_v19 = vmul.f32 1.442695, %v674_v11  ;;  %v1507_v20 = vadd.f32 %v1105_v14, %v521_v12  ;;  %v1044_v21 = vadd.f32 %v1043_v17, %v1042_v9  ;;  %v1107_v22 = vpop.f32.mrf.mxu1  ;;  %v745_v25 = vadd.f32 1.0, %v1216_v18  ;;  %v1218_v28 = vpop.eup %1217 }
 0x103   :  { %v689_v26 = vmul.f32 0.5, %v674_v11  ;;  %v1045_v27 = vpop.f32.mrf.mxu0  ;;  %v1108_v31 = vadd.f32 %v1107_v22, %v1106_v15  ;;  %v774_v41 = vsel %vm654_vm0, %v1483_v13, %v759_v24 }
 0x104   :  { %v675_v29 = vmin.f32 %v1507_v20, 0.0  ;;  %v524_v30 = vadd.f32 %v1044_v21, %v1480_v4  ;;  %v1109_v32 = vpop.f32.mrf.mxu1  ;;  %v760_v33 = vmul.f32 %v1218_v28, %v745_v25  ;;  %1231 = vpow2.f32 %v724_v19 }
 0x105   :  { %v1046_v35 = vpop.f32.mrf.mxu0  ;;  %v1220_v36 = vpop.eup %1219  ;;  %1233 = vtanh.f32 %v689_v26  ;;  %vm660_vm6 = vcmp.gt.f32.partialorder %v1507_v20, 0.0 }
 0x106   :  { %v726_v37 = vmul.f32 1.442695, %v675_v29  ;;  %v1513_v38 = vadd.f32 %v1108_v31, %v524_v30  ;;  %v1047_v39 = vadd.f32 %v1046_v35, %v1045_v27  ;;  %v1110_v40 = vpop.f32.mrf.mxu1  ;;  %v775_v42 = vsel %vm655_vm1, %v1487_v23, %v760_v33  ;;  %v1222_v50 = vpop.eup %1221 }
 0x107   :  { %v746_v43 = vadd.f32 1.0, %v1220_v36  ;;  %v1048_v44 = vpop.f32.mrf.mxu0  ;;  %v967_v46 = vpack.c.bf16 %v775_v42, %v774_v41  ;;  %v690_v47 = vmul.f32 0.5, %v675_v29  ;;  %v1111_v52 = vadd.f32 %v1110_v40, %v1109_v32 }
 0x108   :  { %v676_v48 = vmin.f32 %v1513_v38, 0.0  ;;  %v1112_v49 = vpop.f32.mrf.mxu1  ;;  %1235 = vpow2.f32 %v726_v37  ;;  %v529_v51 = vadd.f32 %v1047_v39, %v1480_v4  ;;  %vm661_vm7 = vcmp.gt.f32.partialorder %v1513_v38, 0.0 }
 0x109   :  { %v1049_v53 = vpop.f32.mrf.mxu0  ;;  %v1224_v54 = vpop.eup %1223  ;;  %968 = vst [vmem:[%s1594_s3] sm:$0xff] %v967_v46   ;;  %v761_v13 = vmul.f32 %v1222_v50, %v746_v43  ;;  %1237 = vtanh.f32 %v690_v47 }
 0x10a   :  { %v728_v23 = vmul.f32 1.442695, %v676_v48  ;;  %v1050_v55 = vadd.f32 %v1049_v53, %v1048_v44  ;;  %v1113_v57 = vpop.f32.mrf.mxu1  ;;  %v747_v58 = vadd.f32 1.0, %v1224_v54  ;;  %v691_v59 = vmul.f32 0.5, %v676_v48  ;;  %v1226_v62 = vpop.eup %1225 }
 0x10b   :  { %v1522_v60 = vadd.f32 %v1111_v52, %v529_v51  ;;  %v1051_v61 = vpop.f32.mrf.mxu0  ;;  %v1114_v0 = vadd.f32 %v1113_v57, %v1112_v49  ;;  %v776_v8 = vsel %vm656_vm2, %v1491_v34, %v761_v13 }
 0x10c   :  { %v532_v63 = vadd.f32 %v1050_v55, %v1480_v4  ;;  %v1115_v1 = vpop.f32.mrf.mxu1  ;;  %v762_v2 = vmul.f32 %v1226_v62, %v747_v58  ;;  %1239 = vpow2.f32 %v728_v23 }
 0x10d   :  { %v677_v3 = vmin.f32 %v1522_v60, 0.0  ;;  %v1052_v6 = vpop.f32.mrf.mxu0  ;;  %v1228_v7 = vpop.eup %1227  ;;  %1241 = vtanh.f32 %v691_v59  ;;  %vm662_vm8 = vcmp.gt.f32.partialorder %v1522_v60, 0.0 }
 0x10e   :  { %v1529_v9 = vadd.f32 %v1114_v0, %v532_v63  ;;  %v1053_v10 = vadd.f32 %v1052_v6, %v1051_v61  ;;  %v1116_v11 = vpop.f32.mrf.mxu1  ;;  %v777_v12 = vsel %vm657_vm3, %v1495_v45, %v762_v2  ;;  %v748_v14 = vadd.f32 1.0, %v1228_v7  ;;  %v1230_v34 = vpop.eup %1229 }
 0x10f   :  { %v730_v15 = vmul.f32 1.442695, %v677_v3  ;;  %v1054_v16 = vpop.f32.mrf.mxu0  ;;  %v972_v17 = vpack.c.bf16 %v777_v12, %v776_v8  ;;  %v692_v18 = vmul.f32 0.5, %v677_v3  ;;  %v1117_v24 = vadd.f32 %v1116_v11, %v1115_v1 }
 0x110   :  { %v678_v19 = vmin.f32 %v1529_v9, 0.0  ;;  %v537_v21 = vadd.f32 %v1053_v10, %v1480_v4  ;;  %v1118_v22 = vpop.f32.mrf.mxu1  ;;  %v763_v45 = vmul.f32 %v1230_v34, %v748_v14  ;;  %vm663_vm9 = vcmp.gt.f32.partialorder %v1529_v9, 0.0 }
 0x111   :  { %v1055_v25 = vpop.f32.mrf.mxu0  ;;  %v1232_v26 = vpop.eup %1231  ;;  %999 = vst [vmem:[%s1594_s3 + $0x8] sm:$0xff] %v972_v17   ;;  %1243 = vpow2.f32 %v730_v15 }
 0x112   :  { %v732_v27 = vmul.f32 1.442695, %v678_v19  ;;  %v1056_v28 = vadd.f32 %v1055_v25, %v1054_v16  ;;  %v1119_v29 = vpop.f32.mrf.mxu1  ;;  %v749_v30 = vadd.f32 1.0, %v1232_v26  ;;  %v693_v31 = vmul.f32 0.5, %v678_v19  ;;  %v1234_v35 = vpop.eup %1233 }
 0x113   :  { %v1537_v32 = vadd.f32 %v1117_v24, %v537_v21  ;;  %v1057_v33 = vpop.f32.mrf.mxu0  ;;  %1245 = vtanh.f32 %v692_v18  ;;  %v1120_v37 = vadd.f32 %v1119_v29, %v1118_v22  ;;  %v778_v44 = vsel %vm658_vm4, %v1499_v56, %v763_v45 }
 0x114   :  { %v540_v36 = vadd.f32 %v1056_v28, %v1480_v4  ;;  %v1121_v39 = vpop.f32.mrf.mxu1  ;;  %v764_v40 = vmul.f32 %v1234_v35, %v749_v30  ;;  %1247 = vpow2.f32 %v732_v27 }
 0x115   :  { %v679_v41 = vmin.f32 %v1537_v32, 0.0  ;;  %v1058_v42 = vpop.f32.mrf.mxu0  ;;  %v1236_v43 = vpop.eup %1235  ;;  %1249 = vtanh.f32 %v693_v31  ;;  %vm664_vm10 = vcmp.gt.f32.partialorder %v1537_v32, 0.0 }
 0x116   :  { %v1544_v46 = vadd.f32 %v1120_v37, %v540_v36  ;;  %v1059_v47 = vadd.f32 %v1058_v42, %v1057_v33  ;;  %v1122_v48 = vpop.f32.mrf.mxu1  ;;  %v779_v49 = vsel %vm659_vm5, %v1503_v5, %v764_v40  ;;  %v750_v50 = vadd.f32 1.0, %v1236_v43  ;;  %v1238_v56 = vpop.eup %1237 }
 0x117   :  { %v734_v51 = vmul.f32 1.442695, %v679_v41  ;;  %v1060_v52 = vpop.f32.mrf.mxu0  ;;  %v977_v53 = vpack.c.bf16 %v779_v49, %v778_v44  ;;  %v694_v54 = vmul.f32 0.5, %v679_v41  ;;  %v1123_v57 = vadd.f32 %v1122_v48, %v1121_v39 }
 0x118   :  { %v680_v13 = vmin.f32 %v1544_v46, 0.0  ;;  %v545_v23 = vadd.f32 %v1059_v47, %v1480_v4  ;;  %v1124_v55 = vpop.f32.mrf.mxu1  ;;  %v765_v63 = vmul.f32 %v1238_v56, %v750_v50  ;;  %vm665_vm11 = vcmp.gt.f32.partialorder %v1544_v46, 0.0 }
 0x119   :  { %v1061_v58 = vpop.f32.mrf.mxu0  ;;  %v1240_v59 = vpop.eup %1239  ;;  %1000 = vst [vmem:[%s1594_s3 + $0x10] sm:$0xff] %v977_v53   ;;  %1251 = vpow2.f32 %v734_v51 }
 0x11a   :  { %v736_v5 = vmul.f32 1.442695, %v680_v13  ;;  %v1062_v61 = vadd.f32 %v1061_v58, %v1060_v52  ;;  %v1125_v62 = vpop.f32.mrf.mxu1  ;;  %v751_v0 = vadd.f32 1.0, %v1240_v59  ;;  %v695_v1 = vmul.f32 0.5, %v680_v13  ;;  %v1242_v6 = vpop.eup %1241 }
 0x11b   :  { %v1552_v2 = vadd.f32 %v1123_v57, %v545_v23  ;;  %v1063_v3 = vpop.f32.mrf.mxu0  ;;  %1253 = vtanh.f32 %v694_v54  ;;  %v1126_v8 = vadd.f32 %v1125_v62, %v1124_v55  ;;  %v780_v19 = vsel %vm660_vm6, %v1507_v20, %v765_v63 }
 0x11c   :  { %v548_v7 = vadd.f32 %v1062_v61, %v1480_v4  ;;  %v1127_v10 = vpop.f32.mrf.mxu1  ;;  %v766_v11 = vmul.f32 %v1242_v6, %v751_v0  ;;  %1255 = vpow2.f32 %v736_v5 }
 0x11d   :  { %v681_v12 = vmin.f32 %v1552_v2, 0.0  ;;  %v1064_v14 = vpop.f32.mrf.mxu0  ;;  %1257 = vtanh.f32 %v695_v1  ;;  %vm666_vm12 = vcmp.gt.f32.partialorder %v1552_v2, 0.0 }
 0x11e   :  { %v1558_v15 = vadd.f32 %v1126_v8, %v548_v7  ;;  %v1065_v16 = vadd.f32 %v1064_v14, %v1063_v3  ;;  %v1128_v17 = vpop.f32.mrf.mxu1  ;;  %v1244_v18 = vpop.eup %1243  ;;  %v781_v21 = vsel %vm661_vm7, %v1513_v38, %v766_v11 }
 0x11f   :  { %v738_v22 = vmul.f32 1.442695, %v681_v12  ;;  %v1066_v34 = vpop.f32.mrf.mxu0  ;;  %v982_v24 = vpack.c.bf16 %v781_v21, %v780_v19  ;;  %v752_v25 = vadd.f32 1.0, %v1244_v18  ;;  %v696_v26 = vmul.f32 0.5, %v681_v12 }
 0x120   :  { %v682_v45 = vmin.f32 %v1558_v15, 0.0  ;;  %v1130_v27 = vpop.f32.mrf.mxu1  ;;  %v1246_v28 = vpop.eup %1245  ;;  %v553_v29 = vadd.f32 %v1065_v16, %v1480_v4  ;;  %v1129_v30 = vadd.f32 %v1128_v17, %v1127_v10  ;;  %vm667_vm13 = vcmp.gt.f32.partialorder %v1558_v15, 0.0 }
 0x121   :  { %v1067_v31 = vpop.f32.mrf.mxu0  ;;  %v1248_v33 = vpop.eup %1247  ;;  %1001 = vst [vmem:[%s1594_s3 + $0x18] sm:$0xff] %v982_v24   ;;  %1259 = vpow2.f32 %v738_v22  ;;  %v767_v35 = vmul.f32 %v1246_v28, %v752_v25 }
 0x122   :  { %v740_v20 = vmul.f32 1.442695, %v682_v45  ;;  %v1131_v38 = vpop.f32.mrf.mxu1  ;;  %v753_v36 = vadd.f32 1.0, %v1248_v33  ;;  %v697_v37 = vmul.f32 0.5, %v682_v45  ;;  %v649_v39 = vadd.f32 %v1129_v30, %v553_v29  ;;  %v1250_v40 = vpop.eup %1249 }
 0x123   :  { %1261 = vtanh.f32 %v696_v26  ;;  %v782_v43 = vsel %vm662_vm8, %v1522_v60, %v767_v35 }
 0x124   :  { %v768_v41 = vmul.f32 %v1250_v40, %v753_v36  ;;  %1263 = vpow2.f32 %v740_v20  ;;  %v683_v42 = vmin.f32 %v649_v39, 0.0  ;;  %vm668_vm14 = vcmp.gt.f32.partialorder %v649_v39, 0.0 }
 0x125   :  { %1265 = vtanh.f32 %v697_v37 }
 0x126   :  { %v1252_v4 = vpop.eup %1251  ;;  %v783_v44 = vsel %vm663_vm9, %v1529_v9, %v768_v41  ;;  %v742_v47 = vmul.f32 1.442695, %v683_v42  ;;  %v698_v50 = vmul.f32 0.5, %v683_v42 }
 0x127   :  { %v987_v48 = vpack.c.bf16 %v783_v44, %v782_v43  ;;  %v754_v49 = vadd.f32 1.0, %v1252_v4 }
 0x128   :  { %v1254_v51 = vpop.eup %1253  ;;  %1267 = vpow2.f32 %v742_v47 }
 0x129   :  { %v1256_v52 = vpop.eup %1255  ;;  %1002 = vst [vmem:[%s1594_s3 + $0x20] sm:$0xff] %v987_v48   ;;  %v769_v53 = vmul.f32 %v1254_v51, %v754_v49  ;;  %1269 = vtanh.f32 %v698_v50 }
 0x12a   :  { %v755_v54 = vadd.f32 1.0, %v1256_v52  ;;  %v1258_v13 = vpop.eup %1257 }
 0x12b   :  { %v784_v9 = vsel %vm664_vm10, %v1537_v32, %v769_v53 }
 0x12c   :  { %v770_v23 = vmul.f32 %v1258_v13, %v755_v54 }
 0x12e   :  { %v1260_v60 = vpop.eup %1259  ;;  %v785_v55 = vsel %vm665_vm11, %v1544_v46, %v770_v23 }
 0x12f   :  { %v992_v56 = vpack.c.bf16 %v785_v55, %v784_v9  ;;  %v756_v57 = vadd.f32 1.0, %v1260_v60 }
 0x130   :  { %v1262_v58 = vpop.eup %1261 }
 0x131   :  { %v1264_v59 = vpop.eup %1263  ;;  %1003 = vst [vmem:[%s1594_s3 + $0x28] sm:$0xff] %v992_v56   ;;  %v771_v5 = vmul.f32 %v1262_v58, %v756_v57 }
 0x132   :  { %v757_v61 = vadd.f32 1.0, %v1264_v59  ;;  %v1266_v62 = vpop.eup %1265 }
 0x133   :  { %v786_v32 = vsel %vm666_vm12, %v1552_v2, %v771_v5 }
 0x134   :  { %v772_v63 = vmul.f32 %v1266_v62, %v757_v61 }
 0x135   :  { %v1268_v0 = vpop.eup %1267 }
 0x136   :  { %v787_v46 = vsel %vm667_vm13, %v1558_v15, %v772_v63  ;;  %v758_v3 = vadd.f32 1.0, %v1268_v0  ;;  %v1270_v6 = vpop.eup %1269 }
 0x137   :  { %v997_v1 = vpack.c.bf16 %v787_v46, %v786_v32 }
 0x138   :  { %v773_v7 = vmul.f32 %v1270_v6, %v758_v3 }
 0x139   :  { %1004 = vst [vmem:[%s1594_s3 + $0x30] sm:$0xff] %v997_v1  }
 0x13a   :  { %v788_v8 = vsel %vm668_vm14, %v649_v39, %v773_v7 }
 0x13b   :  { %v963_v10 = vpack.c.bf16 %v788_v8, %v788_v8 }
 0x13d   :  { %864 = vst [vmem:[%s1594_s3 + $0x38] sm:$0xf] %v963_v10 }

// kernel: _lambda_.10
= control target key start
LH: loop header
LB: loop body
LE: loop exit
PB: predicated region body
PF: predicated region fallthrough
CT: control target
= control target key end

     0   :  { %v951_v34 = vmov 0.0   ;;  %vm952_vm0 = vmmov 0   ;;  %s1176_s1 = inlined_call_operand.vmem [shape: bf16[640,128], index: 1, kind: input, shape index: {}]   ;;  %s1177_s0 = inlined_call_operand.vmem [shape: bf16[40,640], index: 0, kind: input, shape index: {}]   ;;  %s1178_s2 = inlined_call_operand.vmem [shape: f32[1,128], index: 2, kind: input, shape index: {}]   ;;  %s1179_s3 = inlined_call_operand.vmem [shape: bf16[40,128], index: 3, kind: output, shape index: {}]  }
   0x1   :  { %v872_v0 = vld [vmem:[%s1176_s1 + $0x78] sm:$0xff]   ;;  %v876_v4 = vld [vmem:[%s1176_s1 + $0x70] sm:$0xff]   ;;  %v880_v8 = vld [vmem:[%s1176_s1 + $0x68] sm:$0xff]  }
   0x2   :  { %v873_v1 = vld [vmem:[%s1176_s1 + $0xf8] sm:$0xff]   ;;  %747 = vmatprep.subr.bf16.mxu0 %v872_v0  ;;  %v877_v5 = vld [vmem:[%s1176_s1 + $0xf0] sm:$0xff]   ;;  %v881_v9 = vld [vmem:[%s1176_s1 + $0xe8] sm:$0xff]  }
   0x3   :  { %v874_v2 = vld [vmem:[%s1176_s1 + $0x38] sm:$0xff]   ;;  %781 = vmatprep.subr.bf16.mxu1 %v873_v1  ;;  %v878_v6 = vld [vmem:[%s1176_s1 + $0x30] sm:$0xff]   ;;  %v882_v10 = vld [vmem:[%s1176_s1 + $0x28] sm:$0xff]  }
   0x4   :  { %v875_v3 = vld [vmem:[%s1176_s1 + $0xb8] sm:$0xff]   ;;  %748 = vmatpush3.bf16.msra.mxu0 %v874_v2  ;;  %v879_v7 = vld [vmem:[%s1176_s1 + $0xb0] sm:$0xff]   ;;  %v883_v11 = vld [vmem:[%s1176_s1 + $0xa8] sm:$0xff]  }
   0x5   :  { %782 = vmatpush3.bf16.msra.mxu1 %v875_v3  ;;  %749 = vmatprep.subr.bf16.mxu0 %v876_v4  ;;  %v884_v12 = vld [vmem:[%s1176_s1 + $0x60] sm:$0xff]   ;;  %v888_v16 = vld [vmem:[%s1176_s1 + $0x58] sm:$0xff]   ;;  %v892_v20 = vld [vmem:[%s1176_s1 + $0x50] sm:$0xff]  }
   0x6   :  { %783 = vmatprep.subr.bf16.mxu1 %v877_v5  ;;  %v885_v13 = vld [vmem:[%s1176_s1 + $0xe0] sm:$0xff]   ;;  %v889_v17 = vld [vmem:[%s1176_s1 + $0xd8] sm:$0xff]   ;;  %v893_v21 = vld [vmem:[%s1176_s1 + $0xd0] sm:$0xff]  }
   0x7   :  { %v886_v14 = vld [vmem:[%s1176_s1 + $0x20] sm:$0xff]   ;;  %v890_v18 = vld [vmem:[%s1176_s1 + $0x18] sm:$0xff]   ;;  %v894_v22 = vld [vmem:[%s1176_s1 + $0x10] sm:$0xff]  }
   0x8   :  { %750 = vmatpush3.bf16.msra.mxu0 %v878_v6  ;;  %v887_v15 = vld [vmem:[%s1176_s1 + $0xa0] sm:$0xff]   ;;  %v891_v19 = vld [vmem:[%s1176_s1 + $0x98] sm:$0xff]   ;;  %v895_v23 = vld [vmem:[%s1176_s1 + $0x90] sm:$0xff]  }
   0x9   :  { %784 = vmatpush3.bf16.msra.mxu1 %v879_v7  ;;  %751 = vmatprep.subr.bf16.mxu0 %v880_v8  ;;  %v896_v24 = vld [vmem:[%s1176_s1 + $0x48] sm:$0xff]   ;;  %v900_v28 = vld [vmem:[%s1176_s1 + $0x40] sm:$0xff]   ;;  %v910_v37 = vld [vmem:[%s1176_s1 + $0x138] sm:$0xff]  }
   0xa   :  { %785 = vmatprep.subr.bf16.mxu1 %v881_v9  ;;  %v897_v25 = vld [vmem:[%s1176_s1 + $0xc8] sm:$0xff]   ;;  %v901_v29 = vld [vmem:[%s1176_s1 + $0xc0] sm:$0xff]   ;;  %v911_v38 = vld [vmem:[%s1176_s1 + $0x130] sm:$0xff]  }
   0xb   :  { %v898_v26 = vld [vmem:[%s1176_s1 + $0x8] sm:$0xff]   ;;  %v902_v30 = vld [vmem:[%s1176_s1] sm:$0xff]   ;;  %v28_v44 = vld [vmem:[%s1177_s0 + $0x58] sm:$0xff] }
   0xc   :  { %752 = vmatpush3.bf16.msra.mxu0 %v882_v10  ;;  %v899_v27 = vld [vmem:[%s1176_s1 + $0x88] sm:$0xff]   ;;  %v903_v31 = vld [vmem:[%s1176_s1 + $0x80] sm:$0xff]   ;;  %v27_v45 = vld [vmem:[%s1177_s0 + $0x50] sm:$0xff]  ;;  %v684_v46 = vcombine.high %v28_v44, %v28_v44  ;;  %v683_v51 = vcombine.low %v28_v44, %v28_v44 }
   0xd   :  { %786 = vmatpush3.bf16.msra.mxu1 %v883_v11  ;;  %753 = vmatprep.subr.bf16.mxu0 %v884_v12  ;;  %v904_v32 = vld [vmem:[%s1177_s0] ss:$20 sps:$4 sm:$0xff]   ;;  %v906_v33 = vld [vmem:[%s1177_s0 + $0x4] ss:$20 sps:$4 sm:$0xff]   ;;  %v907_v35 = vld [vmem:[%s1177_s0 + $0x8] ss:$20 sps:$4 sm:$0xff]   ;;  %v682_v47 = vcombine.high %v27_v45, %v27_v45  ;;  %v681_v49 = vcombine.low %v27_v45, %v27_v45 }
   0xe   :  { %787 = vmatprep.subr.bf16.mxu1 %v885_v13  ;;  %v909_v36 = vld [vmem:[%s1177_s0 + $0xc] ss:$20 sps:$4 sm:$0xff]   ;;  %459 = vmatprep.mubr.bf16.mxu0 %v906_v33  ;;  %v915_v40 = vld [vmem:[%s1177_s0 + $0x34] ss:$20 sps:$4 sm:$0xff]   ;;  %v918_v43 = vld [vmem:[%s1177_s0 + $0x30] ss:$20 sps:$4 sm:$0xff]  }
   0xf   :  { %515 = vmatprep.mubr.bf16.mxu1 %v909_v36  ;;  %v912_v39 = vld [vmem:[%s1177_s0 + $0x2c] ss:$20 sps:$4 sm:$0xff]   ;;  %v914_v41 = vld [vmem:[%s1177_s0 + $0x28] ss:$20 sps:$4 sm:$0xff]   ;;  %v925_v52 = vld [vmem:[%s1176_s1 + $0x110] sm:$0xff]  }
  0x10   :  { %754 = vmatpush3.bf16.msra.mxu0 %v886_v14  ;;  %v917_v42 = vld [vmem:[%s1176_s1 + $0x128] sm:$0xff]   ;;  %v919_v48 = vld [vmem:[%s1176_s1 + $0x120] sm:$0xff]   ;;  %v921_v50 = vld [vmem:[%s1176_s1 + $0x118] sm:$0xff]  }
  0x11   :  { %788 = vmatpush3.bf16.msra.mxu1 %v887_v15  ;;  %755 = vmatprep.subr.bf16.mxu0 %v888_v16  ;;  %v926_v53 = vld [vmem:[%s1176_s1 + $0x108] sm:$0xff]   ;;  %v927_v54 = vld [vmem:[%s1176_s1 + $0x100] sm:$0xff]  }
  0x12   :  { %789 = vmatprep.subr.bf16.mxu1 %v889_v17  ;;  %v928_v55 = vld [vmem:[%s1177_s0 + $0x10] ss:$20 sps:$4 sm:$0xff]   ;;  %v929_v56 = vld [vmem:[%s1177_s0 + $0x38] ss:$20 sps:$4 sm:$0xff]   ;;  %v930_v57 = vld [vmem:[%s1177_s0 + $0x60] ss:$0 sps:$4 sm:$0xff]  }
  0x14   :  { %756 = vmatpush3.bf16.msra.mxu0 %v890_v18 }
  0x15   :  { %790 = vmatpush3.bf16.msra.mxu1 %v891_v19  ;;  %757 = vmatprep.subr.bf16.mxu0 %v892_v20  ;;  %v670_v19 = vld [vmem:[%s1178_s2] ss:$0 sm:$0xff] }
  0x16   :  { %791 = vmatprep.subr.bf16.mxu1 %v893_v21 }
  0x18   :  { %758 = vmatpush3.bf16.msra.mxu0 %v894_v22 }
  0x19   :  { %792 = vmatpush3.bf16.msra.mxu1 %v895_v23  ;;  %759 = vmatprep.subr.bf16.mxu0 %v896_v24 }
  0x1a   :  { %793 = vmatprep.subr.bf16.mxu1 %v897_v25 }
  0x1c   :  { %760 = vmatpush3.bf16.msra.mxu0 %v898_v26 }
  0x1d   :  { %794 = vmatpush3.bf16.msra.mxu1 %v899_v27  ;;  %761 = vmatprep.subr.bf16.mxu0 %v900_v28 }
  0x1e   :  { %795 = vmatprep.subr.bf16.mxu1 %v901_v29 }
  0x20   :  { %762 = vmatpush3.bf16.msra.mxu0 %v902_v30 }
  0x21   :  { %796 = vmatpush3.bf16.msra.mxu1 %v903_v31  ;;  %826 = vmatprep.subr.bf16.mxu0 %v951_v34 }
  0x22   :  { %854 = vmatprep.subr.bf16.mxu1 %v951_v34 }
  0x23   :  { %460 = vmatmul.mubr.bf16.vlgmr.msra.gmra.mxu0 %v904_v32 }
  0x24   :  { %516 = vmatmul.mubr.bf16.vlgmr.msra.gmra.mxu1 %v907_v35  ;;  %827 = vmatpush3.bf16.msra.mxu0 %v910_v37 }
  0x25   :  { %862 = vmatpush3.bf16.msra.mxu1 %v910_v37  ;;  %828 = vmatprep.subr.bf16.mxu0 %v951_v34 }
  0x26   :  { %855 = vmatprep.subr.bf16.mxu1 %v951_v34  ;;  %467 = vmatprep.mubr.bf16.mxu0 %v912_v39 }
  0x27   :  { %523 = vmatprep.mubr.bf16.mxu1 %v915_v40 }
  0x28   :  { %829 = vmatpush3.bf16.msra.mxu0 %v911_v38 }
  0x29   :  { %863 = vmatpush3.bf16.msra.mxu1 %v911_v38  ;;  %830 = vmatprep.subr.bf16.mxu0 %v951_v34 }
  0x2a   :  { %856 = vmatprep.subr.bf16.mxu1 %v951_v34 }
  0x2b   :  { %468 = vmatmul.mubr.bf16.gmra.mxu0 %v914_v41 }
  0x2c   :  { %831 = vmatpush3.bf16.msra.mxu0 %v917_v42  ;;  %524 = vmatmul.mubr.bf16.gmra.mxu1 %v918_v43 }
  0x2d   :  { %864 = vmatpush3.bf16.msra.mxu1 %v917_v42  ;;  %832 = vmatprep.subr.bf16.mxu0 %v951_v34 }
  0x2e   :  { %857 = vmatprep.subr.bf16.mxu1 %v951_v34  ;;  %531 = vmatprep.mubr.bf16.mxu1 %v684_v46 }
  0x2f   :  { %475 = vmatprep.mubr.bf16.mxu0 %v682_v47 }
  0x30   :  { %833 = vmatpush3.bf16.msra.mxu0 %v919_v48 }
  0x31   :  { %865 = vmatpush3.bf16.msra.mxu1 %v919_v48  ;;  %834 = vmatprep.subr.bf16.mxu0 %v951_v34 }
  0x32   :  { %858 = vmatprep.subr.bf16.mxu1 %v951_v34 }
  0x33   :  { %476 = vmatmul.mubr.bf16.gmra.mxu0 %v681_v49 }
  0x34   :  { %835 = vmatpush3.bf16.msra.mxu0 %v921_v50  ;;  %532 = vmatmul.mubr.bf16.gmra.mxu1 %v683_v51 }
  0x35   :  { %866 = vmatpush3.bf16.msra.mxu1 %v921_v50  ;;  %836 = vmatprep.subr.bf16.mxu0 %v951_v34 }
  0x36   :  { %859 = vmatprep.subr.bf16.mxu1 %v951_v34  ;;  %842 = vmatprep.mubr.msk.bf16.mxu0 %vm952_vm0, %v951_v34 }
  0x37   :  { %846 = vmatprep.mubr.msk.bf16.mxu1 %vm952_vm0, %v951_v34 }
  0x38   :  { %837 = vmatpush3.bf16.msra.mxu0 %v925_v52 }
  0x39   :  { %867 = vmatpush3.bf16.msra.mxu1 %v925_v52  ;;  %838 = vmatprep.subr.bf16.mxu0 %v951_v34 }
  0x3a   :  { %860 = vmatprep.subr.bf16.mxu1 %v951_v34 }
  0x3c   :  { %839 = vmatpush3.bf16.msra.mxu0 %v926_v53 }
  0x3d   :  { %868 = vmatpush3.bf16.msra.mxu1 %v926_v53  ;;  %840 = vmatprep.subr.bf16.mxu0 %v951_v34 }
  0x3e   :  { %861 = vmatprep.subr.bf16.mxu1 %v951_v34 }
  0x40   :  { %841 = vmatpush3.bf16.msra.mxu0 %v927_v54 }
  0x41   :  { %869 = vmatpush3.bf16.msra.mxu1 %v927_v54 }
  0x43   :  { %843 = vmatmul.mubr.bf16.vlgmr.msra.gmra.mxu0 %v928_v55 }
  0x44   :  { %847 = vmatmul.mubr.bf16.vlgmr.msra.gmra.mxu1 %v929_v56 }
  0x45   :  { %850 = vmatprep.mubr.msk.bf16.mxu1 %vm952_vm0, %v951_v34 }
  0x4c   :  { %851 = vmatmul.mubr.bf16.gmra.mxu1 %v930_v57 }
  0xe3   :  { %v763_v58 = vpop.f32.mrf.mxu0 }
  0xe4   :  { %v797_v59 = vpop.f32.mrf.mxu1 }
  0xe5   :  { %v764_v60 = vpop.f32.mrf.mxu0 }
  0xe6   :  { %v798_v61 = vpop.f32.mrf.mxu1  ;;  %v765_v17 = vadd.f32 %v764_v60, %v763_v58 }
  0xe7   :  { %v766_v62 = vpop.f32.mrf.mxu0  ;;  %v799_v26 = vadd.f32 %v798_v61, %v797_v59 }
  0xe8   :  { %v800_v63 = vpop.f32.mrf.mxu1  ;;  %v462_v21 = vadd.f32 %v765_v17, %v670_v19 }
  0xe9   :  { %v767_v0 = vpop.f32.mrf.mxu0 }
  0xea   :  { %v801_v1 = vpop.f32.mrf.mxu1  ;;  %v768_v22 = vadd.f32 %v767_v0, %v766_v62  ;;  %v518_v28 = vadd.f32 %v799_v26, %v462_v21 }
  0xeb   :  { %v769_v2 = vpop.f32.mrf.mxu0  ;;  %v802_v34 = vadd.f32 %v801_v1, %v800_v63 }
  0xec   :  { %v803_v3 = vpop.f32.mrf.mxu1  ;;  %v465_v27 = vadd.f32 %v768_v22, %v670_v19 }
  0xed   :  { %v770_v4 = vpop.f32.mrf.mxu0 }
  0xee   :  { %v804_v5 = vpop.f32.mrf.mxu1  ;;  %v771_v20 = vadd.f32 %v770_v4, %v769_v2  ;;  %v521_v41 = vadd.f32 %v802_v34, %v465_v27 }
  0xef   :  { %v772_v6 = vpop.f32.mrf.mxu0  ;;  %v805_v24 = vadd.f32 %v804_v5, %v803_v3 }
  0xf0   :  { %v806_v7 = vpop.f32.mrf.mxu1  ;;  %v470_v23 = vadd.f32 %v771_v20, %v670_v19 }
  0xf1   :  { %v773_v8 = vpop.f32.mrf.mxu0 }
  0xf2   :  { %v807_v9 = vpop.f32.mrf.mxu1  ;;  %v774_v25 = vadd.f32 %v773_v8, %v772_v6  ;;  %v526_v33 = vadd.f32 %v805_v24, %v470_v23 }
  0xf3   :  { %v775_v10 = vpop.f32.mrf.mxu0  ;;  %v808_v30 = vadd.f32 %v807_v9, %v806_v7 }
  0xf4   :  { %v809_v11 = vpop.f32.mrf.mxu1  ;;  %v473_v29 = vadd.f32 %v774_v25, %v670_v19 }
  0xf5   :  { %v776_v12 = vpop.f32.mrf.mxu0 }
  0xf6   :  { %v810_v13 = vpop.f32.mrf.mxu1  ;;  %v777_v31 = vadd.f32 %v776_v12, %v775_v10  ;;  %v529_v46 = vadd.f32 %v808_v30, %v473_v29 }
  0xf7   :  { %v778_v14 = vpop.f32.mrf.mxu0  ;;  %v811_v42 = vadd.f32 %v810_v13, %v809_v11 }
  0xf8   :  { %v812_v15 = vpop.f32.mrf.mxu1  ;;  %v478_v43 = vadd.f32 %v777_v31, %v670_v19 }
  0xf9   :  { %v779_v16 = vpop.f32.mrf.mxu0 }
  0xfa   :  { %v813_v18 = vpop.f32.mrf.mxu1  ;;  %v534_v58 = vadd.f32 %v811_v42, %v478_v43 }
 0x103   :  { %v573_v32 = vpop.f32.mrf.mxu0 }
 0x104   :  { %v1157_v35 = vadd.f32 %v573_v32, %v518_v28  ;;  %v581_v36 = vpop.f32.mrf.mxu1 }
 0x105   :  { %v1159_v37 = vadd.f32 %v581_v36, %v526_v33  ;;  %v844_v38 = vpop.f32.mrf.mxu0 }
 0x106   :  { %v600_v39 = vmin.f32 %v1157_v35, 0.0  ;;  %v848_v40 = vpop.f32.mrf.mxu1  ;;  %vm595_vm1 = vcmp.gt.f32.partialorder %v1157_v35, 0.0 }
 0x107   :  { %v602_v44 = vmin.f32 %v1159_v37, 0.0  ;;  %v576_v45 = vpop.f32.mrf.mxu0  ;;  %vm597_vm3 = vcmp.gt.f32.partialorder %v1159_v37, 0.0 }
 0x108   :  { %v605_v47 = vmul.f32 0.5, %v600_v39  ;;  %v615_v48 = vmul.f32 1.442695, %v600_v39  ;;  %v577_v49 = vadd.f32 %v576_v45, %v521_v41  ;;  %v584_v50 = vpop.f32.mrf.mxu1 }
 0x109   :  { %v619_v51 = vmul.f32 1.442695, %v602_v44  ;;  %v585_v52 = vadd.f32 %v584_v50, %v529_v46  ;;  %v845_v53 = vpop.f32.mrf.mxu0  ;;  %v607_v54 = vmul.f32 0.5, %v602_v44 }
 0x10a   :  { %v601_v55 = vmin.f32 %v577_v49, 0.0  ;;  %v849_v56 = vpop.f32.mrf.mxu1  ;;  %931 = vpow2.f32 %v615_v48  ;;  %vm596_vm2 = vcmp.gt.f32.partialorder %v577_v49, 0.0 }
 0x10b   :  { %v603_v57 = vmin.f32 %v585_v52, 0.0  ;;  %933 = vtanh.f32 %v605_v47  ;;  %vm598_vm4 = vcmp.gt.f32.partialorder %v585_v52, 0.0 }
 0x10c   :  { %v606_v59 = vmul.f32 0.5, %v601_v55  ;;  %v617_v60 = vmul.f32 1.442695, %v601_v55  ;;  %v589_v61 = vpop.f32.mrf.mxu1  ;;  %935 = vpow2.f32 %v619_v51 }
 0x10d   :  { %v621_v62 = vmul.f32 1.442695, %v603_v57  ;;  %v590_v63 = vadd.f32 %v589_v61, %v534_v58  ;;  %937 = vtanh.f32 %v607_v54  ;;  %v608_v1 = vmul.f32 0.5, %v603_v57 }
 0x10e   :  { %v852_v0 = vpop.f32.mrf.mxu1  ;;  %939 = vpow2.f32 %v617_v60 }
 0x10f   :  { %v604_v2 = vmin.f32 %v590_v63, 0.0  ;;  %941 = vtanh.f32 %v606_v59  ;;  %vm599_vm5 = vcmp.gt.f32.partialorder %v590_v63, 0.0 }
 0x110   :  { %v592_v3 = vpop.f32.mrf.mxu1  ;;  %943 = vpow2.f32 %v621_v62 }
 0x111   :  { %v623_v4 = vmul.f32 1.442695, %v604_v2  ;;  %v609_v5 = vmul.f32 0.5, %v604_v2  ;;  %945 = vtanh.f32 %v608_v1 }
 0x112   :  { %v853_v6 = vpop.f32.mrf.mxu1 }
 0x113   :  { %947 = vpow2.f32 %v623_v4 }
 0x114   :  { %949 = vtanh.f32 %v609_v5 }
 0x117   :  { %v932_v7 = vpop.eup %931 }
 0x118   :  { %v934_v8 = vpop.eup %933  ;;  %v625_v9 = vadd.f32 1.0, %v932_v7 }
 0x119   :  { %v936_v10 = vpop.eup %935 }
 0x11a   :  { %v938_v11 = vpop.eup %937  ;;  %v627_v12 = vadd.f32 1.0, %v936_v10  ;;  %v630_v15 = vmul.f32 %v934_v8, %v625_v9 }
 0x11b   :  { %v940_v13 = vpop.eup %939 }
 0x11c   :  { %v942_v14 = vpop.eup %941  ;;  %v626_v16 = vadd.f32 1.0, %v940_v13  ;;  %v632_v18 = vmul.f32 %v938_v11, %v627_v12  ;;  %v635_v23 = vsel %vm595_vm1, %v1157_v35, %v630_v15 }
 0x11d   :  { %v944_v17 = vpop.eup %943 }
 0x11e   :  { %v631_v19 = vmul.f32 %v942_v14, %v626_v16  ;;  %v628_v20 = vadd.f32 1.0, %v944_v17  ;;  %v946_v21 = vpop.eup %945  ;;  %v637_v29 = vsel %vm597_vm3, %v1159_v37, %v632_v18 }
 0x120   :  { %v948_v22 = vpop.eup %947  ;;  %v636_v24 = vsel %vm596_vm2, %v577_v49, %v631_v19  ;;  %v633_v25 = vmul.f32 %v946_v21, %v628_v20 }
 0x121   :  { %v739_v26 = vpack.c.bf16 %v636_v24, %v635_v23  ;;  %v629_v27 = vadd.f32 1.0, %v948_v22  ;;  %v950_v28 = vpop.eup %949 }
 0x122   :  { %v638_v30 = vsel %vm598_vm4, %v585_v52, %v633_v25 }
 0x123   :  { %740 = vst [vmem:[%s1179_s3] sm:$0xff] %v739_v26   ;;  %v744_v31 = vpack.c.bf16 %v638_v30, %v637_v29  ;;  %v634_v32 = vmul.f32 %v950_v28, %v629_v27 }
 0x125   :  { %746 = vst [vmem:[%s1179_s3 + $0x8] sm:$0xff] %v744_v31   ;;  %v639_v33 = vsel %vm599_vm5, %v590_v63, %v634_v32 }
 0x126   :  { %v735_v34 = vpack.c.bf16 %v639_v33, %v639_v33 }
 0x128   :  { %665 = vst [vmem:[%s1179_s3 + $0x10] sm:$0xf] %v735_v34 }

// kernel: _lambda_.11
= control target key start
LH: loop header
LB: loop body
LE: loop exit
PB: predicated region body
PF: predicated region fallthrough
CT: control target
= control target key end

     0   :  { %s12366_s1 = inlined_call_operand.vmem [shape: bf16[1152,1280], index: 1, kind: input, shape index: {}]   ;;  %s12367_s0 = inlined_call_operand.vmem [shape: bf16[16,1152], index: 0, kind: input, shape index: {}]   ;;  %s12368_s3 = inlined_call_operand.vmem [shape: bf16[1280,128], index: 3, kind: input, shape index: {}]   ;;  %s12369_s2 = inlined_call_operand.vmem [shape: f32[1,1280], index: 2, kind: input, shape index: {}]   ;;  %s12370_s5 = inlined_call_operand.vmem [shape: bf16[128,128], index: 5, kind: input, shape index: {}]   ;;  %s12371_s4 = inlined_call_operand.vmem [shape: f32[1,128], index: 4, kind: input, shape index: {}]   ;;  %s12372_s7 = inlined_call_operand.vmem [shape: bf16[128,128], index: 7, kind: input, shape index: {}]   ;;  %s12373_s6 = inlined_call_operand.vmem [shape: f32[1,128], index: 6, kind: input, shape index: {}]   ;;  %s12374_s9 = inlined_call_operand.vmem [shape: bf16[128,128], index: 9, kind: input, shape index: {}]   ;;  %s12375_s8 = inlined_call_operand.vmem [shape: f32[1,128], index: 8, kind: input, shape index: {}]   ;;  %s12376_s10 = inlined_call_operand.vmem [shape: f32[1,128], index: 10, kind: input, shape index: {}]   ;;  %s12377_s11 = inlined_call_operand.vmem [shape: f32[16,128], index: 11, kind: output, shape index: {}]  }
   0x1   :  { %v8022_v0 = vld [vmem:[%s12366_s1 + $0x234] ss:$40 sps:$4 sm:$0xff]   ;;  %v8026_v2 = vld [vmem:[%s12366_s1 + $0x230] ss:$40 sps:$4 sm:$0xff]   ;;  %v8028_v4 = vld [vmem:[%s12366_s1 + $0x1e4] ss:$40 sps:$4 sm:$0xff]  }
   0x2   :  { %v8024_v1 = vld [vmem:[%s12366_s1 + $0x734] ss:$40 sps:$4 sm:$0xff]   ;;  %4469 = vmatprep.subr.bf16.mxu0 %v8022_v0  ;;  %v8027_v3 = vld [vmem:[%s12366_s1 + $0x730] ss:$40 sps:$4 sm:$0xff]   ;;  %v8030_v5 = vld [vmem:[%s12366_s1 + $0x6e4] ss:$40 sps:$4 sm:$0xff]  }
   0x3   :  { %4512 = vmatprep.subr.bf16.mxu1 %v8024_v1  ;;  %4470 = vmatpush1.bf16.msra.mxu0 %v8026_v2  ;;  %v8032_v6 = vld [vmem:[%s12366_s1 + $0x1e0] ss:$40 sps:$4 sm:$0xff]   ;;  %v8034_v8 = vld [vmem:[%s12366_s1 + $0x194] ss:$40 sps:$4 sm:$0xff]   ;;  %v8038_v10 = vld [vmem:[%s12366_s1 + $0x190] ss:$40 sps:$4 sm:$0xff]  }
   0x4   :  { %4513 = vmatpush1.bf16.msra.mxu1 %v8027_v3  ;;  %4471 = vmatprep.subr.bf16.mxu0 %v8028_v4  ;;  %v8033_v7 = vld [vmem:[%s12366_s1 + $0x6e0] ss:$40 sps:$4 sm:$0xff]   ;;  %v8036_v9 = vld [vmem:[%s12366_s1 + $0x694] ss:$40 sps:$4 sm:$0xff]   ;;  %v8039_v11 = vld [vmem:[%s12366_s1 + $0x690] ss:$40 sps:$4 sm:$0xff]  }
   0x5   :  { %4514 = vmatprep.subr.bf16.mxu1 %v8030_v5  ;;  %v8040_v12 = vld [vmem:[%s12366_s1 + $0x144] ss:$40 sps:$4 sm:$0xff]   ;;  %v8044_v14 = vld [vmem:[%s12366_s1 + $0x140] ss:$40 sps:$4 sm:$0xff]   ;;  %v8046_v16 = vld [vmem:[%s12366_s1 + $0xf4] ss:$40 sps:$4 sm:$0xff]  }
   0x6   :  { %v8042_v13 = vld [vmem:[%s12366_s1 + $0x644] ss:$40 sps:$4 sm:$0xff]   ;;  %v8045_v15 = vld [vmem:[%s12366_s1 + $0x640] ss:$40 sps:$4 sm:$0xff]   ;;  %v8048_v17 = vld [vmem:[%s12366_s1 + $0x5f4] ss:$40 sps:$4 sm:$0xff]  }
   0x7   :  { %4472 = vmatpush1.bf16.msra.mxu0 %v8032_v6  ;;  %v8050_v18 = vld [vmem:[%s12366_s1 + $0xf0] ss:$40 sps:$4 sm:$0xff]   ;;  %v8052_v20 = vld [vmem:[%s12366_s1 + $0xa4] ss:$40 sps:$4 sm:$0xff]   ;;  %v8056_v22 = vld [vmem:[%s12366_s1 + $0xa0] ss:$40 sps:$4 sm:$0xff]  }
   0x8   :  { %4515 = vmatpush1.bf16.msra.mxu1 %v8033_v7  ;;  %4473 = vmatprep.subr.bf16.mxu0 %v8034_v8  ;;  %v8051_v19 = vld [vmem:[%s12366_s1 + $0x5f0] ss:$40 sps:$4 sm:$0xff]   ;;  %v8054_v21 = vld [vmem:[%s12366_s1 + $0x5a4] ss:$40 sps:$4 sm:$0xff]   ;;  %v8057_v23 = vld [vmem:[%s12366_s1 + $0x5a0] ss:$40 sps:$4 sm:$0xff]  }
   0x9   :  { %4516 = vmatprep.subr.bf16.mxu1 %v8036_v9  ;;  %v8058_v24 = vld [vmem:[%s12366_s1 + $0x54] ss:$40 sps:$4 sm:$0xff]   ;;  %v8062_v26 = vld [vmem:[%s12366_s1 + $0x50] ss:$40 sps:$4 sm:$0xff]   ;;  %v8064_v28 = vld [vmem:[%s12366_s1 + $0x4] ss:$40 sps:$4 sm:$0xff]  }
   0xa   :  { %v8060_v25 = vld [vmem:[%s12366_s1 + $0x554] ss:$40 sps:$4 sm:$0xff]   ;;  %v8063_v27 = vld [vmem:[%s12366_s1 + $0x550] ss:$40 sps:$4 sm:$0xff]   ;;  %v8066_v29 = vld [vmem:[%s12366_s1 + $0x504] ss:$40 sps:$4 sm:$0xff]  }
   0xb   :  { %4474 = vmatpush1.bf16.msra.mxu0 %v8038_v10  ;;  %v8068_v30 = vld [vmem:[%s12366_s1] ss:$40 sps:$4 sm:$0xff]   ;;  %v8070_v32 = vld [vmem:[%s12366_s1 + $0x4b4] ss:$40 sps:$4 sm:$0xff]   ;;  %v8074_v34 = vld [vmem:[%s12366_s1 + $0x4b0] ss:$40 sps:$4 sm:$0xff]  }
   0xc   :  { %4517 = vmatpush1.bf16.msra.mxu1 %v8039_v11  ;;  %4475 = vmatprep.subr.bf16.mxu0 %v8040_v12  ;;  %v8069_v31 = vld [vmem:[%s12366_s1 + $0x500] ss:$40 sps:$4 sm:$0xff]   ;;  %v8072_v33 = vld [vmem:[%s12366_s1 + $0x9b4] ss:$40 sps:$4 sm:$0xff]   ;;  %v8075_v35 = vld [vmem:[%s12366_s1 + $0x9b0] ss:$40 sps:$4 sm:$0xff]  }
   0xd   :  { %4518 = vmatprep.subr.bf16.mxu1 %v8042_v13  ;;  %v8076_v36 = vld [vmem:[%s12366_s1 + $0x464] ss:$40 sps:$4 sm:$0xff]   ;;  %v8080_v38 = vld [vmem:[%s12366_s1 + $0x460] ss:$40 sps:$4 sm:$0xff]   ;;  %v8082_v40 = vld [vmem:[%s12366_s1 + $0x414] ss:$40 sps:$4 sm:$0xff]  }
   0xe   :  { %v8078_v37 = vld [vmem:[%s12366_s1 + $0x964] ss:$40 sps:$4 sm:$0xff]   ;;  %v8081_v39 = vld [vmem:[%s12366_s1 + $0x960] ss:$40 sps:$4 sm:$0xff]   ;;  %v8084_v41 = vld [vmem:[%s12366_s1 + $0x914] ss:$40 sps:$4 sm:$0xff]  }
   0xf   :  { %4476 = vmatpush1.bf16.msra.mxu0 %v8044_v14  ;;  %v8086_v42 = vld [vmem:[%s12366_s1 + $0x410] ss:$40 sps:$4 sm:$0xff]   ;;  %v8088_v44 = vld [vmem:[%s12366_s1 + $0x3c4] ss:$40 sps:$4 sm:$0xff]   ;;  %v8092_v46 = vld [vmem:[%s12366_s1 + $0x3c0] ss:$40 sps:$4 sm:$0xff]  }
  0x10   :  { %4519 = vmatpush1.bf16.msra.mxu1 %v8045_v15  ;;  %4477 = vmatprep.subr.bf16.mxu0 %v8046_v16  ;;  %v8087_v43 = vld [vmem:[%s12366_s1 + $0x910] ss:$40 sps:$4 sm:$0xff]   ;;  %v8090_v45 = vld [vmem:[%s12366_s1 + $0x8c4] ss:$40 sps:$4 sm:$0xff]   ;;  %v8093_v47 = vld [vmem:[%s12366_s1 + $0x8c0] ss:$40 sps:$4 sm:$0xff]  }
  0x11   :  { %4520 = vmatprep.subr.bf16.mxu1 %v8048_v17  ;;  %v8094_v48 = vld [vmem:[%s12366_s1 + $0x374] ss:$40 sps:$4 sm:$0xff]   ;;  %v9555_v49 = vld [vmem:[%s12367_s0 + $0x4] ss:$36 sps:$4 sm:$0xff]   ;;  %v9560_v50 = vld [vmem:[%s12367_s0 + $0xc] ss:$36 sps:$4 sm:$0xff]  }
  0x12   :  { %v8096_v51 = vld [vmem:[%s12366_s1 + $0x874] ss:$40 sps:$4 sm:$0xff]   ;;  %4501 = vmatprep.mubr.bf16.mxu0 %v9555_v49  ;;  %4544 = vmatprep.mubr.bf16.mxu1 %v9560_v50  ;;  %v8098_v52 = vld [vmem:[%s12366_s1 + $0x370] ss:$40 sps:$4 sm:$0xff]   ;;  %v8100_v54 = vld [vmem:[%s12366_s1 + $0x324] ss:$40 sps:$4 sm:$0xff]  }
  0x13   :  { %4478 = vmatpush1.bf16.msra.mxu0 %v8050_v18  ;;  %v8099_v53 = vld [vmem:[%s12366_s1 + $0x870] ss:$40 sps:$4 sm:$0xff]   ;;  %v8102_v55 = vld [vmem:[%s12366_s1 + $0x824] ss:$40 sps:$4 sm:$0xff]   ;;  %v8104_v56 = vld [vmem:[%s12366_s1 + $0x320] ss:$40 sps:$4 sm:$0xff]  }
  0x14   :  { %4521 = vmatpush1.bf16.msra.mxu1 %v8051_v19  ;;  %4479 = vmatprep.subr.bf16.mxu0 %v8052_v20  ;;  %v8105_v57 = vld [vmem:[%s12366_s1 + $0x820] ss:$40 sps:$4 sm:$0xff]   ;;  %v8106_v58 = vld [vmem:[%s12366_s1 + $0x2d4] ss:$40 sps:$4 sm:$0xff]   ;;  %v8110_v60 = vld [vmem:[%s12366_s1 + $0x2d0] ss:$40 sps:$4 sm:$0xff]  }
  0x15   :  { %4522 = vmatprep.subr.bf16.mxu1 %v8054_v21  ;;  %v8108_v59 = vld [vmem:[%s12366_s1 + $0x7d4] ss:$40 sps:$4 sm:$0xff]   ;;  %v8111_v61 = vld [vmem:[%s12366_s1 + $0x7d0] ss:$40 sps:$4 sm:$0xff]   ;;  %v8112_v62 = vld [vmem:[%s12366_s1 + $0x284] ss:$40 sps:$4 sm:$0xff]  }
  0x16   :  { %v8114_v63 = vld [vmem:[%s12366_s1 + $0x784] ss:$40 sps:$4 sm:$0xff]   ;;  %v8116_v0 = vld [vmem:[%s12366_s1 + $0x280] ss:$40 sps:$4 sm:$0xff]   ;;  %v8125_v2 = vld [vmem:[%s12366_s1 + $0xc34] ss:$40 sps:$4 sm:$0xff]  }
  0x17   :  { %4480 = vmatpush1.bf16.msra.mxu0 %v8056_v22  ;;  %v8117_v1 = vld [vmem:[%s12366_s1 + $0x780] ss:$40 sps:$4 sm:$0xff]   ;;  %v8128_v3 = vld [vmem:[%s12366_s1 + $0x1134] ss:$40 sps:$4 sm:$0xff]   ;;  %v8123_v5 = vld [vmem:[%s12366_s1 + $0xc30] ss:$40 sps:$4 sm:$0xff]  }
  0x18   :  { %4523 = vmatpush1.bf16.msra.mxu1 %v8057_v23  ;;  %4481 = vmatprep.subr.bf16.mxu0 %v8058_v24  ;;  %v9618_v4 = vld [vmem:[%s12367_s0] ss:$36 sps:$4 sm:$0xff]   ;;  %v8126_v6 = vld [vmem:[%s12366_s1 + $0x1130] ss:$40 sps:$4 sm:$0xff]   ;;  %v8129_v7 = vld [vmem:[%s12367_s0 + $0x8] ss:$36 sps:$4 sm:$0xff]  }
  0x19   :  { %4524 = vmatprep.subr.bf16.mxu1 %v8060_v25  ;;  %v8132_v8 = vld [vmem:[%s12366_s1 + $0xbe4] ss:$40 sps:$4 sm:$0xff]   ;;  %v8130_v10 = vld [vmem:[%s12366_s1 + $0xbe0] ss:$40 sps:$4 sm:$0xff]   ;;  %v8138_v12 = vld [vmem:[%s12366_s1 + $0xb94] ss:$40 sps:$4 sm:$0xff]  }
  0x1a   :  { %v8135_v9 = vld [vmem:[%s12366_s1 + $0x10e4] ss:$40 sps:$4 sm:$0xff]   ;;  %v8133_v11 = vld [vmem:[%s12366_s1 + $0x10e0] ss:$40 sps:$4 sm:$0xff]   ;;  %v8141_v13 = vld [vmem:[%s12366_s1 + $0x1094] ss:$40 sps:$4 sm:$0xff]  }
  0x1b   :  { %4482 = vmatpush1.bf16.msra.mxu0 %v8062_v26  ;;  %v8136_v14 = vld [vmem:[%s12366_s1 + $0xb90] ss:$40 sps:$4 sm:$0xff]   ;;  %v8144_v16 = vld [vmem:[%s12366_s1 + $0xb44] ss:$40 sps:$4 sm:$0xff]   ;;  %v8142_v18 = vld [vmem:[%s12366_s1 + $0xb40] ss:$40 sps:$4 sm:$0xff]  }
  0x1c   :  { %4525 = vmatpush1.bf16.msra.mxu1 %v8063_v27  ;;  %4483 = vmatprep.subr.bf16.mxu0 %v8064_v28  ;;  %v8139_v15 = vld [vmem:[%s12366_s1 + $0x1090] ss:$40 sps:$4 sm:$0xff]   ;;  %v8147_v17 = vld [vmem:[%s12366_s1 + $0x1044] ss:$40 sps:$4 sm:$0xff]   ;;  %v8145_v19 = vld [vmem:[%s12366_s1 + $0x1040] ss:$40 sps:$4 sm:$0xff]  }
  0x1d   :  { %4526 = vmatprep.subr.bf16.mxu1 %v8066_v29  ;;  %v8150_v20 = vld [vmem:[%s12366_s1 + $0xaf4] ss:$40 sps:$4 sm:$0xff]   ;;  %v8148_v22 = vld [vmem:[%s12366_s1 + $0xaf0] ss:$40 sps:$4 sm:$0xff]   ;;  %v8156_v24 = vld [vmem:[%s12366_s1 + $0xaa4] ss:$40 sps:$4 sm:$0xff]  }
  0x1e   :  { %v8153_v21 = vld [vmem:[%s12366_s1 + $0xff4] ss:$40 sps:$4 sm:$0xff]   ;;  %v8151_v23 = vld [vmem:[%s12366_s1 + $0xff0] ss:$40 sps:$4 sm:$0xff]   ;;  %v8159_v25 = vld [vmem:[%s12366_s1 + $0xfa4] ss:$40 sps:$4 sm:$0xff]  }
  0x1f   :  { %4484 = vmatpush1.bf16.msra.mxu0 %v8068_v30  ;;  %v8154_v26 = vld [vmem:[%s12366_s1 + $0xaa0] ss:$40 sps:$4 sm:$0xff]   ;;  %v8162_v28 = vld [vmem:[%s12366_s1 + $0xa54] ss:$40 sps:$4 sm:$0xff]   ;;  %v8160_v30 = vld [vmem:[%s12366_s1 + $0xa50] ss:$40 sps:$4 sm:$0xff]  }
  0x20   :  { %4527 = vmatpush1.bf16.msra.mxu1 %v8069_v31  ;;  %4485 = vmatprep.subr.bf16.mxu0 %v8070_v32  ;;  %v8157_v27 = vld [vmem:[%s12366_s1 + $0xfa0] ss:$40 sps:$4 sm:$0xff]   ;;  %v8165_v29 = vld [vmem:[%s12366_s1 + $0xf54] ss:$40 sps:$4 sm:$0xff]   ;;  %v8163_v31 = vld [vmem:[%s12366_s1 + $0xf50] ss:$40 sps:$4 sm:$0xff]  }
  0x21   :  { %4528 = vmatprep.subr.bf16.mxu1 %v8072_v33  ;;  %v8168_v32 = vld [vmem:[%s12366_s1 + $0xa04] ss:$40 sps:$4 sm:$0xff]   ;;  %v9708_v33 = vld [vmem:[%s12367_s0 + $0x14] ss:$36 sps:$4 sm:$0xff]  }
  0x23   :  { %4486 = vmatpush2.bf16.msra.mxu0 %v8074_v34  ;;  %v8171_v34 = vld [vmem:[%s12366_s1 + $0xf04] ss:$40 sps:$4 sm:$0xff]  }
  0x24   :  { %4529 = vmatpush2.bf16.msra.mxu1 %v8075_v35  ;;  %4487 = vmatprep.subr.bf16.mxu0 %v8076_v36  ;;  %v9717_v35 = vld [vmem:[%s12367_s0 + $0x1c] ss:$36 sps:$4 sm:$0xff]  }
  0x25   :  { %4530 = vmatprep.subr.bf16.mxu1 %v8078_v37  ;;  %v8166_v36 = vld [vmem:[%s12366_s1 + $0xa00] ss:$40 sps:$4 sm:$0xff]  }
  0x26   :  { %v8169_v37 = vld [vmem:[%s12366_s1 + $0xf00] ss:$40 sps:$4 sm:$0xff]  }
  0x27   :  { %4488 = vmatpush2.bf16.msra.mxu0 %v8080_v38  ;;  %v8174_v38 = vld [vmem:[%s12366_s1 + $0xeb4] ss:$40 sps:$4 sm:$0xff]  }
  0x28   :  { %4531 = vmatpush2.bf16.msra.mxu1 %v8081_v39  ;;  %4489 = vmatprep.subr.bf16.mxu0 %v8082_v40  ;;  %v8177_v39 = vld [vmem:[%s12366_s1 + $0x13b4] ss:$40 sps:$4 sm:$0xff]   ;;  %v8172_v40 = vld [vmem:[%s12366_s1 + $0xeb0] ss:$40 sps:$4 sm:$0xff]  }
  0x29   :  { %4532 = vmatprep.subr.bf16.mxu1 %v8084_v41  ;;  %v8175_v41 = vld [vmem:[%s12366_s1 + $0x13b0] ss:$40 sps:$4 sm:$0xff]  }
  0x2b   :  { %4490 = vmatpush2.bf16.msra.mxu0 %v8086_v42  ;;  %v8180_v42 = vld [vmem:[%s12366_s1 + $0xe64] ss:$40 sps:$4 sm:$0xff]  }
  0x2c   :  { %4533 = vmatpush2.bf16.msra.mxu1 %v8087_v43  ;;  %4491 = vmatprep.subr.bf16.mxu0 %v8088_v44  ;;  %v8183_v43 = vld [vmem:[%s12366_s1 + $0x1364] ss:$40 sps:$4 sm:$0xff]   ;;  %v8178_v44 = vld [vmem:[%s12366_s1 + $0xe60] ss:$40 sps:$4 sm:$0xff]  }
  0x2d   :  { %4534 = vmatprep.subr.bf16.mxu1 %v8090_v45  ;;  %v8181_v45 = vld [vmem:[%s12366_s1 + $0x1360] ss:$40 sps:$4 sm:$0xff]  }
  0x2f   :  { %4492 = vmatpush2.bf16.msra.mxu0 %v8092_v46  ;;  %v8186_v46 = vld [vmem:[%s12366_s1 + $0xe14] ss:$40 sps:$4 sm:$0xff]  }
  0x30   :  { %4535 = vmatpush2.bf16.msra.mxu1 %v8093_v47  ;;  %4493 = vmatprep.subr.bf16.mxu0 %v8094_v48  ;;  %v8189_v47 = vld [vmem:[%s12366_s1 + $0x1314] ss:$40 sps:$4 sm:$0xff]   ;;  %v8184_v48 = vld [vmem:[%s12366_s1 + $0xe10] ss:$40 sps:$4 sm:$0xff]  }
  0x31   :  { %4536 = vmatprep.subr.bf16.mxu1 %v8096_v51  ;;  %v8187_v51 = vld [vmem:[%s12366_s1 + $0x1310] ss:$40 sps:$4 sm:$0xff]  }
  0x33   :  { %4494 = vmatpush2.bf16.msra.mxu0 %v8098_v52  ;;  %v8192_v52 = vld [vmem:[%s12366_s1 + $0xdc4] ss:$40 sps:$4 sm:$0xff]  }
  0x34   :  { %4537 = vmatpush2.bf16.msra.mxu1 %v8099_v53  ;;  %4495 = vmatprep.subr.bf16.mxu0 %v8100_v54  ;;  %v8195_v53 = vld [vmem:[%s12366_s1 + $0x12c4] ss:$40 sps:$4 sm:$0xff]   ;;  %v8190_v54 = vld [vmem:[%s12366_s1 + $0xdc0] ss:$40 sps:$4 sm:$0xff]  }
  0x35   :  { %4538 = vmatprep.subr.bf16.mxu1 %v8102_v55  ;;  %v8193_v55 = vld [vmem:[%s12366_s1 + $0x12c0] ss:$40 sps:$4 sm:$0xff]  }
  0x37   :  { %4496 = vmatpush2.bf16.msra.mxu0 %v8104_v56  ;;  %v8198_v56 = vld [vmem:[%s12366_s1 + $0xd74] ss:$40 sps:$4 sm:$0xff]  }
  0x38   :  { %4539 = vmatpush2.bf16.msra.mxu1 %v8105_v57  ;;  %4497 = vmatprep.subr.bf16.mxu0 %v8106_v58  ;;  %v8201_v57 = vld [vmem:[%s12366_s1 + $0x1274] ss:$40 sps:$4 sm:$0xff]   ;;  %v8196_v58 = vld [vmem:[%s12366_s1 + $0xd70] ss:$40 sps:$4 sm:$0xff]  }
  0x39   :  { %4540 = vmatprep.subr.bf16.mxu1 %v8108_v59  ;;  %v8199_v59 = vld [vmem:[%s12366_s1 + $0x1270] ss:$40 sps:$4 sm:$0xff]  }
  0x3b   :  { %4498 = vmatpush2.bf16.msra.mxu0 %v8110_v60  ;;  %v8204_v60 = vld [vmem:[%s12366_s1 + $0xd24] ss:$40 sps:$4 sm:$0xff]  }
  0x3c   :  { %4541 = vmatpush2.bf16.msra.mxu1 %v8111_v61  ;;  %4499 = vmatprep.subr.bf16.mxu0 %v8112_v62  ;;  %v8207_v61 = vld [vmem:[%s12366_s1 + $0x1224] ss:$40 sps:$4 sm:$0xff]   ;;  %v8202_v62 = vld [vmem:[%s12366_s1 + $0xd20] ss:$40 sps:$4 sm:$0xff]  }
  0x3d   :  { %4542 = vmatprep.subr.bf16.mxu1 %v8114_v63  ;;  %v8205_v63 = vld [vmem:[%s12366_s1 + $0x1220] ss:$40 sps:$4 sm:$0xff]  }
  0x3f   :  { %4500 = vmatpush2.bf16.msra.mxu0 %v8116_v0  ;;  %v8210_v0 = vld [vmem:[%s12366_s1 + $0xcd4] ss:$40 sps:$4 sm:$0xff]  }
  0x40   :  { %4543 = vmatpush2.bf16.msra.mxu1 %v8117_v1  ;;  %4555 = vmatprep.subr.bf16.mxu0 %v8125_v2  ;;  %v8213_v1 = vld [vmem:[%s12366_s1 + $0x11d4] ss:$40 sps:$4 sm:$0xff]   ;;  %v8208_v2 = vld [vmem:[%s12366_s1 + $0xcd0] ss:$40 sps:$4 sm:$0xff]  }
  0x41   :  { %4598 = vmatprep.subr.bf16.mxu1 %v8128_v3  ;;  %v8211_v3 = vld [vmem:[%s12366_s1 + $0x11d0] ss:$40 sps:$4 sm:$0xff]  }
  0x42   :  { %4502 = vmatmul.mubr.bf16.vlgmr.msra.gmra.mxu0 %v9618_v4 }
  0x43   :  { %4545 = vmatmul.mubr.bf16.vlgmr.msra.gmra.mxu1 %v8129_v7  ;;  %4556 = vmatpush1.bf16.msra.mxu0 %v8123_v5  ;;  %v8216_v5 = vld [vmem:[%s12366_s1 + $0xc84] ss:$40 sps:$4 sm:$0xff]   ;;  %v8214_v7 = vld [vmem:[%s12366_s1 + $0xc80] ss:$40 sps:$4 sm:$0xff]  }
  0x44   :  { %4599 = vmatpush1.bf16.msra.mxu1 %v8126_v6  ;;  %4557 = vmatprep.subr.bf16.mxu0 %v8132_v8  ;;  %v8219_v6 = vld [vmem:[%s12366_s1 + $0x1184] ss:$40 sps:$4 sm:$0xff]   ;;  %v8217_v8 = vld [vmem:[%s12366_s1 + $0x1180] ss:$40 sps:$4 sm:$0xff]  }
  0x45   :  { %4600 = vmatprep.subr.bf16.mxu1 %v8135_v9  ;;  %4587 = vmatprep.mubr.bf16.mxu0 %v9708_v33  ;;  %v8227_v9 = vld [vmem:[%s12366_s1 + $0x1634] ss:$40 sps:$4 sm:$0xff]  }
  0x46   :  { %4630 = vmatprep.mubr.bf16.mxu1 %v9717_v35 }
  0x47   :  { %4558 = vmatpush1.bf16.msra.mxu0 %v8130_v10  ;;  %v8230_v10 = vld [vmem:[%s12366_s1 + $0x23c] ss:$40 sps:$4 sm:$0xff]  }
  0x48   :  { %4601 = vmatpush1.bf16.msra.mxu1 %v8133_v11  ;;  %4559 = vmatprep.subr.bf16.mxu0 %v8138_v12  ;;  %v9831_v11 = vld [vmem:[%s12367_s0 + $0x10] ss:$36 sps:$4 sm:$0xff]  }
  0x49   :  { %4602 = vmatprep.subr.bf16.mxu1 %v8141_v13  ;;  %v8225_v12 = vld [vmem:[%s12366_s1 + $0x1630] ss:$40 sps:$4 sm:$0xff]  }
  0x4a   :  { %v8231_v13 = vld [vmem:[%s12367_s0 + $0x18] ss:$36 sps:$4 sm:$0xff]  }
  0x4b   :  { %4560 = vmatpush1.bf16.msra.mxu0 %v8136_v14  ;;  %v8228_v14 = vld [vmem:[%s12366_s1 + $0x238] ss:$40 sps:$4 sm:$0xff]  }
  0x4c   :  { %4603 = vmatpush1.bf16.msra.mxu1 %v8139_v15  ;;  %4561 = vmatprep.subr.bf16.mxu0 %v8144_v16  ;;  %v8234_v15 = vld [vmem:[%s12366_s1 + $0x15e4] ss:$40 sps:$4 sm:$0xff]  }
  0x4d   :  { %4604 = vmatprep.subr.bf16.mxu1 %v8147_v17  ;;  %v8237_v16 = vld [vmem:[%s12366_s1 + $0x1ec] ss:$40 sps:$4 sm:$0xff]   ;;  %v8232_v17 = vld [vmem:[%s12366_s1 + $0x15e0] ss:$40 sps:$4 sm:$0xff]  }
  0x4f   :  { %4562 = vmatpush1.bf16.msra.mxu0 %v8142_v18  ;;  %v8235_v18 = vld [vmem:[%s12366_s1 + $0x1e8] ss:$40 sps:$4 sm:$0xff]  }
  0x50   :  { %4605 = vmatpush1.bf16.msra.mxu1 %v8145_v19  ;;  %4563 = vmatprep.subr.bf16.mxu0 %v8150_v20  ;;  %v8240_v19 = vld [vmem:[%s12366_s1 + $0x1594] ss:$40 sps:$4 sm:$0xff]  }
  0x51   :  { %4606 = vmatprep.subr.bf16.mxu1 %v8153_v21  ;;  %v8243_v20 = vld [vmem:[%s12366_s1 + $0x19c] ss:$40 sps:$4 sm:$0xff]   ;;  %v12380_v21 = vmov 0  }
  0x53   :  { %4564 = vmatpush1.bf16.msra.mxu0 %v8148_v22  ;;  %v8238_v22 = vld [vmem:[%s12366_s1 + $0x1590] ss:$40 sps:$4 sm:$0xff]  }
  0x54   :  { %4607 = vmatpush1.bf16.msra.mxu1 %v8151_v23  ;;  %4565 = vmatprep.subr.bf16.mxu0 %v8156_v24  ;;  %v8241_v23 = vld [vmem:[%s12366_s1 + $0x198] ss:$40 sps:$4 sm:$0xff]   ;;  %v8246_v24 = vld [vmem:[%s12366_s1 + $0x1544] ss:$40 sps:$4 sm:$0xff]  }
  0x55   :  { %4608 = vmatprep.subr.bf16.mxu1 %v8159_v25  ;;  %v8244_v25 = vld [vmem:[%s12366_s1 + $0x1540] ss:$40 sps:$4 sm:$0xff]  }
  0x57   :  { %4566 = vmatpush1.bf16.msra.mxu0 %v8154_v26  ;;  %v8247_v26 = vld [vmem:[%s12366_s1 + $0x148] ss:$40 sps:$4 sm:$0xff]  }
  0x58   :  { %4609 = vmatpush1.bf16.msra.mxu1 %v8157_v27  ;;  %4567 = vmatprep.subr.bf16.mxu0 %v8162_v28  ;;  %v8252_v27 = vld [vmem:[%s12366_s1 + $0x14f4] ss:$40 sps:$4 sm:$0xff]  }
  0x59   :  { %4610 = vmatprep.subr.bf16.mxu1 %v8165_v29  ;;  %v8255_v28 = vld [vmem:[%s12366_s1 + $0xfc] ss:$40 sps:$4 sm:$0xff]   ;;  %v8250_v29 = vld [vmem:[%s12366_s1 + $0x14f0] ss:$40 sps:$4 sm:$0xff]  }
  0x5b   :  { %4568 = vmatpush1.bf16.msra.mxu0 %v8160_v30  ;;  %v8253_v30 = vld [vmem:[%s12366_s1 + $0xf8] ss:$40 sps:$4 sm:$0xff]  }
  0x5c   :  { %4611 = vmatpush1.bf16.msra.mxu1 %v8163_v31  ;;  %4569 = vmatprep.subr.bf16.mxu0 %v8168_v32  ;;  %v8258_v31 = vld [vmem:[%s12366_s1 + $0x14a4] ss:$40 sps:$4 sm:$0xff]  }
  0x5d   :  { %4612 = vmatprep.subr.bf16.mxu1 %v8171_v34  ;;  %v8261_v32 = vld [vmem:[%s12366_s1 + $0xac] ss:$40 sps:$4 sm:$0xff]   ;;  %v8256_v34 = vld [vmem:[%s12366_s1 + $0x14a0] ss:$40 sps:$4 sm:$0xff]  }
  0x5f   :  { %4570 = vmatpush1.bf16.msra.mxu0 %v8166_v36  ;;  %v8259_v36 = vld [vmem:[%s12366_s1 + $0xa8] ss:$40 sps:$4 sm:$0xff]  }
  0x60   :  { %4613 = vmatpush1.bf16.msra.mxu1 %v8169_v37  ;;  %4571 = vmatprep.subr.bf16.mxu0 %v8174_v38  ;;  %v8264_v37 = vld [vmem:[%s12366_s1 + $0x1454] ss:$40 sps:$4 sm:$0xff]  }
  0x61   :  { %4614 = vmatprep.subr.bf16.mxu1 %v8177_v39  ;;  %v8267_v38 = vld [vmem:[%s12366_s1 + $0x5c] ss:$40 sps:$4 sm:$0xff]   ;;  %v8262_v39 = vld [vmem:[%s12366_s1 + $0x1450] ss:$40 sps:$4 sm:$0xff]  }
  0x63   :  { %4572 = vmatpush2.bf16.msra.mxu0 %v8172_v40  ;;  %v8265_v40 = vld [vmem:[%s12366_s1 + $0x58] ss:$40 sps:$4 sm:$0xff]  }
  0x64   :  { %4615 = vmatpush2.bf16.msra.mxu1 %v8175_v41  ;;  %4573 = vmatprep.subr.bf16.mxu0 %v8180_v42  ;;  %v8270_v41 = vld [vmem:[%s12366_s1 + $0x1404] ss:$40 sps:$4 sm:$0xff]  }
  0x65   :  { %4616 = vmatprep.subr.bf16.mxu1 %v8183_v43  ;;  %v8273_v42 = vld [vmem:[%s12366_s1 + $0xc] ss:$40 sps:$4 sm:$0xff]   ;;  %v8268_v43 = vld [vmem:[%s12366_s1 + $0x1400] ss:$40 sps:$4 sm:$0xff]  }
  0x67   :  { %4574 = vmatpush2.bf16.msra.mxu0 %v8178_v44  ;;  %v8271_v44 = vld [vmem:[%s12366_s1 + $0x8] ss:$40 sps:$4 sm:$0xff]  }
  0x68   :  { %4617 = vmatpush2.bf16.msra.mxu1 %v8181_v45  ;;  %4575 = vmatprep.subr.bf16.mxu0 %v8186_v46  ;;  %v8277_v45 = vld [vmem:[%s12366_s1 + $0x4bc] ss:$40 sps:$4 sm:$0xff]  }
  0x69   :  { %4618 = vmatprep.subr.bf16.mxu1 %v8189_v47  ;;  %v8280_v46 = vld [vmem:[%s12366_s1 + $0x73c] ss:$40 sps:$4 sm:$0xff]  }
  0x6a   :  { %v9938_v47 = vld [vmem:[%s12367_s0 + $0x20] ss:$36 sps:$4 sm:$0xff]  }
  0x6b   :  { %4576 = vmatpush2.bf16.msra.mxu0 %v8184_v48  ;;  %v8275_v48 = vld [vmem:[%s12366_s1 + $0x4b8] ss:$40 sps:$4 sm:$0xff]  }
  0x6c   :  { %4619 = vmatpush2.bf16.msra.mxu1 %v8187_v51  ;;  %4577 = vmatprep.subr.bf16.mxu0 %v8192_v52  ;;  %v8278_v51 = vld [vmem:[%s12366_s1 + $0x738] ss:$40 sps:$4 sm:$0xff]   ;;  %v8283_v52 = vld [vmem:[%s12366_s1 + $0x46c] ss:$40 sps:$4 sm:$0xff]  }
  0x6d   :  { %4620 = vmatprep.subr.bf16.mxu1 %v8195_v53  ;;  %v8286_v53 = vld [vmem:[%s12366_s1 + $0x6ec] ss:$40 sps:$4 sm:$0xff]  }
  0x6f   :  { %4578 = vmatpush2.bf16.msra.mxu0 %v8190_v54  ;;  %v8281_v54 = vld [vmem:[%s12366_s1 + $0x468] ss:$40 sps:$4 sm:$0xff]  }
  0x70   :  { %4621 = vmatpush2.bf16.msra.mxu1 %v8193_v55  ;;  %4579 = vmatprep.subr.bf16.mxu0 %v8198_v56  ;;  %v8284_v55 = vld [vmem:[%s12366_s1 + $0x6e8] ss:$40 sps:$4 sm:$0xff]   ;;  %v8289_v56 = vld [vmem:[%s12366_s1 + $0x41c] ss:$40 sps:$4 sm:$0xff]  }
  0x71   :  { %4622 = vmatprep.subr.bf16.mxu1 %v8201_v57  ;;  %v8292_v57 = vld [vmem:[%s12366_s1 + $0x69c] ss:$40 sps:$4 sm:$0xff]  }
  0x73   :  { %4580 = vmatpush2.bf16.msra.mxu0 %v8196_v58  ;;  %v8287_v58 = vld [vmem:[%s12366_s1 + $0x418] ss:$40 sps:$4 sm:$0xff]  }
  0x74   :  { %4623 = vmatpush2.bf16.msra.mxu1 %v8199_v59  ;;  %4581 = vmatprep.subr.bf16.mxu0 %v8204_v60  ;;  %v8290_v59 = vld [vmem:[%s12366_s1 + $0x698] ss:$40 sps:$4 sm:$0xff]   ;;  %v8295_v60 = vld [vmem:[%s12366_s1 + $0x3cc] ss:$40 sps:$4 sm:$0xff]  }
  0x75   :  { %4624 = vmatprep.subr.bf16.mxu1 %v8207_v61  ;;  %v8293_v61 = vld [vmem:[%s12366_s1 + $0x3c8] ss:$40 sps:$4 sm:$0xff]  }
  0x77   :  { %4582 = vmatpush2.bf16.msra.mxu0 %v8202_v62  ;;  %v8296_v62 = vld [vmem:[%s12366_s1 + $0x648] ss:$40 sps:$4 sm:$0xff]  }
  0x78   :  { %4625 = vmatpush2.bf16.msra.mxu1 %v8205_v63  ;;  %4583 = vmatprep.subr.bf16.mxu0 %v8210_v0  ;;  %v8301_v63 = vld [vmem:[%s12366_s1 + $0x37c] ss:$40 sps:$4 sm:$0xff]  }
  0x79   :  { %4626 = vmatprep.subr.bf16.mxu1 %v8213_v1  ;;  %v8304_v0 = vld [vmem:[%s12366_s1 + $0x5fc] ss:$40 sps:$4 sm:$0xff]   ;;  %v8299_v1 = vld [vmem:[%s12366_s1 + $0x378] ss:$40 sps:$4 sm:$0xff]  }
  0x7b   :  { %4584 = vmatpush2.bf16.msra.mxu0 %v8208_v2  ;;  %v8302_v2 = vld [vmem:[%s12366_s1 + $0x5f8] ss:$40 sps:$4 sm:$0xff]  }
  0x7c   :  { %4627 = vmatpush2.bf16.msra.mxu1 %v8211_v3  ;;  %4585 = vmatprep.subr.bf16.mxu0 %v8216_v5  ;;  %v8307_v3 = vld [vmem:[%s12366_s1 + $0x32c] ss:$40 sps:$4 sm:$0xff]  }
  0x7d   :  { %4628 = vmatprep.subr.bf16.mxu1 %v8219_v6  ;;  %v8310_v5 = vld [vmem:[%s12366_s1 + $0x5ac] ss:$40 sps:$4 sm:$0xff]   ;;  %v8305_v6 = vld [vmem:[%s12366_s1 + $0x328] ss:$40 sps:$4 sm:$0xff]  }
  0x7f   :  { %4586 = vmatpush2.bf16.msra.mxu0 %v8214_v7  ;;  %v8308_v7 = vld [vmem:[%s12366_s1 + $0x5a8] ss:$40 sps:$4 sm:$0xff]  }
  0x80   :  { %4629 = vmatpush2.bf16.msra.mxu1 %v8217_v8  ;;  %4641 = vmatprep.subr.bf16.mxu0 %v8227_v9  ;;  %v8313_v8 = vld [vmem:[%s12366_s1 + $0x2dc] ss:$40 sps:$4 sm:$0xff]  }
  0x81   :  { %4684 = vmatprep.subr.bf16.mxu1 %v8230_v10  ;;  %v8316_v9 = vld [vmem:[%s12366_s1 + $0x55c] ss:$40 sps:$4 sm:$0xff]   ;;  %v8311_v10 = vld [vmem:[%s12366_s1 + $0x2d8] ss:$40 sps:$4 sm:$0xff]  }
  0x82   :  { %4588 = vmatmul.mubr.bf16.vlgmr.msra.gmra.mxu0 %v9831_v11 }
  0x83   :  { %4631 = vmatmul.mubr.bf16.vlgmr.msra.gmra.mxu1 %v8231_v13  ;;  %4642 = vmatpush1.bf16.msra.mxu0 %v8225_v12  ;;  %v8314_v12 = vld [vmem:[%s12366_s1 + $0x558] ss:$40 sps:$4 sm:$0xff]   ;;  %v8319_v13 = vld [vmem:[%s12366_s1 + $0x28c] ss:$40 sps:$4 sm:$0xff]  }
  0x84   :  { %4685 = vmatpush1.bf16.msra.mxu1 %v8228_v14  ;;  %4643 = vmatprep.subr.bf16.mxu0 %v8234_v15  ;;  %v8322_v14 = vld [vmem:[%s12366_s1 + $0x50c] ss:$40 sps:$4 sm:$0xff]   ;;  %v8317_v15 = vld [vmem:[%s12366_s1 + $0x288] ss:$40 sps:$4 sm:$0xff]  }
  0x85   :  { %4686 = vmatprep.subr.bf16.mxu1 %v8237_v16  ;;  %4673 = vmatprep.mubr.bf16.mxu0 %v12380_v21  ;;  %v8320_v16 = vld [vmem:[%s12366_s1 + $0x508] ss:$40 sps:$4 sm:$0xff]  }
  0x86   :  { %4716 = vmatprep.mubr.bf16.mxu1 %v9555_v49  ;;  %v8249_v49 = vld [vmem:[%s12366_s1 + $0x14c] ss:$40 sps:$4 sm:$0xff]  }
  0x87   :  { %4644 = vmatpush1.bf16.msra.mxu0 %v8232_v17  ;;  %v8325_v17 = vld [vmem:[%s12366_s1 + $0x9bc] ss:$40 sps:$4 sm:$0xff]  }
  0x88   :  { %4687 = vmatpush1.bf16.msra.mxu1 %v8235_v18  ;;  %4645 = vmatprep.subr.bf16.mxu0 %v8240_v19  ;;  %v8328_v18 = vld [vmem:[%s12366_s1 + $0xc3c] ss:$40 sps:$4 sm:$0xff]   ;;  %v8323_v19 = vld [vmem:[%s12366_s1 + $0x9b8] ss:$40 sps:$4 sm:$0xff]  }
  0x89   :  { %4688 = vmatprep.subr.bf16.mxu1 %v8243_v20  ;;  %v8326_v20 = vld [vmem:[%s12366_s1 + $0xc38] ss:$40 sps:$4 sm:$0xff]  }
  0x8b   :  { %4646 = vmatpush1.bf16.msra.mxu0 %v8238_v22  ;;  %v8331_v22 = vld [vmem:[%s12366_s1 + $0x96c] ss:$40 sps:$4 sm:$0xff]  }
  0x8c   :  { %4689 = vmatpush1.bf16.msra.mxu1 %v8241_v23  ;;  %4647 = vmatprep.subr.bf16.mxu0 %v8246_v24  ;;  %v8334_v23 = vld [vmem:[%s12366_s1 + $0xbec] ss:$40 sps:$4 sm:$0xff]   ;;  %v8329_v24 = vld [vmem:[%s12366_s1 + $0x968] ss:$40 sps:$4 sm:$0xff]  }
  0x8d   :  { %4690 = vmatprep.subr.bf16.mxu1 %v8249_v49  ;;  %v8332_v49 = vld [vmem:[%s12366_s1 + $0xbe8] ss:$40 sps:$4 sm:$0xff]  }
  0x8f   :  { %4648 = vmatpush1.bf16.msra.mxu0 %v8244_v25  ;;  %v8337_v25 = vld [vmem:[%s12366_s1 + $0x91c] ss:$40 sps:$4 sm:$0xff]  }
  0x90   :  { %4691 = vmatpush1.bf16.msra.mxu1 %v8247_v26  ;;  %4649 = vmatprep.subr.bf16.mxu0 %v8252_v27  ;;  %v8335_v26 = vld [vmem:[%s12366_s1 + $0x918] ss:$40 sps:$4 sm:$0xff]  }
  0x91   :  { %4692 = vmatprep.subr.bf16.mxu1 %v8255_v28  ;;  %v8338_v27 = vld [vmem:[%s12366_s1 + $0xb98] ss:$40 sps:$4 sm:$0xff]   ;;  %v8343_v28 = vld [vmem:[%s12366_s1 + $0x8cc] ss:$40 sps:$4 sm:$0xff]  }
  0x93   :  { %4650 = vmatpush1.bf16.msra.mxu0 %v8250_v29  ;;  %v8341_v29 = vld [vmem:[%s12366_s1 + $0x8c8] ss:$40 sps:$4 sm:$0xff]  }
  0x94   :  { %4693 = vmatpush1.bf16.msra.mxu1 %v8253_v30  ;;  %4651 = vmatprep.subr.bf16.mxu0 %v8258_v31  ;;  %v8344_v30 = vld [vmem:[%s12366_s1 + $0xb48] ss:$40 sps:$4 sm:$0xff]   ;;  %v8349_v31 = vld [vmem:[%s12366_s1 + $0x87c] ss:$40 sps:$4 sm:$0xff]  }
  0x95   :  { %4694 = vmatprep.subr.bf16.mxu1 %v8261_v32  ;;  %v8352_v32 = vld [vmem:[%s12366_s1 + $0xafc] ss:$40 sps:$4 sm:$0xff]  }
  0x97   :  { %4652 = vmatpush1.bf16.msra.mxu0 %v8256_v34  ;;  %v8347_v34 = vld [vmem:[%s12366_s1 + $0x878] ss:$40 sps:$4 sm:$0xff]  }
  0x98   :  { %4695 = vmatpush1.bf16.msra.mxu1 %v8259_v36  ;;  %4653 = vmatprep.subr.bf16.mxu0 %v8264_v37  ;;  %v8350_v36 = vld [vmem:[%s12366_s1 + $0xaf8] ss:$40 sps:$4 sm:$0xff]   ;;  %v8355_v37 = vld [vmem:[%s12366_s1 + $0x82c] ss:$40 sps:$4 sm:$0xff]  }
  0x99   :  { %4696 = vmatprep.subr.bf16.mxu1 %v8267_v38  ;;  %v8358_v38 = vld [vmem:[%s12366_s1 + $0xaac] ss:$40 sps:$4 sm:$0xff]  }
  0x9b   :  { %4654 = vmatpush1.bf16.msra.mxu0 %v8262_v39  ;;  %v8353_v39 = vld [vmem:[%s12366_s1 + $0x828] ss:$40 sps:$4 sm:$0xff]  }
  0x9c   :  { %4697 = vmatpush1.bf16.msra.mxu1 %v8265_v40  ;;  %4655 = vmatprep.subr.bf16.mxu0 %v8270_v41  ;;  %v8356_v40 = vld [vmem:[%s12366_s1 + $0xaa8] ss:$40 sps:$4 sm:$0xff]   ;;  %v8361_v41 = vld [vmem:[%s12366_s1 + $0x7dc] ss:$40 sps:$4 sm:$0xff]  }
  0x9d   :  { %4698 = vmatprep.subr.bf16.mxu1 %v8273_v42  ;;  %v8364_v42 = vld [vmem:[%s12366_s1 + $0xa5c] ss:$40 sps:$4 sm:$0xff]  }
  0x9f   :  { %4656 = vmatpush1.bf16.msra.mxu0 %v8268_v43  ;;  %v8359_v43 = vld [vmem:[%s12366_s1 + $0x7d8] ss:$40 sps:$4 sm:$0xff]  }
  0xa0   :  { %4699 = vmatpush1.bf16.msra.mxu1 %v8271_v44  ;;  %4727 = vmatprep.subr.bf16.mxu0 %v8280_v46  ;;  %v8362_v44 = vld [vmem:[%s12366_s1 + $0xa58] ss:$40 sps:$4 sm:$0xff]   ;;  %v8370_v46 = vld [vmem:[%s12366_s1 + $0xa0c] ss:$40 sps:$4 sm:$0xff]  }
  0xa1   :  { %4700 = vmatprep.subr.bf16.mxu1 %v8277_v45  ;;  %v8367_v45 = vld [vmem:[%s12366_s1 + $0x78c] ss:$40 sps:$4 sm:$0xff]  }
  0xa2   :  { %4674 = vmatmul.mubr.bf16.vlgmr.msra.gmra.mxu0 %v9938_v47 }
  0xa3   :  { %4728 = vmatpush1.bf16.msra.mxu0 %v8278_v51  ;;  %4759 = vmatprep.mubr.bf16.mxu0 %v9560_v50  ;;  %v8298_v50 = vld [vmem:[%s12366_s1 + $0x64c] ss:$40 sps:$4 sm:$0xff]   ;;  %v8368_v51 = vld [vmem:[%s12366_s1 + $0xa08] ss:$40 sps:$4 sm:$0xff]  }
  0xa4   :  { %4701 = vmatpush2.bf16.msra.mxu1 %v8275_v48  ;;  %4729 = vmatprep.subr.bf16.mxu0 %v8286_v53  ;;  %v8365_v48 = vld [vmem:[%s12366_s1 + $0x788] ss:$40 sps:$4 sm:$0xff]   ;;  %v8376_v53 = vld [vmem:[%s12366_s1 + $0x113c] ss:$40 sps:$4 sm:$0xff]  }
  0xa5   :  { %4702 = vmatprep.subr.bf16.mxu1 %v8283_v52  ;;  %v8373_v52 = vld [vmem:[%s12366_s1 + $0xebc] ss:$40 sps:$4 sm:$0xff]  }
  0xa7   :  { %4730 = vmatpush1.bf16.msra.mxu0 %v8284_v55  ;;  %v8374_v55 = vld [vmem:[%s12366_s1 + $0x1138] ss:$40 sps:$4 sm:$0xff]  }
  0xa8   :  { %4703 = vmatpush2.bf16.msra.mxu1 %v8281_v54  ;;  %4731 = vmatprep.subr.bf16.mxu0 %v8292_v57  ;;  %v8371_v54 = vld [vmem:[%s12366_s1 + $0xeb8] ss:$40 sps:$4 sm:$0xff]   ;;  %v8382_v57 = vld [vmem:[%s12366_s1 + $0x10ec] ss:$40 sps:$4 sm:$0xff]  }
  0xa9   :  { %4704 = vmatprep.subr.bf16.mxu1 %v8289_v56  ;;  %v8379_v56 = vld [vmem:[%s12366_s1 + $0xe6c] ss:$40 sps:$4 sm:$0xff]  }
  0xab   :  { %4732 = vmatpush1.bf16.msra.mxu0 %v8290_v59  ;;  %v8377_v59 = vld [vmem:[%s12366_s1 + $0xe68] ss:$40 sps:$4 sm:$0xff]  }
  0xac   :  { %4705 = vmatpush2.bf16.msra.mxu1 %v8287_v58  ;;  %4733 = vmatprep.subr.bf16.mxu0 %v8298_v50  ;;  %v10151_v58 = vld [vmem:[%s12367_s0 + $0x8] ss:$36 sps:$4 sm:$0xff]   ;;  %v8385_v50 = vld [vmem:[%s12366_s1 + $0xe1c] ss:$40 sps:$4 sm:$0xff]  }
  0xad   :  { %4706 = vmatprep.subr.bf16.mxu1 %v8295_v60  ;;  %v8380_v60 = vld [vmem:[%s12366_s1 + $0x10e8] ss:$40 sps:$4 sm:$0xff]  }
  0xaf   :  { %4734 = vmatpush1.bf16.msra.mxu0 %v8296_v62  ;;  %v8383_v62 = vld [vmem:[%s12366_s1 + $0xe18] ss:$40 sps:$4 sm:$0xff]  }
  0xb0   :  { %4707 = vmatpush2.bf16.msra.mxu1 %v8293_v61  ;;  %4735 = vmatprep.subr.bf16.mxu0 %v8304_v0  ;;  %v8388_v61 = vld [vmem:[%s12366_s1 + $0x109c] ss:$40 sps:$4 sm:$0xff]   ;;  %v8391_v0 = vld [vmem:[%s12366_s1 + $0xdcc] ss:$40 sps:$4 sm:$0xff]  }
  0xb1   :  { %4708 = vmatprep.subr.bf16.mxu1 %v8301_v63  ;;  %v8386_v63 = vld [vmem:[%s12366_s1 + $0x1098] ss:$40 sps:$4 sm:$0xff]  }
  0xb3   :  { %4736 = vmatpush1.bf16.msra.mxu0 %v8302_v2  ;;  %v8392_v2 = vld [vmem:[%s12366_s1 + $0x1048] ss:$40 sps:$4 sm:$0xff]  }
  0xb4   :  { %4709 = vmatpush2.bf16.msra.mxu1 %v8299_v1  ;;  %4737 = vmatprep.subr.bf16.mxu0 %v8310_v5  ;;  %v8389_v1 = vld [vmem:[%s12366_s1 + $0xdc8] ss:$40 sps:$4 sm:$0xff]   ;;  %v8400_v5 = vld [vmem:[%s12366_s1 + $0xffc] ss:$40 sps:$4 sm:$0xff]  }
  0xb5   :  { %4710 = vmatprep.subr.bf16.mxu1 %v8307_v3  ;;  %v8397_v3 = vld [vmem:[%s12366_s1 + $0xd7c] ss:$40 sps:$4 sm:$0xff]  }
  0xb7   :  { %4738 = vmatpush1.bf16.msra.mxu0 %v8308_v7  ;;  %v8398_v7 = vld [vmem:[%s12366_s1 + $0xff8] ss:$40 sps:$4 sm:$0xff]  }
  0xb8   :  { %4711 = vmatpush2.bf16.msra.mxu1 %v8305_v6  ;;  %4739 = vmatprep.subr.bf16.mxu0 %v8316_v9  ;;  %v8395_v6 = vld [vmem:[%s12366_s1 + $0xd78] ss:$40 sps:$4 sm:$0xff]   ;;  %v8406_v9 = vld [vmem:[%s12366_s1 + $0xfac] ss:$40 sps:$4 sm:$0xff]  }
  0xb9   :  { %4712 = vmatprep.subr.bf16.mxu1 %v8313_v8  ;;  %v8403_v8 = vld [vmem:[%s12366_s1 + $0xd2c] ss:$40 sps:$4 sm:$0xff]  }
  0xbb   :  { %4740 = vmatpush1.bf16.msra.mxu0 %v8314_v12  ;;  %v8404_v12 = vld [vmem:[%s12366_s1 + $0xfa8] ss:$40 sps:$4 sm:$0xff]  }
  0xbc   :  { %4713 = vmatpush2.bf16.msra.mxu1 %v8311_v10  ;;  %4741 = vmatprep.subr.bf16.mxu0 %v8322_v14  ;;  %v8401_v10 = vld [vmem:[%s12366_s1 + $0xd28] ss:$40 sps:$4 sm:$0xff]   ;;  %v8412_v14 = vld [vmem:[%s12366_s1 + $0xf5c] ss:$40 sps:$4 sm:$0xff]  }
  0xbd   :  { %4714 = vmatprep.subr.bf16.mxu1 %v8319_v13  ;;  %v8409_v13 = vld [vmem:[%s12366_s1 + $0xcdc] ss:$40 sps:$4 sm:$0xff]  }
  0xbf   :  { %4742 = vmatpush1.bf16.msra.mxu0 %v8320_v16  ;;  %v8410_v16 = vld [vmem:[%s12366_s1 + $0xf58] ss:$40 sps:$4 sm:$0xff]  }
  0xc0   :  { %4715 = vmatpush2.bf16.msra.mxu1 %v8317_v15  ;;  %4743 = vmatprep.subr.bf16.mxu0 %v8325_v17  ;;  %v8407_v15 = vld [vmem:[%s12366_s1 + $0xcd8] ss:$40 sps:$4 sm:$0xff]   ;;  %v8415_v17 = vld [vmem:[%s12366_s1 + $0xc8c] ss:$40 sps:$4 sm:$0xff]  }
  0xc1   :  { %4770 = vmatprep.subr.bf16.mxu1 %v8328_v18  ;;  %v8418_v18 = vld [vmem:[%s12366_s1 + $0xf0c] ss:$40 sps:$4 sm:$0xff]  }
  0xc3   :  { %4717 = vmatmul.mubr.bf16.vlgmr.msra.gmra.mxu1 %v9618_v4  ;;  %4744 = vmatpush2.bf16.msra.mxu0 %v8323_v19  ;;  %v8340_v4 = vld [vmem:[%s12366_s1 + $0xb9c] ss:$40 sps:$4 sm:$0xff]   ;;  %v8413_v19 = vld [vmem:[%s12366_s1 + $0xc88] ss:$40 sps:$4 sm:$0xff]  }
  0xc4   :  { %4771 = vmatpush1.bf16.msra.mxu1 %v8326_v20  ;;  %4745 = vmatprep.subr.bf16.mxu0 %v8331_v22  ;;  %v8416_v20 = vld [vmem:[%s12366_s1 + $0xf08] ss:$40 sps:$4 sm:$0xff]   ;;  %v8421_v22 = vld [vmem:[%s12366_s1 + $0x13bc] ss:$40 sps:$4 sm:$0xff]  }
  0xc5   :  { %4772 = vmatprep.subr.bf16.mxu1 %v8334_v23  ;;  %4802 = vmatprep.mubr.bf16.mxu1 %v9708_v33  ;;  %v8346_v33 = vld [vmem:[%s12366_s1 + $0xb4c] ss:$40 sps:$4 sm:$0xff]   ;;  %v8424_v23 = vld [vmem:[%s12366_s1 + $0x163c] ss:$40 sps:$4 sm:$0xff]  }
  0xc7   :  { %4746 = vmatpush2.bf16.msra.mxu0 %v8329_v24  ;;  %v8419_v24 = vld [vmem:[%s12366_s1 + $0x13b8] ss:$40 sps:$4 sm:$0xff]  }
  0xc8   :  { %4773 = vmatpush1.bf16.msra.mxu1 %v8332_v49  ;;  %4747 = vmatprep.subr.bf16.mxu0 %v8337_v25  ;;  %v8422_v49 = vld [vmem:[%s12366_s1 + $0x1638] ss:$40 sps:$4 sm:$0xff]   ;;  %v8427_v25 = vld [vmem:[%s12366_s1 + $0x136c] ss:$40 sps:$4 sm:$0xff]  }
  0xc9   :  { %4774 = vmatprep.subr.bf16.mxu1 %v8340_v4  ;;  %v8430_v4 = vld [vmem:[%s12366_s1 + $0x15ec] ss:$40 sps:$4 sm:$0xff]  }
  0xcb   :  { %4748 = vmatpush2.bf16.msra.mxu0 %v8335_v26  ;;  %v8425_v26 = vld [vmem:[%s12366_s1 + $0x1368] ss:$40 sps:$4 sm:$0xff]  }
  0xcc   :  { %4775 = vmatpush1.bf16.msra.mxu1 %v8338_v27  ;;  %4749 = vmatprep.subr.bf16.mxu0 %v8343_v28  ;;  %v8428_v27 = vld [vmem:[%s12366_s1 + $0x15e8] ss:$40 sps:$4 sm:$0xff]   ;;  %v8433_v28 = vld [vmem:[%s12366_s1 + $0x131c] ss:$40 sps:$4 sm:$0xff]  }
  0xcd   :  { %4776 = vmatprep.subr.bf16.mxu1 %v8346_v33  ;;  %v8431_v33 = vld [vmem:[%s12366_s1 + $0x1318] ss:$40 sps:$4 sm:$0xff]  }
  0xcf   :  { %4750 = vmatpush2.bf16.msra.mxu0 %v8341_v29  ;;  %v8434_v29 = vld [vmem:[%s12366_s1 + $0x1598] ss:$40 sps:$4 sm:$0xff]  }
  0xd0   :  { %4777 = vmatpush1.bf16.msra.mxu1 %v8344_v30  ;;  %4751 = vmatprep.subr.bf16.mxu0 %v8349_v31  ;;  %v8439_v30 = vld [vmem:[%s12366_s1 + $0x12cc] ss:$40 sps:$4 sm:$0xff]  }
  0xd1   :  { %4778 = vmatprep.subr.bf16.mxu1 %v8352_v32  ;;  %v8442_v31 = vld [vmem:[%s12366_s1 + $0x154c] ss:$40 sps:$4 sm:$0xff]   ;;  %v8437_v32 = vld [vmem:[%s12366_s1 + $0x12c8] ss:$40 sps:$4 sm:$0xff]  }
  0xd3   :  { %4752 = vmatpush2.bf16.msra.mxu0 %v8347_v34  ;;  %v8440_v34 = vld [vmem:[%s12366_s1 + $0x1548] ss:$40 sps:$4 sm:$0xff]  }
  0xd4   :  { %4779 = vmatpush1.bf16.msra.mxu1 %v8350_v36  ;;  %4753 = vmatprep.subr.bf16.mxu0 %v8355_v37  ;;  %v8445_v36 = vld [vmem:[%s12366_s1 + $0x127c] ss:$40 sps:$4 sm:$0xff]  }
  0xd5   :  { %4780 = vmatprep.subr.bf16.mxu1 %v8358_v38  ;;  %v8448_v37 = vld [vmem:[%s12366_s1 + $0x14fc] ss:$40 sps:$4 sm:$0xff]   ;;  %v8443_v38 = vld [vmem:[%s12366_s1 + $0x1278] ss:$40 sps:$4 sm:$0xff]  }
  0xd7   :  { %4754 = vmatpush2.bf16.msra.mxu0 %v8353_v39  ;;  %v8446_v39 = vld [vmem:[%s12366_s1 + $0x14f8] ss:$40 sps:$4 sm:$0xff]  }
  0xd8   :  { %4781 = vmatpush1.bf16.msra.mxu1 %v8356_v40  ;;  %4755 = vmatprep.subr.bf16.mxu0 %v8361_v41  ;;  %v8451_v40 = vld [vmem:[%s12366_s1 + $0x122c] ss:$40 sps:$4 sm:$0xff]  }
  0xd9   :  { %4782 = vmatprep.subr.bf16.mxu1 %v8364_v42  ;;  %v8454_v41 = vld [vmem:[%s12366_s1 + $0x14ac] ss:$40 sps:$4 sm:$0xff]   ;;  %v8449_v42 = vld [vmem:[%s12366_s1 + $0x1228] ss:$40 sps:$4 sm:$0xff]  }
  0xdb   :  { %4756 = vmatpush2.bf16.msra.mxu0 %v8359_v43  ;;  %v8452_v43 = vld [vmem:[%s12366_s1 + $0x14a8] ss:$40 sps:$4 sm:$0xff]  }
  0xdc   :  { %4783 = vmatpush1.bf16.msra.mxu1 %v8362_v44  ;;  %4757 = vmatprep.subr.bf16.mxu0 %v8367_v45  ;;  %v8457_v44 = vld [vmem:[%s12366_s1 + $0x11dc] ss:$40 sps:$4 sm:$0xff]  }
  0xdd   :  { %4784 = vmatprep.subr.bf16.mxu1 %v8370_v46  ;;  %v8460_v45 = vld [vmem:[%s12366_s1 + $0x145c] ss:$40 sps:$4 sm:$0xff]   ;;  %v8455_v46 = vld [vmem:[%s12366_s1 + $0x11d8] ss:$40 sps:$4 sm:$0xff]  }
  0xdf   :  { %4758 = vmatpush2.bf16.msra.mxu0 %v8365_v48  ;;  %v8458_v48 = vld [vmem:[%s12366_s1 + $0x1458] ss:$40 sps:$4 sm:$0xff]  }
  0xe0   :  { %4785 = vmatpush1.bf16.msra.mxu1 %v8368_v51  ;;  %4813 = vmatprep.subr.bf16.mxu0 %v8376_v53  ;;  %v8463_v51 = vld [vmem:[%s12366_s1 + $0x118c] ss:$40 sps:$4 sm:$0xff]   ;;  %v8461_v53 = vld [vmem:[%s12366_s1 + $0x1188] ss:$40 sps:$4 sm:$0xff]  }
  0xe1   :  { %4786 = vmatprep.subr.bf16.mxu1 %v8373_v52  ;;  %v8466_v52 = vld [vmem:[%s12366_s1 + $0x140c] ss:$40 sps:$4 sm:$0xff]  }
  0xe2   :  { %4760 = vmatmul.mubr.bf16.vlgmr.msra.gmra.mxu0 %v10151_v58 }
  0xe3   :  { %4814 = vmatpush1.bf16.msra.mxu0 %v8374_v55  ;;  %4845 = vmatprep.mubr.bf16.mxu0 %v9717_v35  ;;  %v8394_v35 = vld [vmem:[%s12366_s1 + $0x104c] ss:$40 sps:$4 sm:$0xff]  }
  0xe4   :  { %4787 = vmatpush2.bf16.msra.mxu1 %v8371_v54  ;;  %4815 = vmatprep.subr.bf16.mxu0 %v8382_v57  ;;  %v8464_v54 = vld [vmem:[%s12366_s1 + $0x1408] ss:$40 sps:$4 sm:$0xff]   ;;  %v8469_v55 = vld [vmem:[%s12366_s1 + $0x244] ss:$40 sps:$4 sm:$0xff]  }
  0xe5   :  { %4788 = vmatprep.subr.bf16.mxu1 %v8379_v56  ;;  %v8472_v56 = vld [vmem:[%s12366_s1 + $0x744] ss:$40 sps:$4 sm:$0xff]   ;;  %v8467_v57 = vld [vmem:[%s12366_s1 + $0x240] ss:$40 sps:$4 sm:$0xff]  }
  0xe7   :  { %4816 = vmatpush1.bf16.msra.mxu0 %v8380_v60  ;;  %v8475_v60 = vld [vmem:[%s12366_s1 + $0x1f4] ss:$40 sps:$4 sm:$0xff]  }
  0xe8   :  { %4789 = vmatpush2.bf16.msra.mxu1 %v8377_v59  ;;  %4817 = vmatprep.subr.bf16.mxu0 %v8388_v61  ;;  %v8470_v59 = vld [vmem:[%s12366_s1 + $0x740] ss:$40 sps:$4 sm:$0xff]   ;;  %v9324_v61 = vld [vmem:[%s12367_s0 + $0x18] ss:$36 sps:$4 sm:$0xff]  }
  0xe9   :  { %4790 = vmatprep.subr.bf16.mxu1 %v8385_v50  ;;  %v8478_v50 = vld [vmem:[%s12366_s1 + $0x6f4] ss:$40 sps:$4 sm:$0xff]  }
  0xeb   :  { %4818 = vmatpush1.bf16.msra.mxu0 %v8386_v63  ;;  %v8476_v63 = vld [vmem:[%s12366_s1 + $0x6f0] ss:$40 sps:$4 sm:$0xff]  }
  0xec   :  { %4791 = vmatpush2.bf16.msra.mxu1 %v8383_v62  ;;  %4819 = vmatprep.subr.bf16.mxu0 %v8394_v35  ;;  %v8473_v62 = vld [vmem:[%s12366_s1 + $0x1f0] ss:$40 sps:$4 sm:$0xff]   ;;  %v8484_v35 = vld [vmem:[%s12366_s1 + $0x6a4] ss:$40 sps:$4 sm:$0xff]  }
  0xed   :  { %4792 = vmatprep.subr.bf16.mxu1 %v8391_v0  ;;  %v8481_v0 = vld [vmem:[%s12366_s1 + $0x1a4] ss:$40 sps:$4 sm:$0xff]  }
  0xef   :  { %4820 = vmatpush1.bf16.msra.mxu0 %v8392_v2  ;;  %v8479_v2 = vld [vmem:[%s12366_s1 + $0x1a0] ss:$40 sps:$4 sm:$0xff]  }
  0xf0   :  { %4793 = vmatpush2.bf16.msra.mxu1 %v8389_v1  ;;  %4821 = vmatprep.subr.bf16.mxu0 %v8400_v5  ;;  %v9326_v1 = vld [vmem:[%s12367_s0 + $0xc] ss:$36 sps:$4 sm:$0xff]   ;;  %v8487_v5 = vld [vmem:[%s12366_s1 + $0x154] ss:$40 sps:$4 sm:$0xff]  }
  0xf1   :  { %4794 = vmatprep.subr.bf16.mxu1 %v8397_v3  ;;  %v8482_v3 = vld [vmem:[%s12366_s1 + $0x6a0] ss:$40 sps:$4 sm:$0xff]  }
  0xf3   :  { %4822 = vmatpush1.bf16.msra.mxu0 %v8398_v7  ;;  %v8485_v7 = vld [vmem:[%s12366_s1 + $0x150] ss:$40 sps:$4 sm:$0xff]  }
  0xf4   :  { %4795 = vmatpush2.bf16.msra.mxu1 %v8395_v6  ;;  %4823 = vmatprep.subr.bf16.mxu0 %v8406_v9  ;;  %v8490_v6 = vld [vmem:[%s12366_s1 + $0x654] ss:$40 sps:$4 sm:$0xff]   ;;  %v8493_v9 = vld [vmem:[%s12366_s1 + $0x104] ss:$40 sps:$4 sm:$0xff]  }
  0xf5   :  { %4796 = vmatprep.subr.bf16.mxu1 %v8403_v8  ;;  %v8488_v8 = vld [vmem:[%s12366_s1 + $0x650] ss:$40 sps:$4 sm:$0xff]  }
  0xf7   :  { %4824 = vmatpush1.bf16.msra.mxu0 %v8404_v12  ;;  %v8491_v12 = vld [vmem:[%s12366_s1 + $0x100] ss:$40 sps:$4 sm:$0xff]  }
  0xf8   :  { %4797 = vmatpush2.bf16.msra.mxu1 %v8401_v10  ;;  %4825 = vmatprep.subr.bf16.mxu0 %v8412_v14  ;;  %v8496_v10 = vld [vmem:[%s12366_s1 + $0x604] ss:$40 sps:$4 sm:$0xff]   ;;  %v8499_v14 = vld [vmem:[%s12366_s1 + $0xb4] ss:$40 sps:$4 sm:$0xff]  }
  0xf9   :  { %4798 = vmatprep.subr.bf16.mxu1 %v8409_v13  ;;  %v8494_v13 = vld [vmem:[%s12366_s1 + $0x600] ss:$40 sps:$4 sm:$0xff]  }
  0xfb   :  { %4826 = vmatpush1.bf16.msra.mxu0 %v8410_v16  ;;  %v8497_v16 = vld [vmem:[%s12366_s1 + $0xb0] ss:$40 sps:$4 sm:$0xff]  }
  0xfc   :  { %4799 = vmatpush2.bf16.msra.mxu1 %v8407_v15  ;;  %4827 = vmatprep.subr.bf16.mxu0 %v8418_v18  ;;  %v8502_v15 = vld [vmem:[%s12366_s1 + $0x5b4] ss:$40 sps:$4 sm:$0xff]   ;;  %v8505_v18 = vld [vmem:[%s12366_s1 + $0x64] ss:$40 sps:$4 sm:$0xff]  }
  0xfd   :  { %4800 = vmatprep.subr.bf16.mxu1 %v8415_v17  ;;  %v8500_v17 = vld [vmem:[%s12366_s1 + $0x5b0] ss:$40 sps:$4 sm:$0xff]  }
  0xff   :  { %4828 = vmatpush1.bf16.msra.mxu0 %v8416_v20  ;;  %v8503_v20 = vld [vmem:[%s12366_s1 + $0x60] ss:$40 sps:$4 sm:$0xff]  }
 0x100   :  { %4801 = vmatpush2.bf16.msra.mxu1 %v8413_v19  ;;  %4829 = vmatprep.subr.bf16.mxu0 %v8421_v22  ;;  %v8508_v19 = vld [vmem:[%s12366_s1 + $0x564] ss:$40 sps:$4 sm:$0xff]   ;;  %v8506_v22 = vld [vmem:[%s12366_s1 + $0x560] ss:$40 sps:$4 sm:$0xff]  }
 0x101   :  { %4856 = vmatprep.subr.bf16.mxu1 %v8424_v23  ;;  %v8511_v23 = vld [vmem:[%s12366_s1 + $0x14] ss:$40 sps:$4 sm:$0xff]  }
 0x103   :  { %4803 = vmatmul.mubr.bf16.vlgmr.msra.gmra.mxu1 %v9831_v11  ;;  %4830 = vmatpush2.bf16.msra.mxu0 %v8419_v24  ;;  %v8436_v11 = vld [vmem:[%s12366_s1 + $0x159c] ss:$40 sps:$4 sm:$0xff]  }
 0x104   :  { %4857 = vmatpush1.bf16.msra.mxu1 %v8422_v49  ;;  %4831 = vmatprep.subr.bf16.mxu0 %v8427_v25  ;;  %v8514_v24 = vld [vmem:[%s12366_s1 + $0x514] ss:$40 sps:$4 sm:$0xff]   ;;  %v8509_v49 = vld [vmem:[%s12366_s1 + $0x10] ss:$40 sps:$4 sm:$0xff]  }
 0x105   :  { %4858 = vmatprep.subr.bf16.mxu1 %v8430_v4  ;;  %4888 = vmatprep.mubr.bf16.mxu1 %v12380_v21  ;;  %v8512_v25 = vld [vmem:[%s12366_s1 + $0x510] ss:$40 sps:$4 sm:$0xff]   ;;  %v8517_v4 = vld [vmem:[%s12366_s1 + $0x4c4] ss:$40 sps:$4 sm:$0xff]  }
 0x107   :  { %4832 = vmatpush2.bf16.msra.mxu0 %v8425_v26  ;;  %v8520_v26 = vld [vmem:[%s12366_s1 + $0x9c4] ss:$40 sps:$4 sm:$0xff]  }
 0x108   :  { %4859 = vmatpush1.bf16.msra.mxu1 %v8428_v27  ;;  %4833 = vmatprep.subr.bf16.mxu0 %v8433_v28  ;;  %v8515_v27 = vld [vmem:[%s12366_s1 + $0x4c0] ss:$40 sps:$4 sm:$0xff]  }
 0x109   :  { %4860 = vmatprep.subr.bf16.mxu1 %v8436_v11  ;;  %v8518_v28 = vld [vmem:[%s12366_s1 + $0x9c0] ss:$40 sps:$4 sm:$0xff]   ;;  %v8523_v11 = vld [vmem:[%s12366_s1 + $0x474] ss:$40 sps:$4 sm:$0xff]  }
 0x10b   :  { %4834 = vmatpush2.bf16.msra.mxu0 %v8431_v33  ;;  %v8526_v33 = vld [vmem:[%s12366_s1 + $0x974] ss:$40 sps:$4 sm:$0xff]  }
 0x10c   :  { %4861 = vmatpush1.bf16.msra.mxu1 %v8434_v29  ;;  %4835 = vmatprep.subr.bf16.mxu0 %v8439_v30  ;;  %v8521_v29 = vld [vmem:[%s12366_s1 + $0x470] ss:$40 sps:$4 sm:$0xff]  }
 0x10d   :  { %4862 = vmatprep.subr.bf16.mxu1 %v8442_v31  ;;  %v8524_v30 = vld [vmem:[%s12366_s1 + $0x970] ss:$40 sps:$4 sm:$0xff]   ;;  %v8529_v31 = vld [vmem:[%s12366_s1 + $0x424] ss:$40 sps:$4 sm:$0xff]  }
 0x10f   :  { %4836 = vmatpush2.bf16.msra.mxu0 %v8437_v32  ;;  %v8532_v32 = vld [vmem:[%s12366_s1 + $0x924] ss:$40 sps:$4 sm:$0xff]  }
 0x110   :  { %4863 = vmatpush1.bf16.msra.mxu1 %v8440_v34  ;;  %4837 = vmatprep.subr.bf16.mxu0 %v8445_v36  ;;  %v8527_v34 = vld [vmem:[%s12366_s1 + $0x420] ss:$40 sps:$4 sm:$0xff]  }
 0x111   :  { %4864 = vmatprep.subr.bf16.mxu1 %v8448_v37  ;;  %v8530_v36 = vld [vmem:[%s12366_s1 + $0x920] ss:$40 sps:$4 sm:$0xff]   ;;  %v8535_v37 = vld [vmem:[%s12366_s1 + $0x3d4] ss:$40 sps:$4 sm:$0xff]  }
 0x113   :  { %4838 = vmatpush2.bf16.msra.mxu0 %v8443_v38  ;;  %v8538_v38 = vld [vmem:[%s12366_s1 + $0x8d4] ss:$40 sps:$4 sm:$0xff]  }
 0x114   :  { %4865 = vmatpush1.bf16.msra.mxu1 %v8446_v39  ;;  %4839 = vmatprep.subr.bf16.mxu0 %v8451_v40  ;;  %v8533_v39 = vld [vmem:[%s12366_s1 + $0x3d0] ss:$40 sps:$4 sm:$0xff]  }
 0x115   :  { %4866 = vmatprep.subr.bf16.mxu1 %v8454_v41  ;;  %v8536_v40 = vld [vmem:[%s12366_s1 + $0x8d0] ss:$40 sps:$4 sm:$0xff]   ;;  %v8541_v41 = vld [vmem:[%s12366_s1 + $0x384] ss:$40 sps:$4 sm:$0xff]  }
 0x117   :  { %4840 = vmatpush2.bf16.msra.mxu0 %v8449_v42  ;;  %v8544_v42 = vld [vmem:[%s12366_s1 + $0x884] ss:$40 sps:$4 sm:$0xff]  }
 0x118   :  { %4867 = vmatpush1.bf16.msra.mxu1 %v8452_v43  ;;  %4841 = vmatprep.subr.bf16.mxu0 %v8457_v44  ;;  %v8539_v43 = vld [vmem:[%s12366_s1 + $0x380] ss:$40 sps:$4 sm:$0xff]  }
 0x119   :  { %4868 = vmatprep.subr.bf16.mxu1 %v8460_v45  ;;  %v8542_v44 = vld [vmem:[%s12366_s1 + $0x880] ss:$40 sps:$4 sm:$0xff]   ;;  %v8547_v45 = vld [vmem:[%s12366_s1 + $0x334] ss:$40 sps:$4 sm:$0xff]  }
 0x11b   :  { %4842 = vmatpush2.bf16.msra.mxu0 %v8455_v46  ;;  %v8550_v46 = vld [vmem:[%s12366_s1 + $0x834] ss:$40 sps:$4 sm:$0xff]  }
 0x11c   :  { %4869 = vmatpush1.bf16.msra.mxu1 %v8458_v48  ;;  %4843 = vmatprep.subr.bf16.mxu0 %v8463_v51  ;;  %v8545_v48 = vld [vmem:[%s12366_s1 + $0x330] ss:$40 sps:$4 sm:$0xff]  }
 0x11d   :  { %4870 = vmatprep.subr.bf16.mxu1 %v8466_v52  ;;  %v8548_v51 = vld [vmem:[%s12366_s1 + $0x830] ss:$40 sps:$4 sm:$0xff]   ;;  %v8553_v52 = vld [vmem:[%s12366_s1 + $0x2e4] ss:$40 sps:$4 sm:$0xff]  }
 0x11f   :  { %4844 = vmatpush2.bf16.msra.mxu0 %v8461_v53  ;;  %v8556_v53 = vld [vmem:[%s12366_s1 + $0x7e4] ss:$40 sps:$4 sm:$0xff]  }
 0x120   :  { %4871 = vmatpush1.bf16.msra.mxu1 %v8464_v54  ;;  %4899 = vmatprep.subr.bf16.mxu0 %v8469_v55  ;;  %v8551_v54 = vld [vmem:[%s12366_s1 + $0x2e0] ss:$40 sps:$4 sm:$0xff]  }
 0x121   :  { %4942 = vmatprep.subr.bf16.mxu1 %v8472_v56  ;;  %v8554_v55 = vld [vmem:[%s12366_s1 + $0x7e0] ss:$40 sps:$4 sm:$0xff]   ;;  %v8559_v56 = vld [vmem:[%s12366_s1 + $0x294] ss:$40 sps:$4 sm:$0xff]  }
 0x122   :  { %4846 = vmatmul.mubr.bf16.vlgmr.msra.gmra.mxu0 %v9324_v61  ;;  %v8568_v61 = vld [vmem:[%s12366_s1 + $0x1144] ss:$40 sps:$4 sm:$0xff]  }
 0x123   :  { %4889 = vmatmul.mubr.bf16.vlgmr.msra.gmra.mxu1 %v9938_v47  ;;  %4900 = vmatpush1.bf16.msra.mxu0 %v8467_v57  ;;  %v9325_v47 = vld [vmem:[%s12367_s0 + $0x4] ss:$36 sps:$4 sm:$0xff]   ;;  %v8562_v57 = vld [vmem:[%s12366_s1 + $0x794] ss:$40 sps:$4 sm:$0xff]  }
 0x124   :  { %4943 = vmatpush1.bf16.msra.mxu1 %v8470_v59  ;;  %4901 = vmatprep.subr.bf16.mxu0 %v8475_v60  ;;  %v8557_v59 = vld [vmem:[%s12366_s1 + $0x290] ss:$40 sps:$4 sm:$0xff]  }
 0x125   :  { %4944 = vmatprep.subr.bf16.mxu1 %v8478_v50  ;;  %4931 = vmatprep.mubr.bf16.mxu0 %v9325_v47  ;;  %v8560_v60 = vld [vmem:[%s12366_s1 + $0x790] ss:$40 sps:$4 sm:$0xff]   ;;  %v8565_v50 = vld [vmem:[%s12366_s1 + $0xc44] ss:$40 sps:$4 sm:$0xff]  }
 0x126   :  { %4974 = vmatprep.mubr.bf16.mxu1 %v9326_v1  ;;  %v10554_v47 = vld [vmem:[%s12367_s0] ss:$36 sps:$4 sm:$0xff]   ;;  %v8569_v1 = vld [vmem:[%s12366_s1 + $0xbf0] ss:$40 sps:$4 sm:$0xff]  }
 0x127   :  { %4902 = vmatpush1.bf16.msra.mxu0 %v8473_v62  ;;  %v8563_v62 = vld [vmem:[%s12366_s1 + $0xc40] ss:$40 sps:$4 sm:$0xff]  }
 0x128   :  { %4945 = vmatpush1.bf16.msra.mxu1 %v8476_v63  ;;  %4903 = vmatprep.subr.bf16.mxu0 %v8481_v0  ;;  %v8566_v63 = vld [vmem:[%s12366_s1 + $0x1140] ss:$40 sps:$4 sm:$0xff]   ;;  %v8571_v0 = vld [vmem:[%s12366_s1 + $0xbf4] ss:$40 sps:$4 sm:$0xff]  }
 0x129   :  { %4946 = vmatprep.subr.bf16.mxu1 %v8484_v35  ;;  %v8574_v35 = vld [vmem:[%s12366_s1 + $0x10f4] ss:$40 sps:$4 sm:$0xff]  }
 0x12b   :  { %4904 = vmatpush1.bf16.msra.mxu0 %v8479_v2  ;;  %v8572_v2 = vld [vmem:[%s12366_s1 + $0x10f0] ss:$40 sps:$4 sm:$0xff]  }
 0x12c   :  { %4947 = vmatpush1.bf16.msra.mxu1 %v8482_v3  ;;  %4905 = vmatprep.subr.bf16.mxu0 %v8487_v5  ;;  %v8577_v3 = vld [vmem:[%s12366_s1 + $0xba4] ss:$40 sps:$4 sm:$0xff]  }
 0x12d   :  { %4948 = vmatprep.subr.bf16.mxu1 %v8490_v6  ;;  %v8580_v5 = vld [vmem:[%s12366_s1 + $0x10a4] ss:$40 sps:$4 sm:$0xff]   ;;  %v10579_v6 = vld [vmem:[%s12367_s0 + $0x1c] ss:$36 sps:$4 sm:$0xff]  }
 0x12f   :  { %4906 = vmatpush1.bf16.msra.mxu0 %v8485_v7  ;;  %v8575_v7 = vld [vmem:[%s12366_s1 + $0xba0] ss:$40 sps:$4 sm:$0xff]  }
 0x130   :  { %4949 = vmatpush1.bf16.msra.mxu1 %v8488_v8  ;;  %4907 = vmatprep.subr.bf16.mxu0 %v8493_v9  ;;  %v8578_v8 = vld [vmem:[%s12366_s1 + $0x10a0] ss:$40 sps:$4 sm:$0xff]   ;;  %v8583_v9 = vld [vmem:[%s12366_s1 + $0xb54] ss:$40 sps:$4 sm:$0xff]  }
 0x131   :  { %4950 = vmatprep.subr.bf16.mxu1 %v8496_v10  ;;  %v8586_v10 = vld [vmem:[%s12366_s1 + $0x1054] ss:$40 sps:$4 sm:$0xff]  }
 0x133   :  { %4908 = vmatpush1.bf16.msra.mxu0 %v8491_v12  ;;  %v8581_v12 = vld [vmem:[%s12366_s1 + $0xb50] ss:$40 sps:$4 sm:$0xff]  }
 0x134   :  { %4951 = vmatpush1.bf16.msra.mxu1 %v8494_v13  ;;  %4909 = vmatprep.subr.bf16.mxu0 %v8499_v14  ;;  %v8584_v13 = vld [vmem:[%s12366_s1 + $0x1050] ss:$40 sps:$4 sm:$0xff]   ;;  %v8589_v14 = vld [vmem:[%s12366_s1 + $0xb04] ss:$40 sps:$4 sm:$0xff]  }
 0x135   :  { %4952 = vmatprep.subr.bf16.mxu1 %v8502_v15  ;;  %v8592_v15 = vld [vmem:[%s12366_s1 + $0x1004] ss:$40 sps:$4 sm:$0xff]  }
 0x137   :  { %4910 = vmatpush1.bf16.msra.mxu0 %v8497_v16  ;;  %v8587_v16 = vld [vmem:[%s12366_s1 + $0xb00] ss:$40 sps:$4 sm:$0xff]  }
 0x138   :  { %4953 = vmatpush1.bf16.msra.mxu1 %v8500_v17  ;;  %4911 = vmatprep.subr.bf16.mxu0 %v8505_v18  ;;  %v8590_v17 = vld [vmem:[%s12366_s1 + $0x1000] ss:$40 sps:$4 sm:$0xff]   ;;  %v8595_v18 = vld [vmem:[%s12366_s1 + $0xab4] ss:$40 sps:$4 sm:$0xff]  }
 0x139   :  { %4954 = vmatprep.subr.bf16.mxu1 %v8508_v19  ;;  %v8598_v19 = vld [vmem:[%s12366_s1 + $0xfb4] ss:$40 sps:$4 sm:$0xff]  }
 0x13b   :  { %4912 = vmatpush1.bf16.msra.mxu0 %v8503_v20  ;;  %v8593_v20 = vld [vmem:[%s12366_s1 + $0xab0] ss:$40 sps:$4 sm:$0xff]  }
 0x13c   :  { %4955 = vmatpush1.bf16.msra.mxu1 %v8506_v22  ;;  %4913 = vmatprep.subr.bf16.mxu0 %v8511_v23  ;;  %v8596_v22 = vld [vmem:[%s12366_s1 + $0xfb0] ss:$40 sps:$4 sm:$0xff]   ;;  %v8601_v23 = vld [vmem:[%s12366_s1 + $0xa64] ss:$40 sps:$4 sm:$0xff]  }
 0x13d   :  { %4956 = vmatprep.subr.bf16.mxu1 %v8514_v24  ;;  %v8604_v24 = vld [vmem:[%s12366_s1 + $0xf64] ss:$40 sps:$4 sm:$0xff]  }
 0x13f   :  { %4914 = vmatpush1.bf16.msra.mxu0 %v8509_v49  ;;  %v8599_v49 = vld [vmem:[%s12366_s1 + $0xa60] ss:$40 sps:$4 sm:$0xff]  }
 0x140   :  { %4957 = vmatpush1.bf16.msra.mxu1 %v8512_v25  ;;  %4915 = vmatprep.subr.bf16.mxu0 %v8517_v4  ;;  %v8602_v25 = vld [vmem:[%s12366_s1 + $0xf60] ss:$40 sps:$4 sm:$0xff]   ;;  %v8607_v4 = vld [vmem:[%s12366_s1 + $0xa14] ss:$40 sps:$4 sm:$0xff]  }
 0x141   :  { %4958 = vmatprep.subr.bf16.mxu1 %v8520_v26  ;;  %v8610_v26 = vld [vmem:[%s12366_s1 + $0xf14] ss:$40 sps:$4 sm:$0xff]  }
 0x143   :  { %4916 = vmatpush2.bf16.msra.mxu0 %v8515_v27  ;;  %v8605_v27 = vld [vmem:[%s12366_s1 + $0xa10] ss:$40 sps:$4 sm:$0xff]  }
 0x144   :  { %4959 = vmatpush2.bf16.msra.mxu1 %v8518_v28  ;;  %4917 = vmatprep.subr.bf16.mxu0 %v8523_v11  ;;  %v8608_v28 = vld [vmem:[%s12366_s1 + $0xf10] ss:$40 sps:$4 sm:$0xff]   ;;  %v8613_v11 = vld [vmem:[%s12366_s1 + $0xec4] ss:$40 sps:$4 sm:$0xff]  }
 0x145   :  { %4960 = vmatprep.subr.bf16.mxu1 %v8526_v33  ;;  %v8616_v33 = vld [vmem:[%s12366_s1 + $0x13c4] ss:$40 sps:$4 sm:$0xff]  }
 0x147   :  { %4918 = vmatpush2.bf16.msra.mxu0 %v8521_v29  ;;  %v8611_v29 = vld [vmem:[%s12366_s1 + $0xec0] ss:$40 sps:$4 sm:$0xff]  }
 0x148   :  { %4961 = vmatpush2.bf16.msra.mxu1 %v8524_v30  ;;  %4919 = vmatprep.subr.bf16.mxu0 %v8529_v31  ;;  %v8614_v30 = vld [vmem:[%s12366_s1 + $0x13c0] ss:$40 sps:$4 sm:$0xff]   ;;  %v8619_v31 = vld [vmem:[%s12366_s1 + $0xe74] ss:$40 sps:$4 sm:$0xff]  }
 0x149   :  { %4962 = vmatprep.subr.bf16.mxu1 %v8532_v32  ;;  %v8622_v32 = vld [vmem:[%s12366_s1 + $0x1374] ss:$40 sps:$4 sm:$0xff]  }
 0x14b   :  { %4920 = vmatpush2.bf16.msra.mxu0 %v8527_v34  ;;  %v8617_v34 = vld [vmem:[%s12366_s1 + $0xe70] ss:$40 sps:$4 sm:$0xff]  }
 0x14c   :  { %4963 = vmatpush2.bf16.msra.mxu1 %v8530_v36  ;;  %4921 = vmatprep.subr.bf16.mxu0 %v8535_v37  ;;  %v8620_v36 = vld [vmem:[%s12366_s1 + $0x1370] ss:$40 sps:$4 sm:$0xff]   ;;  %v8625_v37 = vld [vmem:[%s12366_s1 + $0xe24] ss:$40 sps:$4 sm:$0xff]  }
 0x14d   :  { %4964 = vmatprep.subr.bf16.mxu1 %v8538_v38  ;;  %v8628_v38 = vld [vmem:[%s12366_s1 + $0x1324] ss:$40 sps:$4 sm:$0xff]  }
 0x14f   :  { %4922 = vmatpush2.bf16.msra.mxu0 %v8533_v39  ;;  %v8623_v39 = vld [vmem:[%s12366_s1 + $0xe20] ss:$40 sps:$4 sm:$0xff]  }
 0x150   :  { %4965 = vmatpush2.bf16.msra.mxu1 %v8536_v40  ;;  %4923 = vmatprep.subr.bf16.mxu0 %v8541_v41  ;;  %v8626_v40 = vld [vmem:[%s12366_s1 + $0x1320] ss:$40 sps:$4 sm:$0xff]   ;;  %v8631_v41 = vld [vmem:[%s12366_s1 + $0xdd4] ss:$40 sps:$4 sm:$0xff]  }
 0x151   :  { %4966 = vmatprep.subr.bf16.mxu1 %v8544_v42  ;;  %v8634_v42 = vld [vmem:[%s12366_s1 + $0x12d4] ss:$40 sps:$4 sm:$0xff]  }
 0x153   :  { %4924 = vmatpush2.bf16.msra.mxu0 %v8539_v43  ;;  %v8629_v43 = vld [vmem:[%s12366_s1 + $0xdd0] ss:$40 sps:$4 sm:$0xff]  }
 0x154   :  { %4967 = vmatpush2.bf16.msra.mxu1 %v8542_v44  ;;  %4925 = vmatprep.subr.bf16.mxu0 %v8547_v45  ;;  %v8632_v44 = vld [vmem:[%s12366_s1 + $0x12d0] ss:$40 sps:$4 sm:$0xff]   ;;  %v8637_v45 = vld [vmem:[%s12366_s1 + $0xd84] ss:$40 sps:$4 sm:$0xff]  }
 0x155   :  { %4968 = vmatprep.subr.bf16.mxu1 %v8550_v46  ;;  %v8640_v46 = vld [vmem:[%s12366_s1 + $0x1284] ss:$40 sps:$4 sm:$0xff]  }
 0x157   :  { %4926 = vmatpush2.bf16.msra.mxu0 %v8545_v48  ;;  %v8635_v48 = vld [vmem:[%s12366_s1 + $0xd80] ss:$40 sps:$4 sm:$0xff]  }
 0x158   :  { %4969 = vmatpush2.bf16.msra.mxu1 %v8548_v51  ;;  %4927 = vmatprep.subr.bf16.mxu0 %v8553_v52  ;;  %v8638_v51 = vld [vmem:[%s12366_s1 + $0x1280] ss:$40 sps:$4 sm:$0xff]   ;;  %v8643_v52 = vld [vmem:[%s12366_s1 + $0xd34] ss:$40 sps:$4 sm:$0xff]  }
 0x159   :  { %4970 = vmatprep.subr.bf16.mxu1 %v8556_v53  ;;  %v8646_v53 = vld [vmem:[%s12366_s1 + $0x1234] ss:$40 sps:$4 sm:$0xff]  }
 0x15b   :  { %4928 = vmatpush2.bf16.msra.mxu0 %v8551_v54  ;;  %v8641_v54 = vld [vmem:[%s12366_s1 + $0xd30] ss:$40 sps:$4 sm:$0xff]  }
 0x15c   :  { %4971 = vmatpush2.bf16.msra.mxu1 %v8554_v55  ;;  %4929 = vmatprep.subr.bf16.mxu0 %v8559_v56  ;;  %v8644_v55 = vld [vmem:[%s12366_s1 + $0x1230] ss:$40 sps:$4 sm:$0xff]   ;;  %v8649_v56 = vld [vmem:[%s12366_s1 + $0xce4] ss:$40 sps:$4 sm:$0xff]  }
 0x15d   :  { %4972 = vmatprep.subr.bf16.mxu1 %v8562_v57  ;;  %v8652_v57 = vld [vmem:[%s12366_s1 + $0x11e4] ss:$40 sps:$4 sm:$0xff]  }
 0x15f   :  { %4930 = vmatpush2.bf16.msra.mxu0 %v8557_v59  ;;  %v8647_v59 = vld [vmem:[%s12366_s1 + $0xce0] ss:$40 sps:$4 sm:$0xff]  }
 0x160   :  { %4973 = vmatpush2.bf16.msra.mxu1 %v8560_v60  ;;  %4985 = vmatprep.subr.bf16.mxu0 %v8565_v50  ;;  %v8650_v60 = vld [vmem:[%s12366_s1 + $0x11e0] ss:$40 sps:$4 sm:$0xff]   ;;  %v8655_v50 = vld [vmem:[%s12366_s1 + $0xc94] ss:$40 sps:$4 sm:$0xff]  }
 0x161   :  { %5028 = vmatprep.subr.bf16.mxu1 %v8568_v61  ;;  %v8658_v61 = vld [vmem:[%s12366_s1 + $0x1194] ss:$40 sps:$4 sm:$0xff]  }
 0x162   :  { %4932 = vmatmul.mubr.bf16.vlgmr.msra.gmra.mxu0 %v10554_v47 }
 0x163   :  { %4975 = vmatmul.mubr.bf16.vlgmr.msra.gmra.mxu1 %v10151_v58  ;;  %4986 = vmatpush1.bf16.msra.mxu0 %v8563_v62  ;;  %v10573_v58 = vld [vmem:[%s12367_s0 + $0x14] ss:$36 sps:$4 sm:$0xff]  }
 0x164   :  { %5029 = vmatpush1.bf16.msra.mxu1 %v8566_v63  ;;  %4987 = vmatprep.subr.bf16.mxu0 %v8571_v0  ;;  %v8653_v62 = vld [vmem:[%s12366_s1 + $0xc90] ss:$40 sps:$4 sm:$0xff]   ;;  %v8661_v0 = vld [vmem:[%s12366_s1 + $0x1644] ss:$40 sps:$4 sm:$0xff]  }
 0x165   :  { %5030 = vmatprep.subr.bf16.mxu1 %v8574_v35  ;;  %5017 = vmatprep.mubr.bf16.mxu0 %v10573_v58  ;;  %v8656_v63 = vld [vmem:[%s12366_s1 + $0x1190] ss:$40 sps:$4 sm:$0xff]   ;;  %v8664_v35 = vld [vmem:[%s12366_s1 + $0x24c] ss:$40 sps:$4 sm:$0xff]  }
 0x166   :  { %5060 = vmatprep.mubr.bf16.mxu1 %v10579_v6 }
 0x167   :  { %4988 = vmatpush1.bf16.msra.mxu0 %v8569_v1  ;;  %v8659_v1 = vld [vmem:[%s12366_s1 + $0x1640] ss:$40 sps:$4 sm:$0xff]  }
 0x168   :  { %5031 = vmatpush1.bf16.msra.mxu1 %v8572_v2  ;;  %4989 = vmatprep.subr.bf16.mxu0 %v8577_v3  ;;  %v8662_v2 = vld [vmem:[%s12366_s1 + $0x248] ss:$40 sps:$4 sm:$0xff]   ;;  %v8667_v3 = vld [vmem:[%s12366_s1 + $0x15f4] ss:$40 sps:$4 sm:$0xff]  }
 0x169   :  { %5032 = vmatprep.subr.bf16.mxu1 %v8580_v5  ;;  %v8670_v5 = vld [vmem:[%s12366_s1 + $0x1fc] ss:$40 sps:$4 sm:$0xff]  }
 0x16b   :  { %4990 = vmatpush1.bf16.msra.mxu0 %v8575_v7  ;;  %v10765_v7 = vld [vmem:[%s12367_s0 + $0x10] ss:$36 sps:$4 sm:$0xff]  }
 0x16c   :  { %5033 = vmatpush1.bf16.msra.mxu1 %v8578_v8  ;;  %4991 = vmatprep.subr.bf16.mxu0 %v8583_v9  ;;  %v10771_v8 = vld [vmem:[%s12367_s0 + $0x18] ss:$36 sps:$4 sm:$0xff]  }
 0x16d   :  { %5034 = vmatprep.subr.bf16.mxu1 %v8586_v10  ;;  %v8665_v9 = vld [vmem:[%s12366_s1 + $0x15f0] ss:$40 sps:$4 sm:$0xff]  }
 0x16e   :  { %v8668_v10 = vld [vmem:[%s12366_s1 + $0x1f8] ss:$40 sps:$4 sm:$0xff]  }
 0x16f   :  { %4992 = vmatpush1.bf16.msra.mxu0 %v8581_v12  ;;  %v8673_v12 = vld [vmem:[%s12366_s1 + $0x15a4] ss:$40 sps:$4 sm:$0xff]  }
 0x170   :  { %5035 = vmatpush1.bf16.msra.mxu1 %v8584_v13  ;;  %4993 = vmatprep.subr.bf16.mxu0 %v8589_v14  ;;  %v8676_v13 = vld [vmem:[%s12366_s1 + $0x1ac] ss:$40 sps:$4 sm:$0xff]   ;;  %v10790_v14 = vld [vmem:[%s12367_s0 + $0x4] ss:$36 sps:$4 sm:$0xff]  }
 0x171   :  { %5036 = vmatprep.subr.bf16.mxu1 %v8592_v15  ;;  %v8671_v15 = vld [vmem:[%s12366_s1 + $0x15a0] ss:$40 sps:$4 sm:$0xff]  }
 0x173   :  { %4994 = vmatpush1.bf16.msra.mxu0 %v8587_v16  ;;  %v8674_v16 = vld [vmem:[%s12366_s1 + $0x1a8] ss:$40 sps:$4 sm:$0xff]  }
 0x174   :  { %5037 = vmatpush1.bf16.msra.mxu1 %v8590_v17  ;;  %4995 = vmatprep.subr.bf16.mxu0 %v8595_v18  ;;  %v8679_v17 = vld [vmem:[%s12366_s1 + $0x1554] ss:$40 sps:$4 sm:$0xff]  }
 0x175   :  { %5038 = vmatprep.subr.bf16.mxu1 %v8598_v19  ;;  %v8682_v18 = vld [vmem:[%s12366_s1 + $0x15c] ss:$40 sps:$4 sm:$0xff]   ;;  %v8677_v19 = vld [vmem:[%s12366_s1 + $0x1550] ss:$40 sps:$4 sm:$0xff]  }
 0x177   :  { %4996 = vmatpush1.bf16.msra.mxu0 %v8593_v20  ;;  %v8680_v20 = vld [vmem:[%s12366_s1 + $0x158] ss:$40 sps:$4 sm:$0xff]  }
 0x178   :  { %5039 = vmatpush1.bf16.msra.mxu1 %v8596_v22  ;;  %4997 = vmatprep.subr.bf16.mxu0 %v8601_v23  ;;  %v8685_v22 = vld [vmem:[%s12366_s1 + $0x1504] ss:$40 sps:$4 sm:$0xff]  }
 0x179   :  { %5040 = vmatprep.subr.bf16.mxu1 %v8604_v24  ;;  %v8688_v23 = vld [vmem:[%s12366_s1 + $0x10c] ss:$40 sps:$4 sm:$0xff]   ;;  %v8683_v24 = vld [vmem:[%s12366_s1 + $0x1500] ss:$40 sps:$4 sm:$0xff]  }
 0x17b   :  { %4998 = vmatpush1.bf16.msra.mxu0 %v8599_v49  ;;  %v8686_v49 = vld [vmem:[%s12366_s1 + $0x108] ss:$40 sps:$4 sm:$0xff]  }
 0x17c   :  { %5041 = vmatpush1.bf16.msra.mxu1 %v8602_v25  ;;  %4999 = vmatprep.subr.bf16.mxu0 %v8607_v4  ;;  %v8691_v25 = vld [vmem:[%s12366_s1 + $0x14b4] ss:$40 sps:$4 sm:$0xff]  }
 0x17d   :  { %5042 = vmatprep.subr.bf16.mxu1 %v8610_v26  ;;  %v8694_v4 = vld [vmem:[%s12366_s1 + $0xbc] ss:$40 sps:$4 sm:$0xff]   ;;  %v8689_v26 = vld [vmem:[%s12366_s1 + $0x14b0] ss:$40 sps:$4 sm:$0xff]  }
 0x17f   :  { %5000 = vmatpush1.bf16.msra.mxu0 %v8605_v27  ;;  %v8692_v27 = vld [vmem:[%s12366_s1 + $0xb8] ss:$40 sps:$4 sm:$0xff]  }
 0x180   :  { %5043 = vmatpush1.bf16.msra.mxu1 %v8608_v28  ;;  %5001 = vmatprep.subr.bf16.mxu0 %v8613_v11  ;;  %v8697_v28 = vld [vmem:[%s12366_s1 + $0x1464] ss:$40 sps:$4 sm:$0xff]  }
 0x181   :  { %5044 = vmatprep.subr.bf16.mxu1 %v8616_v33  ;;  %v8700_v11 = vld [vmem:[%s12366_s1 + $0x6c] ss:$40 sps:$4 sm:$0xff]   ;;  %v8695_v33 = vld [vmem:[%s12366_s1 + $0x1460] ss:$40 sps:$4 sm:$0xff]  }
 0x183   :  { %5002 = vmatpush2.bf16.msra.mxu0 %v8611_v29  ;;  %v8698_v29 = vld [vmem:[%s12366_s1 + $0x68] ss:$40 sps:$4 sm:$0xff]  }
 0x184   :  { %5045 = vmatpush2.bf16.msra.mxu1 %v8614_v30  ;;  %5003 = vmatprep.subr.bf16.mxu0 %v8619_v31  ;;  %v8703_v30 = vld [vmem:[%s12366_s1 + $0x1414] ss:$40 sps:$4 sm:$0xff]  }
 0x185   :  { %5046 = vmatprep.subr.bf16.mxu1 %v8622_v32  ;;  %v8706_v31 = vld [vmem:[%s12366_s1 + $0x1c] ss:$40 sps:$4 sm:$0xff]   ;;  %v8701_v32 = vld [vmem:[%s12366_s1 + $0x1410] ss:$40 sps:$4 sm:$0xff]  }
 0x187   :  { %5004 = vmatpush2.bf16.msra.mxu0 %v8617_v34  ;;  %v8704_v34 = vld [vmem:[%s12366_s1 + $0x18] ss:$40 sps:$4 sm:$0xff]  }
 0x188   :  { %5047 = vmatpush2.bf16.msra.mxu1 %v8620_v36  ;;  %5005 = vmatprep.subr.bf16.mxu0 %v8625_v37  ;;  %v8709_v36 = vld [vmem:[%s12366_s1 + $0x4cc] ss:$40 sps:$4 sm:$0xff]  }
 0x189   :  { %5048 = vmatprep.subr.bf16.mxu1 %v8628_v38  ;;  %v8712_v37 = vld [vmem:[%s12366_s1 + $0x74c] ss:$40 sps:$4 sm:$0xff]   ;;  %v8707_v38 = vld [vmem:[%s12366_s1 + $0x4c8] ss:$40 sps:$4 sm:$0xff]  }
 0x18b   :  { %5006 = vmatpush2.bf16.msra.mxu0 %v8623_v39  ;;  %v8710_v39 = vld [vmem:[%s12366_s1 + $0x748] ss:$40 sps:$4 sm:$0xff]  }
 0x18c   :  { %5049 = vmatpush2.bf16.msra.mxu1 %v8626_v40  ;;  %5007 = vmatprep.subr.bf16.mxu0 %v8631_v41  ;;  %v8715_v40 = vld [vmem:[%s12366_s1 + $0x47c] ss:$40 sps:$4 sm:$0xff]  }
 0x18d   :  { %5050 = vmatprep.subr.bf16.mxu1 %v8634_v42  ;;  %v8718_v41 = vld [vmem:[%s12366_s1 + $0x6fc] ss:$40 sps:$4 sm:$0xff]  }
 0x18e   :  { %v10880_v42 = vld [vmem:[%s12367_s0 + $0x20] ss:$36 sps:$4 sm:$0xff]  }
 0x18f   :  { %5008 = vmatpush2.bf16.msra.mxu0 %v8629_v43  ;;  %v8713_v43 = vld [vmem:[%s12366_s1 + $0x478] ss:$40 sps:$4 sm:$0xff]  }
 0x190   :  { %5051 = vmatpush2.bf16.msra.mxu1 %v8632_v44  ;;  %5009 = vmatprep.subr.bf16.mxu0 %v8637_v45  ;;  %v8716_v44 = vld [vmem:[%s12366_s1 + $0x6f8] ss:$40 sps:$4 sm:$0xff]   ;;  %v8721_v45 = vld [vmem:[%s12366_s1 + $0x42c] ss:$40 sps:$4 sm:$0xff]  }
 0x191   :  { %5052 = vmatprep.subr.bf16.mxu1 %v8640_v46  ;;  %v8724_v46 = vld [vmem:[%s12366_s1 + $0x6ac] ss:$40 sps:$4 sm:$0xff]  }
 0x193   :  { %5010 = vmatpush2.bf16.msra.mxu0 %v8635_v48  ;;  %v10898_v48 = vld [vmem:[%s12367_s0 + $0xc] ss:$36 sps:$4 sm:$0xff]  }
 0x194   :  { %5053 = vmatpush2.bf16.msra.mxu1 %v8638_v51  ;;  %5011 = vmatprep.subr.bf16.mxu0 %v8643_v52  ;;  %v8719_v51 = vld [vmem:[%s12366_s1 + $0x428] ss:$40 sps:$4 sm:$0xff]  }
 0x195   :  { %5054 = vmatprep.subr.bf16.mxu1 %v8646_v53  ;;  %v8722_v52 = vld [vmem:[%s12366_s1 + $0x6a8] ss:$40 sps:$4 sm:$0xff]   ;;  %v8727_v53 = vld [vmem:[%s12366_s1 + $0x3dc] ss:$40 sps:$4 sm:$0xff]  }
 0x197   :  { %5012 = vmatpush2.bf16.msra.mxu0 %v8641_v54  ;;  %v8730_v54 = vld [vmem:[%s12366_s1 + $0x65c] ss:$40 sps:$4 sm:$0xff]  }
 0x198   :  { %5055 = vmatpush2.bf16.msra.mxu1 %v8644_v55  ;;  %5013 = vmatprep.subr.bf16.mxu0 %v8649_v56  ;;  %v8725_v55 = vld [vmem:[%s12366_s1 + $0x3d8] ss:$40 sps:$4 sm:$0xff]  }
 0x199   :  { %5056 = vmatprep.subr.bf16.mxu1 %v8652_v57  ;;  %v8728_v56 = vld [vmem:[%s12366_s1 + $0x658] ss:$40 sps:$4 sm:$0xff]   ;;  %v8733_v57 = vld [vmem:[%s12366_s1 + $0x38c] ss:$40 sps:$4 sm:$0xff]  }
 0x19b   :  { %5014 = vmatpush2.bf16.msra.mxu0 %v8647_v59  ;;  %v8736_v59 = vld [vmem:[%s12366_s1 + $0x60c] ss:$40 sps:$4 sm:$0xff]  }
 0x19c   :  { %5057 = vmatpush2.bf16.msra.mxu1 %v8650_v60  ;;  %5015 = vmatprep.subr.bf16.mxu0 %v8655_v50  ;;  %v8731_v60 = vld [vmem:[%s12366_s1 + $0x388] ss:$40 sps:$4 sm:$0xff]  }
 0x19d   :  { %5058 = vmatprep.subr.bf16.mxu1 %v8658_v61  ;;  %v8734_v50 = vld [vmem:[%s12366_s1 + $0x608] ss:$40 sps:$4 sm:$0xff]   ;;  %v8739_v61 = vld [vmem:[%s12366_s1 + $0x33c] ss:$40 sps:$4 sm:$0xff]  }
 0x19f   :  { %5016 = vmatpush2.bf16.msra.mxu0 %v8653_v62  ;;  %v8742_v62 = vld [vmem:[%s12366_s1 + $0x5bc] ss:$40 sps:$4 sm:$0xff]  }
 0x1a0   :  { %5059 = vmatpush2.bf16.msra.mxu1 %v8656_v63  ;;  %5071 = vmatprep.subr.bf16.mxu0 %v8661_v0  ;;  %v8737_v63 = vld [vmem:[%s12366_s1 + $0x338] ss:$40 sps:$4 sm:$0xff]  }
 0x1a1   :  { %5114 = vmatprep.subr.bf16.mxu1 %v8664_v35  ;;  %v8740_v0 = vld [vmem:[%s12366_s1 + $0x5b8] ss:$40 sps:$4 sm:$0xff]   ;;  %v8745_v35 = vld [vmem:[%s12366_s1 + $0x2ec] ss:$40 sps:$4 sm:$0xff]  }
 0x1a2   :  { %5018 = vmatmul.mubr.bf16.vlgmr.msra.gmra.mxu0 %v10765_v7 }
 0x1a3   :  { %5061 = vmatmul.mubr.bf16.vlgmr.msra.gmra.mxu1 %v10771_v8  ;;  %5072 = vmatpush1.bf16.msra.mxu0 %v8659_v1  ;;  %v8748_v1 = vld [vmem:[%s12366_s1 + $0x56c] ss:$40 sps:$4 sm:$0xff]  }
 0x1a4   :  { %5115 = vmatpush1.bf16.msra.mxu1 %v8662_v2  ;;  %5073 = vmatprep.subr.bf16.mxu0 %v8667_v3  ;;  %v8743_v2 = vld [vmem:[%s12366_s1 + $0x2e8] ss:$40 sps:$4 sm:$0xff]  }
 0x1a5   :  { %5116 = vmatprep.subr.bf16.mxu1 %v8670_v5  ;;  %5103 = vmatprep.mubr.bf16.mxu0 %v12380_v21  ;;  %v8746_v3 = vld [vmem:[%s12366_s1 + $0x568] ss:$40 sps:$4 sm:$0xff]   ;;  %v8751_v5 = vld [vmem:[%s12366_s1 + $0x29c] ss:$40 sps:$4 sm:$0xff]  }
 0x1a6   :  { %5146 = vmatprep.mubr.bf16.mxu1 %v10790_v14 }
 0x1a7   :  { %5074 = vmatpush1.bf16.msra.mxu0 %v8665_v9  ;;  %v8754_v9 = vld [vmem:[%s12366_s1 + $0x51c] ss:$40 sps:$4 sm:$0xff]  }
 0x1a8   :  { %5117 = vmatpush1.bf16.msra.mxu1 %v8668_v10  ;;  %5075 = vmatprep.subr.bf16.mxu0 %v8673_v12  ;;  %v8749_v10 = vld [vmem:[%s12366_s1 + $0x298] ss:$40 sps:$4 sm:$0xff]  }
 0x1a9   :  { %5118 = vmatprep.subr.bf16.mxu1 %v8676_v13  ;;  %v8752_v12 = vld [vmem:[%s12366_s1 + $0x518] ss:$40 sps:$4 sm:$0xff]   ;;  %v8757_v13 = vld [vmem:[%s12366_s1 + $0x9cc] ss:$40 sps:$4 sm:$0xff]  }
 0x1ab   :  { %5076 = vmatpush1.bf16.msra.mxu0 %v8671_v15  ;;  %v8760_v15 = vld [vmem:[%s12366_s1 + $0xc4c] ss:$40 sps:$4 sm:$0xff]  }
 0x1ac   :  { %5119 = vmatpush1.bf16.msra.mxu1 %v8674_v16  ;;  %5077 = vmatprep.subr.bf16.mxu0 %v8679_v17  ;;  %v8755_v16 = vld [vmem:[%s12366_s1 + $0x9c8] ss:$40 sps:$4 sm:$0xff]  }
 0x1ad   :  { %5120 = vmatprep.subr.bf16.mxu1 %v8682_v18  ;;  %v8758_v17 = vld [vmem:[%s12366_s1 + $0xc48] ss:$40 sps:$4 sm:$0xff]   ;;  %v8763_v18 = vld [vmem:[%s12366_s1 + $0x97c] ss:$40 sps:$4 sm:$0xff]  }
 0x1af   :  { %5078 = vmatpush1.bf16.msra.mxu0 %v8677_v19  ;;  %v8766_v19 = vld [vmem:[%s12366_s1 + $0xbfc] ss:$40 sps:$4 sm:$0xff]  }
 0x1b0   :  { %5121 = vmatpush1.bf16.msra.mxu1 %v8680_v20  ;;  %5079 = vmatprep.subr.bf16.mxu0 %v8685_v22  ;;  %v8761_v20 = vld [vmem:[%s12366_s1 + $0x978] ss:$40 sps:$4 sm:$0xff]  }
 0x1b1   :  { %5122 = vmatprep.subr.bf16.mxu1 %v8688_v23  ;;  %v8764_v22 = vld [vmem:[%s12366_s1 + $0xbf8] ss:$40 sps:$4 sm:$0xff]   ;;  %v8769_v23 = vld [vmem:[%s12366_s1 + $0x92c] ss:$40 sps:$4 sm:$0xff]  }
 0x1b3   :  { %5080 = vmatpush1.bf16.msra.mxu0 %v8683_v24  ;;  %v8767_v24 = vld [vmem:[%s12366_s1 + $0x928] ss:$40 sps:$4 sm:$0xff]  }
 0x1b4   :  { %5123 = vmatpush1.bf16.msra.mxu1 %v8686_v49  ;;  %5081 = vmatprep.subr.bf16.mxu0 %v8691_v25  ;;  %v8770_v49 = vld [vmem:[%s12366_s1 + $0xba8] ss:$40 sps:$4 sm:$0xff]   ;;  %v8775_v25 = vld [vmem:[%s12366_s1 + $0x8dc] ss:$40 sps:$4 sm:$0xff]  }
 0x1b5   :  { %5124 = vmatprep.subr.bf16.mxu1 %v8694_v4  ;;  %v8773_v4 = vld [vmem:[%s12366_s1 + $0x8d8] ss:$40 sps:$4 sm:$0xff]  }
 0x1b7   :  { %5082 = vmatpush1.bf16.msra.mxu0 %v8689_v26  ;;  %v8776_v26 = vld [vmem:[%s12366_s1 + $0xb58] ss:$40 sps:$4 sm:$0xff]  }
 0x1b8   :  { %5125 = vmatpush1.bf16.msra.mxu1 %v8692_v27  ;;  %5083 = vmatprep.subr.bf16.mxu0 %v8697_v28  ;;  %v8781_v27 = vld [vmem:[%s12366_s1 + $0x88c] ss:$40 sps:$4 sm:$0xff]  }
 0x1b9   :  { %5126 = vmatprep.subr.bf16.mxu1 %v8700_v11  ;;  %v8784_v28 = vld [vmem:[%s12366_s1 + $0xb0c] ss:$40 sps:$4 sm:$0xff]   ;;  %v8779_v11 = vld [vmem:[%s12366_s1 + $0x888] ss:$40 sps:$4 sm:$0xff]  }
 0x1bb   :  { %5084 = vmatpush1.bf16.msra.mxu0 %v8695_v33  ;;  %v8782_v33 = vld [vmem:[%s12366_s1 + $0xb08] ss:$40 sps:$4 sm:$0xff]  }
 0x1bc   :  { %5127 = vmatpush1.bf16.msra.mxu1 %v8698_v29  ;;  %5085 = vmatprep.subr.bf16.mxu0 %v8703_v30  ;;  %v8787_v29 = vld [vmem:[%s12366_s1 + $0x83c] ss:$40 sps:$4 sm:$0xff]  }
 0x1bd   :  { %5128 = vmatprep.subr.bf16.mxu1 %v8706_v31  ;;  %v8790_v30 = vld [vmem:[%s12366_s1 + $0xabc] ss:$40 sps:$4 sm:$0xff]   ;;  %v8785_v31 = vld [vmem:[%s12366_s1 + $0x838] ss:$40 sps:$4 sm:$0xff]  }
 0x1bf   :  { %5086 = vmatpush1.bf16.msra.mxu0 %v8701_v32  ;;  %v8788_v32 = vld [vmem:[%s12366_s1 + $0xab8] ss:$40 sps:$4 sm:$0xff]  }
 0x1c0   :  { %5129 = vmatpush1.bf16.msra.mxu1 %v8704_v34  ;;  %5157 = vmatprep.subr.bf16.mxu0 %v8712_v37  ;;  %v8793_v34 = vld [vmem:[%s12366_s1 + $0x7ec] ss:$40 sps:$4 sm:$0xff]   ;;  %v8791_v37 = vld [vmem:[%s12366_s1 + $0x7e8] ss:$40 sps:$4 sm:$0xff]  }
 0x1c1   :  { %5130 = vmatprep.subr.bf16.mxu1 %v8709_v36  ;;  %v8796_v36 = vld [vmem:[%s12366_s1 + $0xa6c] ss:$40 sps:$4 sm:$0xff]  }
 0x1c2   :  { %5104 = vmatmul.mubr.bf16.vlgmr.msra.gmra.mxu0 %v10880_v42 }
 0x1c3   :  { %5158 = vmatpush1.bf16.msra.mxu0 %v8710_v39  ;;  %5189 = vmatprep.mubr.bf16.mxu0 %v10898_v48  ;;  %v8799_v39 = vld [vmem:[%s12366_s1 + $0x79c] ss:$40 sps:$4 sm:$0xff]  }
 0x1c4   :  { %5131 = vmatpush2.bf16.msra.mxu1 %v8707_v38  ;;  %5159 = vmatprep.subr.bf16.mxu0 %v8718_v41  ;;  %v8794_v38 = vld [vmem:[%s12366_s1 + $0xa68] ss:$40 sps:$4 sm:$0xff]   ;;  %v8797_v41 = vld [vmem:[%s12366_s1 + $0x798] ss:$40 sps:$4 sm:$0xff]  }
 0x1c5   :  { %5132 = vmatprep.subr.bf16.mxu1 %v8715_v40  ;;  %v8802_v40 = vld [vmem:[%s12366_s1 + $0xa1c] ss:$40 sps:$4 sm:$0xff]  }
 0x1c7   :  { %5160 = vmatpush1.bf16.msra.mxu0 %v8716_v44  ;;  %v8805_v44 = vld [vmem:[%s12366_s1 + $0xecc] ss:$40 sps:$4 sm:$0xff]  }
 0x1c8   :  { %5133 = vmatpush2.bf16.msra.mxu1 %v8713_v43  ;;  %5161 = vmatprep.subr.bf16.mxu0 %v8724_v46  ;;  %v8800_v43 = vld [vmem:[%s12366_s1 + $0xa18] ss:$40 sps:$4 sm:$0xff]   ;;  %v8803_v46 = vld [vmem:[%s12366_s1 + $0xec8] ss:$40 sps:$4 sm:$0xff]  }
 0x1c9   :  { %5134 = vmatprep.subr.bf16.mxu1 %v8721_v45  ;;  %v8808_v45 = vld [vmem:[%s12366_s1 + $0x114c] ss:$40 sps:$4 sm:$0xff]  }
 0x1cb   :  { %5162 = vmatpush1.bf16.msra.mxu0 %v8722_v52  ;;  %v8811_v52 = vld [vmem:[%s12366_s1 + $0xe7c] ss:$40 sps:$4 sm:$0xff]  }
 0x1cc   :  { %5135 = vmatpush2.bf16.msra.mxu1 %v8719_v51  ;;  %5163 = vmatprep.subr.bf16.mxu0 %v8730_v54  ;;  %v8806_v51 = vld [vmem:[%s12366_s1 + $0x1148] ss:$40 sps:$4 sm:$0xff]  }
 0x1cd   :  { %5136 = vmatprep.subr.bf16.mxu1 %v8727_v53  ;;  %v8814_v53 = vld [vmem:[%s12366_s1 + $0x10fc] ss:$40 sps:$4 sm:$0xff]   ;;  %v11086_v54 = vld [vmem:[%s12367_s0 + $0x8] ss:$36 sps:$4 sm:$0xff]  }
 0x1cf   :  { %5164 = vmatpush1.bf16.msra.mxu0 %v8728_v56  ;;  %v8812_v56 = vld [vmem:[%s12366_s1 + $0x10f8] ss:$40 sps:$4 sm:$0xff]  }
 0x1d0   :  { %5137 = vmatpush2.bf16.msra.mxu1 %v8725_v55  ;;  %5165 = vmatprep.subr.bf16.mxu0 %v8736_v59  ;;  %v8809_v55 = vld [vmem:[%s12366_s1 + $0xe78] ss:$40 sps:$4 sm:$0xff]   ;;  %v8820_v59 = vld [vmem:[%s12366_s1 + $0x10ac] ss:$40 sps:$4 sm:$0xff]  }
 0x1d1   :  { %5138 = vmatprep.subr.bf16.mxu1 %v8733_v57  ;;  %v8817_v57 = vld [vmem:[%s12366_s1 + $0xe2c] ss:$40 sps:$4 sm:$0xff]  }
 0x1d3   :  { %5166 = vmatpush1.bf16.msra.mxu0 %v8734_v50  ;;  %v8818_v50 = vld [vmem:[%s12366_s1 + $0x10a8] ss:$40 sps:$4 sm:$0xff]  }
 0x1d4   :  { %5139 = vmatpush2.bf16.msra.mxu1 %v8731_v60  ;;  %5167 = vmatprep.subr.bf16.mxu0 %v8742_v62  ;;  %v8815_v60 = vld [vmem:[%s12366_s1 + $0xe28] ss:$40 sps:$4 sm:$0xff]   ;;  %v8821_v62 = vld [vmem:[%s12366_s1 + $0xdd8] ss:$40 sps:$4 sm:$0xff]  }
 0x1d5   :  { %5140 = vmatprep.subr.bf16.mxu1 %v8739_v61  ;;  %v8823_v61 = vld [vmem:[%s12366_s1 + $0xddc] ss:$40 sps:$4 sm:$0xff]  }
 0x1d7   :  { %5168 = vmatpush1.bf16.msra.mxu0 %v8740_v0  ;;  %v8829_v0 = vld [vmem:[%s12366_s1 + $0xd8c] ss:$40 sps:$4 sm:$0xff]  }
 0x1d8   :  { %5141 = vmatpush2.bf16.msra.mxu1 %v8737_v63  ;;  %5169 = vmatprep.subr.bf16.mxu0 %v8748_v1  ;;  %v8824_v63 = vld [vmem:[%s12366_s1 + $0x1058] ss:$40 sps:$4 sm:$0xff]   ;;  %v8827_v1 = vld [vmem:[%s12366_s1 + $0xd88] ss:$40 sps:$4 sm:$0xff]  }
 0x1d9   :  { %5142 = vmatprep.subr.bf16.mxu1 %v8745_v35  ;;  %v8832_v35 = vld [vmem:[%s12366_s1 + $0x100c] ss:$40 sps:$4 sm:$0xff]  }
 0x1db   :  { %5170 = vmatpush1.bf16.msra.mxu0 %v8746_v3  ;;  %v8835_v3 = vld [vmem:[%s12366_s1 + $0xd3c] ss:$40 sps:$4 sm:$0xff]  }
 0x1dc   :  { %5143 = vmatpush2.bf16.msra.mxu1 %v8743_v2  ;;  %5171 = vmatprep.subr.bf16.mxu0 %v8754_v9  ;;  %v8830_v2 = vld [vmem:[%s12366_s1 + $0x1008] ss:$40 sps:$4 sm:$0xff]   ;;  %v8833_v9 = vld [vmem:[%s12366_s1 + $0xd38] ss:$40 sps:$4 sm:$0xff]  }
 0x1dd   :  { %5144 = vmatprep.subr.bf16.mxu1 %v8751_v5  ;;  %v8838_v5 = vld [vmem:[%s12366_s1 + $0xfbc] ss:$40 sps:$4 sm:$0xff]  }
 0x1df   :  { %5172 = vmatpush1.bf16.msra.mxu0 %v8752_v12  ;;  %v8841_v12 = vld [vmem:[%s12366_s1 + $0xcec] ss:$40 sps:$4 sm:$0xff]  }
 0x1e0   :  { %5145 = vmatpush2.bf16.msra.mxu1 %v8749_v10  ;;  %5173 = vmatprep.subr.bf16.mxu0 %v8757_v13  ;;  %v8836_v10 = vld [vmem:[%s12366_s1 + $0xfb8] ss:$40 sps:$4 sm:$0xff]   ;;  %v8844_v13 = vld [vmem:[%s12366_s1 + $0xf6c] ss:$40 sps:$4 sm:$0xff]  }
 0x1e1   :  { %5200 = vmatprep.subr.bf16.mxu1 %v8760_v15  ;;  %v8839_v15 = vld [vmem:[%s12366_s1 + $0xce8] ss:$40 sps:$4 sm:$0xff]  }
 0x1e3   :  { %5147 = vmatmul.mubr.bf16.vlgmr.msra.gmra.mxu1 %v10554_v47  ;;  %5174 = vmatpush2.bf16.msra.mxu0 %v8755_v16  ;;  %v8772_v47 = vld [vmem:[%s12366_s1 + $0xbac] ss:$40 sps:$4 sm:$0xff]   ;;  %v8842_v16 = vld [vmem:[%s12366_s1 + $0xf68] ss:$40 sps:$4 sm:$0xff]  }
 0x1e4   :  { %5201 = vmatpush1.bf16.msra.mxu1 %v8758_v17  ;;  %5175 = vmatprep.subr.bf16.mxu0 %v8763_v18  ;;  %v8847_v17 = vld [vmem:[%s12366_s1 + $0xc9c] ss:$40 sps:$4 sm:$0xff]  }
 0x1e5   :  { %5202 = vmatprep.subr.bf16.mxu1 %v8766_v19  ;;  %5232 = vmatprep.mubr.bf16.mxu1 %v10573_v58  ;;  %v8778_v58 = vld [vmem:[%s12366_s1 + $0xb5c] ss:$40 sps:$4 sm:$0xff]   ;;  %v8845_v19 = vld [vmem:[%s12366_s1 + $0xc98] ss:$40 sps:$4 sm:$0xff]  }
 0x1e6   :  { %v8850_v18 = vld [vmem:[%s12366_s1 + $0xf1c] ss:$40 sps:$4 sm:$0xff]  }
 0x1e7   :  { %5176 = vmatpush2.bf16.msra.mxu0 %v8761_v20  ;;  %v8848_v20 = vld [vmem:[%s12366_s1 + $0xf18] ss:$40 sps:$4 sm:$0xff]  }
 0x1e8   :  { %5203 = vmatpush1.bf16.msra.mxu1 %v8764_v22  ;;  %5177 = vmatprep.subr.bf16.mxu0 %v8769_v23  ;;  %v8853_v22 = vld [vmem:[%s12366_s1 + $0x13cc] ss:$40 sps:$4 sm:$0xff]  }
 0x1e9   :  { %5204 = vmatprep.subr.bf16.mxu1 %v8772_v47  ;;  %v8856_v23 = vld [vmem:[%s12366_s1 + $0x164c] ss:$40 sps:$4 sm:$0xff]   ;;  %v8851_v47 = vld [vmem:[%s12366_s1 + $0x13c8] ss:$40 sps:$4 sm:$0xff]  }
 0x1eb   :  { %5178 = vmatpush2.bf16.msra.mxu0 %v8767_v24  ;;  %v8854_v24 = vld [vmem:[%s12366_s1 + $0x1648] ss:$40 sps:$4 sm:$0xff]  }
 0x1ec   :  { %5205 = vmatpush1.bf16.msra.mxu1 %v8770_v49  ;;  %5179 = vmatprep.subr.bf16.mxu0 %v8775_v25  ;;  %v8859_v49 = vld [vmem:[%s12366_s1 + $0x137c] ss:$40 sps:$4 sm:$0xff]  }
 0x1ed   :  { %5206 = vmatprep.subr.bf16.mxu1 %v8778_v58  ;;  %v8862_v25 = vld [vmem:[%s12366_s1 + $0x15fc] ss:$40 sps:$4 sm:$0xff]   ;;  %v8857_v58 = vld [vmem:[%s12366_s1 + $0x1378] ss:$40 sps:$4 sm:$0xff]  }
 0x1ef   :  { %5180 = vmatpush2.bf16.msra.mxu0 %v8773_v4  ;;  %v8860_v4 = vld [vmem:[%s12366_s1 + $0x15f8] ss:$40 sps:$4 sm:$0xff]  }
 0x1f0   :  { %5207 = vmatpush1.bf16.msra.mxu1 %v8776_v26  ;;  %5181 = vmatprep.subr.bf16.mxu0 %v8781_v27  ;;  %v8865_v26 = vld [vmem:[%s12366_s1 + $0x132c] ss:$40 sps:$4 sm:$0xff]   ;;  %v8863_v27 = vld [vmem:[%s12366_s1 + $0x1328] ss:$40 sps:$4 sm:$0xff]  }
 0x1f1   :  { %5208 = vmatprep.subr.bf16.mxu1 %v8784_v28  ;;  %v8866_v28 = vld [vmem:[%s12366_s1 + $0x15a8] ss:$40 sps:$4 sm:$0xff]  }
 0x1f3   :  { %5182 = vmatpush2.bf16.msra.mxu0 %v8779_v11  ;;  %v8871_v11 = vld [vmem:[%s12366_s1 + $0x12dc] ss:$40 sps:$4 sm:$0xff]  }
 0x1f4   :  { %5209 = vmatpush1.bf16.msra.mxu1 %v8782_v33  ;;  %5183 = vmatprep.subr.bf16.mxu0 %v8787_v29  ;;  %v8874_v33 = vld [vmem:[%s12366_s1 + $0x155c] ss:$40 sps:$4 sm:$0xff]   ;;  %v8869_v29 = vld [vmem:[%s12366_s1 + $0x12d8] ss:$40 sps:$4 sm:$0xff]  }
 0x1f5   :  { %5210 = vmatprep.subr.bf16.mxu1 %v8790_v30  ;;  %v8872_v30 = vld [vmem:[%s12366_s1 + $0x1558] ss:$40 sps:$4 sm:$0xff]  }
 0x1f7   :  { %5184 = vmatpush2.bf16.msra.mxu0 %v8785_v31  ;;  %v8877_v31 = vld [vmem:[%s12366_s1 + $0x128c] ss:$40 sps:$4 sm:$0xff]  }
 0x1f8   :  { %5211 = vmatpush1.bf16.msra.mxu1 %v8788_v32  ;;  %5185 = vmatprep.subr.bf16.mxu0 %v8793_v34  ;;  %v8880_v32 = vld [vmem:[%s12366_s1 + $0x150c] ss:$40 sps:$4 sm:$0xff]   ;;  %v8875_v34 = vld [vmem:[%s12366_s1 + $0x1288] ss:$40 sps:$4 sm:$0xff]  }
 0x1f9   :  { %5212 = vmatprep.subr.bf16.mxu1 %v8796_v36  ;;  %v8878_v36 = vld [vmem:[%s12366_s1 + $0x1508] ss:$40 sps:$4 sm:$0xff]  }
 0x1fb   :  { %5186 = vmatpush2.bf16.msra.mxu0 %v8791_v37  ;;  %v8883_v37 = vld [vmem:[%s12366_s1 + $0x123c] ss:$40 sps:$4 sm:$0xff]  }
 0x1fc   :  { %5213 = vmatpush1.bf16.msra.mxu1 %v8794_v38  ;;  %5187 = vmatprep.subr.bf16.mxu0 %v8799_v39  ;;  %v8886_v38 = vld [vmem:[%s12366_s1 + $0x14bc] ss:$40 sps:$4 sm:$0xff]   ;;  %v8881_v39 = vld [vmem:[%s12366_s1 + $0x1238] ss:$40 sps:$4 sm:$0xff]  }
 0x1fd   :  { %5214 = vmatprep.subr.bf16.mxu1 %v8802_v40  ;;  %v8884_v40 = vld [vmem:[%s12366_s1 + $0x14b8] ss:$40 sps:$4 sm:$0xff]  }
 0x1ff   :  { %5188 = vmatpush2.bf16.msra.mxu0 %v8797_v41  ;;  %v8889_v41 = vld [vmem:[%s12366_s1 + $0x11ec] ss:$40 sps:$4 sm:$0xff]  }
 0x200   :  { %5215 = vmatpush1.bf16.msra.mxu1 %v8800_v43  ;;  %5243 = vmatprep.subr.bf16.mxu0 %v8808_v45  ;;  %v8892_v43 = vld [vmem:[%s12366_s1 + $0x146c] ss:$40 sps:$4 sm:$0xff]   ;;  %v8890_v45 = vld [vmem:[%s12366_s1 + $0x1468] ss:$40 sps:$4 sm:$0xff]  }
 0x201   :  { %5216 = vmatprep.subr.bf16.mxu1 %v8805_v44  ;;  %v8887_v44 = vld [vmem:[%s12366_s1 + $0x11e8] ss:$40 sps:$4 sm:$0xff]  }
 0x202   :  { %5190 = vmatmul.mubr.bf16.vlgmr.msra.gmra.mxu0 %v11086_v54 }
 0x203   :  { %5244 = vmatpush1.bf16.msra.mxu0 %v8806_v51  ;;  %5275 = vmatprep.mubr.bf16.mxu0 %v10579_v6  ;;  %v8826_v6 = vld [vmem:[%s12366_s1 + $0x105c] ss:$40 sps:$4 sm:$0xff]  }
 0x204   :  { %5217 = vmatpush2.bf16.msra.mxu1 %v8803_v46  ;;  %5245 = vmatprep.subr.bf16.mxu0 %v8814_v53  ;;  %v8895_v46 = vld [vmem:[%s12366_s1 + $0x119c] ss:$40 sps:$4 sm:$0xff]   ;;  %v8896_v53 = vld [vmem:[%s12366_s1 + $0x1418] ss:$40 sps:$4 sm:$0xff]  }
 0x205   :  { %5218 = vmatprep.subr.bf16.mxu1 %v8811_v52  ;;  %v8898_v51 = vld [vmem:[%s12366_s1 + $0x141c] ss:$40 sps:$4 sm:$0xff]   ;;  %v8893_v52 = vld [vmem:[%s12366_s1 + $0x1198] ss:$40 sps:$4 sm:$0xff]  }
 0x207   :  { %5246 = vmatpush1.bf16.msra.mxu0 %v8812_v56  ;;  %v8904_v56 = vld [vmem:[%s12366_s1 + $0x754] ss:$40 sps:$4 sm:$0xff]  }
 0x208   :  { %5219 = vmatpush2.bf16.msra.mxu1 %v8809_v55  ;;  %5247 = vmatprep.subr.bf16.mxu0 %v8820_v59  ;;  %v8901_v55 = vld [vmem:[%s12366_s1 + $0x254] ss:$40 sps:$4 sm:$0xff]   ;;  %v8902_v59 = vld [vmem:[%s12366_s1 + $0x750] ss:$40 sps:$4 sm:$0xff]  }
 0x209   :  { %5220 = vmatprep.subr.bf16.mxu1 %v8817_v57  ;;  %v8899_v57 = vld [vmem:[%s12366_s1 + $0x250] ss:$40 sps:$4 sm:$0xff]  }
 0x20b   :  { %5248 = vmatpush1.bf16.msra.mxu0 %v8818_v50  ;;  %v8910_v50 = vld [vmem:[%s12366_s1 + $0x704] ss:$40 sps:$4 sm:$0xff]  }
 0x20c   :  { %5221 = vmatpush2.bf16.msra.mxu1 %v8815_v60  ;;  %5249 = vmatprep.subr.bf16.mxu0 %v8826_v6  ;;  %v8907_v60 = vld [vmem:[%s12366_s1 + $0x204] ss:$40 sps:$4 sm:$0xff]   ;;  %v8908_v6 = vld [vmem:[%s12366_s1 + $0x700] ss:$40 sps:$4 sm:$0xff]  }
 0x20d   :  { %5222 = vmatprep.subr.bf16.mxu1 %v8823_v61  ;;  %v8905_v61 = vld [vmem:[%s12366_s1 + $0x200] ss:$40 sps:$4 sm:$0xff]  }
 0x20f   :  { %5250 = vmatpush1.bf16.msra.mxu0 %v8824_v63  ;;  %v8914_v63 = vld [vmem:[%s12366_s1 + $0x6b0] ss:$40 sps:$4 sm:$0xff]  }
 0x210   :  { %5223 = vmatpush2.bf16.msra.mxu1 %v8821_v62  ;;  %5251 = vmatprep.subr.bf16.mxu0 %v8832_v35  ;;  %v8913_v62 = vld [vmem:[%s12366_s1 + $0x1b4] ss:$40 sps:$4 sm:$0xff]   ;;  %v8917_v35 = vld [vmem:[%s12366_s1 + $0x160] ss:$40 sps:$4 sm:$0xff]  }
 0x211   :  { %5224 = vmatprep.subr.bf16.mxu1 %v8829_v0  ;;  %v8919_v0 = vld [vmem:[%s12366_s1 + $0x164] ss:$40 sps:$4 sm:$0xff]  }
 0x213   :  { %5252 = vmatpush1.bf16.msra.mxu0 %v8830_v2  ;;  %v8925_v2 = vld [vmem:[%s12366_s1 + $0x114] ss:$40 sps:$4 sm:$0xff]  }
 0x214   :  { %5225 = vmatpush2.bf16.msra.mxu1 %v8827_v1  ;;  %5253 = vmatprep.subr.bf16.mxu0 %v8838_v5  ;;  %v8920_v1 = vld [vmem:[%s12366_s1 + $0x660] ss:$40 sps:$4 sm:$0xff]  }
 0x215   :  { %5226 = vmatprep.subr.bf16.mxu1 %v8835_v3  ;;  %v8928_v3 = vld [vmem:[%s12366_s1 + $0x614] ss:$40 sps:$4 sm:$0xff]  }
 0x217   :  { %5254 = vmatpush1.bf16.msra.mxu0 %v8836_v10  ;;  %v8926_v10 = vld [vmem:[%s12366_s1 + $0x610] ss:$40 sps:$4 sm:$0xff]  }
 0x218   :  { %5227 = vmatpush2.bf16.msra.mxu1 %v8833_v9  ;;  %5255 = vmatprep.subr.bf16.mxu0 %v8844_v13  ;;  %v8923_v9 = vld [vmem:[%s12366_s1 + $0x110] ss:$40 sps:$4 sm:$0xff]   ;;  %v8934_v13 = vld [vmem:[%s12366_s1 + $0x5c4] ss:$40 sps:$4 sm:$0xff]  }
 0x219   :  { %5228 = vmatprep.subr.bf16.mxu1 %v8841_v12  ;;  %v8931_v12 = vld [vmem:[%s12366_s1 + $0xc4] ss:$40 sps:$4 sm:$0xff]  }
 0x21b   :  { %5256 = vmatpush1.bf16.msra.mxu0 %v8842_v16  ;;  %v8929_v16 = vld [vmem:[%s12366_s1 + $0xc0] ss:$40 sps:$4 sm:$0xff]  }
 0x21c   :  { %5229 = vmatpush2.bf16.msra.mxu1 %v8839_v15  ;;  %5257 = vmatprep.subr.bf16.mxu0 %v8850_v18  ;;  %v8937_v18 = vld [vmem:[%s12366_s1 + $0x74] ss:$40 sps:$4 sm:$0xff]  }
 0x21d   :  { %5230 = vmatprep.subr.bf16.mxu1 %v8847_v17  ;;  %v8932_v17 = vld [vmem:[%s12366_s1 + $0x5c0] ss:$40 sps:$4 sm:$0xff]  }
 0x21f   :  { %5258 = vmatpush1.bf16.msra.mxu0 %v8848_v20  ;;  %v11354_v20 = vpop.f32.mrf.mxu1 }
 0x220   :  { %5231 = vmatpush2.bf16.msra.mxu1 %v8845_v19  ;;  %5259 = vmatprep.subr.bf16.mxu0 %v8853_v22  ;;  %v8940_v19 = vld [vmem:[%s12366_s1 + $0x574] ss:$40 sps:$4 sm:$0xff]  }
 0x221   :  { %5286 = vmatprep.subr.bf16.mxu1 %v8856_v23  ;;  %v8935_v23 = vld [vmem:[%s12366_s1 + $0x70] ss:$40 sps:$4 sm:$0xff]  }
 0x223   :  { %5233 = vmatmul.mubr.bf16.vlgmr.msra.gmra.mxu1 %v10765_v7  ;;  %5260 = vmatpush2.bf16.msra.mxu0 %v8851_v47  ;;  %v8868_v7 = vld [vmem:[%s12366_s1 + $0x15ac] ss:$40 sps:$4 sm:$0xff]   ;;  %v8938_v47 = vld [vmem:[%s12366_s1 + $0x570] ss:$40 sps:$4 sm:$0xff]  }
 0x224   :  { %5287 = vmatpush1.bf16.msra.mxu1 %v8854_v24  ;;  %5261 = vmatprep.subr.bf16.mxu0 %v8859_v49  ;;  %v8943_v24 = vld [vmem:[%s12366_s1 + $0x24] ss:$40 sps:$4 sm:$0xff]  }
 0x225   :  { %5288 = vmatprep.subr.bf16.mxu1 %v8862_v25  ;;  %5318 = vmatprep.mubr.bf16.mxu1 %v12380_v21  ;;  %v8946_v25 = vld [vmem:[%s12366_s1 + $0x524] ss:$40 sps:$4 sm:$0xff]  }
 0x227   :  { %5262 = vmatpush2.bf16.msra.mxu0 %v8857_v58  ;;  %v11372_v58 = vpop.f32.mrf.mxu1 }
 0x228   :  { %5289 = vmatpush1.bf16.msra.mxu1 %v8860_v4  ;;  %5263 = vmatprep.subr.bf16.mxu0 %v8865_v26  ;;  %v8941_v4 = vld [vmem:[%s12366_s1 + $0x20] ss:$40 sps:$4 sm:$0xff]  }
 0x229   :  { %5290 = vmatprep.subr.bf16.mxu1 %v8868_v7  ;;  %v8944_v26 = vld [vmem:[%s12366_s1 + $0x520] ss:$40 sps:$4 sm:$0xff]   ;;  %v8949_v7 = vld [vmem:[%s12366_s1 + $0x4d4] ss:$40 sps:$4 sm:$0xff]  }
 0x22b   :  { %5264 = vmatpush2.bf16.msra.mxu0 %v8863_v27 }
 0x22c   :  { %5291 = vmatpush1.bf16.msra.mxu1 %v8866_v28  ;;  %5265 = vmatprep.subr.bf16.mxu0 %v8871_v11  ;;  %v8952_v28 = vld [vmem:[%s12366_s1 + $0x9d4] ss:$40 sps:$4 sm:$0xff]   ;;  %v8947_v11 = vld [vmem:[%s12366_s1 + $0x4d0] ss:$40 sps:$4 sm:$0xff]  }
 0x22d   :  { %5292 = vmatprep.subr.bf16.mxu1 %v8874_v33  ;;  %v8950_v33 = vld [vmem:[%s12366_s1 + $0x9d0] ss:$40 sps:$4 sm:$0xff]  }
 0x22f   :  { %5266 = vmatpush2.bf16.msra.mxu0 %v8869_v29  ;;  %v11394_v29 = vpop.f32.mrf.mxu1 }
 0x230   :  { %5293 = vmatpush1.bf16.msra.mxu1 %v8872_v30  ;;  %5267 = vmatprep.subr.bf16.mxu0 %v8877_v31  ;;  %v8955_v30 = vld [vmem:[%s12366_s1 + $0x484] ss:$40 sps:$4 sm:$0xff]  }
 0x231   :  { %5294 = vmatprep.subr.bf16.mxu1 %v8880_v32  ;;  %v8958_v31 = vld [vmem:[%s12366_s1 + $0x984] ss:$40 sps:$4 sm:$0xff]  }
 0x233   :  { %5268 = vmatpush2.bf16.msra.mxu0 %v8875_v34  ;;  %v11404_v34 = vpop.f32.mrf.mxu1 }
 0x234   :  { %5295 = vmatpush1.bf16.msra.mxu1 %v8878_v36  ;;  %5269 = vmatprep.subr.bf16.mxu0 %v8883_v37  ;;  %v8953_v36 = vld [vmem:[%s12366_s1 + $0x480] ss:$40 sps:$4 sm:$0xff]  }
 0x235   :  { %5296 = vmatprep.subr.bf16.mxu1 %v8886_v38  ;;  %v8956_v37 = vld [vmem:[%s12366_s1 + $0x980] ss:$40 sps:$4 sm:$0xff]   ;;  %v8961_v38 = vld [vmem:[%s12366_s1 + $0x434] ss:$40 sps:$4 sm:$0xff]  }
 0x237   :  { %5270 = vmatpush2.bf16.msra.mxu0 %v8881_v39  ;;  %v11415_v39 = vpop.f32.mrf.mxu1 }
 0x238   :  { %5297 = vmatpush1.bf16.msra.mxu1 %v8884_v40  ;;  %5271 = vmatprep.subr.bf16.mxu0 %v8889_v41  ;;  %v8964_v41 = vld [vmem:[%s12366_s1 + $0x934] ss:$40 sps:$4 sm:$0xff]  }
 0x239   :  { %5298 = vmatprep.subr.bf16.mxu1 %v8892_v43 }
 0x23b   :  { %5272 = vmatpush2.bf16.msra.mxu0 %v8887_v44  ;;  %v8959_v44 = vld [vmem:[%s12366_s1 + $0x430] ss:$40 sps:$4 sm:$0xff]  }
 0x23c   :  { %5299 = vmatpush1.bf16.msra.mxu1 %v8890_v45  ;;  %5273 = vmatprep.subr.bf16.mxu0 %v8895_v46  ;;  %v8962_v45 = vld [vmem:[%s12366_s1 + $0x930] ss:$40 sps:$4 sm:$0xff]   ;;  %v8967_v46 = vld [vmem:[%s12366_s1 + $0x3e4] ss:$40 sps:$4 sm:$0xff]  }
 0x23d   :  { %5300 = vmatprep.subr.bf16.mxu1 %v8898_v51  ;;  %v11433_v51 = vpop.f32.mrf.mxu1 }
 0x23f   :  { %5274 = vmatpush2.bf16.msra.mxu0 %v8893_v52  ;;  %v8970_v52 = vld [vmem:[%s12366_s1 + $0x8e4] ss:$40 sps:$4 sm:$0xff]  }
 0x240   :  { %5301 = vmatpush1.bf16.msra.mxu1 %v8896_v53  ;;  %5329 = vmatprep.subr.bf16.mxu0 %v8901_v55  ;;  %v8965_v53 = vld [vmem:[%s12366_s1 + $0x3e0] ss:$40 sps:$4 sm:$0xff]  }
 0x241   :  { %5372 = vmatprep.subr.bf16.mxu1 %v8904_v56  ;;  %v8968_v56 = vld [vmem:[%s12366_s1 + $0x8e0] ss:$40 sps:$4 sm:$0xff]  }
 0x242   :  { %5276 = vmatmul.mubr.bf16.vlgmr.msra.gmra.mxu0 %v10771_v8  ;;  %v8916_v8 = vld [vmem:[%s12366_s1 + $0x6b4] ss:$40 sps:$4 sm:$0xff]  }
 0x243   :  { %5319 = vmatmul.mubr.bf16.vlgmr.msra.gmra.mxu1 %v10880_v42  ;;  %5330 = vmatpush1.bf16.msra.mxu0 %v8899_v57  ;;  %v8911_v42 = vld [vmem:[%s12366_s1 + $0x1b0] ss:$40 sps:$4 sm:$0xff]   ;;  %v11446_v57 = vpop.f32.mrf.mxu1 }
 0x244   :  { %5373 = vmatpush1.bf16.msra.mxu1 %v8902_v59  ;;  %5331 = vmatprep.subr.bf16.mxu0 %v8907_v60  ;;  %v8973_v59 = vld [vmem:[%s12366_s1 + $0x394] ss:$40 sps:$4 sm:$0xff]  }
 0x245   :  { %5374 = vmatprep.subr.bf16.mxu1 %v8910_v50  ;;  %5361 = vmatprep.mubr.bf16.mxu0 %v10790_v14  ;;  %v8922_v14 = vld [vmem:[%s12366_s1 + $0x664] ss:$40 sps:$4 sm:$0xff]   ;;  %v8976_v60 = vld [vmem:[%s12366_s1 + $0x894] ss:$40 sps:$4 sm:$0xff]   ;;  %v8971_v50 = vld [vmem:[%s12366_s1 + $0x390] ss:$40 sps:$4 sm:$0xff]  }
 0x246   :  { %5404 = vmatprep.mubr.bf16.mxu1 %v10898_v48  ;;  %v11312_v48 = vpop.f32.mrf.mxu0 }
 0x247   :  { %5332 = vmatpush1.bf16.msra.mxu0 %v8905_v61 }
 0x248   :  { %5375 = vmatpush1.bf16.msra.mxu1 %v8908_v6  ;;  %5333 = vmatprep.subr.bf16.mxu0 %v8913_v62  ;;  %v11326_v5 = vpop.f32.mrf.mxu0  ;;  %v8974_v6 = vld [vmem:[%s12366_s1 + $0x890] ss:$40 sps:$4 sm:$0xff]   ;;  %v11462_v62 = vpop.f32.mrf.mxu1 }
 0x249   :  { %5376 = vmatprep.subr.bf16.mxu1 %v8916_v8  ;;  %v8979_v8 = vld [vmem:[%s12366_s1 + $0x344] ss:$40 sps:$4 sm:$0xff]  }
 0x24a   :  { %v11340_v15 = vpop.f32.mrf.mxu0 }
 0x24b   :  { %5334 = vmatpush1.bf16.msra.mxu0 %v8911_v42  ;;  %v8982_v42 = vld [vmem:[%s12366_s1 + $0x844] ss:$40 sps:$4 sm:$0xff]  }
 0x24c   :  { %5377 = vmatpush1.bf16.msra.mxu1 %v8914_v63  ;;  %5335 = vmatprep.subr.bf16.mxu0 %v8919_v0  ;;  %v11356_v22 = vpop.f32.mrf.mxu0  ;;  %v8977_v63 = vld [vmem:[%s12366_s1 + $0x340] ss:$40 sps:$4 sm:$0xff]  }
 0x24d   :  { %5378 = vmatprep.subr.bf16.mxu1 %v8922_v14  ;;  %v11475_v14 = vpop.f32.mrf.mxu1 }
 0x24e   :  { %v11367_v49 = vpop.f32.mrf.mxu0 }
 0x24f   :  { %5336 = vmatpush1.bf16.msra.mxu0 %v8917_v35  ;;  %v8980_v35 = vld [vmem:[%s12366_s1 + $0x840] ss:$40 sps:$4 sm:$0xff]  }
 0x250   :  { %5379 = vmatpush1.bf16.msra.mxu1 %v8920_v1  ;;  %5337 = vmatprep.subr.bf16.mxu0 %v8925_v2  ;;  %v11383_v27 = vpop.f32.mrf.mxu0  ;;  %v8985_v2 = vld [vmem:[%s12366_s1 + $0x2f4] ss:$40 sps:$4 sm:$0xff]  }
 0x251   :  { %5380 = vmatprep.subr.bf16.mxu1 %v8928_v3  ;;  %v8988_v3 = vld [vmem:[%s12366_s1 + $0x7f4] ss:$40 sps:$4 sm:$0xff]  }
 0x252   :  { %v11402_v32 = vpop.f32.mrf.mxu0 }
 0x253   :  { %5338 = vmatpush1.bf16.msra.mxu0 %v8923_v9  ;;  %v8983_v9 = vld [vmem:[%s12366_s1 + $0x2f0] ss:$40 sps:$4 sm:$0xff]  }
 0x254   :  { %5381 = vmatpush1.bf16.msra.mxu1 %v8926_v10  ;;  %5339 = vmatprep.subr.bf16.mxu0 %v8931_v12  ;;  %v11417_v40 = vpop.f32.mrf.mxu0  ;;  %v11491_v10 = vpop.f32.mrf.mxu1  ;;  %v8986_v12 = vld [vmem:[%s12366_s1 + $0x7f0] ss:$40 sps:$4 sm:$0xff]  }
 0x255   :  { %5382 = vmatprep.subr.bf16.mxu1 %v8934_v13 }
 0x256   :  { %v11422_v43 = vpop.f32.mrf.mxu0 }
 0x257   :  { %5340 = vmatpush1.bf16.msra.mxu0 %v8929_v16  ;;  %v8991_v16 = vld [vmem:[%s12366_s1 + $0x2a4] ss:$40 sps:$4 sm:$0xff]  }
 0x258   :  { %5383 = vmatpush1.bf16.msra.mxu1 %v8932_v17  ;;  %5341 = vmatprep.subr.bf16.mxu0 %v8937_v18  ;;  %v11441_v55 = vpop.f32.mrf.mxu0  ;;  %v8994_v17 = vld [vmem:[%s12366_s1 + $0x7a4] ss:$40 sps:$4 sm:$0xff]   ;;  %v8989_v18 = vld [vmem:[%s12366_s1 + $0x2a0] ss:$40 sps:$4 sm:$0xff]  }
 0x259   :  { %5384 = vmatprep.subr.bf16.mxu1 %v8940_v19  ;;  %v11507_v19 = vpop.f32.mrf.mxu1 }
 0x25a   :  { %v11457_v61 = vpop.f32.mrf.mxu0 }
 0x25b   :  { %5342 = vmatpush1.bf16.msra.mxu0 %v8935_v23  ;;  %v8992_v23 = vld [vmem:[%s12366_s1 + $0x7a0] ss:$40 sps:$4 sm:$0xff]  }
 0x25c   :  { %5385 = vmatpush1.bf16.msra.mxu1 %v8938_v47  ;;  %5343 = vmatprep.subr.bf16.mxu0 %v8943_v24  ;;  %v11473_v0 = vpop.f32.mrf.mxu0  ;;  %v8997_v24 = vld [vmem:[%s12366_s1 + $0xc54] ss:$40 sps:$4 sm:$0xff]  }
 0x25d   :  { %5386 = vmatprep.subr.bf16.mxu1 %v8946_v25  ;;  %v9000_v25 = vld [vmem:[%s12366_s1 + $0x1154] ss:$40 sps:$4 sm:$0xff]  }
 0x25e   :  { %v11480_v1 = vpop.f32.mrf.mxu0 }
 0x25f   :  { %5344 = vmatpush1.bf16.msra.mxu0 %v8941_v4  ;;  %v8995_v4 = vld [vmem:[%s12366_s1 + $0xc50] ss:$40 sps:$4 sm:$0xff]  }
 0x260   :  { %5387 = vmatpush1.bf16.msra.mxu1 %v8944_v26  ;;  %5345 = vmatprep.subr.bf16.mxu0 %v8949_v7  ;;  %v11496_v13 = vpop.f32.mrf.mxu0  ;;  %v8998_v26 = vld [vmem:[%s12366_s1 + $0x1150] ss:$40 sps:$4 sm:$0xff]   ;;  %v11526_v7 = vpop.f32.mrf.mxu1 }
 0x261   :  { %5388 = vmatprep.subr.bf16.mxu1 %v8952_v28  ;;  %v9003_v28 = vld [vmem:[%s12366_s1 + $0xc04] ss:$40 sps:$4 sm:$0xff]  }
 0x262   :  { %v11512_v47 = vpop.f32.mrf.mxu0 }
 0x263   :  { %5346 = vmatpush2.bf16.msra.mxu0 %v8947_v11  ;;  %v9006_v11 = vld [vmem:[%s12366_s1 + $0x1104] ss:$40 sps:$4 sm:$0xff]  }
 0x264   :  { %5389 = vmatpush2.bf16.msra.mxu1 %v8950_v33  ;;  %5347 = vmatprep.subr.bf16.mxu0 %v8955_v30  ;;  %v11534_v33 = vpop.f32.mrf.mxu0  ;;  %v11536_v30 = vpop.f32.mrf.mxu1 }
 0x265   :  { %5390 = vmatprep.subr.bf16.mxu1 %v8958_v31  ;;  %v773_v31 = vlaneseq }
 0x267   :  { %5348 = vmatpush2.bf16.msra.mxu0 %v8953_v36  ;;  %v9001_v36 = vld [vmem:[%s12366_s1 + $0xc00] ss:$40 sps:$4 sm:$0xff]  }
 0x268   :  { %5391 = vmatpush2.bf16.msra.mxu1 %v8956_v37  ;;  %5349 = vmatprep.subr.bf16.mxu0 %v8961_v38  ;;  %v9004_v37 = vld [vmem:[%s12366_s1 + $0x1100] ss:$40 sps:$4 sm:$0xff]   ;;  %v11544_v38 = vpop.f32.mrf.mxu0 }
 0x269   :  { %5392 = vmatprep.subr.bf16.mxu1 %v8964_v41  ;;  %v9336_v41 = vld [vmem:[%s12367_s0] ss:$36 sps:$4 sm:$0xff]  }
 0x26b   :  { %5350 = vmatpush2.bf16.msra.mxu0 %v8959_v44  ;;  %v9009_v44 = vld [vmem:[%s12366_s1 + $0xbb4] ss:$40 sps:$4 sm:$0xff]  }
 0x26c   :  { %5393 = vmatpush2.bf16.msra.mxu1 %v8962_v45  ;;  %5351 = vmatprep.subr.bf16.mxu0 %v8967_v46  ;;  %v9012_v45 = vld [vmem:[%s12366_s1 + $0x10b4] ss:$40 sps:$4 sm:$0xff]   ;;  %v11556_v46 = vpop.f32.mrf.mxu1 }
 0x26d   :  { %5394 = vmatprep.subr.bf16.mxu1 %v8970_v52  ;;  %v11558_v52 = vshrl.u32 %v773_v31, 7 }
 0x26f   :  { %5352 = vmatpush2.bf16.msra.mxu0 %v8965_v53  ;;  %v9338_v53 = vld [vmem:[%s12367_s0 + $0x1c] ss:$36 sps:$4 sm:$0xff]  }
 0x270   :  { %5395 = vmatpush2.bf16.msra.mxu1 %v8968_v56  ;;  %5353 = vmatprep.subr.bf16.mxu0 %v8973_v59  ;;  %v11566_v56 = vpop.f32.mrf.mxu0  ;;  %v9007_v59 = vld [vmem:[%s12366_s1 + $0xbb0] ss:$40 sps:$4 sm:$0xff]  }
 0x271   :  { %5396 = vmatprep.subr.bf16.mxu1 %v8976_v60  ;;  %v9010_v60 = vld [vmem:[%s12366_s1 + $0x10b0] ss:$40 sps:$4 sm:$0xff]  }
 0x273   :  { %5354 = vmatpush2.bf16.msra.mxu0 %v8971_v50  ;;  %v9015_v50 = vld [vmem:[%s12366_s1 + $0xb64] ss:$40 sps:$4 sm:$0xff]  }
 0x274   :  { %5397 = vmatpush2.bf16.msra.mxu1 %v8974_v6  ;;  %5355 = vmatprep.subr.bf16.mxu0 %v8979_v8  ;;  %v11577_v6 = vpop.f32.mrf.mxu1  ;;  %v9018_v8 = vld [vmem:[%s12366_s1 + $0x1064] ss:$40 sps:$4 sm:$0xff]  }
 0x275   :  { %5398 = vmatprep.subr.bf16.mxu1 %v8982_v42  ;;  %v11585_v42 = vld [vmem:[%s12369_s2] sm:$0xff] }
 0x277   :  { %5356 = vmatpush2.bf16.msra.mxu0 %v8977_v63  ;;  %v12378_v63 = vsub.s32 1, %v11558_v52 }
 0x278   :  { %5399 = vmatpush2.bf16.msra.mxu1 %v8980_v35  ;;  %5357 = vmatprep.subr.bf16.mxu0 %v8985_v2  ;;  %v11588_v35 = vpop.f32.mrf.mxu0  ;;  %v9013_v2 = vld [vmem:[%s12366_s1 + $0xb60] ss:$40 sps:$4 sm:$0xff]  }
 0x279   :  { %5400 = vmatprep.subr.bf16.mxu1 %v8988_v3  ;;  %v9016_v3 = vld [vmem:[%s12366_s1 + $0x1060] ss:$40 sps:$4 sm:$0xff]  }
 0x27b   :  { %5358 = vmatpush2.bf16.msra.mxu0 %v8983_v9  ;;  %v11596_v9 = vpop.f32.mrf.mxu1 }
 0x27c   :  { %5401 = vmatpush2.bf16.msra.mxu1 %v8986_v12  ;;  %5359 = vmatprep.subr.bf16.mxu0 %v8991_v16  ;;  %v9021_v12 = vld [vmem:[%s12366_s1 + $0xb14] ss:$40 sps:$4 sm:$0xff]  }
 0x27d   :  { %5402 = vmatprep.subr.bf16.mxu1 %v8994_v17  ;;  %v9024_v16 = vld [vmem:[%s12366_s1 + $0x1014] ss:$40 sps:$4 sm:$0xff]   ;;  %v780_v17 = vrot.slane %v11585_v42, %v12378_v63 }
 0x27f   :  { %5360 = vmatpush2.bf16.msra.mxu0 %v8989_v18  ;;  %v9019_v18 = vld [vmem:[%s12366_s1 + $0xb10] ss:$40 sps:$4 sm:$0xff]   ;;  %v4506_v31 = vadd.f32 %v11326_v5, %v780_v17  ;;  %v9033_v5 = vld [vmem:[%s12366_s1 + $0xa74] ss:$40 sps:$4 sm:$0xff]  }
 0x280   :  { %5403 = vmatpush2.bf16.msra.mxu1 %v8992_v23  ;;  %5415 = vmatprep.subr.bf16.mxu0 %v8997_v24  ;;  %v9022_v23 = vld [vmem:[%s12366_s1 + $0x1010] ss:$40 sps:$4 sm:$0xff]   ;;  %v11613_v24 = vpop.f32.mrf.mxu1 }
 0x281   :  { %5458 = vmatprep.subr.bf16.mxu1 %v9000_v25  ;;  %v11615_v25 = vpop.f32.mrf.mxu0 }
 0x282   :  { %5362 = vmatmul.mubr.bf16.vlgmr.msra.gmra.mxu0 %v9336_v41  ;;  %v9028_v41 = vld [vmem:[%s12366_s1 + $0xfc0] ss:$40 sps:$4 sm:$0xff]  }
 0x283   :  { %5405 = vmatmul.mubr.bf16.vlgmr.msra.gmra.mxu1 %v11086_v54  ;;  %5416 = vmatpush1.bf16.msra.mxu0 %v8995_v4  ;;  %v9337_v54 = vld [vmem:[%s12367_s0 + $0x14] ss:$36 sps:$4 sm:$0xff]   ;;  %v9027_v4 = vld [vmem:[%s12366_s1 + $0xac4] ss:$40 sps:$4 sm:$0xff]  }
 0x284   :  { %5459 = vmatpush1.bf16.msra.mxu1 %v8998_v26  ;;  %5417 = vmatprep.subr.bf16.mxu0 %v9003_v28  ;;  %v4510_v26 = vadd.f32 %v11356_v22, %v780_v17  ;;  %v11621_v28 = vpop.f32.mrf.mxu0  ;;  %v9025_v22 = vld [vmem:[%s12366_s1 + $0xac0] ss:$40 sps:$4 sm:$0xff]  }
 0x285   :  { %5460 = vmatprep.subr.bf16.mxu1 %v9006_v11  ;;  %5447 = vmatprep.mubr.bf16.mxu0 %v9337_v54  ;;  %v9030_v11 = vld [vmem:[%s12366_s1 + $0xfc4] ss:$40 sps:$4 sm:$0xff]   ;;  %v9040_v17 = vld [vmem:[%s12366_s1 + $0xf20] ss:$40 sps:$4 sm:$0xff]  }
 0x286   :  { %5490 = vmatprep.mubr.bf16.mxu1 %v9338_v53 }
 0x287   :  { %5418 = vmatpush1.bf16.msra.mxu0 %v9001_v36  ;;  %v11627_v36 = vpop.f32.mrf.mxu1 }
 0x288   :  { %5461 = vmatpush1.bf16.msra.mxu1 %v9004_v37  ;;  %5419 = vmatprep.subr.bf16.mxu0 %v9009_v44  ;;  %v4553_v37 = vadd.f32 %v11404_v34, %v4510_v26  ;;  %v11636_v44 = vpop.f32.mrf.mxu0  ;;  %v9036_v34 = vld [vmem:[%s12366_s1 + $0xf74] ss:$40 sps:$4 sm:$0xff]  }
 0x289   :  { %5462 = vmatprep.subr.bf16.mxu1 %v9012_v45  ;;  %v4549_v45 = vadd.f32 %v11372_v58, %v4506_v31  ;;  %v11646_v53 = vpop.f32.mrf.mxu1  ;;  %v9039_v58 = vld [vmem:[%s12366_s1 + $0xa24] ss:$40 sps:$4 sm:$0xff]   ;;  %v9046_v31 = vld [vmem:[%s12366_s1 + $0x13d0] ss:$40 sps:$4 sm:$0xff]  }
 0x28a   :  { %v4596_v54 = vadd.f32 %v11417_v40, %v4553_v37 }
 0x28b   :  { %5420 = vmatpush1.bf16.msra.mxu0 %v9007_v59  ;;  %v4592_v59 = vadd.f32 %v11383_v27, %v4549_v45  ;;  %v9042_v27 = vld [vmem:[%s12366_s1 + $0xf24] ss:$40 sps:$4 sm:$0xff]   ;;  %v9049_v45 = vld [vmem:[%s12366_s1 + $0xe80] ss:$40 sps:$4 sm:$0xff]  }
 0x28c   :  { %5463 = vmatpush1.bf16.msra.mxu1 %v9010_v60  ;;  %5421 = vmatprep.subr.bf16.mxu0 %v9015_v50  ;;  %v9031_v60 = vld [vmem:[%s12366_s1 + $0xa70] ss:$40 sps:$4 sm:$0xff]   ;;  %v4639_v40 = vadd.f32 %v11462_v62, %v4596_v54  ;;  %v9052_v54 = vld [vmem:[%s12366_s1 + $0x1380] ss:$40 sps:$4 sm:$0xff]  }
 0x28d   :  { %5464 = vmatprep.subr.bf16.mxu1 %v9018_v8  ;;  %v9034_v50 = vld [vmem:[%s12366_s1 + $0xf70] ss:$40 sps:$4 sm:$0xff]   ;;  %v11655_v8 = vpop.f32.mrf.mxu0 }
 0x28f   :  { %5422 = vmatpush1.bf16.msra.mxu0 %v9013_v2  ;;  %v11664_v2 = vpop.f32.mrf.mxu1  ;;  %v11678_v62 = vpop.f32.mrf.mxu0 }
 0x290   :  { %5465 = vmatpush1.bf16.msra.mxu1 %v9016_v3  ;;  %5423 = vmatprep.subr.bf16.mxu0 %v9021_v12  ;;  %v4635_v3 = vadd.f32 %v11433_v51, %v4592_v59  ;;  %v11668_v12 = vadd.f32 %v11473_v0, %v4639_v40  ;;  %v9045_v51 = vld [vmem:[%s12366_s1 + $0xed4] ss:$40 sps:$4 sm:$0xff]   ;;  %v12379_v59 = vsub.s32 0, %v11558_v52 }
 0x291   :  { %5466 = vmatprep.subr.bf16.mxu1 %v9024_v16  ;;  %v9037_v16 = vld [vmem:[%s12366_s1 + $0xa20] ss:$40 sps:$4 sm:$0xff]   ;;  %v9048_v0 = vld [vmem:[%s12366_s1 + $0x13d4] ss:$40 sps:$4 sm:$0xff]  }
 0x292   :  { %v5575_v26 = vmin.f32 %v11668_v12, 0.0  ;;  %vm5555_vm0 = vcmp.gt.f32.partialorder %v11668_v12, 0.0 }
 0x293   :  { %5424 = vmatpush1.bf16.msra.mxu0 %v9019_v18  ;;  %v11676_v18 = vpop.f32.mrf.mxu1 }
 0x294   :  { %5467 = vmatpush1.bf16.msra.mxu1 %v9022_v23  ;;  %5425 = vmatprep.subr.bf16.mxu0 %v9027_v4  ;;  %v11687_v23 = vadd.f32 %v11441_v55, %v4635_v3  ;;  %v11689_v4 = vpop.f32.mrf.mxu0  ;;  %v9051_v55 = vld [vmem:[%s12366_s1 + $0xe84] ss:$40 sps:$4 sm:$0xff]   ;;  %v9055_v3 = vld [vmem:[%s12366_s1 + $0xe30] ss:$40 sps:$4 sm:$0xff]  }
 0x295   :  { %5468 = vmatprep.subr.bf16.mxu1 %v9030_v11  ;;  %v9043_v11 = vld [vmem:[%s12366_s1 + $0xed0] ss:$40 sps:$4 sm:$0xff]   ;;  %v11698_v37 = vpop.f32.mrf.mxu1 }
 0x296   :  { %vm5545_vm1 = vcmp.gt.f32.partialorder %v11687_v23, 0.0 }
 0x297   :  { %5426 = vmatpush1.bf16.msra.mxu0 %v9025_v22  ;;  %v9054_v22 = vld [vmem:[%s12366_s1 + $0x1384] ss:$40 sps:$4 sm:$0xff]  }
 0x298   :  { %5469 = vmatpush1.bf16.msra.mxu1 %v9028_v41  ;;  %5427 = vmatprep.subr.bf16.mxu0 %v9033_v5  ;;  %v5565_v41 = vmin.f32 %v11687_v23, 0.0  ;;  %v11707_v5 = vpop.f32.mrf.mxu0 }
 0x299   :  { %5470 = vmatprep.subr.bf16.mxu1 %v9036_v34  ;;  %v5646_v34 = vmul.f32 1.442695, %v5575_v26 }
 0x29a   :  { %v11724_v40 = vpop.f32.mrf.mxu0 }
 0x29b   :  { %5428 = vmatpush1.bf16.msra.mxu0 %v9031_v60  ;;  %v11716_v60 = vpop.f32.mrf.mxu1  ;;  %9219 = vpow2.f32 %v5646_v34 }
 0x29c   :  { %5471 = vmatpush1.bf16.msra.mxu1 %v9034_v50  ;;  %5429 = vmatprep.subr.bf16.mxu0 %v9039_v58  ;;  %v9057_v50 = vld [vmem:[%s12366_s1 + $0xe34] ss:$40 sps:$4 sm:$0xff]  }
 0x29d   :  { %5472 = vmatprep.subr.bf16.mxu1 %v9042_v27  ;;  %v9060_v58 = vld [vmem:[%s12366_s1 + $0x1334] ss:$40 sps:$4 sm:$0xff]   ;;  %v5626_v27 = vmul.f32 1.442695, %v5565_v41 }
 0x29f   :  { %5430 = vmatpush1.bf16.msra.mxu0 %v9037_v16  ;;  %v9058_v16 = vld [vmem:[%s12366_s1 + $0x1330] ss:$40 sps:$4 sm:$0xff]   ;;  %9221 = vpow2.f32 %v5626_v27 }
 0x2a0   :  { %5473 = vmatpush1.bf16.msra.mxu1 %v9040_v17  ;;  %5431 = vmatprep.subr.bf16.mxu0 %v9045_v51  ;;  %v776_v17 = vrot.slane %v11585_v42, %v12379_v59  ;;  %v787_v51 = vsub.s32 3, %v11558_v52 }
 0x2a1   :  { %5474 = vmatprep.subr.bf16.mxu1 %v9048_v0  ;;  %v4982_v0 = vpop.f32.mrf.mxu1 }
 0x2a2   :  { %v4504_v63 = vadd.f32 %v11312_v48, %v776_v17 }
 0x2a3   :  { %5432 = vmatpush2.bf16.msra.mxu0 %v9043_v11  ;;  %v9063_v11 = vld [vmem:[%s12366_s1 + $0xde4] ss:$40 sps:$4 sm:$0xff]   ;;  %v11743_v34 = vpop.f32.mrf.mxu1 }
 0x2a4   :  { %5475 = vmatpush2.bf16.msra.mxu1 %v9046_v31  ;;  %5433 = vmatprep.subr.bf16.mxu0 %v9051_v55  ;;  %v9066_v31 = vld [vmem:[%s12366_s1 + $0x12e4] ss:$40 sps:$4 sm:$0xff]   ;;  %v5595_v55 = vmul.f32 0.5, %v5575_v26  ;;  %v788_v26 = vrot.slane %v11585_v42, %v787_v51  ;;  %v4547_v21 = vadd.f32 %v11354_v20, %v4504_v63 }
 0x2a5   :  { %5476 = vmatprep.subr.bf16.mxu1 %v9054_v22  ;;  %v795_v22 = vsub.s32 5, %v11558_v52  ;;  %v5064_v48 = vpop.f32.mrf.mxu1 }
 0x2a6   :  { %9223 = vtanh.f32 %v5595_v55 }
 0x2a7   :  { %5434 = vmatpush2.bf16.msra.mxu0 %v9049_v45  ;;  %v5025_v45 = vpop.f32.mrf.mxu0  ;;  %v796_v59 = vrot.slane %v11585_v42, %v795_v22  ;;  %v9078_v22 = vld [vmem:[%s12366_s1 + $0x1244] ss:$40 sps:$4 sm:$0xff]   ;;  %v11785_v63 = vpop.f32.mrf.mxu1 }
 0x2a8   :  { %5477 = vmatpush2.bf16.msra.mxu1 %v9052_v54  ;;  %5435 = vmatprep.subr.bf16.mxu0 %v9057_v50  ;;  %v5585_v54 = vmul.f32 0.5, %v5565_v41  ;;  %v9061_v50 = vld [vmem:[%s12366_s1 + $0xde0] ss:$40 sps:$4 sm:$0xff]   ;;  %v9069_v41 = vld [vmem:[%s12366_s1 + $0xd94] ss:$40 sps:$4 sm:$0xff]  }
 0x2a9   :  { %5478 = vmatprep.subr.bf16.mxu1 %v9060_v58  ;;  %v9064_v58 = vld [vmem:[%s12366_s1 + $0x12e0] ss:$40 sps:$4 sm:$0xff]   ;;  %v11753_v27 = vpop.f32.mrf.mxu0  ;;  %v4940_v51 = vadd.f32 %v11678_v62, %v796_v59  ;;  %v9075_v62 = vld [vmem:[%s12366_s1 + $0xd44] ss:$40 sps:$4 sm:$0xff]   ;;  %v4936_v20 = vadd.f32 %v11636_v44, %v796_v59  ;;  %v9220_v44 = vpop.eup %9219  ;;  %v9084_v59 = vld [vmem:[%s12366_s1 + $0x11f4] ss:$40 sps:$4 sm:$0xff]  }
 0x2aa   :  { %9225 = vtanh.f32 %v5585_v54 }
 0x2ab   :  { %5436 = vmatpush2.bf16.msra.mxu0 %v9055_v3  ;;  %v9072_v3 = vld [vmem:[%s12366_s1 + $0x1294] ss:$40 sps:$4 sm:$0xff]   ;;  %v11773_v55 = vpop.f32.mrf.mxu0 }
 0x2ac   :  { %5479 = vmatpush2.bf16.msra.mxu1 %v9058_v16  ;;  %5437 = vmatprep.subr.bf16.mxu0 %v9063_v11  ;;  %v4508_v16 = vadd.f32 %v11340_v15, %v776_v17  ;;  %v9067_v11 = vld [vmem:[%s12366_s1 + $0xd90] ss:$40 sps:$4 sm:$0xff]   ;;  %v4721_v15 = vadd.f32 %v11491_v10, %v788_v26  ;;  %v4725_v17 = vadd.f32 %v11526_v7, %v788_v26  ;;  %v9073_v26 = vld [vmem:[%s12366_s1 + $0xd40] ss:$40 sps:$4 sm:$0xff]  }
 0x2ad   :  { %5480 = vmatprep.subr.bf16.mxu1 %v9066_v31  ;;  %v9070_v31 = vld [vmem:[%s12366_s1 + $0x1290] ss:$40 sps:$4 sm:$0xff]   ;;  %v4590_v10 = vadd.f32 %v11367_v49, %v4547_v21 }
 0x2ae   :  { %v4551_v54 = vadd.f32 %v11394_v29, %v4508_v16  ;;  %v4768_v7 = vadd.f32 %v11534_v33, %v4725_v17  ;;  %v9076_v29 = vld [vmem:[%s12366_s1 + $0x1240] ss:$40 sps:$4 sm:$0xff]   ;;  %v4764_v21 = vadd.f32 %v11496_v13, %v4721_v15  ;;  %v11796_v33 = vpop.f32.mrf.mxu0 }
 0x2af   :  { %5438 = vmatpush2.bf16.msra.mxu0 %v9061_v50  ;;  %v4633_v13 = vadd.f32 %v11415_v39, %v4590_v10  ;;  %v9082_v39 = vld [vmem:[%s12366_s1 + $0x11f0] ss:$40 sps:$4 sm:$0xff]   ;;  %v9085_v10 = vld [vmem:[%s12366_s1 + $0xca0] ss:$40 sps:$4 sm:$0xff]  }
 0x2b0   :  { %5481 = vmatpush2.bf16.msra.mxu1 %v9064_v58  ;;  %5439 = vmatprep.subr.bf16.mxu0 %v9069_v41  ;;  %v4594_v50 = vadd.f32 %v11402_v32, %v4551_v54  ;;  %v4983_v58 = vadd.f32 %v4982_v0, %v4940_v51  ;;  %v4811_v49 = vadd.f32 %v11596_v9, %v4768_v7  ;;  %v9081_v32 = vld [vmem:[%s12366_s1 + $0xcf4] ss:$40 sps:$4 sm:$0xff]   ;;  %v5068_v51 = vpop.f32.mrf.mxu1  ;;  %v9088_v7 = vld [vmem:[%s12366_s1 + $0x11a0] ss:$40 sps:$4 sm:$0xff]  }
 0x2b1   :  { %5482 = vmatprep.subr.bf16.mxu1 %v9072_v3  ;;  %v4979_v0 = vadd.f32 %v11698_v37, %v4936_v20  ;;  %v9222_v3 = vpop.eup %9221  ;;  %v4807_v9 = vadd.f32 %v11556_v46, %v4764_v21  ;;  %v9079_v37 = vld [vmem:[%s12366_s1 + $0xcf0] ss:$40 sps:$4 sm:$0xff]   ;;  %v11817_v46 = vadd.f32 %v11422_v43, %v4633_v13 }
 0x2b2   :  { %v5026_v41 = vadd.f32 %v5025_v45, %v4983_v58  ;;  %v4854_v16 = vadd.f32 %v11615_v25, %v4811_v49  ;;  %v5111_v45 = vpop.f32.mrf.mxu0  ;;  %v5665_v17 = vadd.f32 1.0, %v9222_v3  ;;  %v9098_v3 = vld [vmem:[%s12366_s1 + $0x1604] ss:$40 sps:$4 sm:$0xff]  }
 0x2b3   :  { %5440 = vmatpush2.bf16.msra.mxu0 %v9067_v11  ;;  %v4637_v11 = vadd.f32 %v11446_v57, %v4594_v50  ;;  %v5022_v15 = vadd.f32 %v11707_v5, %v4979_v0  ;;  %v4850_v25 = vadd.f32 %v11566_v56, %v4807_v9  ;;  %v9087_v57 = vld [vmem:[%s12366_s1 + $0xca4] ss:$40 sps:$4 sm:$0xff]   ;;  %v9224_v43 = vpop.eup %9223  ;;  %v5564_v58 = vmin.f32 %v11817_v46, 0.0 }
 0x2b4   :  { %5483 = vmatpush2.bf16.msra.mxu1 %v9070_v31  ;;  %5441 = vmatprep.subr.bf16.mxu0 %v9075_v62  ;;  %v5675_v31 = vadd.f32 1.0, %v9220_v44  ;;  %v9090_v5 = vld [vmem:[%s12366_s1 + $0x11a4] ss:$40 sps:$4 sm:$0xff]   ;;  %v11830_v54 = vadd.f32 %v11664_v2, %v4854_v16  ;;  %vm5544_vm4 = vcmp.gt.f32.partialorder %v11817_v46, 0.0 }
 0x2b5   :  { %5484 = vmatprep.subr.bf16.mxu1 %v9078_v22  ;;  %v11827_v62 = vadd.f32 %v11457_v61, %v4637_v11  ;;  %v5069_v22 = vadd.f32 %v5068_v51, %v5026_v41  ;;  %v5065_v56 = vadd.f32 %v5064_v48, %v5022_v15  ;;  %v11842_v2 = vadd.f32 %v11627_v36, %v4850_v25  ;;  %v9093_v48 = vld [vmem:[%s12366_s1 + $0x1654] ss:$40 sps:$4 sm:$0xff]  }
 0x2b6   :  { %v5695_v61 = vmul.f32 %v9224_v43, %v5675_v31  ;;  %v5577_v36 = vmin.f32 %v11830_v54, 0.0  ;;  %v5624_v0 = vmul.f32 1.442695, %v5564_v58  ;;  %v9339_v11 = vld [vmem:[%s12367_s0 + $0x10] ss:$36 sps:$4 sm:$0xff]   ;;  %vm5557_vm3 = vcmp.gt.f32.partialorder %v11830_v54, 0.0 }
 0x2b7   :  { %5442 = vmatpush2.bf16.msra.mxu0 %v9073_v26  ;;  %v11832_v20 = vadd.f32 %v5111_v45, %v5069_v22  ;;  %v9226_v50 = vpop.eup %9225  ;;  %v9094_v26 = vld [vmem:[%s12368_s3 + $0x78] sm:$0xff]   ;;  %v11852_v44 = vadd.f32 %v11773_v55, %v5065_v56  ;;  %v5567_v41 = vmin.f32 %v11842_v2, 0.0  ;;  %v5584_v22 = vmul.f32 0.5, %v5564_v58  ;;  %v9108_v58 = vld [vmem:[%s12366_s1 + $0x1564] ss:$40 sps:$4 sm:$0xff]  }
 0x2b8   :  { %5485 = vmatpush2.bf16.msra.mxu1 %v9076_v29  ;;  %5443 = vmatprep.subr.bf16.mxu0 %v9081_v32  ;;  %v5574_v29 = vmin.f32 %v11827_v62, 0.0  ;;  %v5685_v21 = vmul.f32 %v9226_v50, %v5665_v17  ;;  %v9091_v32 = vld [vmem:[%s12366_s1 + $0x1650] ss:$40 sps:$4 sm:$0xff]   ;;  %v5715_v55 = vsel %vm5555_vm0, %v11668_v12, %v5695_v61  ;;  %v5650_v51 = vmul.f32 1.442695, %v5577_v36 }
 0x2b9   :  { %5486 = vmatprep.subr.bf16.mxu1 %v9084_v59  ;;  %v5579_v49 = vmin.f32 %v11832_v20, 0.0  ;;  %v9095_v59 = vld [vmem:[%s12368_s3 + $0x38] sm:$0xff]   ;;  %v5569_v9 = vmin.f32 %v11852_v44, 0.0  ;;  %v9099_v12 = vld [vmem:[%s12368_s3 + $0x70] sm:$0xff]   ;;  %9227 = vpow2.f32 %v5624_v0  ;;  %v5630_v25 = vmul.f32 1.442695, %v5567_v41 }
 0x2ba   :  { %v5644_v13 = vmul.f32 1.442695, %v5574_v29  ;;  %v5705_v16 = vsel %vm5545_vm1, %v11687_v23, %v5685_v21  ;;  %v9340_v31 = vld [vmem:[%s12367_s0 + $0x18] ss:$36 sps:$4 sm:$0xff]   ;;  %v9096_v23 = vld [vmem:[%s12366_s1 + $0x1600] ss:$40 sps:$4 sm:$0xff]  }
 0x2bb   :  { %5444 = vmatpush2.bf16.msra.mxu0 %v9079_v37  ;;  %v5725_v15 = vpack.c.bf16 %v5715_v55, %v5705_v16  ;;  %v5654_v37 = vmul.f32 1.442695, %v5579_v49  ;;  %v9103_v45 = vld [vmem:[%s12366_s1 + $0x15b4] ss:$40 sps:$4 sm:$0xff]   ;;  %v12381_v17 = vmov 0   ;;  %v5594_v43 = vmul.f32 0.5, %v5574_v29 }
 0x2bc   :  { %5487 = vmatpush2.bf16.msra.mxu1 %v9082_v39  ;;  %5445 = vmatprep.subr.bf16.mxu0 %v9087_v57  ;;  %v9100_v39 = vld [vmem:[%s12368_s3 + $0x30] sm:$0xff]   ;;  %v9104_v57 = vld [vmem:[%s12368_s3 + $0x68] sm:$0xff]   ;;  %9229 = vpow2.f32 %v5644_v13  ;;  %v783_v56 = vsub.s32 2, %v11558_v52  ;;  %v5597_v61 = vmul.f32 0.5, %v5577_v36  ;;  %v791_v50 = vsub.s32 4, %v11558_v52  ;;  %v9114_v0 = vld [vmem:[%s12368_s3 + $0x58] sm:$0xff]  }
 0x2bd   :  { %5488 = vmatprep.subr.bf16.mxu1 %v9090_v5  ;;  %v5634_v5 = vmul.f32 1.442695, %v5569_v9  ;;  %9231 = vpow2.f32 %v5650_v51  ;;  %v5587_v29 = vmul.f32 0.5, %v5567_v41  ;;  %v5589_v36 = vmul.f32 0.5, %v5569_v9  ;;  %v9111_v9 = vld [vmem:[%s12366_s1 + $0x1510] ss:$40 sps:$4 sm:$0xff]  }
 0x2be   :  { %9233 = vpow2.f32 %v5654_v37  ;;  %v784_v21 = vrot.slane %v11585_v42, %v783_v56  ;;  %v792_v55 = vrot.slane %v11585_v42, %v791_v50  ;;  %v9115_v16 = vld [vmem:[%s12368_s3 + $0x18] sm:$0xff]   ;;  %vm5554_vm2 = vcmp.gt.f32.partialorder %v11827_v62, 0.0 }
 0x2bf   :  { %5446 = vmatpush2.bf16.msra.mxu0 %v9085_v10  ;;  %v9101_v10 = vld [vmem:[%s12366_s1 + $0x15b0] ss:$40 sps:$4 sm:$0xff]   ;;  %9235 = vpow2.f32 %v5630_v25  ;;  %vm5559_vm5 = vcmp.gt.f32.partialorder %v11832_v20, 0.0  ;;  %vm5547_vm6 = vcmp.gt.f32.partialorder %v11842_v2, 0.0  ;;  %vm5549_vm7 = vcmp.gt.f32.partialorder %v11852_v44, 0.0 }
 0x2c0   :  { %5489 = vmatpush2.bf16.msra.mxu1 %v9088_v7  ;;  %5501 = vmatprep.subr.bf16.mxu0 %v9093_v48  ;;  %v9105_v7 = vld [vmem:[%s12368_s3 + $0x28] sm:$0xff]   ;;  %v9109_v48 = vld [vmem:[%s12368_s3 + $0x60] sm:$0xff]   ;;  %9237 = vpow2.f32 %v5634_v5  ;;  %v4938_v41 = vadd.f32 %v11655_v8, %v792_v55  ;;  %v4723_v13 = vadd.f32 %v11507_v19, %v784_v21  ;;  %v9119_v19 = vld [vmem:[%s12368_s3 + $0x50] sm:$0xff]  }
 0x2c1   :  { %7822 = vmatprep.subr.bf16.mxu1 %v9094_v26  ;;  %v5599_v26 = vmul.f32 0.5, %v5579_v49  ;;  %9239 = vtanh.f32 %v5584_v22  ;;  %v9113_v49 = vld [vmem:[%s12366_s1 + $0x1514] ss:$40 sps:$4 sm:$0xff]  }
 0x2c2   :  { %5448 = vmatmul.mubr.bf16.vlgmr.msra.gmra.mxu0 %v9339_v11  ;;  %9241 = vtanh.f32 %v5594_v43  ;;  %v4766_v51 = vadd.f32 %v11512_v47, %v4723_v13  ;;  %v9132_v13 = vld [vmem:[%s12368_s3 + $0x178] sm:$0xff]  }
 0x2c3   :  { %5491 = vmatmul.mubr.bf16.vlgmr.msra.gmra.mxu1 %v9340_v31  ;;  %5502 = vmatpush1.bf16.msra.mxu0 %v9091_v32  ;;  %v9106_v32 = vld [vmem:[%s12366_s1 + $0x1560] ss:$40 sps:$4 sm:$0xff]   ;;  %9243 = vtanh.f32 %v5597_v61  ;;  %v4981_v31 = vadd.f32 %v11716_v60, %v4938_v41  ;;  %v9121_v61 = vld [vmem:[%s12366_s1 + $0x1470] ss:$40 sps:$4 sm:$0xff]  }
 0x2c4   :  { %7823 = vmatpush3.bf16.msra.mxu1 %v9095_v59  ;;  %6413 = vmatprep.mubr.bf16.mxu1 %v5725_v15  ;;  %v9110_v59 = vld [vmem:[%s12368_s3 + $0x20] sm:$0xff]   ;;  %9245 = vtanh.f32 %v5599_v26 }
 0x2c5   :  { %5503 = vmatprep.subr.bf16.mxu0 %v9098_v3  ;;  %7824 = vmatprep.subr.bf16.mxu1 %v9099_v12  ;;  %9247 = vtanh.f32 %v5587_v29  ;;  %v4719_v3 = vadd.f32 %v11475_v14, %v784_v21  ;;  %v4934_v12 = vadd.f32 %v11621_v28, %v792_v55  ;;  %v9118_v14 = vld [vmem:[%s12366_s1 + $0x14c4] ss:$40 sps:$4 sm:$0xff]   ;;  %v4809_v28 = vadd.f32 %v11577_v6, %v4766_v51 }
 0x2c6   :  { %5533 = vmatprep.mubr.bf16.mxu0 %v12381_v17  ;;  %9249 = vtanh.f32 %v5589_v36  ;;  %v9228_v8 = vpop.eup %9227  ;;  %v5024_v60 = vadd.f32 %v11724_v40, %v4981_v31  ;;  %v9124_v6 = vld [vmem:[%s12368_s3 + $0x48] sm:$0xff]   ;;  %v9130_v41 = vld [vmem:[%s12368_s3] sm:$0xff]  }
 0x2c7   :  { %5504 = vmatpush1.bf16.msra.mxu0 %v9096_v23  ;;  %v4762_v37 = vadd.f32 %v11480_v1, %v4719_v3  ;;  %v9116_v23 = vld [vmem:[%s12366_s1 + $0x14c0] ss:$40 sps:$4 sm:$0xff]   ;;  %v4977_v47 = vadd.f32 %v11676_v18, %v4934_v12  ;;  %v9123_v1 = vld [vmem:[%s12366_s1 + $0x1474] ss:$40 sps:$4 sm:$0xff]   ;;  %v4852_v17 = vadd.f32 %v11588_v35, %v4809_v28  ;;  %v5664_v56 = vadd.f32 1.0, %v9228_v8 }
 0x2c8   :  { %7825 = vmatpush3.bf16.msra.mxu1 %v9100_v39  ;;  %5505 = vmatprep.subr.bf16.mxu0 %v9103_v45  ;;  %v9120_v39 = vld [vmem:[%s12368_s3 + $0x10] sm:$0xff]  }
 0x2c9   :  { %7826 = vmatprep.subr.bf16.mxu1 %v9104_v57  ;;  %v9230_v11 = vpop.eup %9229  ;;  %v4805_v5 = vadd.f32 %v11536_v30, %v4762_v37  ;;  %v5020_v40 = vadd.f32 %v11689_v4, %v4977_v47  ;;  %v9125_v30 = vld [vmem:[%s12368_s3 + $0x8] sm:$0xff]   ;;  %v9129_v4 = vld [vmem:[%s12368_s3 + $0x40] sm:$0xff]   ;;  %v11973_v29 = vadd.f32 %v11646_v53, %v4852_v17 }
 0x2ca   :  { %v9232_v15 = vpop.eup %9231  ;;  %v5674_v57 = vadd.f32 1.0, %v9230_v11  ;;  %v9126_v53 = vld [vmem:[%s12366_s1 + $0x1420] ss:$40 sps:$4 sm:$0xff]  }
 0x2cb   :  { %5506 = vmatpush1.bf16.msra.mxu0 %v9101_v10  ;;  %v9234_v25 = vpop.eup %9233  ;;  %v5677_v18 = vadd.f32 1.0, %v9232_v15  ;;  %v4848_v10 = vadd.f32 %v11544_v38, %v4805_v5  ;;  %v9128_v38 = vld [vmem:[%s12366_s1 + $0x1424] ss:$40 sps:$4 sm:$0xff]   ;;  %v5576_v12 = vmin.f32 %v11973_v29, 0.0  ;;  %v12040_v5 = vpop.f32.mrf.mxu1  ;;  %vm5556_vm8 = vcmp.gt.f32.partialorder %v11973_v29, 0.0 }
 0x2cc   :  { %7827 = vmatpush3.bf16.msra.mxu1 %v9105_v7  ;;  %5507 = vmatprep.subr.bf16.mxu0 %v9108_v58  ;;  %v9236_v45 = vpop.eup %9235  ;;  %v5679_v7 = vadd.f32 1.0, %v9234_v25  ;;  %v5067_v58 = vadd.f32 %v11785_v63, %v5024_v60 }
 0x2cd   :  { %7828 = vmatprep.subr.bf16.mxu1 %v9109_v48  ;;  %v9238_v22 = vpop.eup %9237  ;;  %v5667_v50 = vadd.f32 1.0, %v9236_v45  ;;  %v5648_v37 = vmul.f32 1.442695, %v5576_v12  ;;  %v9139_v45 = vld [vmem:[%s12368_s3 + $0xe8] sm:$0xff]   ;;  %v5596_v17 = vmul.f32 0.5, %v5576_v12 }
 0x2ce   :  { %v9240_v43 = vpop.eup %9239  ;;  %v5669_v21 = vadd.f32 1.0, %v9238_v22  ;;  %v11977_v63 = vadd.f32 %v11796_v33, %v5067_v58  ;;  %v9141_v22 = vld [vmem:[%s12368_s3 + $0xa8] sm:$0xff]   ;;  %v9148_v58 = vld [vmem:[%s12368_s3 + $0x158] sm:$0xff]  }
 0x2cf   :  { %5508 = vmatpush1.bf16.msra.mxu0 %v9106_v32  ;;  %v9242_v35 = vpop.eup %9241  ;;  %v5063_v32 = vadd.f32 %v11743_v34, %v5020_v40  ;;  %9251 = vpow2.f32 %v5648_v37  ;;  %v9142_v40 = vld [vmem:[%s12368_s3 + $0x128] sm:$0xff]  }
 0x2d0   :  { %7829 = vmatpush3.bf16.msra.mxu1 %v9110_v59  ;;  %5509 = vmatprep.subr.bf16.mxu0 %v9113_v49  ;;  %v9244_v48 = vpop.eup %9243  ;;  %v5694_v26 = vmul.f32 %v9242_v35, %v5674_v57  ;;  %v5684_v49 = vmul.f32 %v9240_v43, %v5664_v56  ;;  %v9140_v57 = vld [vmem:[%s12368_s3 + $0x168] sm:$0xff]   ;;  %v9143_v43 = vld [vmem:[%s12368_s3 + $0xe0] sm:$0xff]   ;;  %vm5558_vm9 = vcmp.gt.f32.partialorder %v11977_v63, 0.0 }
 0x2d1   :  { %7830 = vmatprep.subr.bf16.mxu1 %v9114_v0  ;;  %v9246_v36 = vpop.eup %9245  ;;  %v5697_v59 = vmul.f32 %v9244_v48, %v5677_v18  ;;  %v11980_v0 = vadd.f32 %v11613_v24, %v4848_v10  ;;  %v11990_v33 = vadd.f32 %v11753_v27, %v5063_v32  ;;  %v9131_v24 = vld [vmem:[%s12368_s3 + $0xf8] sm:$0xff]   ;;  %v5578_v27 = vmin.f32 %v11977_v63, 0.0  ;;  %v9144_v10 = vld [vmem:[%s12368_s3 + $0x160] sm:$0xff]   ;;  %v9156_v12 = vld [vmem:[%s12368_s3 + $0x148] sm:$0xff]  }
 0x2d2   :  { %v9248_v55 = vpop.eup %9247  ;;  %v5699_v34 = vmul.f32 %v9246_v36, %v5679_v7  ;;  %v5704_v8 = vsel %vm5544_vm4, %v11817_v46, %v5684_v49  ;;  %v9146_v35 = vld [vmem:[%s12368_s3 + $0x120] sm:$0xff]   ;;  %v9150_v48 = vld [vmem:[%s12368_s3 + $0x118] sm:$0xff]   ;;  %v9153_v49 = vld [vmem:[%s12368_s3 + $0x90] sm:$0xff]   ;;  %vm9344_vm4 = vmmov 0  }
 0x2d3   :  { %5510 = vmatpush1.bf16.msra.mxu0 %v9111_v9  ;;  %v9250_v3 = vpop.eup %9249  ;;  %v5687_v9 = vmul.f32 %v9248_v55, %v5667_v50  ;;  %v5566_v51 = vmin.f32 %v11980_v0, 0.0  ;;  %v5568_v15 = vmin.f32 %v11990_v33, 0.0  ;;  %v5652_v25 = vmul.f32 1.442695, %v5578_v27  ;;  %v9147_v50 = vld [vmem:[%s12368_s3 + $0xd8] sm:$0xff]  }
 0x2d4   :  { %7831 = vmatpush3.bf16.msra.mxu1 %v9115_v16  ;;  %5511 = vmatprep.subr.bf16.mxu0 %v9118_v14  ;;  %v5714_v16 = vsel %vm5554_vm2, %v11827_v62, %v5694_v26  ;;  %v5689_v14 = vmul.f32 %v9250_v3, %v5669_v21  ;;  %v9133_v62 = vld [vmem:[%s12368_s3 + $0xb8] sm:$0xff]   ;;  %v5719_v11 = vsel %vm5559_vm5, %v11832_v20, %v5699_v34  ;;  %v9135_v20 = vld [vmem:[%s12368_s3 + $0xf0] sm:$0xff]   ;;  %v5598_v18 = vmul.f32 0.5, %v5578_v27 }
 0x2d5   :  { %7832 = vmatprep.subr.bf16.mxu1 %v9119_v19  ;;  %v5717_v19 = vsel %vm5557_vm3, %v11830_v54, %v5697_v59  ;;  %v5724_v31 = vpack.c.bf16 %v5714_v16, %v5704_v8  ;;  %v5707_v46 = vsel %vm5547_vm6, %v11842_v2, %v5687_v9  ;;  %v9134_v54 = vld [vmem:[%s12368_s3 + $0x138] sm:$0xff]   ;;  %v9341_v2 = vld [vmem:[%s12367_s0 + $0x20] ss:$36 sps:$4 sm:$0xff]   ;;  %v5628_v60 = vmul.f32 1.442695, %v5566_v51  ;;  %v9151_v26 = vld [vmem:[%s12368_s3 + $0xd0] sm:$0xff]  }
 0x2d6   :  { %v5727_v28 = vpack.c.bf16 %v5717_v19, %v5707_v46  ;;  %9253 = vpow2.f32 %v5652_v25  ;;  %v5586_v56 = vmul.f32 0.5, %v5566_v51  ;;  %v5588_v7 = vmul.f32 0.5, %v5568_v15  ;;  %v9152_v21 = vld [vmem:[%s12368_s3 + $0x150] sm:$0xff]   ;;  %v9157_v8 = vld [vmem:[%s12368_s3 + $0x88] sm:$0xff]   ;;  %v9159_v46 = vld [vmem:[%s12368_s3 + $0xc0] sm:$0xff]  }
 0x2d7   :  { %5512 = vmatpush1.bf16.msra.mxu0 %v9116_v23  ;;  %v5709_v23 = vsel %vm5549_vm7, %v11852_v44, %v5689_v14  ;;  %v9137_v44 = vld [vmem:[%s12368_s3 + $0xb0] sm:$0xff]   ;;  %9255 = vpow2.f32 %v5628_v60  ;;  %v799_v55 = vsub.s32 6, %v11558_v52  ;;  %v803_v16 = vsub.s32 7, %v11558_v52  ;;  %v9161_v60 = vld [vmem:[%s12368_s3 + $0x80] sm:$0xff]  }
 0x2d8   :  { %7833 = vmatpush3.bf16.msra.mxu1 %v9120_v39  ;;  %5513 = vmatprep.subr.bf16.mxu0 %v9123_v1  ;;  %v9136_v39 = vld [vmem:[%s12368_s3 + $0x170] sm:$0xff]   ;;  %v5729_v47 = vpack.c.bf16 %v5719_v11, %v5709_v23  ;;  %v5632_v1 = vmul.f32 1.442695, %v5568_v15  ;;  %v9158_v15 = vld [vmem:[%s12368_s3 + $0x108] sm:$0xff]   ;;  %v9160_v23 = vld [vmem:[%s12368_s3 + $0x140] sm:$0xff]   ;;  %vm5546_vm10 = vcmp.gt.f32.partialorder %v11980_v0, 0.0 }
 0x2d9   :  { %7834 = vmatprep.subr.bf16.mxu1 %v9124_v6  ;;  %v9138_v6 = vld [vmem:[%s12368_s3 + $0x130] sm:$0xff]   ;;  %v800_v19 = vrot.slane %v11585_v42, %v799_v55  ;;  %vm5548_vm11 = vcmp.gt.f32.partialorder %v11990_v33, 0.0 }
 0x2da   :  { %9257 = vpow2.f32 %v5632_v1  ;;  %v9154_v3 = vld [vmem:[%s12368_s3 + $0x110] sm:$0xff]  }
 0x2db   :  { %5514 = vmatpush1.bf16.msra.mxu0 %v9121_v61  ;;  %v12054_v61 = vpop.f32.mrf.mxu1  ;;  %9259 = vtanh.f32 %v5596_v17 }
 0x2dc   :  { %7835 = vmatpush3.bf16.msra.mxu1 %v9125_v30  ;;  %5515 = vmatprep.subr.bf16.mxu0 %v9128_v38  ;;  %v9145_v30 = vld [vmem:[%s12368_s3 + $0xa0] sm:$0xff]   ;;  %9261 = vtanh.f32 %v5598_v18  ;;  %v9252_v36 = vpop.eup %9251 }
 0x2dd   :  { %7836 = vmatprep.subr.bf16.mxu1 %v9129_v4  ;;  %9263 = vtanh.f32 %v5586_v56  ;;  %v12068_v38 = vpop.f32.mrf.mxu1  ;;  %v9149_v4 = vld [vmem:[%s12368_s3 + $0x98] sm:$0xff]   ;;  %v5676_v9 = vadd.f32 1.0, %v9252_v36 }
 0x2de   :  { %9265 = vtanh.f32 %v5588_v7  ;;  %v5153_v7 = vadd.f32 %v12068_v38, %v800_v19  ;;  %v9167_v38 = vld [vmem:[%s12368_s3 + $0x1e8] sm:$0xff]  }
 0x2df   :  { %5516 = vmatpush1.bf16.msra.mxu0 %v9126_v53  ;;  %v12082_v32 = vpop.f32.mrf.mxu1 }
 0x2e0   :  { %7837 = vmatpush3.bf16.msra.mxu1 %v9130_v41  ;;  %7844 = vmatprep.subr.bf16.mxu0 %v9131_v24  ;;  %v5191_v41 = vpop.f32.mrf.mxu0  ;;  %v9155_v24 = vld [vmem:[%s12368_s3 + $0xc8] sm:$0xff]  }
 0x2e1   :  { %7866 = vmatprep.subr.bf16.mxu1 %v9132_v13 }
 0x2e2   :  { %5534 = vmatmul.mubr.bf16.vlgmr.msra.gmra.mxu0 %v9341_v2  ;;  %v5193_v11 = vpop.f32.mrf.mxu0 }
 0x2e3   :  { %6414 = vmatmul.mubr.bf16.vlgmr.msra.gmra.mxu1 %v5724_v31  ;;  %7845 = vmatpush3.bf16.msra.mxu0 %v9133_v62  ;;  %v9254_v59 = vpop.eup %9253  ;;  %v12088_v34 = vpop.f32.mrf.mxu1 }
 0x2e4   :  { %6454 = vmatprep.mubr.bf16.mxu0 %v5727_v28  ;;  %7867 = vmatpush3.bf16.msra.mxu1 %v9134_v54  ;;  %v9256_v53 = vpop.eup %9255  ;;  %v5678_v14 = vadd.f32 1.0, %v9254_v59  ;;  %v804_v28 = vrot.slane %v11585_v42, %v803_v16  ;;  %v5195_v42 = vpop.f32.mrf.mxu0 }
 0x2e5   :  { %6495 = vmatprep.mubr.bf16.mxu1 %v5729_v47  ;;  %7846 = vmatprep.subr.bf16.mxu0 %v9135_v20  ;;  %v5666_v27 = vadd.f32 1.0, %v9256_v53  ;;  %v5236_v31 = vpop.f32.mrf.mxu1  ;;  %v5149_v47 = vadd.f32 %v12040_v5, %v800_v19 }
 0x2e6   :  { %7868 = vmatprep.subr.bf16.mxu1 %v9136_v39  ;;  %v5151_v5 = vadd.f32 %v12054_v61, %v804_v28  ;;  %v5197_v56 = vpop.f32.mrf.mxu0 }
 0x2e7   :  { %7847 = vmatpush3.bf16.msra.mxu0 %v9137_v44  ;;  %v9258_v13 = vpop.eup %9257  ;;  %v5238_v1 = vpop.f32.mrf.mxu1  ;;  %v5192_v18 = vadd.f32 %v5191_v41, %v5149_v47 }
 0x2e8   :  { %7869 = vmatpush3.bf16.msra.mxu1 %v9138_v6  ;;  %7848 = vmatprep.subr.bf16.mxu0 %v9139_v45  ;;  %v9260_v51 = vpop.eup %9259  ;;  %v5668_v62 = vadd.f32 1.0, %v9258_v13  ;;  %v9162_v6 = vld [vmem:[%s12368_s3 + $0x100] sm:$0xff]   ;;  %v9163_v45 = vld [vmem:[%s12368_s3 + $0x1f8] sm:$0xff]   ;;  %v5194_v61 = vadd.f32 %v5193_v11, %v5151_v5 }
 0x2e9   :  { %7870 = vmatprep.subr.bf16.mxu1 %v9140_v57  ;;  %v9262_v54 = vpop.eup %9261  ;;  %v5696_v37 = vmul.f32 %v9260_v51, %v5676_v9  ;;  %v9170_v11 = vld [vmem:[%s12368_s3 + $0x1a0] sm:$0xff]  }
 0x2ea   :  { %v9264_v20 = vpop.eup %9263  ;;  %v5698_v39 = vmul.f32 %v9262_v54, %v5678_v14 }
 0x2eb   :  { %7849 = vmatpush3.bf16.msra.mxu0 %v9141_v22  ;;  %v9266_v25 = vpop.eup %9265  ;;  %v5686_v2 = vmul.f32 %v9264_v20, %v5666_v27  ;;  %v5716_v57 = vsel %vm5556_vm8, %v11973_v29, %v5696_v37  ;;  %v9172_v20 = vld [vmem:[%s12368_s3 + $0x198] sm:$0xff]  }
 0x2ec   :  { %7871 = vmatpush3.bf16.msra.mxu1 %v9142_v40  ;;  %7850 = vmatprep.subr.bf16.mxu0 %v9143_v43  ;;  %v5688_v44 = vmul.f32 %v9266_v25, %v5668_v62  ;;  %v5718_v17 = vsel %vm5558_vm9, %v11977_v63, %v5698_v39  ;;  %v9164_v40 = vld [vmem:[%s12368_s3 + $0x1b8] sm:$0xff]   ;;  %v9165_v63 = vld [vmem:[%s12368_s3 + $0x1f0] sm:$0xff]  }
 0x2ed   :  { %7872 = vmatprep.subr.bf16.mxu1 %v9144_v10  ;;  %v5706_v22 = vsel %vm5546_vm10, %v11980_v0, %v5686_v2  ;;  %v5240_v10 = vpop.f32.mrf.mxu1  ;;  %v9173_v39 = vld [vmem:[%s12368_s3 + $0x1d0] sm:$0xff]  }
 0x2ee   :  { %v5726_v29 = vpack.c.bf16 %v5716_v57, %v5706_v22  ;;  %v5708_v43 = vsel %vm5548_vm11, %v11990_v33, %v5688_v44  ;;  %v9175_v44 = vld [vmem:[%s12368_s3 + $0x1c8] sm:$0xff]  }
 0x2ef   :  { %7851 = vmatpush3.bf16.msra.mxu0 %v9145_v30  ;;  %v5728_v0 = vpack.c.bf16 %v5718_v17, %v5708_v43  ;;  %v5235_v30 = vadd.f32 %v12088_v34, %v5192_v18 }
 0x2f0   :  { %7873 = vmatpush3.bf16.msra.mxu1 %v9146_v35  ;;  %7852 = vmatprep.subr.bf16.mxu0 %v9147_v50 }
 0x2f1   :  { %7874 = vmatprep.subr.bf16.mxu1 %v9148_v58  ;;  %v5196_v58 = vadd.f32 %v5195_v42, %v5153_v7  ;;  %v9176_v42 = vld [vmem:[%s12368_s3 + $0x188] sm:$0xff]  }
 0x2f3   :  { %7853 = vmatpush3.bf16.msra.mxu0 %v9149_v4  ;;  %v5237_v4 = vadd.f32 %v5236_v31, %v5194_v61  ;;  %v5239_v59 = vadd.f32 %v5238_v1, %v5196_v58  ;;  %v9177_v1 = vld [vmem:[%s12368_s3 + $0x1c0] sm:$0xff]  }
 0x2f4   :  { %7875 = vmatpush3.bf16.msra.mxu1 %v9150_v48  ;;  %7854 = vmatprep.subr.bf16.mxu0 %v9151_v26  ;;  %v9166_v48 = vld [vmem:[%s12368_s3 + $0x1b0] sm:$0xff]   ;;  %v5155_v26 = vadd.f32 %v12082_v32, %v804_v28  ;;  %v9168_v32 = vld [vmem:[%s12368_s3 + $0x1a8] sm:$0xff]  }
 0x2f5   :  { %7876 = vmatprep.subr.bf16.mxu1 %v9152_v21 }
 0x2f6   :  { %v5198_v53 = vadd.f32 %v5197_v56, %v5155_v26  ;;  %v9180_v26 = vld [vmem:[%s12368_s3 + $0x238] sm:$0xff]  }
 0x2f7   :  { %7855 = vmatpush3.bf16.msra.mxu0 %v9153_v49 }
 0x2f8   :  { %7877 = vmatpush3.bf16.msra.mxu1 %v9154_v3  ;;  %7856 = vmatprep.subr.bf16.mxu0 %v9155_v24  ;;  %v5241_v9 = vadd.f32 %v5240_v10, %v5198_v53  ;;  %v9186_v53 = vld [vmem:[%s12368_s3 + $0x220] sm:$0xff]  }
 0x2f9   :  { %7878 = vmatprep.subr.bf16.mxu1 %v9156_v12  ;;  %v9169_v12 = vld [vmem:[%s12368_s3 + $0x1e0] sm:$0xff]  }
 0x2fb   :  { %7857 = vmatpush3.bf16.msra.mxu0 %v9157_v8 }
 0x2fc   :  { %7879 = vmatpush3.bf16.msra.mxu1 %v9158_v15  ;;  %7858 = vmatprep.subr.bf16.mxu0 %v9159_v46  ;;  %v9171_v46 = vld [vmem:[%s12368_s3 + $0x1d8] sm:$0xff]  }
 0x2fd   :  { %7880 = vmatprep.subr.bf16.mxu1 %v9160_v23 }
 0x2ff   :  { %7859 = vmatpush3.bf16.msra.mxu0 %v9161_v60  ;;  %v9174_v60 = vld [vmem:[%s12368_s3 + $0x190] sm:$0xff]  }
 0x300   :  { %7881 = vmatpush3.bf16.msra.mxu1 %v9162_v6  ;;  %7888 = vmatprep.subr.bf16.mxu0 %v9163_v45  ;;  %v9178_v45 = vld [vmem:[%s12368_s3 + $0x180] sm:$0xff]  }
 0x302   :  { %v5277_v35 = vpop.f32.mrf.mxu0  ;;  %6455 = vmatmul.mubr.bf16.vlgmr.msra.gmra.mxu0 %v5726_v29 }
 0x303   :  { %v5320_v50 = vpop.f32.mrf.mxu1  ;;  %v5278_v33 = vadd.f32 %v5277_v35, %v5235_v30  ;;  %6496 = vmatmul.mubr.bf16.vlgmr.msra.gmra.mxu1 %v5728_v0  ;;  %7889 = vmatpush3.bf16.msra.mxu0 %v9164_v40 }
 0x304   :  { %v5279_v21 = vpop.f32.mrf.mxu0  ;;  %7890 = vmatprep.subr.bf16.mxu0 %v9165_v63 }
 0x305   :  { %v5322_v36 = vpop.f32.mrf.mxu1  ;;  %v5280_v55 = vadd.f32 %v5279_v21, %v5237_v4  ;;  %v12148_v49 = vadd.f32 %v5320_v50, %v5278_v33  ;;  %v9179_v4 = vld [vmem:[%s12368_s3 + $0x278] sm:$0xff]  }
 0x306   :  { %v5281_v41 = vpop.f32.mrf.mxu0  ;;  %7910 = vmatprep.subr.bf16.mxu1 %v9179_v4 }
 0x307   :  { %v5324_v34 = vpop.f32.mrf.mxu1  ;;  %v5570_v3 = vmin.f32 %v12148_v49, 0.0  ;;  %v5282_v24 = vadd.f32 %v5281_v41, %v5239_v59  ;;  %v12151_v13 = vadd.f32 %v5322_v36, %v5280_v55  ;;  %7891 = vmatpush3.bf16.msra.mxu0 %v9166_v48  ;;  %vm5550_vm15 = vcmp.gt.f32.partialorder %v12148_v49, 0.0  ;;  %7911 = vmatpush3.bf16.msra.mxu1 %v9180_v26  ;;  %v9181_v36 = vld [vmem:[%s12368_s3 + $0x270] sm:$0xff]   ;;  %v9183_v59 = vld [vmem:[%s12368_s3 + $0x268] sm:$0xff]   ;;  %v9187_v41 = vld [vmem:[%s12368_s3 + $0x258] sm:$0xff]  }
 0x308   :  { %v5283_v16 = vpop.f32.mrf.mxu0  ;;  %7892 = vmatprep.subr.bf16.mxu0 %v9167_v38  ;;  %v9182_v38 = vld [vmem:[%s12368_s3 + $0x230] sm:$0xff]   ;;  %7912 = vmatprep.subr.bf16.mxu1 %v9181_v36  ;;  %v9184_v55 = vld [vmem:[%s12368_s3 + $0x228] sm:$0xff]  }
 0x309   :  { %v5571_v14 = vmin.f32 %v12151_v13, 0.0  ;;  %v5326_v27 = vpop.f32.mrf.mxu1  ;;  %v5284_v19 = vadd.f32 %v5283_v16, %v5241_v9  ;;  %v5325_v8 = vadd.f32 %v5324_v34, %v5282_v24  ;;  %v5636_v51 = vmul.f32 1.442695, %v5570_v3  ;;  %v9188_v34 = vld [vmem:[%s12368_s3 + $0x218] sm:$0xff]   ;;  %v9190_v24 = vld [vmem:[%s12368_s3 + $0x210] sm:$0xff]   ;;  %v9193_v9 = vld [vmem:[%s12368_s3 + $0x240] sm:$0xff]  }
 0x30a   :  { %v5590_v25 = vmul.f32 0.5, %v5570_v3  ;;  %vm5551_vm13 = vcmp.gt.f32.partialorder %v12151_v13, 0.0  ;;  %v9189_v3 = vld [vmem:[%s12368_s3 + $0x250] sm:$0xff]   ;;  %v9194_v16 = vld [vmem:[%s12368_s3 + $0x200] sm:$0xff]  }
 0x30b   :  { %v5638_v62 = vmul.f32 1.442695, %v5571_v14  ;;  %7893 = vmatpush3.bf16.msra.mxu0 %v9168_v32  ;;  %v5580_v31 = vmin.f32 %v5325_v8, 0.0  ;;  %v5327_v15 = vadd.f32 %v5326_v27, %v5284_v19  ;;  %v5591_v54 = vmul.f32 0.5, %v5571_v14  ;;  %7913 = vmatpush3.bf16.msra.mxu1 %v9182_v38  ;;  %v9192_v32 = vld [vmem:[%s12368_s3 + $0x208] sm:$0xff]  }
 0x30c   :  { %7894 = vmatprep.subr.bf16.mxu0 %v9169_v12  ;;  %vm5560_vm12 = vcmp.gt.f32.partialorder %v5325_v8, 0.0  ;;  %7914 = vmatprep.subr.bf16.mxu1 %v9183_v59 }
 0x30d   :  { %9267 = vpow2.f32 %v5638_v62  ;;  %v5656_v37 = vmul.f32 1.442695, %v5580_v31  ;;  %v5600_v28 = vmul.f32 0.5, %v5580_v31  ;;  %v5581_v23 = vmin.f32 %v5327_v15, 0.0 }
 0x30e   :  { %9269 = vpow2.f32 %v5636_v51  ;;  %vm5561_vm14 = vcmp.gt.f32.partialorder %v5327_v15, 0.0  ;;  %v770_v51 = vld [vmem:[%s12369_s2 + $0x8] sm:$0x3]  ;;  %v12382_v31 = vsub.s32 0, %v11558_v52 }
 0x30f   :  { %7895 = vmatpush3.bf16.msra.mxu0 %v9170_v11  ;;  %9271 = vpow2.f32 %v5656_v37  ;;  %v5658_v2 = vmul.f32 1.442695, %v5581_v23  ;;  %v5601_v47 = vmul.f32 0.5, %v5581_v23  ;;  %7915 = vmatpush3.bf16.msra.mxu1 %v9184_v55 }
 0x310   :  { %7896 = vmatprep.subr.bf16.mxu0 %v9171_v46  ;;  %9273 = vtanh.f32 %v5591_v54  ;;  %v12383_v54 = vsub.s32 1, %v11558_v52 }
 0x311   :  { %9275 = vtanh.f32 %v5600_v28 }
 0x312   :  { %9277 = vpow2.f32 %v5658_v2  ;;  %v812_v37 = vrot.slane %v770_v51, %v12383_v54 }
 0x313   :  { %7897 = vmatpush3.bf16.msra.mxu0 %v9172_v20  ;;  %9279 = vtanh.f32 %v5590_v25 }
 0x314   :  { %7898 = vmatprep.subr.bf16.mxu0 %v9173_v39  ;;  %9281 = vtanh.f32 %v5601_v47 }
 0x317   :  { %7899 = vmatpush3.bf16.msra.mxu0 %v9174_v60 }
 0x318   :  { %7900 = vmatprep.subr.bf16.mxu0 %v9175_v44 }
 0x31a   :  { %v9268_v6 = vpop.eup %9267 }
 0x31b   :  { %7901 = vmatpush3.bf16.msra.mxu0 %v9176_v42  ;;  %v9270_v57 = vpop.eup %9269  ;;  %v5671_v17 = vadd.f32 1.0, %v9268_v6 }
 0x31c   :  { %7902 = vmatprep.subr.bf16.mxu0 %v9177_v1  ;;  %v9272_v5 = vpop.eup %9271  ;;  %v5670_v18 = vadd.f32 1.0, %v9270_v57 }
 0x31d   :  { %v9274_v22 = vpop.eup %9273  ;;  %v5680_v40 = vadd.f32 1.0, %v9272_v5 }
 0x31e   :  { %v9276_v29 = vpop.eup %9275  ;;  %v5691_v0 = vmul.f32 %v9274_v22, %v5671_v17 }
 0x31f   :  { %7903 = vmatpush3.bf16.msra.mxu0 %v9178_v45  ;;  %v9278_v43 = vpop.eup %9277  ;;  %v5700_v56 = vmul.f32 %v9276_v29, %v5680_v40 }
 0x320   :  { %v9280_v10 = vpop.eup %9279  ;;  %v5681_v63 = vadd.f32 1.0, %v9278_v43  ;;  %v5711_v50 = vsel %vm5551_vm13, %v12151_v13, %v5691_v0  ;;  %v9191_v13 = vld [vmem:[%s12368_s3 + $0x248] sm:$0xff]  }
 0x321   :  { %v9282_v7 = vpop.eup %9281  ;;  %v5690_v61 = vmul.f32 %v9280_v10, %v5670_v18  ;;  %v5720_v35 = vsel %vm5560_vm12, %v5325_v8, %v5700_v56 }
 0x322   :  { %v5701_v30 = vmul.f32 %v9282_v7, %v5681_v63 }
 0x323   :  { %v5710_v33 = vsel %vm5550_vm15, %v12148_v49, %v5690_v61  ;;  %v9185_v49 = vld [vmem:[%s12368_s3 + $0x260] sm:$0xff]  }
 0x324   :  { %v5721_v58 = vsel %vm5561_vm14, %v5327_v15, %v5701_v30  ;;  %v5730_v21 = vpack.c.bf16 %v5720_v35, %v5710_v33  ;;  %7916 = vmatprep.subr.bf16.mxu1 %v9185_v49  ;;  %v808_v15 = vrot.slane %v770_v51, %v12382_v31 }
 0x325   :  { %v5731_v48 = vpack.c.bf16 %v5721_v58, %v5711_v50  ;;  %7917 = vmatpush3.bf16.msra.mxu1 %v9186_v53 }
 0x326   :  { %7918 = vmatprep.subr.bf16.mxu1 %v9187_v41 }
 0x327   :  { %6536 = vmatprep.mubr.bf16.mxu0 %v5731_v48 }
 0x328   :  { %6537 = vmatmul.mubr.bf16.vlgmr.msra.gmra.mxu0 %v5730_v21 }
 0x329   :  { %7919 = vmatpush3.bf16.msra.mxu1 %v9188_v34 }
 0x32a   :  { %7920 = vmatprep.subr.bf16.mxu1 %v9189_v3 }
 0x32d   :  { %7921 = vmatpush3.bf16.msra.mxu1 %v9190_v24 }
 0x32e   :  { %7922 = vmatprep.subr.bf16.mxu1 %v9191_v13 }
 0x331   :  { %7923 = vmatpush3.bf16.msra.mxu1 %v9192_v32 }
 0x332   :  { %7924 = vmatprep.subr.bf16.mxu1 %v9193_v9 }
 0x335   :  { %7925 = vmatpush3.bf16.msra.mxu1 %v9194_v16 }
 0x342   :  { %v5363_v12 = vpop.f32.mrf.mxu0 }
 0x343   :  { %v5406_v27 = vpop.f32.mrf.mxu1  ;;  %v5364_v23 = vadd.f32 %v5363_v12, %v808_v15 }
 0x344   :  { %v5365_v14 = vpop.f32.mrf.mxu0 }
 0x345   :  { %v5408_v8 = vpop.f32.mrf.mxu1  ;;  %v5366_v25 = vadd.f32 %v5365_v14, %v812_v37  ;;  %v5407_v2 = vadd.f32 %v5406_v27, %v5364_v23 }
 0x346   :  { %v5367_v19 = vpop.f32.mrf.mxu0 }
 0x347   :  { %v5410_v11 = vpop.f32.mrf.mxu1  ;;  %v5368_v47 = vadd.f32 %v5367_v19, %v808_v15  ;;  %v5409_v42 = vadd.f32 %v5408_v8, %v5366_v25  ;;  %v9196_v25 = vld [vmem:[%s12370_s5 + $0x30] sm:$0xff]  }
 0x348   :  { %v5369_v62 = vpop.f32.mrf.mxu0 }
 0x349   :  { %v5412_v28 = vpop.f32.mrf.mxu1  ;;  %v5370_v1 = vadd.f32 %v5369_v62, %v812_v37  ;;  %v5411_v57 = vadd.f32 %v5410_v11, %v5368_v47  ;;  %v9198_v47 = vld [vmem:[%s12370_s5 + $0x20] sm:$0xff]  }
 0x34b   :  { %v5413_v22 = vadd.f32 %v5412_v28, %v5370_v1  ;;  %v9202_v1 = vld [vmem:[%s12370_s5] sm:$0xff]  }
 0x382   :  { %v5449_v46 = vpop.f32.mrf.mxu0 }
 0x383   :  { %v5492_v39 = vpop.f32.mrf.mxu1  ;;  %v5450_v6 = vadd.f32 %v5449_v46, %v5407_v2  ;;  %v9197_v2 = vld [vmem:[%s12370_s5 + $0x28] sm:$0xff]  }
 0x384   :  { %v5451_v20 = vpop.f32.mrf.mxu0 }
 0x385   :  { %v5494_v44 = vpop.f32.mrf.mxu1  ;;  %v5452_v45 = vadd.f32 %v5451_v20, %v5409_v42  ;;  %v5493_v18 = vadd.f32 %v5492_v39, %v5450_v6  ;;  %v9195_v20 = vld [vmem:[%s12370_s5 + $0x38] sm:$0xff]   ;;  %v9343_v39 = vmov 0.0   ;;  %v9201_v42 = vld [vmem:[%s12370_s5 + $0x8] sm:$0xff]  }
 0x386   :  { %v5453_v60 = vpop.f32.mrf.mxu0  ;;  %7959 = vmatprep.subr.bf16.mxu0 %v9343_v39  ;;  %7979 = vmatprep.subr.bf16.mxu1 %v9343_v39 }
 0x387   :  { %v5496_v17 = vpop.f32.mrf.mxu1  ;;  %v5454_v52 = vadd.f32 %v5453_v60, %v5411_v57  ;;  %v5495_v29 = vadd.f32 %v5494_v44, %v5452_v45  ;;  %7960 = vmatpush3.bf16.msra.mxu0 %v9195_v20  ;;  %v9199_v60 = vld [vmem:[%s12370_s5 + $0x18] sm:$0xff]   ;;  %v9200_v44 = vld [vmem:[%s12370_s5 + $0x10] sm:$0xff]   ;;  %7975 = vmatprep.mubr.msk.bf16.mxu0 %vm9344_vm4, %v9343_v39 }
 0x388   :  { %v5455_v5 = vpop.f32.mrf.mxu0  ;;  %7961 = vmatprep.subr.bf16.mxu0 %v9343_v39 }
 0x389   :  { %v5456_v43 = vadd.f32 %v5455_v5, %v5413_v22  ;;  %v5498_v10 = vpop.f32.mrf.mxu1  ;;  %v5497_v61 = vadd.f32 %v5496_v17, %v5454_v52 }
 0x38b   :  { %v5499_v35 = vadd.f32 %v5498_v10, %v5456_v43  ;;  %7962 = vmatpush3.bf16.msra.mxu0 %v9196_v25  ;;  %v7714_v10 = vld [vmem:[%s12371_s4] ss:$0 sm:$0xff] }
 0x38c   :  { %7963 = vmatprep.subr.bf16.mxu0 %v9343_v39 }
 0x38f   :  { %7964 = vmatpush3.bf16.msra.mxu0 %v9197_v2 }
 0x390   :  { %7965 = vmatprep.subr.bf16.mxu0 %v9343_v39 }
 0x393   :  { %7966 = vmatpush3.bf16.msra.mxu0 %v9198_v47  ;;  %v9203_v47 = vld [vmem:[%s12372_s7 + $0x38] sm:$0xff]  }
 0x394   :  { %7967 = vmatprep.subr.bf16.mxu0 %v9343_v39 }
 0x397   :  { %7968 = vmatpush3.bf16.msra.mxu0 %v9199_v60  ;;  %v9204_v60 = vld [vmem:[%s12372_s7 + $0x30] sm:$0xff]  }
 0x398   :  { %7969 = vmatprep.subr.bf16.mxu0 %v9343_v39 }
 0x39b   :  { %7970 = vmatpush3.bf16.msra.mxu0 %v9200_v44  ;;  %v9205_v44 = vld [vmem:[%s12372_s7 + $0x28] sm:$0xff]  }
 0x39c   :  { %7971 = vmatprep.subr.bf16.mxu0 %v9343_v39 }
 0x39f   :  { %7972 = vmatpush3.bf16.msra.mxu0 %v9201_v42  ;;  %v9206_v42 = vld [vmem:[%s12372_s7 + $0x20] sm:$0xff]  }
 0x3a0   :  { %7973 = vmatprep.subr.bf16.mxu0 %v9343_v39 }
 0x3a2   :  { %v5535_v40 = vpop.f32.mrf.mxu0 }
 0x3a3   :  { %v5536_v56 = vadd.f32 %v5535_v40, %v5493_v18  ;;  %7974 = vmatpush3.bf16.msra.mxu0 %v9202_v1  ;;  %v7838_v6 = vpop.f32.mrf.mxu1  ;;  %v9207_v1 = vld [vmem:[%s12372_s7 + $0x18] sm:$0xff]  }
 0x3a4   :  { %v5537_v63 = vpop.f32.mrf.mxu0  ;;  %7999 = vmatprep.subr.bf16.mxu0 %v9343_v39 }
 0x3a5   :  { %v5572_v0 = vmin.f32 %v5536_v56, 0.0  ;;  %v5538_v7 = vadd.f32 %v5537_v63, %v5495_v29  ;;  %vm5552_vm3 = vcmp.gt.f32.partialorder %v5536_v56, 0.0  ;;  %v7839_v57 = vpop.f32.mrf.mxu1 }
 0x3a6   :  { %v5539_v30 = vpop.f32.mrf.mxu0 }
 0x3a7   :  { %v5640_v50 = vmul.f32 1.442695, %v5572_v0  ;;  %v5573_v58 = vmin.f32 %v5538_v7, 0.0  ;;  %v5540_v4 = vadd.f32 %v5539_v30, %v5497_v61  ;;  %v5592_v53 = vmul.f32 0.5, %v5572_v0  ;;  %v7841_v17 = vpop.f32.mrf.mxu1 }
 0x3a8   :  { %v5541_v33 = vpop.f32.mrf.mxu0  ;;  %vm5553_vm1 = vcmp.gt.f32.partialorder %v5538_v7, 0.0 }
 0x3a9   :  { %v5642_v48 = vmul.f32 1.442695, %v5573_v58  ;;  %v5542_v26 = vadd.f32 %v5541_v33, %v5499_v35  ;;  %v5593_v21 = vmul.f32 0.5, %v5573_v58  ;;  %v5582_v36 = vmin.f32 %v5540_v4, 0.0  ;;  %v7842_v18 = vpop.f32.mrf.mxu1 }
 0x3aa   :  { %9283 = vpow2.f32 %v5640_v50  ;;  %vm5562_vm0 = vcmp.gt.f32.partialorder %v5540_v4, 0.0  ;;  %v7843_v30 = vadd.f32 %v7842_v18, %v7841_v17 }
 0x3ab   :  { %v5583_v38 = vmin.f32 %v5542_v26, 0.0  ;;  %9285 = vpow2.f32 %v5642_v48  ;;  %v5602_v59 = vmul.f32 0.5, %v5582_v36  ;;  %v5660_v55 = vmul.f32 1.442695, %v5582_v36 }
 0x3ac   :  { %9287 = vtanh.f32 %v5593_v21  ;;  %vm5563_vm2 = vcmp.gt.f32.partialorder %v5542_v26, 0.0  ;;  %v6419_v33 = vadd.f32 %v7843_v30, %v7714_v10 }
 0x3ad   :  { %v5662_v49 = vmul.f32 1.442695, %v5583_v38  ;;  %9289 = vpow2.f32 %v5660_v55  ;;  %v5603_v41 = vmul.f32 0.5, %v5583_v38 }
 0x3ae   :  { %9291 = vtanh.f32 %v5602_v59 }
 0x3af   :  { %9293 = vpow2.f32 %v5662_v49 }
 0x3b0   :  { %9295 = vtanh.f32 %v5592_v53 }
 0x3b1   :  { %9297 = vtanh.f32 %v5603_v41 }
 0x3b7   :  { %v9284_v34 = vpop.eup %9283 }
 0x3b8   :  { %v9286_v3 = vpop.eup %9285  ;;  %v5672_v9 = vadd.f32 1.0, %v9284_v34 }
 0x3b9   :  { %v9288_v24 = vpop.eup %9287  ;;  %v5673_v13 = vadd.f32 1.0, %v9286_v3 }
 0x3ba   :  { %v9290_v32 = vpop.eup %9289 }
 0x3bb   :  { %v9292_v16 = vpop.eup %9291  ;;  %v5682_v12 = vadd.f32 1.0, %v9290_v32  ;;  %v5693_v51 = vmul.f32 %v9288_v24, %v5673_v13 }
 0x3bc   :  { %v9294_v14 = vpop.eup %9293 }
 0x3bd   :  { %v9296_v27 = vpop.eup %9295  ;;  %v5702_v19 = vmul.f32 %v9292_v16, %v5682_v12  ;;  %v5683_v8 = vadd.f32 1.0, %v9294_v14  ;;  %v5713_v46 = vsel %vm5553_vm1, %v5538_v7, %v5693_v51 }
 0x3be   :  { %v9298_v62 = vpop.eup %9297  ;;  %v5692_v11 = vmul.f32 %v9296_v27, %v5672_v9 }
 0x3bf   :  { %v5703_v31 = vmul.f32 %v9298_v62, %v5683_v8  ;;  %v5722_v15 = vsel %vm5562_vm0, %v5540_v4, %v5702_v19 }
 0x3c0   :  { %v5712_v37 = vsel %vm5552_vm3, %v5536_v56, %v5692_v11  ;;  %v7840_v56 = vadd.f32 %v7839_v57, %v7838_v6  ;;  %v9208_v6 = vld [vmem:[%s12372_s7 + $0x10] sm:$0xff]   ;;  %v9210_v57 = vld [vmem:[%s12372_s7] sm:$0xff]  }
 0x3c1   :  { %v5723_v54 = vsel %vm5563_vm2, %v5542_v26, %v5703_v31  ;;  %v5732_v23 = vpack.c.bf16 %v5722_v15, %v5712_v37 }
 0x3c2   :  { %v5733_v28 = vpack.c.bf16 %v5723_v54, %v5713_v46  ;;  %v7860_v45 = vpop.f32.mrf.mxu0  ;;  %v6416_v61 = vadd.f32 %v7840_v56, %v7714_v10 }
 0x3c3   :  { %v7882_v52 = vpop.f32.mrf.mxu1 }
 0x3c4   :  { %6577 = vmatprep.mubr.bf16.mxu1 %v5733_v28  ;;  %v7861_v5 = vpop.f32.mrf.mxu0 }
 0x3c5   :  { %6578 = vmatmul.mubr.bf16.vlgmr.msra.gmra.mxu1 %v5732_v23  ;;  %v7883_v43 = vpop.f32.mrf.mxu1  ;;  %v7862_v0 = vadd.f32 %v7861_v5, %v7860_v45  ;;  %v9209_v45 = vld [vmem:[%s12372_s7 + $0x8] sm:$0xff]   ;;  %v7795_v5 = vld [vmem:[%s12373_s6] ss:$0 sm:$0xff] }
 0x3c6   :  { %7995 = vmatprep.mubr.msk.bf16.mxu1 %vm9344_vm4, %v9343_v39  ;;  %v7863_v22 = vpop.f32.mrf.mxu0  ;;  %v7884_v48 = vadd.f32 %v7883_v43, %v7882_v52  ;;  %7980 = vmatpush3.bf16.msra.mxu1 %v9203_v47  ;;  %v7813_v47 = vld [vmem:[%s12376_s10] ss:$0 sm:$0xff] }
 0x3c7   :  { %v7885_v7 = vpop.f32.mrf.mxu1  ;;  %v6457_v50 = vadd.f32 %v7862_v0, %v6416_v61  ;;  %7981 = vmatprep.subr.bf16.mxu1 %v9343_v39 }
 0x3c8   :  { %v7864_v40 = vpop.f32.mrf.mxu0 }
 0x3c9   :  { %v7865_v58 = vadd.f32 %v7864_v40, %v7863_v22  ;;  %v7886_v4 = vpop.f32.mrf.mxu1  ;;  %v6498_v38 = vadd.f32 %v7884_v48, %v6457_v50 }
 0x3ca   :  { %v7887_v49 = vadd.f32 %v7886_v4, %v7885_v7  ;;  %7982 = vmatpush3.bf16.msra.mxu1 %v9204_v60 }
 0x3cb   :  { %v6460_v59 = vadd.f32 %v7865_v58, %v6419_v33  ;;  %7983 = vmatprep.subr.bf16.mxu1 %v9343_v39 }
 0x3cd   :  { %v6501_v24 = vadd.f32 %v7887_v49, %v6460_v59  ;;  %v9212_v59 = vld [vmem:[%s12374_s9 + $0x30] sm:$0xff]   ;;  %v9214_v49 = vld [vmem:[%s12374_s9 + $0x20] sm:$0xff]  }
 0x3ce   :  { %7984 = vmatpush3.bf16.msra.mxu1 %v9205_v44 }
 0x3cf   :  { %7985 = vmatprep.subr.bf16.mxu1 %v9343_v39 }
 0x3d2   :  { %7986 = vmatpush3.bf16.msra.mxu1 %v9206_v42 }
 0x3d3   :  { %7987 = vmatprep.subr.bf16.mxu1 %v9343_v39 }
 0x3d6   :  { %7988 = vmatpush3.bf16.msra.mxu1 %v9207_v1 }
 0x3d7   :  { %7989 = vmatprep.subr.bf16.mxu1 %v9343_v39 }
 0x3da   :  { %7990 = vmatpush3.bf16.msra.mxu1 %v9208_v6 }
 0x3db   :  { %7991 = vmatprep.subr.bf16.mxu1 %v9343_v39 }
 0x3de   :  { %7992 = vmatpush3.bf16.msra.mxu1 %v9209_v45 }
 0x3df   :  { %7993 = vmatprep.subr.bf16.mxu1 %v9343_v39 }
 0x3e2   :  { %7994 = vmatpush3.bf16.msra.mxu1 %v9210_v57 }
 0x3e8   :  { %v7904_v29 = vpop.f32.mrf.mxu0 }
 0x3ea   :  { %v7905_v63 = vpop.f32.mrf.mxu0 }
 0x3eb   :  { %v7906_v26 = vadd.f32 %v7905_v63, %v7904_v29 }
 0x3ec   :  { %v7907_v35 = vpop.f32.mrf.mxu0 }
 0x3ed   :  { %v6539_v53 = vadd.f32 %v7906_v26, %v6498_v38  ;;  %v9211_v38 = vld [vmem:[%s12374_s9 + $0x38] sm:$0xff]  }
 0x3ee   :  { %v7908_v21 = vpop.f32.mrf.mxu0 }
 0x3ef   :  { %v7909_v41 = vadd.f32 %v7908_v21, %v7907_v35 }
 0x3f1   :  { %v6542_v9 = vadd.f32 %v7909_v41, %v6501_v24  ;;  %v9216_v41 = vld [vmem:[%s12374_s9 + $0x10] sm:$0xff]   ;;  %v7804_v24 = vld [vmem:[%s12375_s8] ss:$0 sm:$0xff] }
 0x485   :  { %v7926_v36 = vpop.f32.mrf.mxu1 }
 0x487   :  { %v7927_v55 = vpop.f32.mrf.mxu1 }
 0x488   :  { %v7928_v34 = vadd.f32 %v7927_v55, %v7926_v36  ;;  %v9213_v55 = vld [vmem:[%s12374_s9 + $0x28] sm:$0xff]  }
 0x489   :  { %v7929_v3 = vpop.f32.mrf.mxu1 }
 0x48a   :  { %v6580_v13 = vadd.f32 %v7928_v34, %v6539_v53  ;;  %v9215_v53 = vld [vmem:[%s12374_s9 + $0x18] sm:$0xff]   ;;  %v9217_v34 = vld [vmem:[%s12374_s9 + $0x8] sm:$0xff]  }
 0x48b   :  { %v7930_v32 = vpop.f32.mrf.mxu1 }
 0x48c   :  { %v6588_v16 = vmin.f32 %v6580_v13, 0.0  ;;  %v7931_v12 = vadd.f32 %v7930_v32, %v7929_v3  ;;  %vm6586_vm5 = vcmp.gt.f32.partialorder %v6580_v13, 0.0  ;;  %v9218_v3 = vld [vmem:[%s12374_s9] sm:$0xff]  }
 0x48e   :  { %v6594_v14 = vmul.f32 1.442695, %v6588_v16  ;;  %v6583_v27 = vadd.f32 %v7931_v12, %v6542_v9  ;;  %v6590_v19 = vmul.f32 0.5, %v6588_v16 }
 0x490   :  { %v6589_v8 = vmin.f32 %v6583_v27, 0.0  ;;  %9299 = vpow2.f32 %v6594_v14  ;;  %vm6587_vm6 = vcmp.gt.f32.partialorder %v6583_v27, 0.0 }
 0x491   :  { %9301 = vtanh.f32 %v6590_v19 }
 0x492   :  { %v6596_v51 = vmul.f32 1.442695, %v6589_v8  ;;  %v6591_v62 = vmul.f32 0.5, %v6589_v8 }
 0x494   :  { %9303 = vpow2.f32 %v6596_v51 }
 0x495   :  { %9305 = vtanh.f32 %v6591_v62 }
 0x49d   :  { %v9300_v11 = vpop.eup %9299 }
 0x49e   :  { %v6598_v31 = vadd.f32 1.0, %v9300_v11  ;;  %v9302_v15 = vpop.eup %9301 }
 0x4a0   :  { %v6600_v54 = vmul.f32 %v9302_v15, %v6598_v31 }
 0x4a1   :  { %v9304_v46 = vpop.eup %9303 }
 0x4a2   :  { %v6599_v37 = vadd.f32 1.0, %v9304_v46  ;;  %v9306_v28 = vpop.eup %9305  ;;  %v6602_v20 = vsel %vm6586_vm5, %v6580_v13, %v6600_v54 }
 0x4a4   :  { %v6601_v23 = vmul.f32 %v9306_v28, %v6599_v37 }
 0x4a6   :  { %v6603_v25 = vsel %vm6587_vm6, %v6583_v27, %v6601_v23 }
 0x4a7   :  { %v6604_v2 = vpack.c.bf16 %v6603_v25, %v6602_v20 }
 0x4a9   :  { %7976 = vmatmul.mubr.bf16.vlgmr.msra.gmra.mxu0 %v6604_v2 }
 0x4aa   :  { %8015 = vmatprep.mubr.msk.bf16.mxu0 %vm9344_vm4, %v9343_v39  ;;  %8000 = vmatpush3.bf16.msra.mxu0 %v9211_v38 }
 0x4ab   :  { %8001 = vmatprep.subr.bf16.mxu0 %v9343_v39 }
 0x4ae   :  { %8002 = vmatpush3.bf16.msra.mxu0 %v9212_v59 }
 0x4af   :  { %8003 = vmatprep.subr.bf16.mxu0 %v9343_v39 }
 0x4b2   :  { %8004 = vmatpush3.bf16.msra.mxu0 %v9213_v55 }
 0x4b3   :  { %8005 = vmatprep.subr.bf16.mxu0 %v9343_v39 }
 0x4b6   :  { %8006 = vmatpush3.bf16.msra.mxu0 %v9214_v49 }
 0x4b7   :  { %8007 = vmatprep.subr.bf16.mxu0 %v9343_v39 }
 0x4ba   :  { %8008 = vmatpush3.bf16.msra.mxu0 %v9215_v53 }
 0x4bb   :  { %8009 = vmatprep.subr.bf16.mxu0 %v9343_v39 }
 0x4be   :  { %8010 = vmatpush3.bf16.msra.mxu0 %v9216_v41 }
 0x4bf   :  { %8011 = vmatprep.subr.bf16.mxu0 %v9343_v39 }
 0x4c2   :  { %8012 = vmatpush3.bf16.msra.mxu0 %v9217_v34 }
 0x4c3   :  { %8013 = vmatprep.subr.bf16.mxu0 %v9343_v39 }
 0x4c6   :  { %8014 = vmatpush3.bf16.msra.mxu0 %v9218_v3 }
 0x569   :  { %v6710_v17 = vpop.f32.mrf.mxu0 }
 0x56a   :  { %v6711_v22 = vadd.f32 %v7795_v5, %v6710_v17 }
 0x56b   :  { %v7977_v18 = vpop.f32.mrf.mxu0 }
 0x56c   :  { %v6719_v52 = vmin.f32 %v6711_v22, 0.0  ;;  %vm6717_vm7 = vcmp.gt.f32.partialorder %v6711_v22, 0.0 }
 0x56d   :  { %v6713_v40 = vpop.f32.mrf.mxu0 }
 0x56e   :  { %v6725_v29 = vmul.f32 1.442695, %v6719_v52  ;;  %v6714_v43 = vadd.f32 %v7795_v5, %v6713_v40  ;;  %v6721_v10 = vmul.f32 0.5, %v6719_v52 }
 0x56f   :  { %v7978_v56 = vpop.f32.mrf.mxu0 }
 0x570   :  { %v6720_v63 = vmin.f32 %v6714_v43, 0.0  ;;  %9307 = vpow2.f32 %v6725_v29  ;;  %vm6718_vm8 = vcmp.gt.f32.partialorder %v6714_v43, 0.0 }
 0x571   :  { %9309 = vtanh.f32 %v6721_v10 }
 0x572   :  { %v6727_v0 = vmul.f32 1.442695, %v6720_v63  ;;  %v6722_v7 = vmul.f32 0.5, %v6720_v63 }
 0x574   :  { %9311 = vpow2.f32 %v6727_v0 }
 0x575   :  { %9313 = vtanh.f32 %v6722_v7 }
 0x57d   :  { %v9308_v61 = vpop.eup %9307 }
 0x57e   :  { %v6729_v30 = vadd.f32 1.0, %v9308_v61  ;;  %v9310_v35 = vpop.eup %9309 }
 0x580   :  { %v6731_v58 = vmul.f32 %v9310_v35, %v6729_v30 }
 0x581   :  { %v9312_v50 = vpop.eup %9311 }
 0x582   :  { %v6730_v4 = vadd.f32 1.0, %v9312_v50  ;;  %v9314_v33 = vpop.eup %9313  ;;  %v6733_v26 = vsel %vm6717_vm7, %v6711_v22, %v6731_v58 }
 0x584   :  { %v6732_v48 = vmul.f32 %v9314_v33, %v6730_v4 }
 0x586   :  { %v6734_v21 = vsel %vm6718_vm8, %v6714_v43, %v6732_v48 }
 0x587   :  { %v6735_v36 = vpack.c.bf16 %v6734_v21, %v6733_v26 }
 0x589   :  { %7996 = vmatmul.mubr.bf16.vlgmr.msra.gmra.mxu1 %v6735_v36 }
 0x649   :  { %v6841_v13 = vpop.f32.mrf.mxu1 }
 0x64a   :  { %v6842_v32 = vadd.f32 %v7804_v24, %v6841_v13 }
 0x64b   :  { %v7997_v9 = vpop.f32.mrf.mxu1 }
 0x64c   :  { %v6850_v16 = vmin.f32 %v6842_v32, 0.0  ;;  %vm6848_vm9 = vcmp.gt.f32.partialorder %v6842_v32, 0.0 }
 0x64d   :  { %v6844_v12 = vpop.f32.mrf.mxu1 }
 0x64e   :  { %v6856_v14 = vmul.f32 1.442695, %v6850_v16  ;;  %v6845_v27 = vadd.f32 %v7804_v24, %v6844_v12  ;;  %v6852_v8 = vmul.f32 0.5, %v6850_v16 }
 0x64f   :  { %v7998_v19 = vpop.f32.mrf.mxu1 }
 0x650   :  { %v6851_v51 = vmin.f32 %v6845_v27, 0.0  ;;  %9315 = vpow2.f32 %v6856_v14  ;;  %vm6849_vm10 = vcmp.gt.f32.partialorder %v6845_v27, 0.0 }
 0x651   :  { %9317 = vtanh.f32 %v6852_v8 }
 0x652   :  { %v6858_v39 = vmul.f32 1.442695, %v6851_v51  ;;  %v6853_v62 = vmul.f32 0.5, %v6851_v51 }
 0x654   :  { %9319 = vpow2.f32 %v6858_v39 }
 0x655   :  { %9321 = vtanh.f32 %v6853_v62 }
 0x65d   :  { %v9316_v11 = vpop.eup %9315 }
 0x65e   :  { %v6860_v31 = vadd.f32 1.0, %v9316_v11  ;;  %v9318_v15 = vpop.eup %9317 }
 0x660   :  { %v6862_v54 = vmul.f32 %v9318_v15, %v6860_v31 }
 0x661   :  { %v9320_v46 = vpop.eup %9319 }
 0x662   :  { %v6861_v37 = vadd.f32 1.0, %v9320_v46  ;;  %v9322_v28 = vpop.eup %9321  ;;  %v6864_v20 = vsel %vm6848_vm9, %v6842_v32, %v6862_v54 }
 0x664   :  { %v6863_v23 = vmul.f32 %v9322_v28, %v6861_v37 }
 0x666   :  { %v6865_v25 = vsel %vm6849_vm10, %v6845_v27, %v6863_v23 }
 0x667   :  { %v6866_v2 = vpack.c.bf16 %v6865_v25, %v6864_v20 }
 0x669   :  { %8016 = vmatmul.mubr.bf16.vlgmr.msra.gmra.mxu0 %v6866_v2 }
 0x729   :  { %v6972_v60 = vpop.f32.mrf.mxu0 }
 0x72a   :  { %v6973_v44 = vadd.f32 %v7813_v47, %v6972_v60 }
 0x72b   :  { %v8017_v42 = vpop.f32.mrf.mxu0 }
 0x72c   :  { %6979 = vst [vmem:[%s12377_s11] sm:$0xff] %v6973_v44 }
 0x72d   :  { %v6975_v1 = vpop.f32.mrf.mxu0 }
 0x72e   :  { %v6976_v6 = vadd.f32 %v7813_v47, %v6975_v1 }
 0x72f   :  { %v8018_v45 = vpop.f32.mrf.mxu0 }
 0x730   :  { %6980 = vst [vmem:[%s12377_s11 + $0x8] sm:$0xff] %v6976_v6 }

</bundles_post_ra>
